<compile_context>
chip_gen: v6e
topology: v6e:2x2x1
jax: 0.10.0
libtpu: 0.0.40
codegen_flags: <defaults>
</compile_context>

<pallas_src>
import math
from functools import partial

import jax
import jax.numpy as jnp
from jax import lax
from jax.experimental import pallas as pl
from jax.experimental.pallas import tpu as pltpu


_VMEM_LIMIT_CACHE = None


def _vmem_limit_bytes():
    """Per-chip scoped-VMEM budget (leave pipelining headroom on 64 MiB parts)."""
    global _VMEM_LIMIT_CACHE
    if _VMEM_LIMIT_CACHE is None:
        cap = None
        try:
            if hasattr(pltpu, "get_tpu_info"):
                cap = int(pltpu.get_tpu_info().vmem_capacity_bytes)
        except Exception:
            cap = None
        if cap is None:
            _VMEM_LIMIT_CACHE = 48 * 1024 * 1024
        elif cap <= 64 * 1024 * 1024:          # v7x-class
            _VMEM_LIMIT_CACHE = 38 * 1024 * 1024
        else:                                   # v5e / v6e (128 MiB physical)
            _VMEM_LIMIT_CACHE = 64 * 1024 * 1024
    return _VMEM_LIMIT_CACHE


def _cp(dims):
    return pltpu.CompilerParams(dimension_semantics=dims,
                                vmem_limit_bytes=_vmem_limit_bytes())


def _pick_row_tile(M, target=256):
    """Row (sublane) tile: divides M, multiple of 8 (or the full dim)."""
    if M <= target:
        return M
    t = (target // 8) * 8
    while t >= 8:
        if M % t == 0:
            return t
        t -= 8
    return M


def _pick_col_tile(Nd, target=512):
    """Column (lane) tile: divides Nd, multiple of 128 (or the full dim)."""
    if Nd <= target:
        return Nd
    t = (target // 128) * 128
    while t >= 128:
        if Nd % t == 0:
            return t
        t -= 128
    return Nd


def _pick_seq_tile(L, target=512):
    """Scan chunk: divides L, multiple of 8 (sublane dim only needs %8)."""
    if L <= target:
        return L
    t = (target // 8) * 8
    while t >= 8:
        if L % t == 0:
            return t
        t -= 8
    return L


# ----------------------------------------------------------------------------
# Fused LayerNorm + matmul  (ln1 + in_proj).  The normalized row block is
# computed once (j == 0) into a VMEM scratch and reused for every column tile.
# ----------------------------------------------------------------------------
def _ln_matmul_kernel(x_ref, w_ref, b_ref, wm_ref, o_ref, xn_ref, *, eps):
    @pl.when(pl.program_id(1) == 0)
    def _():
        x = x_ref[...]                                    # (tm, C) f32
        mean = jnp.mean(x, axis=-1, keepdims=True)
        var = jnp.mean((x - mean) ** 2, axis=-1, keepdims=True)
        xn_ref[...] = ((x - mean) * lax.rsqrt(var + eps) * w_ref[...]
                       + b_ref[...]).astype(jnp.bfloat16)
    o_ref[...] = jnp.dot(xn_ref[...], wm_ref[...],
                         preferred_element_type=jnp.float32)


def pallas_ln_matmul(x2d, ln_w, ln_b, w_bf16, eps):
    M, C = x2d.shape
    Nout = w_bf16.shape[1]
    tm = _pick_row_tile(M)
    tn = _pick_col_tile(Nout)
    return pl.pallas_call(
        partial(_ln_matmul_kernel, eps=eps),
        out_shape=jax.ShapeDtypeStruct((M, Nout), jnp.float32),
        grid=(M // tm, Nout // tn),
        in_specs=[
            pl.BlockSpec((tm, C), lambda i, j: (i, 0)),
            pl.BlockSpec((1, C), lambda i, j: (0, 0)),
            pl.BlockSpec((1, C), lambda i, j: (0, 0)),
            pl.BlockSpec((C, tn), lambda i, j: (0, j)),
        ],
        out_specs=pl.BlockSpec((tm, tn), lambda i, j: (i, j)),
        scratch_shapes=[pltpu.VMEM((tm, C), jnp.bfloat16)],
        compiler_params=_cp(("parallel", "arbitrary")),
    )(x2d, ln_w.reshape(1, C), ln_b.reshape(1, C), w_bf16)


# ----------------------------------------------------------------------------
# Fused out_norm LayerNorm + SiLU gate + out_proj matmul + residual add.
# Also folds the HW + WH direction sum (two y inputs).  The gated bf16 row
# block is cached in VMEM scratch across column tiles.
# ----------------------------------------------------------------------------
def _out_fused_kernel(yh_ref, yw_ref, z_ref, w_ref, b_ref, wm_ref, r_ref,
                      o_ref, g_ref, *, eps):
    @pl.when(pl.program_id(1) == 0)
    def _():
        y = yh_ref[...] + yw_ref[...]                     # (tm, d_inner)
        mean = jnp.mean(y, axis=-1, keepdims=True)
        var = jnp.mean((y - mean) ** 2, axis=-1, keepdims=True)
        yn = (y - mean) * lax.rsqrt(var + eps) * w_ref[...] + b_ref[...]
        z = z_ref[...]
        g_ref[...] = (yn * (z * (1.0 / (1.0 + jnp.exp(-z))))
                      ).astype(jnp.bfloat16)              # yn * SiLU(z)
    o_ref[...] = r_ref[...] + jnp.dot(g_ref[...], wm_ref[...],
                                      preferred_element_type=jnp.float32)


def pallas_out_fused(y_hw, y_wh, z2d, nw, nb, w_bf16, res2d, eps):
    M, D = y_hw.shape
    C = w_bf16.shape[1]
    tm = _pick_row_tile(M)
    tn = _pick_col_tile(C)
    return pl.pallas_call(
        partial(_out_fused_kernel, eps=eps),
        out_shape=jax.ShapeDtypeStruct((M, C), jnp.float32),
        grid=(M // tm, C // tn),
        in_specs=[
            pl.BlockSpec((tm, D), lambda i, j: (i, 0)),
            pl.BlockSpec((tm, D), lambda i, j: (i, 0)),
            pl.BlockSpec((tm, D), lambda i, j: (i, 0)),
            pl.BlockSpec((1, D), lambda i, j: (0, 0)),
            pl.BlockSpec((1, D), lambda i, j: (0, 0)),
            pl.BlockSpec((D, tn), lambda i, j: (0, j)),
            pl.BlockSpec((tm, tn), lambda i, j: (i, j)),
        ],
        out_specs=pl.BlockSpec((tm, tn), lambda i, j: (i, j)),
        scratch_shapes=[pltpu.VMEM((tm, D), jnp.bfloat16)],
        compiler_params=_cp(("parallel", "arbitrary")),
    )(y_hw, y_wh, z2d, nw.reshape(1, D), nb.reshape(1, D), w_bf16, res2d)


# ----------------------------------------------------------------------------
# Depthwise 3x3 conv + SiLU (grid over batch, channels on the lane dim).
# TODO(synk): handle the halo in-kernel and tile H for very large feature maps
# (saves the XLA pad pass and keeps blocks small on 64 MiB-VMEM parts).
# ----------------------------------------------------------------------------
def _dwconv_silu_kernel(x_ref, w_ref, b_ref, o_ref, *, H, W):
    x = x_ref[...]                                        # (H+2, W+2, D)
    w = w_ref[...]                                        # (9, D)
    acc = jnp.zeros(o_ref.shape, jnp.float32)
    for kh in range(3):
        for kw in range(3):
            acc = acc + x[kh:kh + H, kw:kw + W, :] * w[kh * 3 + kw]
    acc = acc + b_ref[0]
    o_ref[...] = acc * (1.0 / (1.0 + jnp.exp(-acc)))      # SiLU


def pallas_dwconv_silu(x_pad, w9, bias):
    Bn, Hp, Wp, D = x_pad.shape
    H, W = Hp - 2, Wp - 2
    return pl.pallas_call(
        partial(_dwconv_silu_kernel, H=H, W=W),
        out_shape=jax.ShapeDtypeStruct((Bn, H, W, D), jnp.float32),
        grid=(Bn,),
        in_specs=[
            pl.BlockSpec((None, Hp, Wp, D), lambda b: (b, 0, 0, 0)),
            pl.BlockSpec((9, D), lambda b: (0, 0)),
            pl.BlockSpec((1, D), lambda b: (0, 0)),
        ],
        out_specs=pl.BlockSpec((None, H, W, D), lambda b: (b, 0, 0, 0)),
        compiler_params=_cp(("parallel",)),
    )(x_pad, w9, bias.reshape(1, D))


# ----------------------------------------------------------------------------
# x_proj + dt_proj for the 2 directions sharing one scan ordering.
# x_proj weight columns are stored [B(N), C(N), dt_rank(R)] so the kernel only
# needs a lane-prefix slice; dt_proj weight is embedded (zero-padded) into a
# (R+2N, d_inner) matrix.  B|C and dt are written directly (no x_dbl in HBM).
# ----------------------------------------------------------------------------
def _xproj_kernel(x_ref, xw_ref, dtw_ref, bc_ref, dt_ref, *, two_n):
    xb = x_ref[...].astype(jnp.bfloat16)                  # (tm, d_inner)
    xdbl = jnp.dot(xb, xw_ref[...],
                   preferred_element_type=jnp.float32)    # (tm, R+2N)
    bc_ref[...] = xdbl[:, :two_n]                         # (tm, 2N): [B | C]
    dt_ref[...] = jnp.dot(xdbl.astype(jnp.bfloat16), dtw_ref[...],
                          preferred_element_type=jnp.float32)


def pallas_xproj(x2d, xw_bf16, dtw_pad_bf16, n_state):
    M, d = x2d.shape
    Kd, _, R2N = xw_bf16.shape                            # Kd = 2 directions
    tm = _pick_row_tile(M)
    return pl.pallas_call(
        partial(_xproj_kernel, two_n=2 * n_state),
        out_shape=(jax.ShapeDtypeStruct((Kd, M, 2 * n_state), jnp.float32),
                   jax.ShapeDtypeStruct((Kd, M, d), jnp.float32)),
        grid=(M // tm, Kd),
        in_specs=[
            pl.BlockSpec((tm, d), lambda i, k: (i, 0)),
            pl.BlockSpec((None, d, R2N), lambda i, k: (k, 0, 0)),
            pl.BlockSpec((None, R2N, d), lambda i, k: (k, 0, 0)),
        ],
        out_specs=(pl.BlockSpec((None, tm, 2 * n_state), lambda i, k: (k, i, 0)),
                   pl.BlockSpec((None, tm, d), lambda i, k: (k, i, 0))),
        compiler_params=_cp(("parallel", "arbitrary")),
    )(x2d, xw_bf16, dtw_pad_bf16)


# ----------------------------------------------------------------------------
# Selective scan, one direction per call.  Grid (B, L-chunks), h carried in a
# VMEM scratch, 8-step unrolled groups with dense (8, d) loads/stores.
# exp(dt*A) is batched per group (off the serial h chain); B/C columns are
# obtained with one transpose per group; the D-skip term and the optional
# accumulate with the previous direction are applied once per chunk.
# ----------------------------------------------------------------------------
def _scan_body(u_ref, dt_ref, bc_ref, a_ref, bias_ref, dsk_ref, prev_ref,
               y_ref, h_ref, *, grp, reverse, nstate):
    c_id = pl.program_id(1)

    @pl.when(c_id == 0)
    def _():
        h_ref[...] = jnp.zeros_like(h_ref)

    A = a_ref[...]                                        # (N, d)
    bias = bias_ref[...]                                  # (1, d)
    dsk = dsk_ref[...]                                    # (1, d)
    Lc = u_ref.shape[0]
    n_groups = Lc // grp

    def group_body(i, h):
        g = (n_groups - 1 - i) if reverse else i
        base = pl.multiple_of(g * grp, grp)
        u_g = u_ref[pl.ds(base, grp), :]                  # (grp, d)
        dt_g = dt_ref[pl.ds(base, grp), :]                # (grp, d)
        bc_g = bc_ref[pl.ds(base, grp), :]                # (grp, 2N)

        raw = dt_g + bias
        # softplus with overflow guard (matches torch.nn.functional.softplus)
        dts_g = jnp.where(raw > 20.0, raw,
                          jnp.log1p(jnp.exp(jnp.minimum(raw, 20.0))))
        dtu_g = dts_g * u_g                               # (grp, d)

        # EUP work hoisted off the recurrence: one batched exp per group.
        dA_g = jnp.exp(dts_g[:, None, :] * A[None, :, :])  # (grp, N, d)
        # One XLU transpose per group gives B and C as (N, grp) columns.
        bcT = jnp.transpose(bc_g)                          # (2N, grp)
        bT = bcT[:nstate, :]                               # (N, grp)
        cT = bcT[nstate:, :]                               # (N, grp)

        rows = [None] * grp
        order = range(grp - 1, -1, -1) if reverse else range(grp)
        for t in order:                                    # unrolled
            # recurrence: two VPU FMAs per step on the critical chain
            h = dA_g[t] * h + bT[:, t:t + 1] * dtu_g[t:t + 1, :]
            # output: broadcast-multiply + sublane reduce (off the h chain)
            rows[t] = jnp.sum(cT[:, t:t + 1] * h, axis=0, keepdims=True)
        y_chunk = jnp.concatenate(rows, axis=0) + dsk * u_g
        if prev_ref is not None:
            y_chunk = y_chunk + prev_ref[pl.ds(base, grp), :]
        y_ref[pl.ds(base, grp), :] = y_chunk
        return h

    h_ref[...] = lax.fori_loop(0, n_groups, group_body, h_ref[...])


def _scan_kernel_noacc(u_ref, dt_ref, bc_ref, a_ref, bias_ref, dsk_ref,
                       y_ref, h_ref, *, grp, reverse, nstate):
    _scan_body(u_ref, dt_ref, bc_ref, a_ref, bias_ref, dsk_ref, None,
               y_ref, h_ref, grp=grp, reverse=reverse, nstate=nstate)


def _scan_kernel_acc(u_ref, dt_ref, bc_ref, a_ref, bias_ref, dsk_ref, prev_ref,
                     y_ref, h_ref, *, grp, reverse, nstate):
    _scan_body(u_ref, dt_ref, bc_ref, a_ref, bias_ref, dsk_ref, prev_ref,
               y_ref, h_ref, grp=grp, reverse=reverse, nstate=nstate)


def pallas_scan_dir(u_bld, dt2, bc2, A2, bias2, dsk2, *, slot, reverse,
                    prev=None):
    Bn, Lp, d = u_bld.shape
    N2 = bc2.shape[-1]
    Nst = A2.shape[1]
    Lc = _pick_seq_tile(Lp)
    NC = Lp // Lc
    grp = 8
    assert Lc % grp == 0, "L must be padded to a multiple of 8"

    def cidx(c):
        return (NC - 1 - c) if reverse else c

    in_specs = [
        pl.BlockSpec((None, Lc, d), lambda b, c: (b, cidx(c), 0)),
        pl.BlockSpec((None, None, Lc, d), lambda b, c: (slot, b, cidx(c), 0)),
        pl.BlockSpec((None, None, Lc, N2), lambda b, c: (slot, b, cidx(c), 0)),
        pl.BlockSpec((None, Nst, d), lambda b, c: (slot, 0, 0)),
        pl.BlockSpec((None, 1, d), lambda b, c: (slot, 0, 0)),
        pl.BlockSpec((None, 1, d), lambda b, c: (slot, 0, 0)),
    ]
    args = [u_bld, dt2, bc2, A2, bias2, dsk2]
    kw = dict(grp=grp, reverse=reverse, nstate=Nst)
    if prev is None:
        kernel = partial(_scan_kernel_noacc, **kw)
        io_alias = {}
    else:
        in_specs.append(pl.BlockSpec((None, Lc, d),
                                     lambda b, c: (b, cidx(c), 0)))
        args.append(prev)
        kernel = partial(_scan_kernel_acc, **kw)
        io_alias = {6: 0}     # accumulate in place (prev input -> output)

    return pl.pallas_call(
        kernel,
        out_shape=jax.ShapeDtypeStruct((Bn, Lp, d), jnp.float32),
        grid=(Bn, NC),
        in_specs=in_specs,
        out_specs=pl.BlockSpec((None, Lc, d), lambda b, c: (b, cidx(c), 0)),
        scratch_shapes=[pltpu.VMEM((Nst, d), jnp.float32)],
        input_output_aliases=io_alias,
        compiler_params=_cp(("parallel", "arbitrary")),
    )(*args)


# ----------------------------------------------------------------------------
# VSSBlock / VSSStage forward
# ----------------------------------------------------------------------------
def vss_block_forward(x_nhwc, p):
    B, H, W, C = x_nhwc.shape
    L = H * W
    M = B * L
    x2d = x_nhwc.reshape(M, C)

    d_inner = p["out_norm_w"].shape[0]
    N = p["A_logs"].shape[1]

    # ln1 (eps=1e-6) fused with in_proj
    xz = pallas_ln_matmul(x2d, p["ln1_w"], p["ln1_b"], p["w_in"], eps=1e-6)
    x_in = xz[:, :d_inner].reshape(B, H, W, d_inner)
    z = xz[:, d_inner:]                                   # (M, d_inner)

    # depthwise 3x3 conv (padding=1) + SiLU
    x_pad = jnp.pad(x_in, ((0, 0), (1, 1), (1, 1), (0, 0)))
    xc = pallas_dwconv_silu(x_pad, p["conv_w9"], p["conv_b"])

    # two scan orderings: HW (row-major) and WH (column-major)
    # TODO(synk): the WH-ordered copy could be produced inside the conv kernel.
    x_hw = xc.reshape(B, L, d_inner)
    x_wh = jnp.transpose(xc, (0, 2, 1, 3)).reshape(B, L, d_inner)

    # per-ordering x_proj + dt_proj (each covers its fwd + rev direction)
    bc_hw, dt_hw = pallas_xproj(x_hw.reshape(M, d_inner),
                                p["xw_hw"], p["dtw_hw"], N)
    bc_wh, dt_wh = pallas_xproj(x_wh.reshape(M, d_inner),
                                p["xw_wh"], p["dtw_wh"], N)

    # direction order in the PyTorch module is [HW, WH, HWrev, WHrev];
    # split per ordering: hw uses dirs [0, 2], wh uses dirs [1, 3].
    A_all = (-jnp.exp(p["A_logs"])).reshape(4, d_inner, N).transpose(0, 2, 1)
    bias_all = p["dt_bias"].reshape(4, 1, d_inner)
    dsk_all = p["Ds"].reshape(4, 1, d_inner)
    A_hw, A_wh = A_all[0::2], A_all[1::2]
    bias_hw, bias_wh = bias_all[0::2], bias_all[1::2]
    dsk_hw, dsk_wh = dsk_all[0::2], dsk_all[1::2]

    # pad L to a multiple of 8 so the scan always takes the 8-step group path
    Lp = ((L + 7) // 8) * 8

    def padL(a):
        if Lp == L:
            return a
        cfg = [(0, 0)] * a.ndim
        cfg[a.ndim - 2] = (0, Lp - L)
        return jnp.pad(a, cfg)

    u_hw = padL(x_hw)
    u_wh = padL(x_wh)
    dt_hw4 = padL(dt_hw.reshape(2, B, L, d_inner))
    dt_wh4 = padL(dt_wh.reshape(2, B, L, d_inner))
    bc_hw4 = padL(bc_hw.reshape(2, B, L, 2 * N))
    bc_wh4 = padL(bc_wh.reshape(2, B, L, 2 * N))

    # selective scans: forward then reverse, accumulated in-kernel
    y_hw = pallas_scan_dir(u_hw, dt_hw4, bc_hw4, A_hw, bias_hw, dsk_hw,
                           slot=0, reverse=False)
    y_hw = pallas_scan_dir(u_hw, dt_hw4, bc_hw4, A_hw, bias_hw, dsk_hw,
                           slot=1, reverse=True, prev=y_hw)
    y_wh = pallas_scan_dir(u_wh, dt_wh4, bc_wh4, A_wh, bias_wh, dsk_wh,
                           slot=0, reverse=False)
    y_wh = pallas_scan_dir(u_wh, dt_wh4, bc_wh4, A_wh, bias_wh, dsk_wh,
                           slot=1, reverse=True, prev=y_wh)

    if Lp != L:
        y_hw = y_hw[:, :L, :]
        y_wh = y_wh[:, :L, :]
    y_hw = y_hw.reshape(M, d_inner)
    y_wh = jnp.transpose(y_wh.reshape(B, W, H, d_inner),
                         (0, 2, 1, 3)).reshape(M, d_inner)

    # out_norm (eps=1e-5) + HW/WH sum + gate SiLU(z) + out_proj + residual.
    # TODO(synk): DropPath is stochastic training-time regularisation (rate 0)
    # -> identity.
    out2d = pallas_out_fused(y_hw, y_wh, z, p["out_norm_w"], p["out_norm_b"],
                             p["w_out"], x2d, eps=1e-5)
    return out2d.reshape(B, H, W, C)


def vss_stage_forward(x_nchw, params):
    # matches VSSStage.forward: permute NCHW->NHWC, run blocks, permute back
    x = jnp.transpose(x_nchw, (0, 2, 3, 1))
    for p in params:
        x = vss_block_forward(x, p)
    return jnp.transpose(x, (0, 3, 1, 2))


# ----------------------------------------------------------------------------
# Deterministic synthetic parameter init (shapes follow VSSBlock/SS2D __init__).
# Layout conventions for the kernels:
#   * matmul weights stored pre-transposed (x @ W) in bf16,
#   * x_proj weight columns ordered [B(N), C(N), dt_rank(R)],
#   * dt_proj weight embedded in rows [2N:2N+R] of a (R+2N, d_inner) matrix,
#   * per-ordering split: hw = directions [0, 2], wh = directions [1, 3].
# ----------------------------------------------------------------------------
def init_block_params(key, dim, d_state):
    d_inner = 2 * dim
    R = max(1, math.ceil(dim / 16))     # dt_rank "auto"
    K, N = 4, d_state
    R2N = R + 2 * N
    ks = jax.random.split(key, 6)

    def nrm(k, shape, scale=0.02):
        return scale * jax.random.normal(k, shape, jnp.float32)

    xw = nrm(ks[2], (K, d_inner, R2N))
    dt_w = nrm(ks[3], (K, R, d_inner), 0.1)
    dtw_pad = jnp.zeros((K, R2N, d_inner), jnp.float32).at[:, 2 * N:, :].set(dt_w)

    A = jnp.tile(jnp.arange(1, N + 1, dtype=jnp.float32)[None, :],
                 (K * d_inner, 1))
    return dict(
        ln1_w=jnp.ones((dim,), jnp.float32),
        ln1_b=jnp.zeros((dim,), jnp.float32),
        w_in=nrm(ks[0], (dim, 2 * d_inner)).astype(jnp.bfloat16),
        conv_w9=nrm(ks[1], (9, d_inner), 0.1),    # depthwise taps (kh*3+kw, ch)
        conv_b=jnp.zeros((d_inner,), jnp.float32),
        xw_hw=xw[0::2].astype(jnp.bfloat16),
        xw_wh=xw[1::2].astype(jnp.bfloat16),
        dtw_hw=dtw_pad[0::2].astype(jnp.bfloat16),
        dtw_wh=dtw_pad[1::2].astype(jnp.bfloat16),
        dt_bias=nrm(ks[4], (K, d_inner), 0.1),
        A_logs=jnp.log(A),
        Ds=jnp.ones((K * d_inner,), jnp.float32),
        out_norm_w=jnp.ones((d_inner,), jnp.float32),
        out_norm_b=jnp.zeros((d_inner,), jnp.float32),
        w_out=nrm(ks[5], (d_inner, dim)).astype(jnp.bfloat16),
    )


if __name__ == "__main__":
    key = jax.random.PRNGKey(0)
    B, C, H, W = 2, 32, 8, 8          # small VSS stage: dim=32, depth=2, d_state=16
    depth, d_state = 2, 16

    kx, kp = jax.random.split(key)
    x = jax.random.normal(kx, (B, C, H, W), jnp.float32)
    block_keys = jax.random.split(kp, depth)
    params = [init_block_params(block_keys[i], C, d_state) for i in range(depth)]

    fwd = jax.jit(vss_stage_forward)
    out = fwd(x, params)
    jax.block_until_ready(out)
    assert out.shape == (B, C, H, W) and out.dtype == jnp.float32
    print("KERNEL_OK")
</pallas_src>

<mosaic_0001>
module attributes {stable_mosaic.version = 11 : i64} {
  func.func @_ln_matmul_kernel(%arg0: i32, %arg1: i32, %arg2: memref<128x32xf32, #tpu.memory_space<vmem>>, %arg3: memref<1x32xf32, #tpu.memory_space<vmem>>, %arg4: memref<1x32xf32, #tpu.memory_space<vmem>>, %arg5: memref<32x128xbf16, #tpu.memory_space<vmem>>, %arg6: memref<128x128xf32, #tpu.memory_space<vmem>>, %arg7: memref<128x32xbf16, #tpu.memory_space<vmem>>) attributes {dimension_semantics = [#tpu.dimension_semantics<parallel>, #tpu.dimension_semantics<arbitrary>], iteration_bounds = array<i64: 1, 1>, scalar_prefetch = 0 : i64, scratch_operands = 1 : i64, tpu.core_type = #tpu.core_type<tc>, window_params = [{transform_indices = @transform_0, window_bounds = array<i64: 128, 32>}, {pipeline_mode = #tpu.pipeline_mode<synchronous>, transform_indices = @transform_1, window_bounds = array<i64: 1, 32>}, {pipeline_mode = #tpu.pipeline_mode<synchronous>, transform_indices = @transform_2, window_bounds = array<i64: 1, 32>}, {transform_indices = @transform_3, window_bounds = array<i64: 32, 128>}, {transform_indices = @transform_4, window_bounds = array<i64: 128, 128>}]} {
    %c0_i32 = arith.constant 0 : i32
    %0 = arith.cmpi eq, %arg1, %c0_i32 : i32
    %1 = arith.extui %0 : i1 to i32
    %c0_i32_0 = arith.constant 0 : i32
    %2 = arith.cmpi ne, %1, %c0_i32_0 : i32
    scf.if %2 {
      %c0_6 = arith.constant 0 : index
      %c0_7 = arith.constant 0 : index
      %7 = vector.load %arg2[%c0_6, %c0_7] : memref<128x32xf32, #tpu.memory_space<vmem>>, vector<128x32xf32>
      %cst_8 = arith.constant dense<0.000000e+00> : vector<128xf32>
      %8 = vector.multi_reduction <add>, %7, %cst_8 [1] : vector<128x32xf32> to vector<128xf32>
      %9 = vector.shape_cast %8 : vector<128xf32> to vector<128x1xf32>
      %cst_9 = arith.constant 3.200000e+01 : f32
      %10 = vector.broadcast %cst_9 : f32 to vector<128x1xf32>
      %11 = arith.divf %9, %10 : vector<128x1xf32>
      %12 = vector.broadcast %11 : vector<128x1xf32> to vector<128x32xf32>
      %13 = arith.subf %7, %12 : vector<128x32xf32>
      %14 = arith.mulf %13, %13 : vector<128x32xf32>
      %cst_10 = arith.constant dense<0.000000e+00> : vector<128xf32>
      %15 = vector.multi_reduction <add>, %14, %cst_10 [1] : vector<128x32xf32> to vector<128xf32>
      %16 = vector.shape_cast %15 : vector<128xf32> to vector<128x1xf32>
      %cst_11 = arith.constant 3.200000e+01 : f32
      %17 = vector.broadcast %cst_11 : f32 to vector<128x1xf32>
      %18 = arith.divf %16, %17 : vector<128x1xf32>
      %19 = vector.broadcast %11 : vector<128x1xf32> to vector<128x32xf32>
      %20 = arith.subf %7, %19 : vector<128x32xf32>
      %cst_12 = arith.constant 9.99999997E-7 : f32
      %21 = vector.broadcast %cst_12 : f32 to vector<128x1xf32>
      %22 = arith.addf %18, %21 : vector<128x1xf32>
      %23 = math.rsqrt %22 : vector<128x1xf32>
      %24 = vector.broadcast %23 : vector<128x1xf32> to vector<128x32xf32>
      %25 = arith.mulf %20, %24 : vector<128x32xf32>
      %c0_13 = arith.constant 0 : index
      %c0_14 = arith.constant 0 : index
      %26 = vector.load %arg3[%c0_13, %c0_14] : memref<1x32xf32, #tpu.memory_space<vmem>>, vector<1x32xf32>
      %27 = vector.broadcast %26 : vector<1x32xf32> to vector<128x32xf32>
      %28 = arith.mulf %25, %27 : vector<128x32xf32>
      %c0_15 = arith.constant 0 : index
      %c0_16 = arith.constant 0 : index
      %29 = vector.load %arg4[%c0_15, %c0_16] : memref<1x32xf32, #tpu.memory_space<vmem>>, vector<1x32xf32>
      %30 = vector.broadcast %29 : vector<1x32xf32> to vector<128x32xf32>
      %31 = arith.addf %28, %30 : vector<128x32xf32>
      %32 = arith.truncf %31 : vector<128x32xf32> to vector<128x32xbf16>
      %c0_17 = arith.constant 0 : index
      %c0_18 = arith.constant 0 : index
      %33 = vector.load %arg7[%c0_17, %c0_18] : memref<128x32xbf16, #tpu.memory_space<vmem>>, vector<128x32xbf16>
      tpu.vector_store %arg7[%c0_17, %c0_18], %32 {strides = array<i32>} : memref<128x32xbf16, #tpu.memory_space<vmem>>, vector<128x32xbf16>,
    } else {
    }
    %c0 = arith.constant 0 : index
    %c0_1 = arith.constant 0 : index
    %3 = vector.load %arg7[%c0, %c0_1] : memref<128x32xbf16, #tpu.memory_space<vmem>>, vector<128x32xbf16>
    %c0_2 = arith.constant 0 : index
    %c0_3 = arith.constant 0 : index
    %4 = vector.load %arg5[%c0_2, %c0_3] : memref<32x128xbf16, #tpu.memory_space<vmem>>, vector<32x128xbf16>
    %cst = arith.constant dense<0.000000e+00> : vector<128x128xf32>
    %5 = tpu.matmul %3, %4, %cst {dimension_numbers = #tpu.dot_dimension_numbers<[1], [0], [0], [1], [0, 0, 1, 1], [], []>} : vector<128x32xbf16>, vector<32x128xbf16>, vector<128x128xf32> -> vector<128x128xf32>
    %c0_4 = arith.constant 0 : index
    %c0_5 = arith.constant 0 : index
    %6 = vector.load %arg6[%c0_4, %c0_5] : memref<128x128xf32, #tpu.memory_space<vmem>>, vector<128x128xf32>
    tpu.vector_store %arg6[%c0_4, %c0_5], %5 {strides = array<i32>} : memref<128x128xf32, #tpu.memory_space<vmem>>, vector<128x128xf32>,
    return
  }
  func.func @transform_0(%arg0: i32, %arg1: i32) -> (i32, i32) {
    %c0_i32 = arith.constant 0 : i32
    %c0_i32_0 = arith.constant 0 : i32
    return %arg0, %c0_i32 : i32, i32
  }
  func.func @transform_1(%arg0: i32, %arg1: i32) -> (i32, i32) {
    %c0_i32 = arith.constant 0 : i32
    %c0_i32_0 = arith.constant 0 : i32
    %c0_i32_1 = arith.constant 0 : i32
    return %c0_i32, %c0_i32_0 : i32, i32
  }
  func.func @transform_2(%arg0: i32, %arg1: i32) -> (i32, i32) {
    %c0_i32 = arith.constant 0 : i32
    %c0_i32_0 = arith.constant 0 : i32
    %c0_i32_1 = arith.constant 0 : i32
    return %c0_i32, %c0_i32_0 : i32, i32
  }
  func.func @transform_3(%arg0: i32, %arg1: i32) -> (i32, i32) {
    %c0_i32 = arith.constant 0 : i32
    %c0_i32_0 = arith.constant 0 : i32
    return %c0_i32, %arg1 : i32, i32
  }
  func.func @transform_4(%arg0: i32, %arg1: i32) -> (i32, i32) {
    %c0_i32 = arith.constant 0 : i32
    return %arg0, %arg1 : i32, i32
  }
}

module attributes {stable_mosaic.version = 11 : i64} {
  func.func @_dwconv_silu_kernel(%arg0: i32, %arg1: memref<1x10x10x64xf32, #tpu.memory_space<vmem>>, %arg2: memref<9x64xf32, #tpu.memory_space<vmem>>, %arg3: memref<1x64xf32, #tpu.memory_space<vmem>>, %arg4: memref<1x8x8x64xf32, #tpu.memory_space<vmem>>) attributes {dimension_semantics = [#tpu.dimension_semantics<parallel>], iteration_bounds = array<i64: 2>, scalar_prefetch = 0 : i64, scratch_operands = 0 : i64, tpu.core_type = #tpu.core_type<tc>, window_params = [{transform_indices = @transform_0, window_bounds = array<i64: 1, 10, 10, 64>}, {pipeline_mode = #tpu.pipeline_mode<synchronous>, transform_indices = @transform_1, window_bounds = array<i64: 9, 64>}, {pipeline_mode = #tpu.pipeline_mode<synchronous>, transform_indices = @transform_2, window_bounds = array<i64: 1, 64>}, {transform_indices = @transform_3, window_bounds = array<i64: 1, 8, 8, 64>}]} {
    %c0 = arith.constant 0 : index
    %c0_0 = arith.constant 0 : index
    %c0_1 = arith.constant 0 : index
    %c0_2 = arith.constant 0 : index
    %0 = vector.load %arg1[%c0, %c0_0, %c0_1, %c0_2] : memref<1x10x10x64xf32, #tpu.memory_space<vmem>>, vector<1x10x10x64xf32>
    %1 = vector.shape_cast %0 : vector<1x10x10x64xf32> to vector<10x10x64xf32>
    %c0_3 = arith.constant 0 : index
    %c0_4 = arith.constant 0 : index
    %2 = vector.load %arg2[%c0_3, %c0_4] : memref<9x64xf32, #tpu.memory_space<vmem>>, vector<9x64xf32>
    %cst = arith.constant 0.000000e+00 : f32
    %3 = vector.broadcast %cst : f32 to vector<8x8x64xf32>
    %4 = vector.extract_strided_slice %1 {offsets = [0, 0, 0], sizes = [8, 8, 64], strides = [1, 1, 1]} : vector<10x10x64xf32> to vector<8x8x64xf32>
    %5 = vector.extract_strided_slice %2 {offsets = [0, 0], sizes = [1, 64], strides = [1, 1]} : vector<9x64xf32> to vector<1x64xf32>
    %6 = vector.shape_cast %5 : vector<1x64xf32> to vector<64xf32>
    %7 = vector.shape_cast %6 : vector<64xf32> to vector<1x1x64xf32>
    %8 = vector.broadcast %7 : vector<1x1x64xf32> to vector<8x8x64xf32>
    %9 = arith.mulf %4, %8 : vector<8x8x64xf32>
    %10 = arith.addf %3, %9 : vector<8x8x64xf32>
    %11 = vector.extract_strided_slice %1 {offsets = [0, 1, 0], sizes = [8, 8, 64], strides = [1, 1, 1]} : vector<10x10x64xf32> to vector<8x8x64xf32>
    %12 = vector.extract_strided_slice %2 {offsets = [1, 0], sizes = [1, 64], strides = [1, 1]} : vector<9x64xf32> to vector<1x64xf32>
    %13 = vector.shape_cast %12 : vector<1x64xf32> to vector<64xf32>
    %14 = vector.shape_cast %13 : vector<64xf32> to vector<1x1x64xf32>
    %15 = vector.broadcast %14 : vector<1x1x64xf32> to vector<8x8x64xf32>
    %16 = arith.mulf %11, %15 : vector<8x8x64xf32>
    %17 = arith.addf %10, %16 : vector<8x8x64xf32>
    %18 = vector.extract_strided_slice %1 {offsets = [0, 2, 0], sizes = [8, 8, 64], strides = [1, 1, 1]} : vector<10x10x64xf32> to vector<8x8x64xf32>
    %19 = vector.extract_strided_slice %2 {offsets = [2, 0], sizes = [1, 64], strides = [1, 1]} : vector<9x64xf32> to vector<1x64xf32>
    %20 = vector.shape_cast %19 : vector<1x64xf32> to vector<64xf32>
    %21 = vector.shape_cast %20 : vector<64xf32> to vector<1x1x64xf32>
    %22 = vector.broadcast %21 : vector<1x1x64xf32> to vector<8x8x64xf32>
    %23 = arith.mulf %18, %22 : vector<8x8x64xf32>
    %24 = arith.addf %17, %23 : vector<8x8x64xf32>
    %25 = vector.extract_strided_slice %1 {offsets = [1, 0, 0], sizes = [8, 8, 64], strides = [1, 1, 1]} : vector<10x10x64xf32> to vector<8x8x64xf32>
    %26 = vector.extract_strided_slice %2 {offsets = [3, 0], sizes = [1, 64], strides = [1, 1]} : vector<9x64xf32> to vector<1x64xf32>
    %27 = vector.shape_cast %26 : vector<1x64xf32> to vector<64xf32>
    %28 = vector.shape_cast %27 : vector<64xf32> to vector<1x1x64xf32>
    %29 = vector.broadcast %28 : vector<1x1x64xf32> to vector<8x8x64xf32>
    %30 = arith.mulf %25, %29 : vector<8x8x64xf32>
    %31 = arith.addf %24, %30 : vector<8x8x64xf32>
    %32 = vector.extract_strided_slice %1 {offsets = [1, 1, 0], sizes = [8, 8, 64], strides = [1, 1, 1]} : vector<10x10x64xf32> to vector<8x8x64xf32>
    %33 = vector.extract_strided_slice %2 {offsets = [4, 0], sizes = [1, 64], strides = [1, 1]} : vector<9x64xf32> to vector<1x64xf32>
    %34 = vector.shape_cast %33 : vector<1x64xf32> to vector<64xf32>
    %35 = vector.shape_cast %34 : vector<64xf32> to vector<1x1x64xf32>
    %36 = vector.broadcast %35 : vector<1x1x64xf32> to vector<8x8x64xf32>
    %37 = arith.mulf %32, %36 : vector<8x8x64xf32>
    %38 = arith.addf %31, %37 : vector<8x8x64xf32>
    %39 = vector.extract_strided_slice %1 {offsets = [1, 2, 0], sizes = [8, 8, 64], strides = [1, 1, 1]} : vector<10x10x64xf32> to vector<8x8x64xf32>
    %40 = vector.extract_strided_slice %2 {offsets = [5, 0], sizes = [1, 64], strides = [1, 1]} : vector<9x64xf32> to vector<1x64xf32>
    %41 = vector.shape_cast %40 : vector<1x64xf32> to vector<64xf32>
    %42 = vector.shape_cast %41 : vector<64xf32> to vector<1x1x64xf32>
    %43 = vector.broadcast %42 : vector<1x1x64xf32> to vector<8x8x64xf32>
    %44 = arith.mulf %39, %43 : vector<8x8x64xf32>
    %45 = arith.addf %38, %44 : vector<8x8x64xf32>
    %46 = vector.extract_strided_slice %1 {offsets = [2, 0, 0], sizes = [8, 8, 64], strides = [1, 1, 1]} : vector<10x10x64xf32> to vector<8x8x64xf32>
    %47 = vector.extract_strided_slice %2 {offsets = [6, 0], sizes = [1, 64], strides = [1, 1]} : vector<9x64xf32> to vector<1x64xf32>
    %48 = vector.shape_cast %47 : vector<1x64xf32> to vector<64xf32>
    %49 = vector.shape_cast %48 : vector<64xf32> to vector<1x1x64xf32>
    %50 = vector.broadcast %49 : vector<1x1x64xf32> to vector<8x8x64xf32>
    %51 = arith.mulf %46, %50 : vector<8x8x64xf32>
    %52 = arith.addf %45, %51 : vector<8x8x64xf32>
    %53 = vector.extract_strided_slice %1 {offsets = [2, 1, 0], sizes = [8, 8, 64], strides = [1, 1, 1]} : vector<10x10x64xf32> to vector<8x8x64xf32>
    %54 = vector.extract_strided_slice %2 {offsets = [7, 0], sizes = [1, 64], strides = [1, 1]} : vector<9x64xf32> to vector<1x64xf32>
    %55 = vector.shape_cast %54 : vector<1x64xf32> to vector<64xf32>
    %56 = vector.shape_cast %55 : vector<64xf32> to vector<1x1x64xf32>
    %57 = vector.broadcast %56 : vector<1x1x64xf32> to vector<8x8x64xf32>
    %58 = arith.mulf %53, %57 : vector<8x8x64xf32>
    %59 = arith.addf %52, %58 : vector<8x8x64xf32>
    %60 = vector.extract_strided_slice %1 {offsets = [2, 2, 0], sizes = [8, 8, 64], strides = [1, 1, 1]} : vector<10x10x64xf32> to vector<8x8x64xf32>
    %61 = vector.extract_strided_slice %2 {offsets = [8, 0], sizes = [1, 64], strides = [1, 1]} : vector<9x64xf32> to vector<1x64xf32>
    %62 = vector.shape_cast %61 : vector<1x64xf32> to vector<64xf32>
    %63 = vector.shape_cast %62 : vector<64xf32> to vector<1x1x64xf32>
    %64 = vector.broadcast %63 : vector<1x1x64xf32> to vector<8x8x64xf32>
    %65 = arith.mulf %60, %64 : vector<8x8x64xf32>
    %66 = arith.addf %59, %65 : vector<8x8x64xf32>
    %c0_5 = arith.constant 0 : index
    %c0_6 = arith.constant 0 : index
    %67 = vector.load %arg3[%c0_5, %c0_6] : memref<1x64xf32, #tpu.memory_space<vmem>>, vector<1x64xf32>
    %68 = vector.shape_cast %67 : vector<1x64xf32> to vector<64xf32>
    %69 = vector.shape_cast %68 : vector<64xf32> to vector<1x1x64xf32>
    %70 = vector.broadcast %69 : vector<1x1x64xf32> to vector<8x8x64xf32>
    %71 = arith.addf %66, %70 : vector<8x8x64xf32>
    %cst_7 = arith.constant 0.000000e+00 : f32
    %72 = vector.broadcast %cst_7 : f32 to vector<8x8x64xf32>
    %73 = arith.subf %72, %71 : vector<8x8x64xf32>
    %74 = math.exp %73 : vector<8x8x64xf32>
    %cst_8 = arith.constant 1.000000e+00 : f32
    %75 = vector.broadcast %cst_8 : f32 to vector<8x8x64xf32>
    %76 = arith.addf %75, %74 : vector<8x8x64xf32>
    %cst_9 = arith.constant 1.000000e+00 : f32
    %77 = vector.broadcast %cst_9 : f32 to vector<8x8x64xf32>
    %78 = arith.divf %77, %76 : vector<8x8x64xf32>
    %79 = arith.mulf %71, %78 : vector<8x8x64xf32>
    %c0_10 = arith.constant 0 : index
    %c0_11 = arith.constant 0 : index
    %c0_12 = arith.constant 0 : index
    %c0_13 = arith.constant 0 : index
    %80 = vector.load %arg4[%c0_10, %c0_11, %c0_12, %c0_13] : memref<1x8x8x64xf32, #tpu.memory_space<vmem>>, vector<1x8x8x64xf32>
    %81 = vector.shape_cast %80 : vector<1x8x8x64xf32> to vector<8x8x64xf32>
    %82 = vector.shape_cast %79 : vector<8x8x64xf32> to vector<1x8x8x64xf32>
    tpu.vector_store %arg4[%c0_10, %c0_11, %c0_12, %c0_13], %82 {strides = array<i32>} : memref<1x8x8x64xf32, #tpu.memory_space<vmem>>, vector<1x8x8x64xf32>,
    return
  }
  func.func @transform_0(%arg0: i32) -> (i32, i32, i32, i32) {
    %c0_i32 = arith.constant 0 : i32
    %c0_i32_0 = arith.constant 0 : i32
    %c0_i32_1 = arith.constant 0 : i32
    %c0_i32_2 = arith.constant 0 : i32
    return %arg0, %c0_i32, %c0_i32_0, %c0_i32_1 : i32, i32, i32, i32
  }
  func.func @transform_1(%arg0: i32) -> (i32, i32) {
    %c0_i32 = arith.constant 0 : i32
    %c0_i32_0 = arith.constant 0 : i32
    %c0_i32_1 = arith.constant 0 : i32
    return %c0_i32, %c0_i32_0 : i32, i32
  }
  func.func @transform_2(%arg0: i32) -> (i32, i32) {
    %c0_i32 = arith.constant 0 : i32
    %c0_i32_0 = arith.constant 0 : i32
    %c0_i32_1 = arith.constant 0 : i32
    return %c0_i32, %c0_i32_0 : i32, i32
  }
  func.func @transform_3(%arg0: i32) -> (i32, i32, i32, i32) {
    %c0_i32 = arith.constant 0 : i32
    %c0_i32_0 = arith.constant 0 : i32
    %c0_i32_1 = arith.constant 0 : i32
    %c0_i32_2 = arith.constant 0 : i32
    return %arg0, %c0_i32, %c0_i32_0, %c0_i32_1 : i32, i32, i32, i32
  }
}

module attributes {stable_mosaic.version = 11 : i64} {
  func.func @_xproj_kernel(%arg0: i32, %arg1: i32, %arg2: memref<128x64xf32, #tpu.memory_space<vmem>>, %arg3: memref<1x64x34xbf16, #tpu.memory_space<vmem>>, %arg4: memref<1x34x64xbf16, #tpu.memory_space<vmem>>, %arg5: memref<1x128x32xf32, #tpu.memory_space<vmem>>, %arg6: memref<1x128x64xf32, #tpu.memory_space<vmem>>) attributes {dimension_semantics = [#tpu.dimension_semantics<parallel>, #tpu.dimension_semantics<arbitrary>], iteration_bounds = array<i64: 1, 2>, scalar_prefetch = 0 : i64, scratch_operands = 0 : i64, tpu.core_type = #tpu.core_type<tc>, window_params = [{transform_indices = @transform_0, window_bounds = array<i64: 128, 64>}, {transform_indices = @transform_1, window_bounds = array<i64: 1, 64, 34>}, {transform_indices = @transform_2, window_bounds = array<i64: 1, 34, 64>}, {transform_indices = @transform_3, window_bounds = array<i64: 1, 128, 32>}, {transform_indices = @transform_4, window_bounds = array<i64: 1, 128, 64>}]} {
    %c0 = arith.constant 0 : index
    %c0_0 = arith.constant 0 : index
    %0 = vector.load %arg2[%c0, %c0_0] : memref<128x64xf32, #tpu.memory_space<vmem>>, vector<128x64xf32>
    %1 = arith.truncf %0 : vector<128x64xf32> to vector<128x64xbf16>
    %c0_1 = arith.constant 0 : index
    %c0_2 = arith.constant 0 : index
    %c0_3 = arith.constant 0 : index
    %2 = vector.load %arg3[%c0_1, %c0_2, %c0_3] : memref<1x64x34xbf16, #tpu.memory_space<vmem>>, vector<1x64x34xbf16>
    %3 = vector.shape_cast %2 : vector<1x64x34xbf16> to vector<64x34xbf16>
    %cst = arith.constant dense<0.000000e+00> : vector<128x34xf32>
    %4 = tpu.matmul %1, %3, %cst {dimension_numbers = #tpu.dot_dimension_numbers<[1], [0], [0], [1], [0, 0, 1, 1], [], []>} : vector<128x64xbf16>, vector<64x34xbf16>, vector<128x34xf32> -> vector<128x34xf32>
    %5 = vector.extract_strided_slice %4 {offsets = [0, 0], sizes = [128, 32], strides = [1, 1]} : vector<128x34xf32> to vector<128x32xf32>
    %c0_4 = arith.constant 0 : index
    %c0_5 = arith.constant 0 : index
    %c0_6 = arith.constant 0 : index
    %6 = vector.load %arg5[%c0_4, %c0_5, %c0_6] : memref<1x128x32xf32, #tpu.memory_space<vmem>>, vector<1x128x32xf32>
    %7 = vector.shape_cast %6 : vector<1x128x32xf32> to vector<128x32xf32>
    %8 = vector.shape_cast %5 : vector<128x32xf32> to vector<1x128x32xf32>
    tpu.vector_store %arg5[%c0_4, %c0_5, %c0_6], %8 {strides = array<i32>} : memref<1x128x32xf32, #tpu.memory_space<vmem>>, vector<1x128x32xf32>,
    %9 = arith.truncf %4 : vector<128x34xf32> to vector<128x34xbf16>
    %c0_7 = arith.constant 0 : index
    %c0_8 = arith.constant 0 : index
    %c0_9 = arith.constant 0 : index
    %10 = vector.load %arg4[%c0_7, %c0_8, %c0_9] : memref<1x34x64xbf16, #tpu.memory_space<vmem>>, vector<1x34x64xbf16>
    %11 = vector.shape_cast %10 : vector<1x34x64xbf16> to vector<34x64xbf16>
    %cst_10 = arith.constant dense<0.000000e+00> : vector<128x64xf32>
    %12 = tpu.matmul %9, %11, %cst_10 {dimension_numbers = #tpu.dot_dimension_numbers<[1], [0], [0], [1], [0, 0, 1, 1], [], []>} : vector<128x34xbf16>, vector<34x64xbf16>, vector<128x64xf32> -> vector<128x64xf32>
    %c0_11 = arith.constant 0 : index
    %c0_12 = arith.constant 0 : index
    %c0_13 = arith.constant 0 : index
    %13 = vector.load %arg6[%c0_11, %c0_12, %c0_13] : memref<1x128x64xf32, #tpu.memory_space<vmem>>, vector<1x128x64xf32>
    %14 = vector.shape_cast %13 : vector<1x128x64xf32> to vector<128x64xf32>
    %15 = vector.shape_cast %12 : vector<128x64xf32> to vector<1x128x64xf32>
    tpu.vector_store %arg6[%c0_11, %c0_12, %c0_13], %15 {strides = array<i32>} : memref<1x128x64xf32, #tpu.memory_space<vmem>>, vector<1x128x64xf32>,
    return
  }
  func.func @transform_0(%arg0: i32, %arg1: i32) -> (i32, i32) {
    %c0_i32 = arith.constant 0 : i32
    %c0_i32_0 = arith.constant 0 : i32
    return %arg0, %c0_i32 : i32, i32
  }
  func.func @transform_1(%arg0: i32, %arg1: i32) -> (i32, i32, i32) {
    %c0_i32 = arith.constant 0 : i32
    %c0_i32_0 = arith.constant 0 : i32
    %c0_i32_1 = arith.constant 0 : i32
    return %arg1, %c0_i32, %c0_i32_0 : i32, i32, i32
  }
  func.func @transform_2(%arg0: i32, %arg1: i32) -> (i32, i32, i32) {
    %c0_i32 = arith.constant 0 : i32
    %c0_i32_0 = arith.constant 0 : i32
    %c0_i32_1 = arith.constant 0 : i32
    return %arg1, %c0_i32, %c0_i32_0 : i32, i32, i32
  }
  func.func @transform_3(%arg0: i32, %arg1: i32) -> (i32, i32, i32) {
    %c0_i32 = arith.constant 0 : i32
    %c0_i32_0 = arith.constant 0 : i32
    return %arg1, %arg0, %c0_i32 : i32, i32, i32
  }
  func.func @transform_4(%arg0: i32, %arg1: i32) -> (i32, i32, i32) {
    %c0_i32 = arith.constant 0 : i32
    %c0_i32_0 = arith.constant 0 : i32
    return %arg1, %arg0, %c0_i32 : i32, i32, i32
  }
}

module attributes {stable_mosaic.version = 11 : i64} {
  func.func @_scan_kernel_noacc(%arg0: i32, %arg1: i32, %arg2: memref<1x64x64xf32, #tpu.memory_space<vmem>>, %arg3: memref<1x1x64x64xf32, #tpu.memory_space<vmem>>, %arg4: memref<1x1x64x32xf32, #tpu.memory_space<vmem>>, %arg5: memref<1x16x64xf32, #tpu.memory_space<vmem>>, %arg6: memref<1x1x64xf32, #tpu.memory_space<vmem>>, %arg7: memref<1x1x64xf32, #tpu.memory_space<vmem>>, %arg8: memref<1x64x64xf32, #tpu.memory_space<vmem>>, %arg9: memref<16x64xf32, #tpu.memory_space<vmem>>) attributes {dimension_semantics = [#tpu.dimension_semantics<parallel>, #tpu.dimension_semantics<arbitrary>], iteration_bounds = array<i64: 2, 1>, scalar_prefetch = 0 : i64, scratch_operands = 1 : i64, tpu.core_type = #tpu.core_type<tc>, window_params = [{transform_indices = @transform_0, window_bounds = array<i64: 1, 64, 64>}, {transform_indices = @transform_1, window_bounds = array<i64: 1, 1, 64, 64>}, {transform_indices = @transform_2, window_bounds = array<i64: 1, 1, 64, 32>}, {transform_indices = @transform_3, window_bounds = array<i64: 1, 16, 64>}, {transform_indices = @transform_4, window_bounds = array<i64: 1, 1, 64>}, {transform_indices = @transform_5, window_bounds = array<i64: 1, 1, 64>}, {transform_indices = @transform_6, window_bounds = array<i64: 1, 64, 64>}]} {
    %c0_i32 = arith.constant 0 : i32
    %0 = arith.cmpi eq, %arg1, %c0_i32 : i32
    %1 = arith.extui %0 : i1 to i32
    %c0_i32_0 = arith.constant 0 : i32
    %2 = arith.cmpi ne, %1, %c0_i32_0 : i32
    scf.if %2 {
      %cst = arith.constant 0.000000e+00 : f32
      %13 = vector.broadcast %cst : f32 to vector<16x64xf32>
      %c0_15 = arith.constant 0 : index
      %c0_16 = arith.constant 0 : index
      %14 = vector.load %arg9[%c0_15, %c0_16] : memref<16x64xf32, #tpu.memory_space<vmem>>, vector<16x64xf32>
      tpu.vector_store %arg9[%c0_15, %c0_16], %13 {strides = array<i32>} : memref<16x64xf32, #tpu.memory_space<vmem>>, vector<16x64xf32>,
    } else {
    }
    %c0 = arith.constant 0 : index
    %c0_1 = arith.constant 0 : index
    %c0_2 = arith.constant 0 : index
    %3 = vector.load %arg5[%c0, %c0_1, %c0_2] : memref<1x16x64xf32, #tpu.memory_space<vmem>>, vector<1x16x64xf32>
    %4 = vector.shape_cast %3 : vector<1x16x64xf32> to vector<16x64xf32>
    %c0_3 = arith.constant 0 : index
    %c0_4 = arith.constant 0 : index
    %c0_5 = arith.constant 0 : index
    %5 = vector.load %arg6[%c0_3, %c0_4, %c0_5] : memref<1x1x64xf32, #tpu.memory_space<vmem>>, vector<1x1x64xf32>
    %6 = vector.shape_cast %5 : vector<1x1x64xf32> to vector<1x64xf32>
    %c0_6 = arith.constant 0 : index
    %c0_7 = arith.constant 0 : index
    %c0_8 = arith.constant 0 : index
    %7 = vector.load %arg7[%c0_6, %c0_7, %c0_8] : memref<1x1x64xf32, #tpu.memory_space<vmem>>, vector<1x1x64xf32>
    %8 = vector.shape_cast %7 : vector<1x1x64xf32> to vector<1x64xf32>
    %c0_9 = arith.constant 0 : index
    %c0_10 = arith.constant 0 : index
    %9 = vector.load %arg9[%c0_9, %c0_10] : memref<16x64xf32, #tpu.memory_space<vmem>>, vector<16x64xf32>
    %c0_i32_11 = arith.constant 0 : i32
    %c8_i32 = arith.constant 8 : i32
    %10 = arith.addi %c0_i32_11, %c8_i32 : i32
    %c1_i32 = arith.constant 1 : i32
    %11 = scf.for %arg10 = %c0_i32_11 to %10 step %c1_i32 iter_args(%arg11 = %9) -> (vector<16x64xf32>)  : i32 {
      %c8_i32_15 = arith.constant 8 : i32
      %13 = arith.muli %arg10, %c8_i32_15 : i32
      %14 = tpu.assume_multiple %13, 8 : i32
      %c0_16 = arith.constant 0 : index
      %15 = arith.index_cast %14 : i32 to index
      %c0_17 = arith.constant 0 : index
      %16 = vector.load %arg2[%c0_16, %15, %c0_17] : memref<1x64x64xf32, #tpu.memory_space<vmem>>, vector<1x8x64xf32>
      %17 = vector.shape_cast %16 : vector<1x8x64xf32> to vector<8x64xf32>
      %c0_18 = arith.constant 0 : index
      %c0_19 = arith.constant 0 : index
      %18 = arith.index_cast %14 : i32 to index
      %c0_20 = arith.constant 0 : index
      %19 = vector.load %arg3[%c0_18, %c0_19, %18, %c0_20] : memref<1x1x64x64xf32, #tpu.memory_space<vmem>>, vector<1x1x8x64xf32>
      %20 = vector.shape_cast %19 : vector<1x1x8x64xf32> to vector<8x64xf32>
      %c0_21 = arith.constant 0 : index
      %c0_22 = arith.constant 0 : index
      %21 = arith.index_cast %14 : i32 to index
      %c0_23 = arith.constant 0 : index
      %22 = vector.load %arg4[%c0_21, %c0_22, %21, %c0_23] : memref<1x1x64x32xf32, #tpu.memory_space<vmem>>, vector<1x1x8x32xf32>
      %23 = vector.shape_cast %22 : vector<1x1x8x32xf32> to vector<8x32xf32>
      %24 = vector.broadcast %6 : vector<1x64xf32> to vector<8x64xf32>
      %25 = arith.addf %20, %24 : vector<8x64xf32>
      %cst = arith.constant 2.000000e+01 : f32
      %26 = vector.broadcast %cst : f32 to vector<8x64xf32>
      %27 = arith.cmpf ogt, %25, %26 : vector<8x64xf32>
      %cst_24 = arith.constant 2.000000e+01 : f32
      %28 = vector.broadcast %cst_24 : f32 to vector<8x64xf32>
      %29 = arith.minimumf %25, %28 : vector<8x64xf32>
      %30 = math.exp %29 : vector<8x64xf32>
      %31 = math.log1p %30 : vector<8x64xf32>
      %32 = arith.select %27, %25, %31 : vector<8x64xi1>, vector<8x64xf32>
      %33 = arith.mulf %32, %17 : vector<8x64xf32>
      %34 = vector.shape_cast %32 : vector<8x64xf32> to vector<8x1x64xf32>
      %35 = vector.shape_cast %4 : vector<16x64xf32> to vector<1x16x64xf32>
      %36 = vector.broadcast %34 : vector<8x1x64xf32> to vector<8x16x64xf32>
      %37 = vector.broadcast %35 : vector<1x16x64xf32> to vector<8x16x64xf32>
      %38 = arith.mulf %36, %37 : vector<8x16x64xf32>
      %39 = math.exp %38 : vector<8x16x64xf32>
      %40 = tpu.transpose %23, [1, 0] : vector<8x32xf32> -> vector<32x8xf32>
      %41 = vector.extract_strided_slice %40 {offsets = [0, 0], sizes = [16, 8], strides = [1, 1]} : vector<32x8xf32> to vector<16x8xf32>
      %42 = vector.extract_strided_slice %40 {offsets = [16, 0], sizes = [16, 8], strides = [1, 1]} : vector<32x8xf32> to vector<16x8xf32>
      %43 = vector.extract_strided_slice %39 {offsets = [0, 0, 0], sizes = [1, 16, 64], strides = [1, 1, 1]} : vector<8x16x64xf32> to vector<1x16x64xf32>
      %44 = vector.shape_cast %43 : vector<1x16x64xf32> to vector<16x64xf32>
      %45 = arith.mulf %44, %arg11 : vector<16x64xf32>
      %46 = vector.extract_strided_slice %41 {offsets = [0, 0], sizes = [16, 1], strides = [1, 1]} : vector<16x8xf32> to vector<16x1xf32>
      %47 = vector.extract_strided_slice %33 {offsets = [0, 0], sizes = [1, 64], strides = [1, 1]} : vector<8x64xf32> to vector<1x64xf32>
      %48 = vector.broadcast %46 : vector<16x1xf32> to vector<16x64xf32>
      %49 = vector.broadcast %47 : vector<1x64xf32> to vector<16x64xf32>
      %50 = arith.mulf %48, %49 : vector<16x64xf32>
      %51 = arith.addf %45, %50 : vector<16x64xf32>
      %52 = vector.extract_strided_slice %42 {offsets = [0, 0], sizes = [16, 1], strides = [1, 1]} : vector<16x8xf32> to vector<16x1xf32>
      %53 = vector.broadcast %52 : vector<16x1xf32> to vector<16x64xf32>
      %54 = arith.mulf %53, %51 : vector<16x64xf32>
      %cst_25 = arith.constant dense<0.000000e+00> : vector<64xf32>
      %55 = vector.multi_reduction <add>, %54, %cst_25 [0] : vector<16x64xf32> to vector<64xf32>
      %56 = vector.shape_cast %55 : vector<64xf32> to vector<1x64xf32>
      %57 = vector.extract_strided_slice %39 {offsets = [1, 0, 0], sizes = [1, 16, 64], strides = [1, 1, 1]} : vector<8x16x64xf32> to vector<1x16x64xf32>
      %58 = vector.shape_cast %57 : vector<1x16x64xf32> to vector<16x64xf32>
      %59 = arith.mulf %58, %51 : vector<16x64xf32>
      %60 = vector.extract_strided_slice %41 {offsets = [0, 1], sizes = [16, 1], strides = [1, 1]} : vector<16x8xf32> to vector<16x1xf32>
      %61 = vector.extract_strided_slice %33 {offsets = [1, 0], sizes = [1, 64], strides = [1, 1]} : vector<8x64xf32> to vector<1x64xf32>
      %62 = vector.broadcast %60 : vector<16x1xf32> to vector<16x64xf32>
      %63 = vector.broadcast %61 : vector<1x64xf32> to vector<16x64xf32>
      %64 = arith.mulf %62, %63 : vector<16x64xf32>
      %65 = arith.addf %59, %64 : vector<16x64xf32>
      %66 = vector.extract_strided_slice %42 {offsets = [0, 1], sizes = [16, 1], strides = [1, 1]} : vector<16x8xf32> to vector<16x1xf32>
      %67 = vector.broadcast %66 : vector<16x1xf32> to vector<16x64xf32>
      %68 = arith.mulf %67, %65 : vector<16x64xf32>
      %cst_26 = arith.constant dense<0.000000e+00> : vector<64xf32>
      %69 = vector.multi_reduction <add>, %68, %cst_26 [0] : vector<16x64xf32> to vector<64xf32>
      %70 = vector.shape_cast %69 : vector<64xf32> to vector<1x64xf32>
      %71 = vector.extract_strided_slice %39 {offsets = [2, 0, 0], sizes = [1, 16, 64], strides = [1, 1, 1]} : vector<8x16x64xf32> to vector<1x16x64xf32>
      %72 = vector.shape_cast %71 : vector<1x16x64xf32> to vector<16x64xf32>
      %73 = arith.mulf %72, %65 : vector<16x64xf32>
      %74 = vector.extract_strided_slice %41 {offsets = [0, 2], sizes = [16, 1], strides = [1, 1]} : vector<16x8xf32> to vector<16x1xf32>
      %75 = vector.extract_strided_slice %33 {offsets = [2, 0], sizes = [1, 64], strides = [1, 1]} : vector<8x64xf32> to vector<1x64xf32>
      %76 = vector.broadcast %74 : vector<16x1xf32> to vector<16x64xf32>
      %77 = vector.broadcast %75 : vector<1x64xf32> to vector<16x64xf32>
      %78 = arith.mulf %76, %77 : vector<16x64xf32>
      %79 = arith.addf %73, %78 : vector<16x64xf32>
      %80 = vector.extract_strided_slice %42 {offsets = [0, 2], sizes = [16, 1], strides = [1, 1]} : vector<16x8xf32> to vector<16x1xf32>
      %81 = vector.broadcast %80 : vector<16x1xf32> to vector<16x64xf32>
      %82 = arith.mulf %81, %79 : vector<16x64xf32>
      %cst_27 = arith.constant dense<0.000000e+00> : vector<64xf32>
      %83 = vector.multi_reduction <add>, %82, %cst_27 [0] : vector<16x64xf32> to vector<64xf32>
      %84 = vector.shape_cast %83 : vector<64xf32> to vector<1x64xf32>
      %85 = vector.extract_strided_slice %39 {offsets = [3, 0, 0], sizes = [1, 16, 64], strides = [1, 1, 1]} : vector<8x16x64xf32> to vector<1x16x64xf32>
      %86 = vector.shape_cast %85 : vector<1x16x64xf32> to vector<16x64xf32>
      %87 = arith.mulf %86, %79 : vector<16x64xf32>
      %88 = vector.extract_strided_slice %41 {offsets = [0, 3], sizes = [16, 1], strides = [1, 1]} : vector<16x8xf32> to vector<16x1xf32>
      %89 = vector.extract_strided_slice %33 {offsets = [3, 0], sizes = [1, 64], strides = [1, 1]} : vector<8x64xf32> to vector<1x64xf32>
      %90 = vector.broadcast %88 : vector<16x1xf32> to vector<16x64xf32>
      %91 = vector.broadcast %89 : vector<1x64xf32> to vector<16x64xf32>
      %92 = arith.mulf %90, %91 : vector<16x64xf32>
      %93 = arith.addf %87, %92 : vector<16x64xf32>
      %94 = vector.extract_strided_slice %42 {offsets = [0, 3], sizes = [16, 1], strides = [1, 1]} : vector<16x8xf32> to vector<16x1xf32>
      %95 = vector.broadcast %94 : vector<16x1xf32> to vector<16x64xf32>
      %96 = arith.mulf %95, %93 : vector<16x64xf32>
      %cst_28 = arith.constant dense<0.000000e+00> : vector<64xf32>
      %97 = vector.multi_reduction <add>, %96, %cst_28 [0] : vector<16x64xf32> to vector<64xf32>
      %98 = vector.shape_cast %97 : vector<64xf32> to vector<1x64xf32>
      %99 = vector.extract_strided_slice %39 {offsets = [4, 0, 0], sizes = [1, 16, 64], strides = [1, 1, 1]} : vector<8x16x64xf32> to vector<1x16x64xf32>
      %100 = vector.shape_cast %99 : vector<1x16x64xf32> to vector<16x64xf32>
      %101 = arith.mulf %100, %93 : vector<16x64xf32>
      %102 = vector.extract_strided_slice %41 {offsets = [0, 4], sizes = [16, 1], strides = [1, 1]} : vector<16x8xf32> to vector<16x1xf32>
      %103 = vector.extract_strided_slice %33 {offsets = [4, 0], sizes = [1, 64], strides = [1, 1]} : vector<8x64xf32> to vector<1x64xf32>
      %104 = vector.broadcast %102 : vector<16x1xf32> to vector<16x64xf32>
      %105 = vector.broadcast %103 : vector<1x64xf32> to vector<16x64xf32>
      %106 = arith.mulf %104, %105 : vector<16x64xf32>
      %107 = arith.addf %101, %106 : vector<16x64xf32>
      %108 = vector.extract_strided_slice %42 {offsets = [0, 4], sizes = [16, 1], strides = [1, 1]} : vector<16x8xf32> to vector<16x1xf32>
      %109 = vector.broadcast %108 : vector<16x1xf32> to vector<16x64xf32>
      %110 = arith.mulf %109, %107 : vector<16x64xf32>
      %cst_29 = arith.constant dense<0.000000e+00> : vector<64xf32>
      %111 = vector.multi_reduction <add>, %110, %cst_29 [0] : vector<16x64xf32> to vector<64xf32>
      %112 = vector.shape_cast %111 : vector<64xf32> to vector<1x64xf32>
      %113 = vector.extract_strided_slice %39 {offsets = [5, 0, 0], sizes = [1, 16, 64], strides = [1, 1, 1]} : vector<8x16x64xf32> to vector<1x16x64xf32>
      %114 = vector.shape_cast %113 : vector<1x16x64xf32> to vector<16x64xf32>
      %115 = arith.mulf %114, %107 : vector<16x64xf32>
      %116 = vector.extract_strided_slice %41 {offsets = [0, 5], sizes = [16, 1], strides = [1, 1]} : vector<16x8xf32> to vector<16x1xf32>
      %117 = vector.extract_strided_slice %33 {offsets = [5, 0], sizes = [1, 64], strides = [1, 1]} : vector<8x64xf32> to vector<1x64xf32>
      %118 = vector.broadcast %116 : vector<16x1xf32> to vector<16x64xf32>
      %119 = vector.broadcast %117 : vector<1x64xf32> to vector<16x64xf32>
      %120 = arith.mulf %118, %119 : vector<16x64xf32>
      %121 = arith.addf %115, %120 : vector<16x64xf32>
      %122 = vector.extract_strided_slice %42 {offsets = [0, 5], sizes = [16, 1], strides = [1, 1]} : vector<16x8xf32> to vector<16x1xf32>
      %123 = vector.broadcast %122 : vector<16x1xf32> to vector<16x64xf32>
      %124 = arith.mulf %123, %121 : vector<16x64xf32>
      %cst_30 = arith.constant dense<0.000000e+00> : vector<64xf32>
      %125 = vector.multi_reduction <add>, %124, %cst_30 [0] : vector<16x64xf32> to vector<64xf32>
      %126 = vector.shape_cast %125 : vector<64xf32> to vector<1x64xf32>
      %127 = vector.extract_strided_slice %39 {offsets = [6, 0, 0], sizes = [1, 16, 64], strides = [1, 1, 1]} : vector<8x16x64xf32> to vector<1x16x64xf32>
      %128 = vector.shape_cast %127 : vector<1x16x64xf32> to vector<16x64xf32>
      %129 = arith.mulf %128, %121 : vector<16x64xf32>
      %130 = vector.extract_strided_slice %41 {offsets = [0, 6], sizes = [16, 1], strides = [1, 1]} : vector<16x8xf32> to vector<16x1xf32>
      %131 = vector.extract_strided_slice %33 {offsets = [6, 0], sizes = [1, 64], strides = [1, 1]} : vector<8x64xf32> to vector<1x64xf32>
      %132 = vector.broadcast %130 : vector<16x1xf32> to vector<16x64xf32>
      %133 = vector.broadcast %131 : vector<1x64xf32> to vector<16x64xf32>
      %134 = arith.mulf %132, %133 : vector<16x64xf32>
      %135 = arith.addf %129, %134 : vector<16x64xf32>
      %136 = vector.extract_strided_slice %42 {offsets = [0, 6], sizes = [16, 1], strides = [1, 1]} : vector<16x8xf32> to vector<16x1xf32>
      %137 = vector.broadcast %136 : vector<16x1xf32> to vector<16x64xf32>
      %138 = arith.mulf %137, %135 : vector<16x64xf32>
      %cst_31 = arith.constant dense<0.000000e+00> : vector<64xf32>
      %139 = vector.multi_reduction <add>, %138, %cst_31 [0] : vector<16x64xf32> to vector<64xf32>
      %140 = vector.shape_cast %139 : vector<64xf32> to vector<1x64xf32>
      %141 = vector.extract_strided_slice %39 {offsets = [7, 0, 0], sizes = [1, 16, 64], strides = [1, 1, 1]} : vector<8x16x64xf32> to vector<1x16x64xf32>
      %142 = vector.shape_cast %141 : vector<1x16x64xf32> to vector<16x64xf32>
      %143 = arith.mulf %142, %135 : vector<16x64xf32>
      %144 = vector.extract_strided_slice %41 {offsets = [0, 7], sizes = [16, 1], strides = [1, 1]} : vector<16x8xf32> to vector<16x1xf32>
      %145 = vector.extract_strided_slice %33 {offsets = [7, 0], sizes = [1, 64], strides = [1, 1]} : vector<8x64xf32> to vector<1x64xf32>
      %146 = vector.broadcast %144 : vector<16x1xf32> to vector<16x64xf32>
      %147 = vector.broadcast %145 : vector<1x64xf32> to vector<16x64xf32>
      %148 = arith.mulf %146, %147 : vector<16x64xf32>
      %149 = arith.addf %143, %148 : vector<16x64xf32>
      %150 = vector.extract_strided_slice %42 {offsets = [0, 7], sizes = [16, 1], strides = [1, 1]} : vector<16x8xf32> to vector<16x1xf32>
      %151 = vector.broadcast %150 : vector<16x1xf32> to vector<16x64xf32>
      %152 = arith.mulf %151, %149 : vector<16x64xf32>
      %cst_32 = arith.constant dense<0.000000e+00> : vector<64xf32>
      %153 = vector.multi_reduction <add>, %152, %cst_32 [0] : vector<16x64xf32> to vector<64xf32>
      %154 = vector.shape_cast %153 : vector<64xf32> to vector<1x64xf32>
      %155 = tpu.concatenate %56, %70, %84, %98, %112, %126, %140, %154 in 0 : vector<1x64xf32>, vector<1x64xf32>, vector<1x64xf32>, vector<1x64xf32>, vector<1x64xf32>, vector<1x64xf32>, vector<1x64xf32>, vector<1x64xf32> -> vector<8x64xf32>
      %156 = vector.broadcast %8 : vector<1x64xf32> to vector<8x64xf32>
      %157 = arith.mulf %156, %17 : vector<8x64xf32>
      %158 = arith.addf %155, %157 : vector<8x64xf32>
      %c0_33 = arith.constant 0 : index
      %159 = arith.index_cast %14 : i32 to index
      %c0_34 = arith.constant 0 : index
      %160 = vector.load %arg8[%c0_33, %159, %c0_34] : memref<1x64x64xf32, #tpu.memory_space<vmem>>, vector<1x8x64xf32>
      %161 = vector.shape_cast %160 : vector<1x8x64xf32> to vector<8x64xf32>
      %162 = vector.shape_cast %158 : vector<8x64xf32> to vector<1x8x64xf32>
      tpu.vector_store %arg8[%c0_33, %159, %c0_34], %162 {strides = array<i32>} : memref<1x64x64xf32, #tpu.memory_space<vmem>>, vector<1x8x64xf32>,
      scf.yield %149 : vector<16x64xf32>
    }
    %c8_i32_12 = arith.constant 8 : i32
    %c0_13 = arith.constant 0 : index
    %c0_14 = arith.constant 0 : index
    %12 = vector.load %arg9[%c0_13, %c0_14] : memref<16x64xf32, #tpu.memory_space<vmem>>, vector<16x64xf32>
    tpu.vector_store %arg9[%c0_13, %c0_14], %11 {strides = array<i32>} : memref<16x64xf32, #tpu.memory_space<vmem>>, vector<16x64xf32>,
    return
  }
  func.func @transform_0(%arg0: i32, %arg1: i32) -> (i32, i32, i32) {
    %c0_i32 = arith.constant 0 : i32
    %c0_i32_0 = arith.constant 0 : i32
    return %arg0, %arg1, %c0_i32 : i32, i32, i32
  }
  func.func @transform_1(%arg0: i32, %arg1: i32) -> (i32, i32, i32, i32) {
    %c0_i32 = arith.constant 0 : i32
    %c0_i32_0 = arith.constant 0 : i32
    %c0_i32_1 = arith.constant 0 : i32
    return %c0_i32, %arg0, %arg1, %c0_i32_0 : i32, i32, i32, i32
  }
  func.func @transform_2(%arg0: i32, %arg1: i32) -> (i32, i32, i32, i32) {
    %c0_i32 = arith.constant 0 : i32
    %c0_i32_0 = arith.constant 0 : i32
    %c0_i32_1 = arith.constant 0 : i32
    return %c0_i32, %arg0, %arg1, %c0_i32_0 : i32, i32, i32, i32
  }
  func.func @transform_3(%arg0: i32, %arg1: i32) -> (i32, i32, i32) {
    %c0_i32 = arith.constant 0 : i32
    %c0_i32_0 = arith.constant 0 : i32
    %c0_i32_1 = arith.constant 0 : i32
    %c0_i32_2 = arith.constant 0 : i32
    return %c0_i32, %c0_i32_0, %c0_i32_1 : i32, i32, i32
  }
  func.func @transform_4(%arg0: i32, %arg1: i32) -> (i32, i32, i32) {
    %c0_i32 = arith.constant 0 : i32
    %c0_i32_0 = arith.constant 0 : i32
    %c0_i32_1 = arith.constant 0 : i32
    %c0_i32_2 = arith.constant 0 : i32
    return %c0_i32, %c0_i32_0, %c0_i32_1 : i32, i32, i32
  }
  func.func @transform_5(%arg0: i32, %arg1: i32) -> (i32, i32, i32) {
    %c0_i32 = arith.constant 0 : i32
    %c0_i32_0 = arith.constant 0 : i32
    %c0_i32_1 = arith.constant 0 : i32
    %c0_i32_2 = arith.constant 0 : i32
    return %c0_i32, %c0_i32_0, %c0_i32_1 : i32, i32, i32
  }
  func.func @transform_6(%arg0: i32, %arg1: i32) -> (i32, i32, i32) {
    %c0_i32 = arith.constant 0 : i32
    %c0_i32_0 = arith.constant 0 : i32
    return %arg0, %arg1, %c0_i32 : i32, i32, i32
  }
}

module attributes {stable_mosaic.version = 11 : i64} {
  func.func @_scan_kernel_acc(%arg0: i32, %arg1: i32, %arg2: memref<1x64x64xf32, #tpu.memory_space<vmem>>, %arg3: memref<1x1x64x64xf32, #tpu.memory_space<vmem>>, %arg4: memref<1x1x64x32xf32, #tpu.memory_space<vmem>>, %arg5: memref<1x16x64xf32, #tpu.memory_space<vmem>>, %arg6: memref<1x1x64xf32, #tpu.memory_space<vmem>>, %arg7: memref<1x1x64xf32, #tpu.memory_space<vmem>>, %arg8: memref<1x64x64xf32, #tpu.memory_space<vmem>>, %arg9: memref<1x64x64xf32, #tpu.memory_space<vmem>>, %arg10: memref<16x64xf32, #tpu.memory_space<vmem>>) attributes {dimension_semantics = [#tpu.dimension_semantics<parallel>, #tpu.dimension_semantics<arbitrary>], iteration_bounds = array<i64: 2, 1>, scalar_prefetch = 0 : i64, scratch_operands = 1 : i64, tpu.core_type = #tpu.core_type<tc>, window_params = [{transform_indices = @transform_0, window_bounds = array<i64: 1, 64, 64>}, {transform_indices = @transform_1, window_bounds = array<i64: 1, 1, 64, 64>}, {transform_indices = @transform_2, window_bounds = array<i64: 1, 1, 64, 32>}, {transform_indices = @transform_3, window_bounds = array<i64: 1, 16, 64>}, {transform_indices = @transform_4, window_bounds = array<i64: 1, 1, 64>}, {transform_indices = @transform_5, window_bounds = array<i64: 1, 1, 64>}, {transform_indices = @transform_6, window_bounds = array<i64: 1, 64, 64>}, {transform_indices = @transform_7, window_bounds = array<i64: 1, 64, 64>}]} {
    %c0_i32 = arith.constant 0 : i32
    %0 = arith.cmpi eq, %arg1, %c0_i32 : i32
    %1 = arith.extui %0 : i1 to i32
    %c0_i32_0 = arith.constant 0 : i32
    %2 = arith.cmpi ne, %1, %c0_i32_0 : i32
    scf.if %2 {
      %cst = arith.constant 0.000000e+00 : f32
      %13 = vector.broadcast %cst : f32 to vector<16x64xf32>
      %c0_15 = arith.constant 0 : index
      %c0_16 = arith.constant 0 : index
      %14 = vector.load %arg10[%c0_15, %c0_16] : memref<16x64xf32, #tpu.memory_space<vmem>>, vector<16x64xf32>
      tpu.vector_store %arg10[%c0_15, %c0_16], %13 {strides = array<i32>} : memref<16x64xf32, #tpu.memory_space<vmem>>, vector<16x64xf32>,
    } else {
    }
    %c0 = arith.constant 0 : index
    %c0_1 = arith.constant 0 : index
    %c0_2 = arith.constant 0 : index
    %3 = vector.load %arg5[%c0, %c0_1, %c0_2] : memref<1x16x64xf32, #tpu.memory_space<vmem>>, vector<1x16x64xf32>
    %4 = vector.shape_cast %3 : vector<1x16x64xf32> to vector<16x64xf32>
    %c0_3 = arith.constant 0 : index
    %c0_4 = arith.constant 0 : index
    %c0_5 = arith.constant 0 : index
    %5 = vector.load %arg6[%c0_3, %c0_4, %c0_5] : memref<1x1x64xf32, #tpu.memory_space<vmem>>, vector<1x1x64xf32>
    %6 = vector.shape_cast %5 : vector<1x1x64xf32> to vector<1x64xf32>
    %c0_6 = arith.constant 0 : index
    %c0_7 = arith.constant 0 : index
    %c0_8 = arith.constant 0 : index
    %7 = vector.load %arg7[%c0_6, %c0_7, %c0_8] : memref<1x1x64xf32, #tpu.memory_space<vmem>>, vector<1x1x64xf32>
    %8 = vector.shape_cast %7 : vector<1x1x64xf32> to vector<1x64xf32>
    %c0_9 = arith.constant 0 : index
    %c0_10 = arith.constant 0 : index
    %9 = vector.load %arg10[%c0_9, %c0_10] : memref<16x64xf32, #tpu.memory_space<vmem>>, vector<16x64xf32>
    %c0_i32_11 = arith.constant 0 : i32
    %c8_i32 = arith.constant 8 : i32
    %10 = arith.addi %c0_i32_11, %c8_i32 : i32
    %c1_i32 = arith.constant 1 : i32
    %11 = scf.for %arg11 = %c0_i32_11 to %10 step %c1_i32 iter_args(%arg12 = %9) -> (vector<16x64xf32>)  : i32 {
      %c7_i32 = arith.constant 7 : i32
      %13 = arith.subi %c7_i32, %arg11 : i32
      %c8_i32_15 = arith.constant 8 : i32
      %14 = arith.muli %13, %c8_i32_15 : i32
      %15 = tpu.assume_multiple %14, 8 : i32
      %c0_16 = arith.constant 0 : index
      %16 = arith.index_cast %15 : i32 to index
      %c0_17 = arith.constant 0 : index
      %17 = vector.load %arg2[%c0_16, %16, %c0_17] : memref<1x64x64xf32, #tpu.memory_space<vmem>>, vector<1x8x64xf32>
      %18 = vector.shape_cast %17 : vector<1x8x64xf32> to vector<8x64xf32>
      %c0_18 = arith.constant 0 : index
      %c0_19 = arith.constant 0 : index
      %19 = arith.index_cast %15 : i32 to index
      %c0_20 = arith.constant 0 : index
      %20 = vector.load %arg3[%c0_18, %c0_19, %19, %c0_20] : memref<1x1x64x64xf32, #tpu.memory_space<vmem>>, vector<1x1x8x64xf32>
      %21 = vector.shape_cast %20 : vector<1x1x8x64xf32> to vector<8x64xf32>
      %c0_21 = arith.constant 0 : index
      %c0_22 = arith.constant 0 : index
      %22 = arith.index_cast %15 : i32 to index
      %c0_23 = arith.constant 0 : index
      %23 = vector.load %arg4[%c0_21, %c0_22, %22, %c0_23] : memref<1x1x64x32xf32, #tpu.memory_space<vmem>>, vector<1x1x8x32xf32>
      %24 = vector.shape_cast %23 : vector<1x1x8x32xf32> to vector<8x32xf32>
      %25 = vector.broadcast %6 : vector<1x64xf32> to vector<8x64xf32>
      %26 = arith.addf %21, %25 : vector<8x64xf32>
      %cst = arith.constant 2.000000e+01 : f32
      %27 = vector.broadcast %cst : f32 to vector<8x64xf32>
      %28 = arith.cmpf ogt, %26, %27 : vector<8x64xf32>
      %cst_24 = arith.constant 2.000000e+01 : f32
      %29 = vector.broadcast %cst_24 : f32 to vector<8x64xf32>
      %30 = arith.minimumf %26, %29 : vector<8x64xf32>
      %31 = math.exp %30 : vector<8x64xf32>
      %32 = math.log1p %31 : vector<8x64xf32>
      %33 = arith.select %28, %26, %32 : vector<8x64xi1>, vector<8x64xf32>
      %34 = arith.mulf %33, %18 : vector<8x64xf32>
      %35 = vector.shape_cast %33 : vector<8x64xf32> to vector<8x1x64xf32>
      %36 = vector.shape_cast %4 : vector<16x64xf32> to vector<1x16x64xf32>
      %37 = vector.broadcast %35 : vector<8x1x64xf32> to vector<8x16x64xf32>
      %38 = vector.broadcast %36 : vector<1x16x64xf32> to vector<8x16x64xf32>
      %39 = arith.mulf %37, %38 : vector<8x16x64xf32>
      %40 = math.exp %39 : vector<8x16x64xf32>
      %41 = tpu.transpose %24, [1, 0] : vector<8x32xf32> -> vector<32x8xf32>
      %42 = vector.extract_strided_slice %41 {offsets = [0, 0], sizes = [16, 8], strides = [1, 1]} : vector<32x8xf32> to vector<16x8xf32>
      %43 = vector.extract_strided_slice %41 {offsets = [16, 0], sizes = [16, 8], strides = [1, 1]} : vector<32x8xf32> to vector<16x8xf32>
      %44 = vector.extract_strided_slice %40 {offsets = [7, 0, 0], sizes = [1, 16, 64], strides = [1, 1, 1]} : vector<8x16x64xf32> to vector<1x16x64xf32>
      %45 = vector.shape_cast %44 : vector<1x16x64xf32> to vector<16x64xf32>
      %46 = arith.mulf %45, %arg12 : vector<16x64xf32>
      %47 = vector.extract_strided_slice %42 {offsets = [0, 7], sizes = [16, 1], strides = [1, 1]} : vector<16x8xf32> to vector<16x1xf32>
      %48 = vector.extract_strided_slice %34 {offsets = [7, 0], sizes = [1, 64], strides = [1, 1]} : vector<8x64xf32> to vector<1x64xf32>
      %49 = vector.broadcast %47 : vector<16x1xf32> to vector<16x64xf32>
      %50 = vector.broadcast %48 : vector<1x64xf32> to vector<16x64xf32>
      %51 = arith.mulf %49, %50 : vector<16x64xf32>
      %52 = arith.addf %46, %51 : vector<16x64xf32>
      %53 = vector.extract_strided_slice %43 {offsets = [0, 7], sizes = [16, 1], strides = [1, 1]} : vector<16x8xf32> to vector<16x1xf32>
      %54 = vector.broadcast %53 : vector<16x1xf32> to vector<16x64xf32>
      %55 = arith.mulf %54, %52 : vector<16x64xf32>
      %cst_25 = arith.constant dense<0.000000e+00> : vector<64xf32>
      %56 = vector.multi_reduction <add>, %55, %cst_25 [0] : vector<16x64xf32> to vector<64xf32>
      %57 = vector.shape_cast %56 : vector<64xf32> to vector<1x64xf32>
      %58 = vector.extract_strided_slice %40 {offsets = [6, 0, 0], sizes = [1, 16, 64], strides = [1, 1, 1]} : vector<8x16x64xf32> to vector<1x16x64xf32>
      %59 = vector.shape_cast %58 : vector<1x16x64xf32> to vector<16x64xf32>
      %60 = arith.mulf %59, %52 : vector<16x64xf32>
      %61 = vector.extract_strided_slice %42 {offsets = [0, 6], sizes = [16, 1], strides = [1, 1]} : vector<16x8xf32> to vector<16x1xf32>
      %62 = vector.extract_strided_slice %34 {offsets = [6, 0], sizes = [1, 64], strides = [1, 1]} : vector<8x64xf32> to vector<1x64xf32>
      %63 = vector.broadcast %61 : vector<16x1xf32> to vector<16x64xf32>
      %64 = vector.broadcast %62 : vector<1x64xf32> to vector<16x64xf32>
      %65 = arith.mulf %63, %64 : vector<16x64xf32>
      %66 = arith.addf %60, %65 : vector<16x64xf32>
      %67 = vector.extract_strided_slice %43 {offsets = [0, 6], sizes = [16, 1], strides = [1, 1]} : vector<16x8xf32> to vector<16x1xf32>
      %68 = vector.broadcast %67 : vector<16x1xf32> to vector<16x64xf32>
      %69 = arith.mulf %68, %66 : vector<16x64xf32>
      %cst_26 = arith.constant dense<0.000000e+00> : vector<64xf32>
      %70 = vector.multi_reduction <add>, %69, %cst_26 [0] : vector<16x64xf32> to vector<64xf32>
      %71 = vector.shape_cast %70 : vector<64xf32> to vector<1x64xf32>
      %72 = vector.extract_strided_slice %40 {offsets = [5, 0, 0], sizes = [1, 16, 64], strides = [1, 1, 1]} : vector<8x16x64xf32> to vector<1x16x64xf32>
      %73 = vector.shape_cast %72 : vector<1x16x64xf32> to vector<16x64xf32>
      %74 = arith.mulf %73, %66 : vector<16x64xf32>
      %75 = vector.extract_strided_slice %42 {offsets = [0, 5], sizes = [16, 1], strides = [1, 1]} : vector<16x8xf32> to vector<16x1xf32>
      %76 = vector.extract_strided_slice %34 {offsets = [5, 0], sizes = [1, 64], strides = [1, 1]} : vector<8x64xf32> to vector<1x64xf32>
      %77 = vector.broadcast %75 : vector<16x1xf32> to vector<16x64xf32>
      %78 = vector.broadcast %76 : vector<1x64xf32> to vector<16x64xf32>
      %79 = arith.mulf %77, %78 : vector<16x64xf32>
      %80 = arith.addf %74, %79 : vector<16x64xf32>
      %81 = vector.extract_strided_slice %43 {offsets = [0, 5], sizes = [16, 1], strides = [1, 1]} : vector<16x8xf32> to vector<16x1xf32>
      %82 = vector.broadcast %81 : vector<16x1xf32> to vector<16x64xf32>
      %83 = arith.mulf %82, %80 : vector<16x64xf32>
      %cst_27 = arith.constant dense<0.000000e+00> : vector<64xf32>
      %84 = vector.multi_reduction <add>, %83, %cst_27 [0] : vector<16x64xf32> to vector<64xf32>
      %85 = vector.shape_cast %84 : vector<64xf32> to vector<1x64xf32>
      %86 = vector.extract_strided_slice %40 {offsets = [4, 0, 0], sizes = [1, 16, 64], strides = [1, 1, 1]} : vector<8x16x64xf32> to vector<1x16x64xf32>
      %87 = vector.shape_cast %86 : vector<1x16x64xf32> to vector<16x64xf32>
      %88 = arith.mulf %87, %80 : vector<16x64xf32>
      %89 = vector.extract_strided_slice %42 {offsets = [0, 4], sizes = [16, 1], strides = [1, 1]} : vector<16x8xf32> to vector<16x1xf32>
      %90 = vector.extract_strided_slice %34 {offsets = [4, 0], sizes = [1, 64], strides = [1, 1]} : vector<8x64xf32> to vector<1x64xf32>
      %91 = vector.broadcast %89 : vector<16x1xf32> to vector<16x64xf32>
      %92 = vector.broadcast %90 : vector<1x64xf32> to vector<16x64xf32>
      %93 = arith.mulf %91, %92 : vector<16x64xf32>
      %94 = arith.addf %88, %93 : vector<16x64xf32>
      %95 = vector.extract_strided_slice %43 {offsets = [0, 4], sizes = [16, 1], strides = [1, 1]} : vector<16x8xf32> to vector<16x1xf32>
      %96 = vector.broadcast %95 : vector<16x1xf32> to vector<16x64xf32>
      %97 = arith.mulf %96, %94 : vector<16x64xf32>
      %cst_28 = arith.constant dense<0.000000e+00> : vector<64xf32>
      %98 = vector.multi_reduction <add>, %97, %cst_28 [0] : vector<16x64xf32> to vector<64xf32>
      %99 = vector.shape_cast %98 : vector<64xf32> to vector<1x64xf32>
      %100 = vector.extract_strided_slice %40 {offsets = [3, 0, 0], sizes = [1, 16, 64], strides = [1, 1, 1]} : vector<8x16x64xf32> to vector<1x16x64xf32>
      %101 = vector.shape_cast %100 : vector<1x16x64xf32> to vector<16x64xf32>
      %102 = arith.mulf %101, %94 : vector<16x64xf32>
      %103 = vector.extract_strided_slice %42 {offsets = [0, 3], sizes = [16, 1], strides = [1, 1]} : vector<16x8xf32> to vector<16x1xf32>
      %104 = vector.extract_strided_slice %34 {offsets = [3, 0], sizes = [1, 64], strides = [1, 1]} : vector<8x64xf32> to vector<1x64xf32>
      %105 = vector.broadcast %103 : vector<16x1xf32> to vector<16x64xf32>
      %106 = vector.broadcast %104 : vector<1x64xf32> to vector<16x64xf32>
      %107 = arith.mulf %105, %106 : vector<16x64xf32>
      %108 = arith.addf %102, %107 : vector<16x64xf32>
      %109 = vector.extract_strided_slice %43 {offsets = [0, 3], sizes = [16, 1], strides = [1, 1]} : vector<16x8xf32> to vector<16x1xf32>
      %110 = vector.broadcast %109 : vector<16x1xf32> to vector<16x64xf32>
      %111 = arith.mulf %110, %108 : vector<16x64xf32>
      %cst_29 = arith.constant dense<0.000000e+00> : vector<64xf32>
      %112 = vector.multi_reduction <add>, %111, %cst_29 [0] : vector<16x64xf32> to vector<64xf32>
      %113 = vector.shape_cast %112 : vector<64xf32> to vector<1x64xf32>
      %114 = vector.extract_strided_slice %40 {offsets = [2, 0, 0], sizes = [1, 16, 64], strides = [1, 1, 1]} : vector<8x16x64xf32> to vector<1x16x64xf32>
      %115 = vector.shape_cast %114 : vector<1x16x64xf32> to vector<16x64xf32>
      %116 = arith.mulf %115, %108 : vector<16x64xf32>
      %117 = vector.extract_strided_slice %42 {offsets = [0, 2], sizes = [16, 1], strides = [1, 1]} : vector<16x8xf32> to vector<16x1xf32>
      %118 = vector.extract_strided_slice %34 {offsets = [2, 0], sizes = [1, 64], strides = [1, 1]} : vector<8x64xf32> to vector<1x64xf32>
      %119 = vector.broadcast %117 : vector<16x1xf32> to vector<16x64xf32>
      %120 = vector.broadcast %118 : vector<1x64xf32> to vector<16x64xf32>
      %121 = arith.mulf %119, %120 : vector<16x64xf32>
      %122 = arith.addf %116, %121 : vector<16x64xf32>
      %123 = vector.extract_strided_slice %43 {offsets = [0, 2], sizes = [16, 1], strides = [1, 1]} : vector<16x8xf32> to vector<16x1xf32>
      %124 = vector.broadcast %123 : vector<16x1xf32> to vector<16x64xf32>
      %125 = arith.mulf %124, %122 : vector<16x64xf32>
      %cst_30 = arith.constant dense<0.000000e+00> : vector<64xf32>
      %126 = vector.multi_reduction <add>, %125, %cst_30 [0] : vector<16x64xf32> to vector<64xf32>
      %127 = vector.shape_cast %126 : vector<64xf32> to vector<1x64xf32>
      %128 = vector.extract_strided_slice %40 {offsets = [1, 0, 0], sizes = [1, 16, 64], strides = [1, 1, 1]} : vector<8x16x64xf32> to vector<1x16x64xf32>
      %129 = vector.shape_cast %128 : vector<1x16x64xf32> to vector<16x64xf32>
      %130 = arith.mulf %129, %122 : vector<16x64xf32>
      %131 = vector.extract_strided_slice %42 {offsets = [0, 1], sizes = [16, 1], strides = [1, 1]} : vector<16x8xf32> to vector<16x1xf32>
      %132 = vector.extract_strided_slice %34 {offsets = [1, 0], sizes = [1, 64], strides = [1, 1]} : vector<8x64xf32> to vector<1x64xf32>
      %133 = vector.broadcast %131 : vector<16x1xf32> to vector<16x64xf32>
      %134 = vector.broadcast %132 : vector<1x64xf32> to vector<16x64xf32>
      %135 = arith.mulf %133, %134 : vector<16x64xf32>
      %136 = arith.addf %130, %135 : vector<16x64xf32>
      %137 = vector.extract_strided_slice %43 {offsets = [0, 1], sizes = [16, 1], strides = [1, 1]} : vector<16x8xf32> to vector<16x1xf32>
      %138 = vector.broadcast %137 : vector<16x1xf32> to vector<16x64xf32>
      %139 = arith.mulf %138, %136 : vector<16x64xf32>
      %cst_31 = arith.constant dense<0.000000e+00> : vector<64xf32>
      %140 = vector.multi_reduction <add>, %139, %cst_31 [0] : vector<16x64xf32> to vector<64xf32>
      %141 = vector.shape_cast %140 : vector<64xf32> to vector<1x64xf32>
      %142 = vector.extract_strided_slice %40 {offsets = [0, 0, 0], sizes = [1, 16, 64], strides = [1, 1, 1]} : vector<8x16x64xf32> to vector<1x16x64xf32>
      %143 = vector.shape_cast %142 : vector<1x16x64xf32> to vector<16x64xf32>
      %144 = arith.mulf %143, %136 : vector<16x64xf32>
      %145 = vector.extract_strided_slice %42 {offsets = [0, 0], sizes = [16, 1], strides = [1, 1]} : vector<16x8xf32> to vector<16x1xf32>
      %146 = vector.extract_strided_slice %34 {offsets = [0, 0], sizes = [1, 64], strides = [1, 1]} : vector<8x64xf32> to vector<1x64xf32>
      %147 = vector.broadcast %145 : vector<16x1xf32> to vector<16x64xf32>
      %148 = vector.broadcast %146 : vector<1x64xf32> to vector<16x64xf32>
      %149 = arith.mulf %147, %148 : vector<16x64xf32>
      %150 = arith.addf %144, %149 : vector<16x64xf32>
      %151 = vector.extract_strided_slice %43 {offsets = [0, 0], sizes = [16, 1], strides = [1, 1]} : vector<16x8xf32> to vector<16x1xf32>
      %152 = vector.broadcast %151 : vector<16x1xf32> to vector<16x64xf32>
      %153 = arith.mulf %152, %150 : vector<16x64xf32>
      %cst_32 = arith.constant dense<0.000000e+00> : vector<64xf32>
      %154 = vector.multi_reduction <add>, %153, %cst_32 [0] : vector<16x64xf32> to vector<64xf32>
      %155 = vector.shape_cast %154 : vector<64xf32> to vector<1x64xf32>
      %156 = tpu.concatenate %155, %141, %127, %113, %99, %85, %71, %57 in 0 : vector<1x64xf32>, vector<1x64xf32>, vector<1x64xf32>, vector<1x64xf32>, vector<1x64xf32>, vector<1x64xf32>, vector<1x64xf32>, vector<1x64xf32> -> vector<8x64xf32>
      %157 = vector.broadcast %8 : vector<1x64xf32> to vector<8x64xf32>
      %158 = arith.mulf %157, %18 : vector<8x64xf32>
      %159 = arith.addf %156, %158 : vector<8x64xf32>
      %c0_33 = arith.constant 0 : index
      %160 = arith.index_cast %15 : i32 to index
      %c0_34 = arith.constant 0 : index
      %161 = vector.load %arg8[%c0_33, %160, %c0_34] : memref<1x64x64xf32, #tpu.memory_space<vmem>>, vector<1x8x64xf32>
      %162 = vector.shape_cast %161 : vector<1x8x64xf32> to vector<8x64xf32>
      %163 = arith.addf %159, %162 : vector<8x64xf32>
      %c0_35 = arith.constant 0 : index
      %164 = arith.index_cast %15 : i32 to index
      %c0_36 = arith.constant 0 : index
      %165 = vector.load %arg9[%c0_35, %164, %c0_36] : memref<1x64x64xf32, #tpu.memory_space<vmem>>, vector<1x8x64xf32>
      %166 = vector.shape_cast %165 : vector<1x8x64xf32> to vector<8x64xf32>
      %167 = vector.shape_cast %163 : vector<8x64xf32> to vector<1x8x64xf32>
      tpu.vector_store %arg9[%c0_35, %164, %c0_36], %167 {strides = array<i32>} : memref<1x64x64xf32, #tpu.memory_space<vmem>>, vector<1x8x64xf32>,
      scf.yield %150 : vector<16x64xf32>
    }
    %c8_i32_12 = arith.constant 8 : i32
    %c0_13 = arith.constant 0 : index
    %c0_14 = arith.constant 0 : index
    %12 = vector.load %arg10[%c0_13, %c0_14] : memref<16x64xf32, #tpu.memory_space<vmem>>, vector<16x64xf32>
    tpu.vector_store %arg10[%c0_13, %c0_14], %11 {strides = array<i32>} : memref<16x64xf32, #tpu.memory_space<vmem>>, vector<16x64xf32>,
    return
  }
  func.func @transform_0(%arg0: i32, %arg1: i32) -> (i32, i32, i32) {
    %c0_i32 = arith.constant 0 : i32
    %0 = arith.subi %c0_i32, %arg1 : i32
    %c0_i32_0 = arith.constant 0 : i32
    %c0_i32_1 = arith.constant 0 : i32
    return %arg0, %0, %c0_i32_0 : i32, i32, i32
  }
  func.func @transform_1(%arg0: i32, %arg1: i32) -> (i32, i32, i32, i32) {
    %c0_i32 = arith.constant 0 : i32
    %0 = arith.subi %c0_i32, %arg1 : i32
    %c1_i32 = arith.constant 1 : i32
    %c0_i32_0 = arith.constant 0 : i32
    %c0_i32_1 = arith.constant 0 : i32
    return %c1_i32, %arg0, %0, %c0_i32_0 : i32, i32, i32, i32
  }
  func.func @transform_2(%arg0: i32, %arg1: i32) -> (i32, i32, i32, i32) {
    %c0_i32 = arith.constant 0 : i32
    %0 = arith.subi %c0_i32, %arg1 : i32
    %c1_i32 = arith.constant 1 : i32
    %c0_i32_0 = arith.constant 0 : i32
    %c0_i32_1 = arith.constant 0 : i32
    return %c1_i32, %arg0, %0, %c0_i32_0 : i32, i32, i32, i32
  }
  func.func @transform_3(%arg0: i32, %arg1: i32) -> (i32, i32, i32) {
    %c1_i32 = arith.constant 1 : i32
    %c0_i32 = arith.constant 0 : i32
    %c0_i32_0 = arith.constant 0 : i32
    %c0_i32_1 = arith.constant 0 : i32
    return %c1_i32, %c0_i32, %c0_i32_0 : i32, i32, i32
  }
  func.func @transform_4(%arg0: i32, %arg1: i32) -> (i32, i32, i32) {
    %c1_i32 = arith.constant 1 : i32
    %c0_i32 = arith.constant 0 : i32
    %c0_i32_0 = arith.constant 0 : i32
    %c0_i32_1 = arith.constant 0 : i32
    return %c1_i32, %c0_i32, %c0_i32_0 : i32, i32, i32
  }
  func.func @transform_5(%arg0: i32, %arg1: i32) -> (i32, i32, i32) {
    %c1_i32 = arith.constant 1 : i32
    %c0_i32 = arith.constant 0 : i32
    %c0_i32_0 = arith.constant 0 : i32
    %c0_i32_1 = arith.constant 0 : i32
    return %c1_i32, %c0_i32, %c0_i32_0 : i32, i32, i32
  }
  func.func @transform_6(%arg0: i32, %arg1: i32) -> (i32, i32, i32) {
    %c0_i32 = arith.constant 0 : i32
    %0 = arith.subi %c0_i32, %arg1 : i32
    %c0_i32_0 = arith.constant 0 : i32
    %c0_i32_1 = arith.constant 0 : i32
    return %arg0, %0, %c0_i32_0 : i32, i32, i32
  }
  func.func @transform_7(%arg0: i32, %arg1: i32) -> (i32, i32, i32) {
    %c0_i32 = arith.constant 0 : i32
    %0 = arith.subi %c0_i32, %arg1 : i32
    %c0_i32_0 = arith.constant 0 : i32
    %c0_i32_1 = arith.constant 0 : i32
    return %arg0, %0, %c0_i32_0 : i32, i32, i32
  }
}

module attributes {stable_mosaic.version = 11 : i64} {
  func.func @_ln_matmul_kernel(%arg0: i32, %arg1: i32, %arg2: memref<128x32xf32, #tpu.memory_space<vmem>>, %arg3: memref<1x32xf32, #tpu.memory_space<vmem>>, %arg4: memref<1x32xf32, #tpu.memory_space<vmem>>, %arg5: memref<32x128xbf16, #tpu.memory_space<vmem>>, %arg6: memref<128x128xf32, #tpu.memory_space<vmem>>, %arg7: memref<128x32xbf16, #tpu.memory_space<vmem>>) attributes {dimension_semantics = [#tpu.dimension_semantics<parallel>, #tpu.dimension_semantics<arbitrary>], iteration_bounds = array<i64: 1, 1>, scalar_prefetch = 0 : i64, scratch_operands = 1 : i64, tpu.core_type = #tpu.core_type<tc>, window_params = [{transform_indices = @transform_0, window_bounds = array<i64: 128, 32>}, {pipeline_mode = #tpu.pipeline_mode<synchronous>, transform_indices = @transform_1, window_bounds = array<i64: 1, 32>}, {pipeline_mode = #tpu.pipeline_mode<synchronous>, transform_indices = @transform_2, window_bounds = array<i64: 1, 32>}, {transform_indices = @transform_3, window_bounds = array<i64: 32, 128>}, {transform_indices = @transform_4, window_bounds = array<i64: 128, 128>}]} {
    %c0_i32 = arith.constant 0 : i32
    %0 = arith.cmpi eq, %arg1, %c0_i32 : i32
    %1 = arith.extui %0 : i1 to i32
    %c0_i32_0 = arith.constant 0 : i32
    %2 = arith.cmpi ne, %1, %c0_i32_0 : i32
    scf.if %2 {
      %c0_6 = arith.constant 0 : index
      %c0_7 = arith.constant 0 : index
      %7 = vector.load %arg2[%c0_6, %c0_7] : memref<128x32xf32, #tpu.memory_space<vmem>>, vector<128x32xf32>
      %cst_8 = arith.constant dense<0.000000e+00> : vector<128xf32>
      %8 = vector.multi_reduction <add>, %7, %cst_8 [1] : vector<128x32xf32> to vector<128xf32>
      %9 = vector.shape_cast %8 : vector<128xf32> to vector<128x1xf32>
      %cst_9 = arith.constant 3.200000e+01 : f32
      %10 = vector.broadcast %cst_9 : f32 to vector<128x1xf32>
      %11 = arith.divf %9, %10 : vector<128x1xf32>
      %12 = vector.broadcast %11 : vector<128x1xf32> to vector<128x32xf32>
      %13 = arith.subf %7, %12 : vector<128x32xf32>
      %14 = arith.mulf %13, %13 : vector<128x32xf32>
      %cst_10 = arith.constant dense<0.000000e+00> : vector<128xf32>
      %15 = vector.multi_reduction <add>, %14, %cst_10 [1] : vector<128x32xf32> to vector<128xf32>
      %16 = vector.shape_cast %15 : vector<128xf32> to vector<128x1xf32>
      %cst_11 = arith.constant 3.200000e+01 : f32
      %17 = vector.broadcast %cst_11 : f32 to vector<128x1xf32>
      %18 = arith.divf %16, %17 : vector<128x1xf32>
      %19 = vector.broadcast %11 : vector<128x1xf32> to vector<128x32xf32>
      %20 = arith.subf %7, %19 : vector<128x32xf32>
      %cst_12 = arith.constant 9.99999997E-7 : f32
      %21 = vector.broadcast %cst_12 : f32 to vector<128x1xf32>
      %22 = arith.addf %18, %21 : vector<128x1xf32>
      %23 = math.rsqrt %22 : vector<128x1xf32>
      %24 = vector.broadcast %23 : vector<128x1xf32> to vector<128x32xf32>
      %25 = arith.mulf %20, %24 : vector<128x32xf32>
      %c0_13 = arith.constant 0 : index
      %c0_14 = arith.constant 0 : index
      %26 = vector.load %arg3[%c0_13, %c0_14] : memref<1x32xf32, #tpu.memory_space<vmem>>, vector<1x32xf32>
      %27 = vector.broadcast %26 : vector<1x32xf32> to vector<128x32xf32>
      %28 = arith.mulf %25, %27 : vector<128x32xf32>
      %c0_15 = arith.constant 0 : index
      %c0_16 = arith.constant 0 : index
      %29 = vector.load %arg4[%c0_15, %c0_16] : memref<1x32xf32, #tpu.memory_space<vmem>>, vector<1x32xf32>
      %30 = vector.broadcast %29 : vector<1x32xf32> to vector<128x32xf32>
      %31 = arith.addf %28, %30 : vector<128x32xf32>
      %32 = arith.truncf %31 : vector<128x32xf32> to vector<128x32xbf16>
      %c0_17 = arith.constant 0 : index
      %c0_18 = arith.constant 0 : index
      %33 = vector.load %arg7[%c0_17, %c0_18] : memref<128x32xbf16, #tpu.memory_space<vmem>>, vector<128x32xbf16>
      tpu.vector_store %arg7[%c0_17, %c0_18], %32 {strides = array<i32>} : memref<128x32xbf16, #tpu.memory_space<vmem>>, vector<128x32xbf16>,
    } else {
    }
    %c0 = arith.constant 0 : index
    %c0_1 = arith.constant 0 : index
    %3 = vector.load %arg7[%c0, %c0_1] : memref<128x32xbf16, #tpu.memory_space<vmem>>, vector<128x32xbf16>
    %c0_2 = arith.constant 0 : index
    %c0_3 = arith.constant 0 : index
    %4 = vector.load %arg5[%c0_2, %c0_3] : memref<32x128xbf16, #tpu.memory_space<vmem>>, vector<32x128xbf16>
    %cst = arith.constant dense<0.000000e+00> : vector<128x128xf32>
    %5 = tpu.matmul %3, %4, %cst {dimension_numbers = #tpu.dot_dimension_numbers<[1], [0], [0], [1], [0, 0, 1, 1], [], []>} : vector<128x32xbf16>, vector<32x128xbf16>, vector<128x128xf32> -> vector<128x128xf32>
    %c0_4 = arith.constant 0 : index
    %c0_5 = arith.constant 0 : index
    %6 = vector.load %arg6[%c0_4, %c0_5] : memref<128x128xf32, #tpu.memory_space<vmem>>, vector<128x128xf32>
    tpu.vector_store %arg6[%c0_4, %c0_5], %5 {strides = array<i32>} : memref<128x128xf32, #tpu.memory_space<vmem>>, vector<128x128xf32>,
    return
  }
  func.func @transform_0(%arg0: i32, %arg1: i32) -> (i32, i32) {
    %c0_i32 = arith.constant 0 : i32
    %c0_i32_0 = arith.constant 0 : i32
    return %arg0, %c0_i32 : i32, i32
  }
  func.func @transform_1(%arg0: i32, %arg1: i32) -> (i32, i32) {
    %c0_i32 = arith.constant 0 : i32
    %c0_i32_0 = arith.constant 0 : i32
    %c0_i32_1 = arith.constant 0 : i32
    return %c0_i32, %c0_i32_0 : i32, i32
  }
  func.func @transform_2(%arg0: i32, %arg1: i32) -> (i32, i32) {
    %c0_i32 = arith.constant 0 : i32
    %c0_i32_0 = arith.constant 0 : i32
    %c0_i32_1 = arith.constant 0 : i32
    return %c0_i32, %c0_i32_0 : i32, i32
  }
  func.func @transform_3(%arg0: i32, %arg1: i32) -> (i32, i32) {
    %c0_i32 = arith.constant 0 : i32
    %c0_i32_0 = arith.constant 0 : i32
    return %c0_i32, %arg1 : i32, i32
  }
  func.func @transform_4(%arg0: i32, %arg1: i32) -> (i32, i32) {
    %c0_i32 = arith.constant 0 : i32
    return %arg0, %arg1 : i32, i32
  }
}

module attributes {stable_mosaic.version = 11 : i64} {
  func.func @_out_fused_kernel(%arg0: i32, %arg1: i32, %arg2: memref<128x64xf32, #tpu.memory_space<vmem>>, %arg3: memref<128x64xf32, #tpu.memory_space<vmem>>, %arg4: memref<128x64xf32, #tpu.memory_space<vmem>>, %arg5: memref<1x64xf32, #tpu.memory_space<vmem>>, %arg6: memref<1x64xf32, #tpu.memory_space<vmem>>, %arg7: memref<64x32xbf16, #tpu.memory_space<vmem>>, %arg8: memref<128x32xf32, #tpu.memory_space<vmem>>, %arg9: memref<128x32xf32, #tpu.memory_space<vmem>>, %arg10: memref<128x64xbf16, #tpu.memory_space<vmem>>) attributes {dimension_semantics = [#tpu.dimension_semantics<parallel>, #tpu.dimension_semantics<arbitrary>], iteration_bounds = array<i64: 1, 1>, scalar_prefetch = 0 : i64, scratch_operands = 1 : i64, tpu.core_type = #tpu.core_type<tc>, window_params = [{transform_indices = @transform_0, window_bounds = array<i64: 128, 64>}, {transform_indices = @transform_1, window_bounds = array<i64: 128, 64>}, {transform_indices = @transform_2, window_bounds = array<i64: 128, 64>}, {pipeline_mode = #tpu.pipeline_mode<synchronous>, transform_indices = @transform_3, window_bounds = array<i64: 1, 64>}, {pipeline_mode = #tpu.pipeline_mode<synchronous>, transform_indices = @transform_4, window_bounds = array<i64: 1, 64>}, {transform_indices = @transform_5, window_bounds = array<i64: 64, 32>}, {transform_indices = @transform_6, window_bounds = array<i64: 128, 32>}, {transform_indices = @transform_7, window_bounds = array<i64: 128, 32>}]} {
    %c0_i32 = arith.constant 0 : i32
    %0 = arith.cmpi eq, %arg1, %c0_i32 : i32
    %1 = arith.extui %0 : i1 to i32
    %c0_i32_0 = arith.constant 0 : i32
    %2 = arith.cmpi ne, %1, %c0_i32_0 : i32
    scf.if %2 {
      %c0_8 = arith.constant 0 : index
      %c0_9 = arith.constant 0 : index
      %9 = vector.load %arg2[%c0_8, %c0_9] : memref<128x64xf32, #tpu.memory_space<vmem>>, vector<128x64xf32>
      %c0_10 = arith.constant 0 : index
      %c0_11 = arith.constant 0 : index
      %10 = vector.load %arg3[%c0_10, %c0_11] : memref<128x64xf32, #tpu.memory_space<vmem>>, vector<128x64xf32>
      %11 = arith.addf %9, %10 : vector<128x64xf32>
      %cst_12 = arith.constant dense<0.000000e+00> : vector<128xf32>
      %12 = vector.multi_reduction <add>, %11, %cst_12 [1] : vector<128x64xf32> to vector<128xf32>
      %13 = vector.shape_cast %12 : vector<128xf32> to vector<128x1xf32>
      %cst_13 = arith.constant 6.400000e+01 : f32
      %14 = vector.broadcast %cst_13 : f32 to vector<128x1xf32>
      %15 = arith.divf %13, %14 : vector<128x1xf32>
      %16 = vector.broadcast %15 : vector<128x1xf32> to vector<128x64xf32>
      %17 = arith.subf %11, %16 : vector<128x64xf32>
      %18 = arith.mulf %17, %17 : vector<128x64xf32>
      %cst_14 = arith.constant dense<0.000000e+00> : vector<128xf32>
      %19 = vector.multi_reduction <add>, %18, %cst_14 [1] : vector<128x64xf32> to vector<128xf32>
      %20 = vector.shape_cast %19 : vector<128xf32> to vector<128x1xf32>
      %cst_15 = arith.constant 6.400000e+01 : f32
      %21 = vector.broadcast %cst_15 : f32 to vector<128x1xf32>
      %22 = arith.divf %20, %21 : vector<128x1xf32>
      %23 = vector.broadcast %15 : vector<128x1xf32> to vector<128x64xf32>
      %24 = arith.subf %11, %23 : vector<128x64xf32>
      %cst_16 = arith.constant 9.99999974E-6 : f32
      %25 = vector.broadcast %cst_16 : f32 to vector<128x1xf32>
      %26 = arith.addf %22, %25 : vector<128x1xf32>
      %27 = math.rsqrt %26 : vector<128x1xf32>
      %28 = vector.broadcast %27 : vector<128x1xf32> to vector<128x64xf32>
      %29 = arith.mulf %24, %28 : vector<128x64xf32>
      %c0_17 = arith.constant 0 : index
      %c0_18 = arith.constant 0 : index
      %30 = vector.load %arg5[%c0_17, %c0_18] : memref<1x64xf32, #tpu.memory_space<vmem>>, vector<1x64xf32>
      %31 = vector.broadcast %30 : vector<1x64xf32> to vector<128x64xf32>
      %32 = arith.mulf %29, %31 : vector<128x64xf32>
      %c0_19 = arith.constant 0 : index
      %c0_20 = arith.constant 0 : index
      %33 = vector.load %arg6[%c0_19, %c0_20] : memref<1x64xf32, #tpu.memory_space<vmem>>, vector<1x64xf32>
      %34 = vector.broadcast %33 : vector<1x64xf32> to vector<128x64xf32>
      %35 = arith.addf %32, %34 : vector<128x64xf32>
      %c0_21 = arith.constant 0 : index
      %c0_22 = arith.constant 0 : index
      %36 = vector.load %arg4[%c0_21, %c0_22] : memref<128x64xf32, #tpu.memory_space<vmem>>, vector<128x64xf32>
      %cst_23 = arith.constant 0.000000e+00 : f32
      %37 = vector.broadcast %cst_23 : f32 to vector<128x64xf32>
      %38 = arith.subf %37, %36 : vector<128x64xf32>
      %39 = math.exp %38 : vector<128x64xf32>
      %cst_24 = arith.constant 1.000000e+00 : f32
      %40 = vector.broadcast %cst_24 : f32 to vector<128x64xf32>
      %41 = arith.addf %40, %39 : vector<128x64xf32>
      %cst_25 = arith.constant 1.000000e+00 : f32
      %42 = vector.broadcast %cst_25 : f32 to vector<128x64xf32>
      %43 = arith.divf %42, %41 : vector<128x64xf32>
      %44 = arith.mulf %36, %43 : vector<128x64xf32>
      %45 = arith.mulf %35, %44 : vector<128x64xf32>
      %46 = arith.truncf %45 : vector<128x64xf32> to vector<128x64xbf16>
      %c0_26 = arith.constant 0 : index
      %c0_27 = arith.constant 0 : index
      %47 = vector.load %arg10[%c0_26, %c0_27] : memref<128x64xbf16, #tpu.memory_space<vmem>>, vector<128x64xbf16>
      tpu.vector_store %arg10[%c0_26, %c0_27], %46 {strides = array<i32>} : memref<128x64xbf16, #tpu.memory_space<vmem>>, vector<128x64xbf16>,
    } else {
    }
    %c0 = arith.constant 0 : index
    %c0_1 = arith.constant 0 : index
    %3 = vector.load %arg8[%c0, %c0_1] : memref<128x32xf32, #tpu.memory_space<vmem>>, vector<128x32xf32>
    %c0_2 = arith.constant 0 : index
    %c0_3 = arith.constant 0 : index
    %4 = vector.load %arg10[%c0_2, %c0_3] : memref<128x64xbf16, #tpu.memory_space<vmem>>, vector<128x64xbf16>
    %c0_4 = arith.constant 0 : index
    %c0_5 = arith.constant 0 : index
    %5 = vector.load %arg7[%c0_4, %c0_5] : memref<64x32xbf16, #tpu.memory_space<vmem>>, vector<64x32xbf16>
    %cst = arith.constant dense<0.000000e+00> : vector<128x32xf32>
    %6 = tpu.matmul %4, %5, %cst {dimension_numbers = #tpu.dot_dimension_numbers<[1], [0], [0], [1], [0, 0, 1, 1], [], []>} : vector<128x64xbf16>, vector<64x32xbf16>, vector<128x32xf32> -> vector<128x32xf32>
    %7 = arith.addf %3, %6 : vector<128x32xf32>
    %c0_6 = arith.constant 0 : index
    %c0_7 = arith.constant 0 : index
    %8 = vector.load %arg9[%c0_6, %c0_7] : memref<128x32xf32, #tpu.memory_space<vmem>>, vector<128x32xf32>
    tpu.vector_store %arg9[%c0_6, %c0_7], %7 {strides = array<i32>} : memref<128x32xf32, #tpu.memory_space<vmem>>, vector<128x32xf32>,
    return
  }
  func.func @transform_0(%arg0: i32, %arg1: i32) -> (i32, i32) {
    %c0_i32 = arith.constant 0 : i32
    %c0_i32_0 = arith.constant 0 : i32
    return %arg0, %c0_i32 : i32, i32
  }
  func.func @transform_1(%arg0: i32, %arg1: i32) -> (i32, i32) {
    %c0_i32 = arith.constant 0 : i32
    %c0_i32_0 = arith.constant 0 : i32
    return %arg0, %c0_i32 : i32, i32
  }
  func.func @transform_2(%arg0: i32, %arg1: i32) -> (i32, i32) {
    %c0_i32 = arith.constant 0 : i32
    %c0_i32_0 = arith.constant 0 : i32
    return %arg0, %c0_i32 : i32, i32
  }
  func.func @transform_3(%arg0: i32, %arg1: i32) -> (i32, i32) {
    %c0_i32 = arith.constant 0 : i32
    %c0_i32_0 = arith.constant 0 : i32
    %c0_i32_1 = arith.constant 0 : i32
    return %c0_i32, %c0_i32_0 : i32, i32
  }
  func.func @transform_4(%arg0: i32, %arg1: i32) -> (i32, i32) {
    %c0_i32 = arith.constant 0 : i32
    %c0_i32_0 = arith.constant 0 : i32
    %c0_i32_1 = arith.constant 0 : i32
    return %c0_i32, %c0_i32_0 : i32, i32
  }
  func.func @transform_5(%arg0: i32, %arg1: i32) -> (i32, i32) {
    %c0_i32 = arith.constant 0 : i32
    %c0_i32_0 = arith.constant 0 : i32
    return %c0_i32, %arg1 : i32, i32
  }
  func.func @transform_6(%arg0: i32, %arg1: i32) -> (i32, i32) {
    %c0_i32 = arith.constant 0 : i32
    return %arg0, %arg1 : i32, i32
  }
  func.func @transform_7(%arg0: i32, %arg1: i32) -> (i32, i32) {
    %c0_i32 = arith.constant 0 : i32
    return %arg0, %arg1 : i32, i32
  }
}

module attributes {stable_mosaic.version = 11 : i64} {
  func.func @_out_fused_kernel(%arg0: i32, %arg1: i32, %arg2: memref<128x64xf32, #tpu.memory_space<vmem>>, %arg3: memref<128x64xf32, #tpu.memory_space<vmem>>, %arg4: memref<128x64xf32, #tpu.memory_space<vmem>>, %arg5: memref<1x64xf32, #tpu.memory_space<vmem>>, %arg6: memref<1x64xf32, #tpu.memory_space<vmem>>, %arg7: memref<64x32xbf16, #tpu.memory_space<vmem>>, %arg8: memref<128x32xf32, #tpu.memory_space<vmem>>, %arg9: memref<128x32xf32, #tpu.memory_space<vmem>>, %arg10: memref<128x64xbf16, #tpu.memory_space<vmem>>) attributes {dimension_semantics = [#tpu.dimension_semantics<parallel>, #tpu.dimension_semantics<arbitrary>], iteration_bounds = array<i64: 1, 1>, scalar_prefetch = 0 : i64, scratch_operands = 1 : i64, tpu.core_type = #tpu.core_type<tc>, window_params = [{transform_indices = @transform_0, window_bounds = array<i64: 128, 64>}, {transform_indices = @transform_1, window_bounds = array<i64: 128, 64>}, {transform_indices = @transform_2, window_bounds = array<i64: 128, 64>}, {pipeline_mode = #tpu.pipeline_mode<synchronous>, transform_indices = @transform_3, window_bounds = array<i64: 1, 64>}, {pipeline_mode = #tpu.pipeline_mode<synchronous>, transform_indices = @transform_4, window_bounds = array<i64: 1, 64>}, {transform_indices = @transform_5, window_bounds = array<i64: 64, 32>}, {transform_indices = @transform_6, window_bounds = array<i64: 128, 32>}, {transform_indices = @transform_7, window_bounds = array<i64: 128, 32>}]} {
    %c0_i32 = arith.constant 0 : i32
    %0 = arith.cmpi eq, %arg1, %c0_i32 : i32
    %1 = arith.extui %0 : i1 to i32
    %c0_i32_0 = arith.constant 0 : i32
    %2 = arith.cmpi ne, %1, %c0_i32_0 : i32
    scf.if %2 {
      %c0_8 = arith.constant 0 : index
      %c0_9 = arith.constant 0 : index
      %9 = vector.load %arg2[%c0_8, %c0_9] : memref<128x64xf32, #tpu.memory_space<vmem>>, vector<128x64xf32>
      %c0_10 = arith.constant 0 : index
      %c0_11 = arith.constant 0 : index
      %10 = vector.load %arg3[%c0_10, %c0_11] : memref<128x64xf32, #tpu.memory_space<vmem>>, vector<128x64xf32>
      %11 = arith.addf %9, %10 : vector<128x64xf32>
      %cst_12 = arith.constant dense<0.000000e+00> : vector<128xf32>
      %12 = vector.multi_reduction <add>, %11, %cst_12 [1] : vector<128x64xf32> to vector<128xf32>
      %13 = vector.shape_cast %12 : vector<128xf32> to vector<128x1xf32>
      %cst_13 = arith.constant 6.400000e+01 : f32
      %14 = vector.broadcast %cst_13 : f32 to vector<128x1xf32>
      %15 = arith.divf %13, %14 : vector<128x1xf32>
      %16 = vector.broadcast %15 : vector<128x1xf32> to vector<128x64xf32>
      %17 = arith.subf %11, %16 : vector<128x64xf32>
      %18 = arith.mulf %17, %17 : vector<128x64xf32>
      %cst_14 = arith.constant dense<0.000000e+00> : vector<128xf32>
      %19 = vector.multi_reduction <add>, %18, %cst_14 [1] : vector<128x64xf32> to vector<128xf32>
      %20 = vector.shape_cast %19 : vector<128xf32> to vector<128x1xf32>
      %cst_15 = arith.constant 6.400000e+01 : f32
      %21 = vector.broadcast %cst_15 : f32 to vector<128x1xf32>
      %22 = arith.divf %20, %21 : vector<128x1xf32>
      %23 = vector.broadcast %15 : vector<128x1xf32> to vector<128x64xf32>
      %24 = arith.subf %11, %23 : vector<128x64xf32>
      %cst_16 = arith.constant 9.99999974E-6 : f32
      %25 = vector.broadcast %cst_16 : f32 to vector<128x1xf32>
      %26 = arith.addf %22, %25 : vector<128x1xf32>
      %27 = math.rsqrt %26 : vector<128x1xf32>
      %28 = vector.broadcast %27 : vector<128x1xf32> to vector<128x64xf32>
      %29 = arith.mulf %24, %28 : vector<128x64xf32>
      %c0_17 = arith.constant 0 : index
      %c0_18 = arith.constant 0 : index
      %30 = vector.load %arg5[%c0_17, %c0_18] : memref<1x64xf32, #tpu.memory_space<vmem>>, vector<1x64xf32>
      %31 = vector.broadcast %30 : vector<1x64xf32> to vector<128x64xf32>
      %32 = arith.mulf %29, %31 : vector<128x64xf32>
      %c0_19 = arith.constant 0 : index
      %c0_20 = arith.constant 0 : index
      %33 = vector.load %arg6[%c0_19, %c0_20] : memref<1x64xf32, #tpu.memory_space<vmem>>, vector<1x64xf32>
      %34 = vector.broadcast %33 : vector<1x64xf32> to vector<128x64xf32>
      %35 = arith.addf %32, %34 : vector<128x64xf32>
      %c0_21 = arith.constant 0 : index
      %c0_22 = arith.constant 0 : index
      %36 = vector.load %arg4[%c0_21, %c0_22] : memref<128x64xf32, #tpu.memory_space<vmem>>, vector<128x64xf32>
      %cst_23 = arith.constant 0.000000e+00 : f32
      %37 = vector.broadcast %cst_23 : f32 to vector<128x64xf32>
      %38 = arith.subf %37, %36 : vector<128x64xf32>
      %39 = math.exp %38 : vector<128x64xf32>
      %cst_24 = arith.constant 1.000000e+00 : f32
      %40 = vector.broadcast %cst_24 : f32 to vector<128x64xf32>
      %41 = arith.addf %40, %39 : vector<128x64xf32>
      %cst_25 = arith.constant 1.000000e+00 : f32
      %42 = vector.broadcast %cst_25 : f32 to vector<128x64xf32>
      %43 = arith.divf %42, %41 : vector<128x64xf32>
      %44 = arith.mulf %36, %43 : vector<128x64xf32>
      %45 = arith.mulf %35, %44 : vector<128x64xf32>
      %46 = arith.truncf %45 : vector<128x64xf32> to vector<128x64xbf16>
      %c0_26 = arith.constant 0 : index
      %c0_27 = arith.constant 0 : index
      %47 = vector.load %arg10[%c0_26, %c0_27] : memref<128x64xbf16, #tpu.memory_space<vmem>>, vector<128x64xbf16>
      tpu.vector_store %arg10[%c0_26, %c0_27], %46 {strides = array<i32>} : memref<128x64xbf16, #tpu.memory_space<vmem>>, vector<128x64xbf16>,
    } else {
    }
    %c0 = arith.constant 0 : index
    %c0_1 = arith.constant 0 : index
    %3 = vector.load %arg8[%c0, %c0_1] : memref<128x32xf32, #tpu.memory_space<vmem>>, vector<128x32xf32>
    %c0_2 = arith.constant 0 : index
    %c0_3 = arith.constant 0 : index
    %4 = vector.load %arg10[%c0_2, %c0_3] : memref<128x64xbf16, #tpu.memory_space<vmem>>, vector<128x64xbf16>
    %c0_4 = arith.constant 0 : index
    %c0_5 = arith.constant 0 : index
    %5 = vector.load %arg7[%c0_4, %c0_5] : memref<64x32xbf16, #tpu.memory_space<vmem>>, vector<64x32xbf16>
    %cst = arith.constant dense<0.000000e+00> : vector<128x32xf32>
    %6 = tpu.matmul %4, %5, %cst {dimension_numbers = #tpu.dot_dimension_numbers<[1], [0], [0], [1], [0, 0, 1, 1], [], []>} : vector<128x64xbf16>, vector<64x32xbf16>, vector<128x32xf32> -> vector<128x32xf32>
    %7 = arith.addf %3, %6 : vector<128x32xf32>
    %c0_6 = arith.constant 0 : index
    %c0_7 = arith.constant 0 : index
    %8 = vector.load %arg9[%c0_6, %c0_7] : memref<128x32xf32, #tpu.memory_space<vmem>>, vector<128x32xf32>
    tpu.vector_store %arg9[%c0_6, %c0_7], %7 {strides = array<i32>} : memref<128x32xf32, #tpu.memory_space<vmem>>, vector<128x32xf32>,
    return
  }
  func.func @transform_0(%arg0: i32, %arg1: i32) -> (i32, i32) {
    %c0_i32 = arith.constant 0 : i32
    %c0_i32_0 = arith.constant 0 : i32
    return %arg0, %c0_i32 : i32, i32
  }
  func.func @transform_1(%arg0: i32, %arg1: i32) -> (i32, i32) {
    %c0_i32 = arith.constant 0 : i32
    %c0_i32_0 = arith.constant 0 : i32
    return %arg0, %c0_i32 : i32, i32
  }
  func.func @transform_2(%arg0: i32, %arg1: i32) -> (i32, i32) {
    %c0_i32 = arith.constant 0 : i32
    %c0_i32_0 = arith.constant 0 : i32
    return %arg0, %c0_i32 : i32, i32
  }
  func.func @transform_3(%arg0: i32, %arg1: i32) -> (i32, i32) {
    %c0_i32 = arith.constant 0 : i32
    %c0_i32_0 = arith.constant 0 : i32
    %c0_i32_1 = arith.constant 0 : i32
    return %c0_i32, %c0_i32_0 : i32, i32
  }
  func.func @transform_4(%arg0: i32, %arg1: i32) -> (i32, i32) {
    %c0_i32 = arith.constant 0 : i32
    %c0_i32_0 = arith.constant 0 : i32
    %c0_i32_1 = arith.constant 0 : i32
    return %c0_i32, %c0_i32_0 : i32, i32
  }
  func.func @transform_5(%arg0: i32, %arg1: i32) -> (i32, i32) {
    %c0_i32 = arith.constant 0 : i32
    %c0_i32_0 = arith.constant 0 : i32
    return %c0_i32, %arg1 : i32, i32
  }
  func.func @transform_6(%arg0: i32, %arg1: i32) -> (i32, i32) {
    %c0_i32 = arith.constant 0 : i32
    return %arg0, %arg1 : i32, i32
  }
  func.func @transform_7(%arg0: i32, %arg1: i32) -> (i32, i32) {
    %c0_i32 = arith.constant 0 : i32
    return %arg0, %arg1 : i32, i32
  }
}

</mosaic_0001>

<bundles_post_ra>
// kernel: vss_stage_forward.19
= control target key start
LH: loop header
LB: loop body
LE: loop exit
PB: predicated region body
PF: predicated region fallthrough
CT: control target
= control target key end

     0   :  { %s928_s12 = smov 0   ;;  %s1332_s0 = inlined_call_operand.vmem [shape: f32[2,10,10,64], index: 0, kind: input, shape index: {}]   ;;  %s1333_s1 = inlined_call_operand.vmem [shape: f32[9,64], index: 1, kind: input, shape index: {}]   ;;  %s1334_s2 = inlined_call_operand.vmem [shape: f32[1,64], index: 2, kind: input, shape index: {}]   ;;  %s1335_s3 = inlined_call_operand.vmem [shape: f32[2,8,8,64], index: 3, kind: output, shape index: {}]  }
   0x1 LB: > { %s846_s13 = sadd.s32 4294967295, %s906_s12   ;;  %p850_p0 = scmp.ge.s32.totalorder %s906_s12, 1  ;;  %s906_s12 = sphi %s928_s12, %s13_s12  }
   0x2   : > { %p137_p1 = scmp.lt.s32.totalorder %s906_s12, 3 }
   0x4   : > { %p138_p2 = pnand %p850_p0, %p137_p1 }
   0x5   : > { %p161_p3 = scmp.lt.s32.totalorder (!%p138_p2), %s846_s13, 1 }
   0x6   : > { %141 = sbr.rel (%p138_p2) target bundleno = 157 (0x9d), region = 32 }
   0xb   : > { %v193_v0 = vlaneseq  ;;  %s1337_s13 = smov (!%p161_p3, %s846_s13), 1  ;;  %v191_v2 = vld [vmem:[%s1333_s1] sm:$0xff]  ;;  %vm249_vm0 = vcmask 1046528   ;;  %vm326_vm1 = vcmask 1045504   ;;  %v982_v36 = vld [vmem:[%s1333_s1 + $0x8] ss:$0 sm:$0xff] }
   0xc   : > { %s859_s16 = smul.u32 160, %s1337_s13  ;;  %vm782_vm2 = vcmask 523264   ;;  %s858_s24 = sshll.u32 %s1337_s13, 6 }
   0xd   : > { %v194_v1 = vshrl.u32 %v193_v0, 7  ;;  %s1201_s27 = scalar_lea.vmem %s1335_s3, %s858_s24 }
   0xe   : > { %s945_s19 = scalar_lea.vmem %s1332_s0, %s859_s16 }
   0xf   : > { %v195_v3 = vsub.s32 0, %v194_v1  ;;  %v215_v4 = vsub.s32 1, %v194_v1  ;;  %v292_v5 = vsub.s32 2, %v194_v1  ;;  %v369_v6 = vsub.s32 3, %v194_v1  ;;  %v171_v15 = vld [vmem:[%s945_s19] sm:$0xff]  ;;  %v173_v21 = vld [vmem:[%s945_s19 + $0x10] sm:$0xff] }
  0x10   : > { %v389_v7 = vsub.s32 4, %v194_v1  ;;  %v465_v8 = vsub.s32 5, %v194_v1  ;;  %v541_v9 = vsub.s32 6, %v194_v1  ;;  %v561_v10 = vsub.s32 7, %v194_v1  ;;  %v172_v16 = vld [vmem:[%s945_s19 + $0x8] sm:$0x3] }
  0x11   : > { %v947_v11 = vrot.slane %v191_v2, %v195_v3  ;;  %v949_v12 = vrot.slane %v191_v2, %v215_v4  ;;  %v951_v13 = vrot.slane %v191_v2, %v292_v5  ;;  %v953_v14 = vrot.slane %v191_v2, %v369_v6  ;;  %v174_v22 = vld [vmem:[%s945_s19 + $0x18] sm:$0x3]  ;;  %v977_v35 = vld [vmem:[%s945_s19 + $0x20] sm:$0xff]  ;;  %v991_v45 = vld [vmem:[%s945_s19 + $0x28] sm:$0x3] }
  0x12   : > { %v957_v17 = vrot.slane %v191_v2, %v389_v7  ;;  %v959_v18 = vrot.slane %v191_v2, %v465_v8  ;;  %v961_v19 = vrot.slane %v191_v2, %v541_v9  ;;  %v963_v20 = vrot.slane %v191_v2, %v561_v10 }
  0x13   : > { %v197_v23 = vmul.f32 %v947_v11, %v171_v15  ;;  %v217_v24 = vmul.f32 %v949_v12, %v171_v15  ;;  %v218_v25 = vmul.f32 %v949_v12, %v172_v16  ;;  %v294_v26 = vmul.f32 %v951_v13, %v171_v15 }
  0x14   : > { %v295_v27 = vmul.f32 %v951_v13, %v172_v16  ;;  %v371_v28 = vmul.f32 %v953_v14, %v173_v21  ;;  %v391_v29 = vmul.f32 %v957_v17, %v173_v21  ;;  %v392_v30 = vmul.f32 %v957_v17, %v174_v22 }
  0x15   : > { %v250_v31 = vrot.slane %v217_v24, 1  ;;  %v251_v32 = vrot.slane %v218_v25, 1  ;;  %v327_v33 = vrot.slane %v294_v26, 2  ;;  %v467_v34 = vmul.f32 %v959_v18, %v173_v21 }
  0x16   : > { %v328_v37 = vrot.slane %v295_v27, 2  ;;  %v423_v38 = vrot.slane %v391_v29, 1  ;;  %v424_v39 = vrot.slane %v392_v30, 1  ;;  %v468_v40 = vmul.f32 %v959_v18, %v174_v22  ;;  %v1025_v27 = vld [vmem:[%s945_s19 + $0x38] sm:$0x3] }
  0x17   : > { %v252_v41 = vsel %vm249_vm0, %v250_v31, %v251_v32  ;;  %v499_v42 = vrot.slane %v467_v34, 2  ;;  %v543_v43 = vmul.f32 %v961_v19, %v977_v35  ;;  %v563_v44 = vmul.f32 %v963_v20, %v977_v35 }
  0x18   : > { %v282_v46 = vadd.f32 %v252_v41, %v197_v23  ;;  %v329_v47 = vsel %vm326_vm1, %v327_v33, %v328_v37  ;;  %v425_v48 = vsel %vm249_vm0, %v423_v38, %v424_v39  ;;  %v500_v49 = vrot.slane %v468_v40, 2  ;;  %v1021_v23 = vld [vmem:[%s945_s19 + $0x30] sm:$0xff] }
  0x19   : > { %v564_v50 = vmul.f32 %v963_v20, %v991_v45  ;;  %v595_v51 = vrot.slane %v563_v44, 1  ;;  %v639_v52 = vmul.f32 %v982_v36, %v977_v35  ;;  %v640_v53 = vmul.f32 %v982_v36, %v991_v45 }
  0x1a   : > { %v359_v54 = vadd.f32 %v329_v47, %v282_v46  ;;  %v501_v55 = vsel %vm326_vm1, %v499_v42, %v500_v49  ;;  %v198_v56 = vmul.f32 %v947_v11, %v173_v21  ;;  %v219_v57 = vmul.f32 %v949_v12, %v173_v21  ;;  %v1042_v47 = vld [vmem:[%s1334_s2] ss:$0 sm:$0xff] }
  0x1b   : > { %v596_v58 = vrot.slane %v564_v50, 1  ;;  %v671_v59 = vrot.slane %v639_v52, 2  ;;  %v672_v60 = vrot.slane %v640_v53, 2  ;;  %v220_v61 = vmul.f32 %v949_v12, %v174_v22 }
  0x1c   : > { %v379_v62 = vadd.f32 %v371_v28, %v359_v54  ;;  %v253_v63 = vrot.slane %v219_v57, 1  ;;  %v296_v0 = vmul.f32 %v951_v13, %v173_v21  ;;  %v297_v1 = vmul.f32 %v951_v13, %v174_v22 }
  0x1d   : > { %v597_v2 = vsel %vm249_vm0, %v595_v51, %v596_v58  ;;  %v673_v3 = vsel %vm326_vm1, %v671_v59, %v672_v60  ;;  %v254_v4 = vrot.slane %v220_v61, 1  ;;  %v372_v5 = vmul.f32 %v953_v14, %v977_v35 }
  0x1e   : > { %v455_v6 = vadd.f32 %v425_v48, %v379_v62  ;;  %v330_v7 = vrot.slane %v296_v0, 2  ;;  %v331_v8 = vrot.slane %v297_v1, 2  ;;  %v393_v9 = vmul.f32 %v957_v17, %v977_v35 }
  0x1f   : > { %v255_v10 = vsel %vm249_vm0, %v253_v63, %v254_v4  ;;  %v394_v15 = vmul.f32 %v957_v17, %v991_v45  ;;  %v469_v16 = vmul.f32 %v959_v18, %v977_v35  ;;  %v470_v21 = vmul.f32 %v959_v18, %v991_v45 }
  0x20   : > { %v531_v22 = vadd.f32 %v501_v55, %v455_v6  ;;  %v283_v24 = vadd.f32 %v255_v10, %v198_v56  ;;  %v332_v25 = vsel %vm326_vm1, %v330_v7, %v331_v8  ;;  %v426_v26 = vrot.slane %v393_v9, 1 }
  0x21   : > { %v427_v28 = vrot.slane %v394_v15, 1  ;;  %v502_v29 = vrot.slane %v469_v16, 2  ;;  %v503_v30 = vrot.slane %v470_v21, 2  ;;  %v544_v31 = vmul.f32 %v961_v19, %v1021_v23  ;;  %v1071_v16 = vld [vmem:[%s945_s19 + $0x40] sm:$0xff] }
  0x22   : > { %v551_v32 = vadd.f32 %v543_v43, %v531_v22  ;;  %v360_v33 = vadd.f32 %v332_v25, %v283_v24  ;;  %v565_v34 = vmul.f32 %v963_v20, %v1021_v23  ;;  %v566_v37 = vmul.f32 %v963_v20, %v1025_v27  ;;  %v1076_v24 = vld [vmem:[%s945_s19 + $0x48] sm:$0x3] }
  0x23   : > { %v428_v38 = vsel %vm249_vm0, %v426_v26, %v427_v28  ;;  %v504_v39 = vsel %vm326_vm1, %v502_v29, %v503_v30  ;;  %v641_v40 = vmul.f32 %v982_v36, %v1021_v23  ;;  %v642_v41 = vmul.f32 %v982_v36, %v1025_v27 }
  0x24   : > { %v627_v42 = vadd.f32 %v597_v2, %v551_v32  ;;  %v380_v44 = vadd.f32 %v372_v5, %v360_v33  ;;  %v598_v43 = vrot.slane %v565_v34, 1  ;;  %v599_v46 = vrot.slane %v566_v37, 1 }
  0x25   : > { %v674_v48 = vrot.slane %v641_v40, 2  ;;  %v675_v49 = vrot.slane %v642_v41, 2  ;;  %v199_v50 = vmul.f32 %v947_v11, %v977_v35  ;;  %v221_v51 = vmul.f32 %v949_v12, %v977_v35 }
  0x26   : > { %v703_v52 = vadd.f32 %v673_v3, %v627_v42  ;;  %v456_v53 = vadd.f32 %v428_v38, %v380_v44  ;;  %v600_v54 = vsel %vm249_vm0, %v598_v43, %v599_v46  ;;  %v222_v55 = vmul.f32 %v949_v12, %v991_v45 }
  0x27   : > { %v676_v56 = vsel %vm326_vm1, %v674_v48, %v675_v49  ;;  %v256_v57 = vrot.slane %v221_v51, 1  ;;  %v298_v58 = vmul.f32 %v951_v13, %v977_v35  ;;  %v299_v59 = vmul.f32 %v951_v13, %v991_v45 }
  0x28   : > { %v1057_v60 = vadd.f32 %v1042_v47, %v703_v52  ;;  %v532_v61 = vadd.f32 %v504_v39, %v456_v53  ;;  %v257_v62 = vrot.slane %v222_v55, 1  ;;  %v373_v63 = vmul.f32 %v953_v14, %v1021_v23 }
  0x29   : > { %v333_v0 = vrot.slane %v298_v58, 2  ;;  %v334_v1 = vrot.slane %v299_v59, 2  ;;  %v395_v2 = vmul.f32 %v957_v17, %v1021_v23  ;;  %v396_v35 = vmul.f32 %v957_v17, %v1025_v27 }
  0x2a   : > { %v726_v45 = vsub.f32 0.0, %v1057_v60  ;;  %v552_v3 = vadd.f32 %v544_v31, %v532_v61  ;;  %v258_v4 = vsel %vm249_vm0, %v256_v57, %v257_v62  ;;  %v471_v5 = vmul.f32 %v959_v18, %v1021_v23 }
  0x2b   : > { %v284_v6 = vadd.f32 %v258_v4, %v199_v50  ;;  %v335_v7 = vsel %vm326_vm1, %v333_v0, %v334_v1  ;;  %v429_v8 = vrot.slane %v395_v2, 1  ;;  %v430_v9 = vrot.slane %v396_v35, 1 }
  0x2c   : > { %v734_v10 = vmul.f32 1.442695, %v726_v45  ;;  %v628_v15 = vadd.f32 %v600_v54, %v552_v3  ;;  %v472_v21 = vmul.f32 %v959_v18, %v1025_v27  ;;  %v505_v22 = vrot.slane %v471_v5, 2  ;;  %v1118_v45 = vld [vmem:[%s945_s19 + $0x50] sm:$0xff] }
  0x2d   : > { %v361_v25 = vadd.f32 %v335_v7, %v284_v6  ;;  %v431_v26 = vsel %vm249_vm0, %v429_v8, %v430_v9  ;;  %v545_v28 = vmul.f32 %v961_v19, %v1071_v16  ;;  %v567_v29 = vmul.f32 %v963_v20, %v1071_v16  ;;  %v1122_v6 = vld [vmem:[%s945_s19 + $0x58] sm:$0x3] }
  0x2e   : > { %868 = vpow2.f32 %v734_v10  ;;  %v704_v30 = vadd.f32 %v676_v56, %v628_v15  ;;  %v506_v31 = vrot.slane %v472_v21, 2  ;;  %v568_v32 = vmul.f32 %v963_v20, %v1076_v24 }
  0x2f   : > { %v381_v33 = vadd.f32 %v373_v63, %v361_v25  ;;  %v601_v34 = vrot.slane %v567_v29, 1  ;;  %v643_v37 = vmul.f32 %v982_v36, %v1071_v16  ;;  %v644_v38 = vmul.f32 %v982_v36, %v1076_v24 }
  0x30   : > { %v1090_v39 = vadd.f32 %v1042_v47, %v704_v30  ;;  %v507_v40 = vsel %vm326_vm1, %v505_v22, %v506_v31  ;;  %v602_v41 = vrot.slane %v568_v32, 1  ;;  %v200_v42 = vmul.f32 %v947_v11, %v1021_v23 }
  0x31   : > { %v457_v44 = vadd.f32 %v431_v26, %v381_v33  ;;  %v677_v43 = vrot.slane %v643_v37, 2  ;;  %v678_v46 = vrot.slane %v644_v38, 2  ;;  %v223_v48 = vmul.f32 %v949_v12, %v1021_v23 }
  0x32   : > { %v727_v49 = vsub.f32 0.0, %v1090_v39  ;;  %v603_v50 = vsel %vm249_vm0, %v601_v34, %v602_v41  ;;  %v224_v51 = vmul.f32 %v949_v12, %v1025_v27  ;;  %v300_v52 = vmul.f32 %v951_v13, %v1021_v23 }
  0x33   : > { %v533_v53 = vadd.f32 %v507_v40, %v457_v44  ;;  %v679_v54 = vsel %vm326_vm1, %v677_v43, %v678_v46  ;;  %v259_v55 = vrot.slane %v223_v48, 1  ;;  %v301_v56 = vmul.f32 %v951_v13, %v1025_v27 }
  0x34   : > { %v736_v57 = vmul.f32 1.442695, %v727_v49  ;;  %v260_v58 = vrot.slane %v224_v51, 1  ;;  %v336_v59 = vrot.slane %v300_v52, 2  ;;  %v374_v61 = vmul.f32 %v953_v14, %v1071_v16 }
  0x35   : > { %v553_v62 = vadd.f32 %v545_v28, %v533_v53  ;;  %v337_v63 = vrot.slane %v301_v56, 2  ;;  %v397_v23 = vmul.f32 %v957_v17, %v1071_v16  ;;  %v398_v0 = vmul.f32 %v957_v17, %v1076_v24 }
  0x36   : > { %870 = vpow2.f32 %v736_v57  ;;  %v261_v1 = vsel %vm249_vm0, %v259_v55, %v260_v58  ;;  %v473_v27 = vmul.f32 %v959_v18, %v1071_v16  ;;  %v474_v2 = vmul.f32 %v959_v18, %v1076_v24 }
  0x37   : > { %v629_v35 = vadd.f32 %v603_v50, %v553_v62  ;;  %v285_v3 = vadd.f32 %v261_v1, %v200_v42  ;;  %v338_v4 = vsel %vm326_vm1, %v336_v59, %v337_v63  ;;  %v432_v5 = vrot.slane %v397_v23, 1 }
  0x38   : > { %v433_v7 = vrot.slane %v398_v0, 1  ;;  %v508_v8 = vrot.slane %v473_v27, 2  ;;  %v509_v9 = vrot.slane %v474_v2, 2  ;;  %v546_v10 = vmul.f32 %v961_v19, %v1118_v45  ;;  %v1164_v2 = vld [vmem:[%s945_s19 + $0x60] sm:$0xff] }
  0x39   : > { %v705_v15 = vadd.f32 %v679_v54, %v629_v35  ;;  %v362_v21 = vadd.f32 %v338_v4, %v285_v3  ;;  %v569_v22 = vmul.f32 %v963_v20, %v1118_v45  ;;  %v570_v25 = vmul.f32 %v963_v20, %v1122_v6 }
  0x3a   : > { %v434_v26 = vsel %vm249_vm0, %v432_v5, %v433_v7  ;;  %v510_v28 = vsel %vm326_vm1, %v508_v8, %v509_v9  ;;  %v645_v29 = vmul.f32 %v982_v36, %v1118_v45  ;;  %v646_v30 = vmul.f32 %v982_v36, %v1122_v6 }
  0x3b   : > { %v869_v31 = vpop.eup %868  ;;  %v1137_v32 = vadd.f32 %v1042_v47, %v705_v15  ;;  %v382_v33 = vadd.f32 %v374_v61, %v362_v21  ;;  %v604_v34 = vrot.slane %v569_v22, 1  ;;  %v605_v37 = vrot.slane %v570_v25, 1  ;;  %v1170_v15 = vld [vmem:[%s945_s19 + $0x68] sm:$0x3] }
  0x3c   : > { %v750_v38 = vadd.f32 1.0, %v869_v31  ;;  %v680_v40 = vrot.slane %v645_v29, 2  ;;  %v681_v41 = vrot.slane %v646_v30, 2  ;;  %v201_v42 = vmul.f32 %v947_v11, %v1071_v16 }
  0x3d   : > { %v728_v44 = vsub.f32 0.0, %v1137_v32  ;;  %v458_v43 = vadd.f32 %v434_v26, %v382_v33  ;;  %v606_v46 = vsel %vm249_vm0, %v604_v34, %v605_v37  ;;  %v225_v48 = vmul.f32 %v949_v12, %v1071_v16 }
  0x3e   : > { %872 = vrcp.f32 %v750_v38  ;;  %v682_v49 = vsel %vm326_vm1, %v680_v40, %v681_v41  ;;  %v226_v50 = vmul.f32 %v949_v12, %v1076_v24  ;;  %v302_v51 = vmul.f32 %v951_v13, %v1071_v16 }
  0x3f   : > { %v738_v52 = vmul.f32 1.442695, %v728_v44  ;;  %v534_v53 = vadd.f32 %v510_v28, %v458_v43  ;;  %v262_v54 = vrot.slane %v225_v48, 1  ;;  %v303_v55 = vmul.f32 %v951_v13, %v1076_v24 }
  0x40   : > { %v263_v56 = vrot.slane %v226_v50, 1  ;;  %v339_v57 = vrot.slane %v302_v51, 2  ;;  %v375_v58 = vmul.f32 %v953_v14, %v1118_v45  ;;  %v399_v59 = vmul.f32 %v957_v17, %v1118_v45 }
  0x41   : > { %874 = vpow2.f32 %v738_v52  ;;  %v554_v61 = vadd.f32 %v546_v10, %v534_v53  ;;  %v340_v62 = vrot.slane %v303_v55, 2  ;;  %v400_v16 = vmul.f32 %v957_v17, %v1122_v6 }
  0x42   : > { %v264_v63 = vsel %vm249_vm0, %v262_v54, %v263_v56  ;;  %v435_v23 = vrot.slane %v399_v59, 1  ;;  %v475_v24 = vmul.f32 %v959_v18, %v1118_v45  ;;  %v476_v0 = vmul.f32 %v959_v18, %v1122_v6 }
  0x43   : > { %v871_v1 = vpop.eup %870  ;;  %v630_v27 = vadd.f32 %v606_v46, %v554_v61  ;;  %v286_v35 = vadd.f32 %v264_v63, %v201_v42  ;;  %v341_v3 = vsel %vm326_vm1, %v339_v57, %v340_v62  ;;  %v436_v4 = vrot.slane %v400_v16, 1 }
  0x44   : > { %v751_v5 = vadd.f32 1.0, %v871_v1  ;;  %v511_v7 = vrot.slane %v475_v24, 2  ;;  %v512_v8 = vrot.slane %v476_v0, 2  ;;  %v547_v9 = vmul.f32 %v961_v19, %v1164_v2 }
  0x45   : > { %v706_v10 = vadd.f32 %v682_v49, %v630_v27  ;;  %v363_v21 = vadd.f32 %v341_v3, %v286_v35  ;;  %v437_v22 = vsel %vm249_vm0, %v435_v23, %v436_v4  ;;  %v571_v25 = vmul.f32 %v963_v20, %v1164_v2  ;;  %v1218_v27 = vld [vmem:[%s945_s19 + $0x70] sm:$0xff] }
  0x46   : > { %876 = vrcp.f32 %v751_v5  ;;  %v513_v26 = vsel %vm326_vm1, %v511_v7, %v512_v8  ;;  %v572_v28 = vmul.f32 %v963_v20, %v1170_v15  ;;  %v647_v29 = vmul.f32 %v982_v36, %v1164_v2 }
  0x47   : > { %v1181_v30 = vadd.f32 %v1042_v47, %v706_v10  ;;  %v383_v31 = vadd.f32 %v375_v58, %v363_v21  ;;  %v607_v33 = vrot.slane %v571_v25, 1  ;;  %v648_v34 = vmul.f32 %v982_v36, %v1170_v15  ;;  %v1225_v10 = vld [vmem:[%s945_s19 + $0x78] sm:$0x3] }
  0x48   : > { %v608_v37 = vrot.slane %v572_v28, 1  ;;  %v683_v38 = vrot.slane %v647_v29, 2  ;;  %v202_v40 = vmul.f32 %v947_v11, %v1118_v45  ;;  %v227_v41 = vmul.f32 %v949_v12, %v1118_v45 }
  0x49   : > { %v729_v42 = vsub.f32 0.0, %v1181_v30  ;;  %v459_v44 = vadd.f32 %v437_v22, %v383_v31  ;;  %v684_v43 = vrot.slane %v648_v34, 2  ;;  %v228_v46 = vmul.f32 %v949_v12, %v1122_v6 }
  0x4a   : > { %v609_v48 = vsel %vm249_vm0, %v607_v33, %v608_v37  ;;  %v265_v49 = vrot.slane %v227_v41, 1  ;;  %v304_v50 = vmul.f32 %v951_v13, %v1118_v45  ;;  %v305_v51 = vmul.f32 %v951_v13, %v1122_v6 }
  0x4b   : > { %v873_v52 = vpop.eup %872  ;;  %v740_v53 = vmul.f32 1.442695, %v729_v42  ;;  %v535_v54 = vadd.f32 %v513_v26, %v459_v44  ;;  %v685_v55 = vsel %vm326_vm1, %v683_v38, %v684_v43  ;;  %v266_v56 = vrot.slane %v228_v46, 1 }
  0x4c   : > { %v774_v57 = vmul.f32 %v873_v52, %v1057_v60  ;;  %v342_v58 = vrot.slane %v304_v50, 2  ;;  %v343_v45 = vrot.slane %v305_v51, 2  ;;  %v376_v6 = vmul.f32 %v953_v14, %v1164_v2 }
  0x4d   : > { %878 = vpow2.f32 %v740_v53  ;;  %v555_v59 = vadd.f32 %v547_v9, %v535_v54  ;;  %v267_v61 = vsel %vm249_vm0, %v265_v49, %v266_v56  ;;  %v401_v62 = vmul.f32 %v957_v17, %v1164_v2 }
  0x4e   : > { %v875_v16 = vpop.eup %874  ;;  %783 = vst.msk [vmem:[%s1201_s27] sm:$0xff] %vm782_vm2, %v774_v57  ;;  %v287_v63 = vadd.f32 %v267_v61, %v202_v40  ;;  %v344_v60 = vsel %vm326_vm1, %v342_v58, %v343_v45  ;;  %v402_v23 = vmul.f32 %v957_v17, %v1170_v15  ;;  %v477_v24 = vmul.f32 %v959_v18, %v1164_v2 }
  0x4f   : > { %v752_v0 = vadd.f32 1.0, %v875_v16  ;;  %v631_v1 = vadd.f32 %v609_v48, %v555_v59  ;;  %v438_v35 = vrot.slane %v401_v62, 1  ;;  %v478_v3 = vmul.f32 %v959_v18, %v1170_v15 }
  0x50   : > { %v364_v4 = vadd.f32 %v344_v60, %v287_v63  ;;  %v439_v5 = vrot.slane %v402_v23, 1  ;;  %v514_v7 = vrot.slane %v477_v24, 2  ;;  %v548_v8 = vmul.f32 %v961_v19, %v1218_v27 }
  0x51   : > { %880 = vrcp.f32 %v752_v0  ;;  %v707_v9 = vadd.f32 %v685_v55, %v631_v1  ;;  %v515_v21 = vrot.slane %v478_v3, 2  ;;  %v573_v22 = vmul.f32 %v963_v20, %v1218_v27  ;;  %v187_v3 = vld [vmem:[%s945_s19 + $0x80] sm:$0xff] }
  0x52   : > { %v384_v25 = vadd.f32 %v376_v6, %v364_v4  ;;  %v440_v26 = vsel %vm249_vm0, %v438_v35, %v439_v5  ;;  %v574_v28 = vmul.f32 %v963_v20, %v1225_v10  ;;  %v649_v29 = vmul.f32 %v982_v36, %v1218_v27 }
  0x53   : > { %v877_v31 = vpop.eup %876  ;;  %v1235_v33 = vadd.f32 %v1042_v47, %v707_v9  ;;  %v516_v34 = vsel %vm326_vm1, %v514_v7, %v515_v21  ;;  %v610_v37 = vrot.slane %v573_v22, 1  ;;  %v650_v38 = vmul.f32 %v982_v36, %v1225_v10 }
  0x54   : > { %v775_v40 = vmul.f32 %v877_v31, %v1090_v39  ;;  %v460_v41 = vadd.f32 %v440_v26, %v384_v25  ;;  %v611_v42 = vrot.slane %v574_v28, 1  ;;  %v686_v44 = vrot.slane %v649_v29, 2 }
  0x55   : > { %v730_v43 = vsub.f32 0.0, %v1235_v33  ;;  %v687_v46 = vrot.slane %v650_v38, 2  ;;  %v203_v48 = vmul.f32 %v947_v11, %v1164_v2  ;;  %v229_v49 = vmul.f32 %v949_v12, %v1164_v2 }
  0x56   : > { %784 = vst.msk [vmem:[%s1201_s27 + $0x8] sm:$0xff] %vm782_vm2, %v775_v40  ;;  %v536_v50 = vadd.f32 %v516_v34, %v460_v41  ;;  %v612_v51 = vsel %vm249_vm0, %v610_v37, %v611_v42  ;;  %v230_v39 = vmul.f32 %v949_v12, %v1170_v15  ;;  %v306_v52 = vmul.f32 %v951_v13, %v1164_v2 }
  0x57   : > { %v742_v53 = vmul.f32 1.442695, %v730_v43  ;;  %v688_v54 = vsel %vm326_vm1, %v686_v44, %v687_v46  ;;  %v268_v55 = vrot.slane %v229_v49, 1  ;;  %v307_v56 = vmul.f32 %v951_v13, %v1170_v15 }
  0x58   : > { %v556_v57 = vadd.f32 %v548_v8, %v536_v50  ;;  %v269_v58 = vrot.slane %v230_v39, 1  ;;  %v345_v45 = vrot.slane %v306_v52, 2  ;;  %v377_v6 = vmul.f32 %v953_v14, %v1218_v27  ;;  %v188_v8 = vld [vmem:[%s945_s19 + $0x88] sm:$0x3] }
  0x59   : > { %882 = vpow2.f32 %v742_v53  ;;  %v346_v59 = vrot.slane %v307_v56, 2  ;;  %v403_v61 = vmul.f32 %v957_v17, %v1218_v27  ;;  %v404_v2 = vmul.f32 %v957_v17, %v1225_v10 }
  0x5a   : > { %v879_v62 = vpop.eup %878  ;;  %v632_v16 = vadd.f32 %v612_v51, %v556_v57  ;;  %v270_v15 = vsel %vm249_vm0, %v268_v55, %v269_v58  ;;  %v479_v63 = vmul.f32 %v959_v18, %v1218_v27  ;;  %v480_v60 = vmul.f32 %v959_v18, %v1225_v10 }
  0x5b   : > { %v753_v23 = vadd.f32 1.0, %v879_v62  ;;  %v288_v24 = vadd.f32 %v270_v15, %v203_v48  ;;  %v347_v0 = vsel %vm326_vm1, %v345_v45, %v346_v59  ;;  %v441_v1 = vrot.slane %v403_v61, 1  ;;  %v189_v61 = vld [vmem:[%s945_s19 + $0x90] sm:$0xff] }
  0x5c   : > { %v708_v35 = vadd.f32 %v688_v54, %v632_v16  ;;  %v442_v4 = vrot.slane %v404_v2, 1  ;;  %v517_v5 = vrot.slane %v479_v63, 2  ;;  %v518_v7 = vrot.slane %v480_v60, 2  ;;  %v190_v63 = vld [vmem:[%s945_s19 + $0x98] sm:$0x3] }
  0x5d   : > { %884 = vrcp.f32 %v753_v23  ;;  %v365_v9 = vadd.f32 %v347_v0, %v288_v24  ;;  %v549_v21 = vmul.f32 %v961_v19, %v187_v3  ;;  %v575_v22 = vmul.f32 %v963_v20, %v187_v3 }
  0x5e   : > { %v881_v25 = vpop.eup %880  ;;  %v1273_v26 = vadd.f32 %v1042_v47, %v708_v35  ;;  %v443_v28 = vsel %vm249_vm0, %v441_v1, %v442_v4  ;;  %v519_v29 = vsel %vm326_vm1, %v517_v5, %v518_v7  ;;  %v576_v31 = vmul.f32 %v963_v20, %v188_v8 }
  0x5f   : > { %v776_v34 = vmul.f32 %v881_v25, %v1137_v32  ;;  %v385_v37 = vadd.f32 %v377_v6, %v365_v9  ;;  %v613_v38 = vrot.slane %v575_v22, 1  ;;  %v651_v40 = vmul.f32 %v982_v36, %v187_v3 }
  0x60   : > { %v731_v41 = vsub.f32 0.0, %v1273_v26  ;;  %v614_v42 = vrot.slane %v576_v31, 1  ;;  %v652_v44 = vmul.f32 %v982_v36, %v188_v8  ;;  %v204_v43 = vmul.f32 %v947_v11, %v1218_v27 }
  0x61   : > { %785 = vst.msk [vmem:[%s1201_s27 + $0x10] sm:$0xff] %vm782_vm2, %v776_v34  ;;  %v461_v46 = vadd.f32 %v443_v28, %v385_v37  ;;  %v689_v48 = vrot.slane %v651_v40, 2  ;;  %v231_v49 = vmul.f32 %v949_v12, %v1218_v27  ;;  %v232_v32 = vmul.f32 %v949_v12, %v1225_v10 }
  0x62   : > { %v744_v50 = vmul.f32 1.442695, %v731_v41  ;;  %v615_v51 = vsel %vm249_vm0, %v613_v38, %v614_v42  ;;  %v690_v39 = vrot.slane %v652_v44, 2  ;;  %v308_v52 = vmul.f32 %v951_v13, %v1218_v27 }
  0x63   : > { %v537_v53 = vadd.f32 %v519_v29, %v461_v46  ;;  %v271_v11 = vrot.slane %v231_v49, 1  ;;  %v272_v54 = vrot.slane %v232_v32, 1  ;;  %v309_v55 = vmul.f32 %v951_v13, %v1225_v10 }
  0x64   : > { %886 = vpow2.f32 %v744_v50  ;;  %v691_v56 = vsel %vm326_vm1, %v689_v48, %v690_v39  ;;  %v348_v57 = vrot.slane %v308_v52, 2  ;;  %v378_v12 = vmul.f32 %v953_v14, %v187_v3 }
  0x65   : > { %v557_v58 = vadd.f32 %v549_v21, %v537_v53  ;;  %v273_v45 = vsel %vm249_vm0, %v271_v11, %v272_v54  ;;  %v349_v6 = vrot.slane %v309_v55, 2  ;;  %v405_v59 = vmul.f32 %v957_v17, %v187_v3 }
  0x66   : > { %v883_v27 = vpop.eup %882  ;;  %v289_v2 = vadd.f32 %v273_v45, %v204_v43  ;;  %v406_v62 = vmul.f32 %v957_v17, %v188_v8  ;;  %v481_v13 = vmul.f32 %v959_v18, %v187_v3  ;;  %v482_v10 = vmul.f32 %v959_v18, %v188_v8 }
  0x67   : > { %v754_v16 = vadd.f32 1.0, %v883_v27  ;;  %v633_v15 = vadd.f32 %v615_v51, %v557_v58  ;;  %v350_v14 = vsel %vm326_vm1, %v348_v57, %v349_v6  ;;  %v444_v60 = vrot.slane %v405_v59, 1 }
  0x68   : > { %v366_v23 = vadd.f32 %v350_v14, %v289_v2  ;;  %v445_v24 = vrot.slane %v406_v62, 1  ;;  %v520_v0 = vrot.slane %v481_v13, 2  ;;  %v521_v1 = vrot.slane %v482_v10, 2 }
  0x69   : > { %888 = vrcp.f32 %v754_v16  ;;  %v709_v35 = vadd.f32 %v691_v56, %v633_v15  ;;  %v577_v4 = vmul.f32 %v963_v20, %v189_v61  ;;  %v578_v7 = vmul.f32 %v963_v20, %v190_v63 }
  0x6a   : > { %v885_v17 = vpop.eup %884  ;;  %v386_v5 = vadd.f32 %v378_v12, %v366_v23  ;;  %v446_v3 = vsel %vm249_vm0, %v444_v60, %v445_v24  ;;  %v522_v18 = vsel %vm326_vm1, %v520_v0, %v521_v1  ;;  %v653_v22 = vmul.f32 %v982_v36, %v189_v61 }
  0x6b   : > { %v777_v8 = vmul.f32 %v885_v17, %v1181_v30  ;;  %v724_v9 = vadd.f32 %v1042_v47, %v709_v35  ;;  %v616_v21 = vrot.slane %v577_v4, 1  ;;  %v550_v28 = vmul.f32 %v961_v19, %v189_v61 }
  0x6c   : > { %v462_v25 = vadd.f32 %v446_v3, %v386_v5  ;;  %v617_v29 = vrot.slane %v578_v7, 1  ;;  %v654_v31 = vmul.f32 %v982_v36, %v190_v63  ;;  %v692_v37 = vrot.slane %v653_v22, 2 }
  0x6d   : > { %786 = vst.msk [vmem:[%s1201_s27 + $0x18] sm:$0xff] %vm782_vm2, %v777_v8  ;;  %v732_v34 = vsub.f32 0.0, %v724_v9 }
  0x6e   : > { %v538_v38 = vadd.f32 %v522_v18, %v462_v25  ;;  %v693_v20 = vrot.slane %v654_v31, 2  ;;  %v618_v30 = vsel %vm249_vm0, %v616_v21, %v617_v29 }
  0x6f   : > { %v746_v40 = vmul.f32 1.442695, %v732_v34 }
  0x70   : > { %v558_v41 = vadd.f32 %v550_v28, %v538_v38  ;;  %v694_v44 = vsel %vm326_vm1, %v692_v37, %v693_v20 }
  0x71   : > { %v887_v42 = vpop.eup %886  ;;  %890 = vpow2.f32 %v746_v40 }
  0x72   : > { %v755_v43 = vadd.f32 1.0, %v887_v42  ;;  %v634_v19 = vadd.f32 %v618_v30, %v558_v41 }
  0x74   : > { %892 = vrcp.f32 %v755_v43  ;;  %v710_v36 = vadd.f32 %v694_v44, %v634_v19 }
  0x76   : > { %v889_v46 = vpop.eup %888  ;;  %v725_v48 = vadd.f32 %v1042_v47, %v710_v36 }
  0x77   : > { %v778_v49 = vmul.f32 %v889_v46, %v1235_v33 }
  0x78   : > { %v733_v32 = vsub.f32 0.0, %v725_v48 }
  0x79   : > { %787 = vst.msk [vmem:[%s1201_s27 + $0x20] sm:$0xff] %vm782_vm2, %v778_v49 }
  0x7a   : > { %v748_v50 = vmul.f32 1.442695, %v733_v32 }
  0x7c   : > { %894 = vpow2.f32 %v748_v50 }
  0x7e   : > { %v891_v51 = vpop.eup %890 }
  0x7f   : > { %v756_v39 = vadd.f32 1.0, %v891_v51 }
  0x81   : > { %v893_v52 = vpop.eup %892  ;;  %896 = vrcp.f32 %v756_v39 }
  0x82   : > { %v779_v53 = vmul.f32 %v893_v52, %v1273_v26 }
  0x84   : > { %788 = vst.msk [vmem:[%s1201_s27 + $0x28] sm:$0xff] %vm782_vm2, %v779_v53 }
  0x89   : > { %v895_v11 = vpop.eup %894 }
  0x8a   : > { %v757_v54 = vadd.f32 1.0, %v895_v11 }
  0x8c   : > { %898 = vrcp.f32 %v757_v54 }
  0x8e   : > { %v897_v47 = vpop.eup %896 }
  0x8f   : > { %v780_v33 = vmul.f32 %v897_v47, %v724_v9 }
  0x91   : > { %789 = vst.msk [vmem:[%s1201_s27 + $0x30] sm:$0xff] %vm782_vm2, %v780_v33 }
  0x99   : > { %v899_v55 = vpop.eup %898 }
  0x9a   : > { %v781_v56 = vmul.f32 %v899_v55, %v725_v48 }
  0x9c   : > { %790 = vst.msk [vmem:[%s1201_s27 + $0x38] sm:$0xff] %vm782_vm2, %v781_v56 }
  0x9d PF: > { %s13_s12 = sadd.s32 1, %s906_s12  }
  0x9e   : > { %p10_p4 = scmp.ge.s32.totalorder %s13_s12, 4  }
  0xa0   :  { %12 = sbr.rel (!%p10_p4) target bundleno = 1 (0x1), region = 62 }

// kernel: vss_stage_forward.18
= control target key start
LH: loop header
LB: loop body
LE: loop exit
PB: predicated region body
PF: predicated region fallthrough
CT: control target
= control target key end

     0   :  { %9 = vsyncpa [#allocation4], 0  ;;  %s757_s15 = smov [#allocation3]   ;;  %s1060_s0 = inlined_call_operand.hbm [shape: f32[128,32], index: 0, kind: input, shape index: {}]   ;;  %s1061_s1 = inlined_call_operand.vmem [shape: f32[1,32], index: 1, kind: input, shape index: {}]   ;;  %s1062_s2 = inlined_call_operand.vmem [shape: f32[1,32], index: 2, kind: input, shape index: {}]   ;;  %s1063_s3 = inlined_call_operand.vmem [shape: bf16[32,128], index: 3, kind: input, shape index: {}]   ;;  %s1064_s4 = inlined_call_operand.vmem [shape: f32[128,128], index: 4, kind: output, shape index: {}]  }
   0x1   :  { %s15_s16 = sshll.u32 %s757_s15, 4  ;;  %s16_s16 = int_to_ptr.vmem [resolvable:$true] %s15_s16 }
   0x2   :  { %s743_s17 = scalar_lea.vmem %s16_s16, 2048  ;;  %p748_p1 = scmp.lt.s32.totalorder %s16_s16, %s16_s16 }
   0x3   :  { %p744_p0 = scmp.ne.s32.totalorder %s16_s16, %s743_s17  ;;  %p749_p2 = scmp.lt.s32.totalorder %s743_s17, %s743_s17 }
   0x5   :  { %p750_p3 = por %p749_p2, %p748_p1 }
   0x7   :  { %p751_p4 = pnand %p750_p3, %p744_p0 }
   0x9   :  { %754 = shalt.err (!%p751_p4)
}
   0xa   :  { %s758_s18 = smov 128   ;;  %s759_s19 = smov 8  }
   0xb   :  { %21 = dma.hbm_to_vmem [thread:$0]  %s1060_s0, 2048, %s16_s16, [#allocation4], %s758_s18, %s758_s18, %s759_s19  }
   0xc   :  { %755 = dma.done.wait [#allocation4], 2048  }
   0xd   :  { %756 = vsyncadd [#allocation4], 4294965248  ;;  %vm52_vm0 = vcmask 261120   ;;  %v36_v0 = vld [vmem:[#allocation3] sm:$0xff]  ;;  %v37_v2 = vld [vmem:[#allocation3 + $0x8] sm:$0xff]  ;;  %vm372_vm1 = vcmask 257024  }
   0xe   :  { %v44_v1 = vld [vmem:[#allocation3 + $0x40] sm:$0xff]  ;;  %v53_v3 = vsel %vm52_vm0, %v36_v0, 0.0  ;;  %v45_v5 = vld [vmem:[#allocation3 + $0x48] sm:$0xff]  ;;  %v56_v6 = vsel %vm52_vm0, %v37_v2, 0.0  ;;  %v38_v8 = vld [vmem:[#allocation3 + $0x10] sm:$0xff] }
   0xf   :  { %v77_v4 = vsel %vm52_vm0, %v44_v1, 0.0  ;;  %54 = vadd.xlane.f32.xlu0 %v53_v3  ;;  %v80_v7 = vsel %vm52_vm0, %v45_v5, 0.0  ;;  %v39_v9 = vld [vmem:[#allocation3 + $0x18] sm:$0xff]  ;;  %v59_v10 = vsel %vm52_vm0, %v38_v8, 0.0  ;;  %v794_v12 = vld [vmem:[#allocation3 + $0x50] sm:$0xff]  ;;  %v802_v16 = vld [vmem:[#allocation3 + $0x20] sm:$0xff] }
  0x10   :  { %78 = vadd.xlane.f32.xlu1 %v77_v4  ;;  %v62_v11 = vsel %vm52_vm0, %v39_v9, 0.0  ;;  %v796_v13 = vld [vmem:[#allocation3 + $0x58] sm:$0xff]  ;;  %v83_v14 = vsel %vm52_vm0, %v794_v12, 0.0  ;;  %v804_v17 = vld [vmem:[#allocation3 + $0x28] sm:$0xff]  ;;  %v65_v18 = vsel %vm52_vm0, %v802_v16, 0.0  ;;  %v810_v20 = vld [vmem:[#allocation3 + $0x60] sm:$0xff] }
  0x11   :  { %v86_v15 = vsel %vm52_vm0, %v796_v13, 0.0  ;;  %v68_v19 = vsel %vm52_vm0, %v804_v17, 0.0  ;;  %v812_v21 = vld [vmem:[#allocation3 + $0x68] sm:$0xff]  ;;  %v89_v22 = vsel %vm52_vm0, %v810_v20, 0.0  ;;  %v818_v24 = vld [vmem:[#allocation3 + $0x30] sm:$0xff]  ;;  %v820_v25 = vld [vmem:[#allocation3 + $0x38] sm:$0xff] }
  0x12   :  { %v92_v23 = vsel %vm52_vm0, %v812_v21, 0.0  ;;  %v71_v26 = vsel %vm52_vm0, %v818_v24, 0.0  ;;  %v74_v27 = vsel %vm52_vm0, %v820_v25, 0.0  ;;  %v826_v28 = vld [vmem:[#allocation3 + $0x70] sm:$0xff]  ;;  %v828_v29 = vld [vmem:[#allocation3 + $0x78] sm:$0xff] }
  0x13   :  { %57 = vadd.xlane.f32.xlu0 %v56_v6  ;;  %v95_v30 = vsel %vm52_vm0, %v826_v28, 0.0  ;;  %v98_v31 = vsel %vm52_vm0, %v828_v29, 0.0 }
  0x14   :  { %81 = vadd.xlane.f32.xlu1 %v80_v7 }
  0x17   :  { %60 = vadd.xlane.f32.xlu0 %v59_v10 }
  0x18   :  { %63 = vadd.xlane.f32.xlu1 %v62_v11 }
  0x1b   :  { %84 = vadd.xlane.f32.xlu0 %v83_v14 }
  0x1c   :  { %87 = vadd.xlane.f32.xlu1 %v86_v15 }
  0x1f   :  { %66 = vadd.xlane.f32.xlu0 %v65_v18 }
  0x20   :  { %69 = vadd.xlane.f32.xlu1 %v68_v19 }
  0x23   :  { %90 = vadd.xlane.f32.xlu0 %v89_v22 }
  0x24   :  { %93 = vadd.xlane.f32.xlu1 %v92_v23 }
  0x27   :  { %72 = vadd.xlane.f32.xlu0 %v71_v26 }
  0x28   :  { %75 = vadd.xlane.f32.xlu1 %v74_v27 }
  0x2b   :  { %96 = vadd.xlane.f32.xlu0 %v95_v30 }
  0x2c   :  { %99 = vadd.xlane.f32.xlu1 %v98_v31 }
  0x98   :  { %v55_v32 = vpop.xlane.xlu0 %54 }
  0x99   :  { %v79_v33 = vpop.xlane.xlu1 %78  ;;  %v102_v34 = vmul.f32 0.03125, %v55_v32 }
  0x9a   :  { %v110_v35 = vmul.f32 0.03125, %v79_v33 }
  0x9b   :  { %v834_v36 = vsub.f32 %v36_v0, %v102_v34 }
  0x9c   :  { %v836_v37 = vsub.f32 %v44_v1, %v110_v35  ;;  %v58_v38 = vpop.xlane.xlu0 %57 }
  0x9d   :  { %v82_v39 = vpop.xlane.xlu1 %81  ;;  %v103_v40 = vmul.f32 0.03125, %v58_v38  ;;  %v134_v42 = vmul.f32 %v834_v36, %v834_v36 }
  0x9e   :  { %v111_v41 = vmul.f32 0.03125, %v82_v39  ;;  %v142_v43 = vmul.f32 %v836_v37, %v836_v37 }
  0x9f   :  { %v842_v44 = vsub.f32 %v37_v2, %v103_v40  ;;  %v150_v46 = vsel %vm52_vm0, %v134_v42, 0.0 }
  0xa0   :  { %v844_v45 = vsub.f32 %v45_v5, %v111_v41  ;;  %151 = vadd.xlane.f32.xlu0 %v150_v46  ;;  %v61_v47 = vpop.xlane.xlu0 %60  ;;  %v174_v49 = vsel %vm52_vm0, %v142_v43, 0.0 }
  0xa1   :  { %v64_v48 = vpop.xlane.xlu1 %63  ;;  %v104_v50 = vmul.f32 0.03125, %v61_v47  ;;  %v135_v52 = vmul.f32 %v842_v44, %v842_v44 }
  0xa2   :  { %v105_v51 = vmul.f32 0.03125, %v64_v48  ;;  %v143_v53 = vmul.f32 %v844_v45, %v844_v45 }
  0xa3   :  { %v852_v54 = vsub.f32 %v38_v8, %v104_v50  ;;  %v153_v56 = vsel %vm52_vm0, %v135_v52, 0.0 }
  0xa4   :  { %v854_v55 = vsub.f32 %v39_v9, %v105_v51  ;;  %175 = vadd.xlane.f32.xlu0 %v174_v49  ;;  %154 = vadd.xlane.f32.xlu1 %v153_v56  ;;  %v85_v57 = vpop.xlane.xlu0 %84  ;;  %v177_v59 = vsel %vm52_vm0, %v143_v53, 0.0  ;;  %v695_v53 = vld [vmem:[%s1063_s3] sm:$0xff]  }
  0xa5   :  { %v88_v58 = vpop.xlane.xlu1 %87  ;;  %v112_v60 = vmul.f32 0.03125, %v85_v57  ;;  %v136_v62 = vmul.f32 %v852_v54, %v852_v54 }
  0xa6   :  { %v113_v61 = vmul.f32 0.03125, %v88_v58  ;;  %v137_v63 = vmul.f32 %v854_v55, %v854_v55 }
  0xa7   :  { %v863_v0 = vsub.f32 %v794_v12, %v112_v60  ;;  %v156_v2 = vsel %vm52_vm0, %v136_v62, 0.0 }
  0xa8   :  { %v866_v1 = vsub.f32 %v796_v13, %v113_v61  ;;  %178 = vadd.xlane.f32.xlu1 %v177_v59  ;;  %157 = vadd.xlane.f32.xlu0 %v156_v2  ;;  %v67_v3 = vpop.xlane.xlu0 %66  ;;  %v159_v5 = vsel %vm52_vm0, %v137_v63, 0.0 }
  0xa9   :  { %v70_v4 = vpop.xlane.xlu1 %69  ;;  %v106_v6 = vmul.f32 0.03125, %v67_v3  ;;  %v144_v8 = vmul.f32 %v863_v0, %v863_v0 }
  0xaa   :  { %v107_v7 = vmul.f32 0.03125, %v70_v4  ;;  %v145_v9 = vmul.f32 %v866_v1, %v866_v1 }
  0xab   :  { %v875_v10 = vsub.f32 %v802_v16, %v106_v6  ;;  %v180_v12 = vsel %vm52_vm0, %v144_v8, 0.0 }
  0xac   :  { %v878_v11 = vsub.f32 %v804_v17, %v107_v7  ;;  %160 = vadd.xlane.f32.xlu1 %v159_v5  ;;  %181 = vadd.xlane.f32.xlu0 %v180_v12  ;;  %v91_v13 = vpop.xlane.xlu0 %90  ;;  %v183_v15 = vsel %vm52_vm0, %v145_v9, 0.0 }
  0xad   :  { %v94_v14 = vpop.xlane.xlu1 %93  ;;  %v114_v18 = vmul.f32 0.03125, %v91_v13  ;;  %v138_v22 = vmul.f32 %v875_v10, %v875_v10 }
  0xae   :  { %v115_v19 = vmul.f32 0.03125, %v94_v14  ;;  %v139_v16 = vmul.f32 %v878_v11, %v878_v11 }
  0xaf   :  { %v887_v23 = vsub.f32 %v810_v20, %v114_v18  ;;  %v162_v26 = vsel %vm52_vm0, %v138_v22, 0.0 }
  0xb0   :  { %v890_v17 = vsub.f32 %v812_v21, %v115_v19  ;;  %184 = vadd.xlane.f32.xlu1 %v183_v15  ;;  %163 = vadd.xlane.f32.xlu0 %v162_v26  ;;  %v73_v27 = vpop.xlane.xlu0 %72  ;;  %v165_v31 = vsel %vm52_vm0, %v139_v16, 0.0 }
  0xb1   :  { %v76_v30 = vpop.xlane.xlu1 %75  ;;  %v108_v32 = vmul.f32 0.03125, %v73_v27  ;;  %v146_v34 = vmul.f32 %v887_v23, %v887_v23 }
  0xb2   :  { %v109_v33 = vmul.f32 0.03125, %v76_v30  ;;  %v147_v20 = vmul.f32 %v890_v17, %v890_v17  ;;  %v933_v30 = vld [vmem:[%s1061_s1] ss:$0 sm:$0xff] }
  0xb3   :  { %v899_v35 = vsub.f32 %v818_v24, %v108_v32  ;;  %v186_v38 = vsel %vm52_vm0, %v146_v34, 0.0  ;;  %v939_v34 = vld [vmem:[%s1062_s2] ss:$0 sm:$0xff] }
  0xb4   :  { %v902_v21 = vsub.f32 %v820_v25, %v109_v33  ;;  %166 = vadd.xlane.f32.xlu1 %v165_v31  ;;  %187 = vadd.xlane.f32.xlu0 %v186_v38  ;;  %v97_v39 = vpop.xlane.xlu0 %96  ;;  %v189_v41 = vsel %vm52_vm0, %v147_v20, 0.0 }
  0xb5   :  { %v100_v40 = vpop.xlane.xlu1 %99  ;;  %v116_v42 = vmul.f32 0.03125, %v97_v39  ;;  %v140_v46 = vmul.f32 %v899_v35, %v899_v35 }
  0xb6   :  { %v117_v43 = vmul.f32 0.03125, %v100_v40  ;;  %v141_v24 = vmul.f32 %v902_v21, %v902_v21 }
  0xb7   :  { %v911_v47 = vsub.f32 %v826_v28, %v116_v42  ;;  %v168_v48 = vsel %vm52_vm0, %v140_v46, 0.0 }
  0xb8   :  { %v914_v25 = vsub.f32 %v828_v29, %v117_v43  ;;  %190 = vadd.xlane.f32.xlu1 %v189_v41  ;;  %169 = vadd.xlane.f32.xlu0 %v168_v48  ;;  %v171_v49 = vsel %vm52_vm0, %v141_v24, 0.0  ;;  %v693_v29 = vld [vmem:[%s1063_s3 + $0x8] sm:$0xff]  }
  0xb9   :  { %v148_v50 = vmul.f32 %v911_v47, %v911_v47  ;;  %666 = vmatprep.subr.bf16.mxu0 %v693_v29  ;;  %686 = vmatprep.subr.bf16.mxu1 %v693_v29 }
  0xba   :  { %v149_v51 = vmul.f32 %v914_v25, %v914_v25  ;;  %667 = vmatpush3.bf16.msra.mxu0 %v693_v29  ;;  %688 = vmatpush3.bf16.msra.mxu1 %v693_v29 }
  0xbb   :  { %v192_v52 = vsel %vm52_vm0, %v148_v50, 0.0  ;;  %668 = vmatprep.subr.bf16.mxu0 %v695_v53  ;;  %687 = vmatprep.subr.bf16.mxu1 %v695_v53 }
  0xbc   :  { %172 = vadd.xlane.f32.xlu1 %v171_v49  ;;  %193 = vadd.xlane.f32.xlu0 %v192_v52  ;;  %v195_v28 = vsel %vm52_vm0, %v149_v51, 0.0 }
  0xbe   :  { %669 = vmatpush3.bf16.msra.mxu0 %v695_v53  ;;  %689 = vmatpush3.bf16.msra.mxu1 %v695_v53 }
  0xc0   :  { %196 = vadd.xlane.f32.xlu1 %v195_v28 }
 0x129   :  { %v152_v56 = vpop.xlane.xlu0 %151 }
 0x12a   :  { %v198_v57 = vmul.f32 0.03125, %v152_v56 }
 0x12c   :  { %v214_v58 = vadd.f32 1e-06, %v198_v57 }
 0x12d   :  { %v155_v59 = vpop.xlane.xlu1 %154  ;;  %v176_v60 = vpop.xlane.xlu0 %175 }
 0x12e   :  { %703 = vrsqrt.f32 %v214_v58  ;;  %v199_v61 = vmul.f32 0.03125, %v155_v59  ;;  %v206_v62 = vmul.f32 0.03125, %v176_v60 }
 0x130   :  { %v215_v63 = vadd.f32 1e-06, %v199_v61  ;;  %v222_v2 = vadd.f32 1e-06, %v206_v62 }
 0x131   :  { %v179_v3 = vpop.xlane.xlu1 %178  ;;  %v158_v4 = vpop.xlane.xlu0 %157 }
 0x132   :  { %705 = vrsqrt.f32 %v215_v63  ;;  %v207_v5 = vmul.f32 0.03125, %v179_v3  ;;  %v200_v6 = vmul.f32 0.03125, %v158_v4 }
 0x133   :  { %707 = vrsqrt.f32 %v222_v2 }
 0x134   :  { %v223_v7 = vadd.f32 1e-06, %v207_v5  ;;  %v216_v8 = vadd.f32 1e-06, %v200_v6 }
 0x135   :  { %v161_v9 = vpop.xlane.xlu1 %160  ;;  %v182_v12 = vpop.xlane.xlu0 %181 }
 0x136   :  { %709 = vrsqrt.f32 %v223_v7  ;;  %v201_v13 = vmul.f32 0.03125, %v161_v9  ;;  %v208_v14 = vmul.f32 0.03125, %v182_v12 }
 0x137   :  { %711 = vrsqrt.f32 %v216_v8 }
 0x138   :  { %v217_v15 = vadd.f32 1e-06, %v201_v13  ;;  %v224_v18 = vadd.f32 1e-06, %v208_v14 }
 0x139   :  { %v185_v19 = vpop.xlane.xlu1 %184  ;;  %v164_v22 = vpop.xlane.xlu0 %163 }
 0x13a   :  { %713 = vrsqrt.f32 %v217_v15  ;;  %v209_v16 = vmul.f32 0.03125, %v185_v19  ;;  %v202_v26 = vmul.f32 0.03125, %v164_v22 }
 0x13b   :  { %v704_v27 = vpop.eup %703  ;;  %715 = vrsqrt.f32 %v224_v18 }
 0x13c   :  { %v246_v31 = vmul.f32 %v704_v27, %v834_v36  ;;  %v225_v32 = vadd.f32 1e-06, %v209_v16  ;;  %v218_v33 = vadd.f32 1e-06, %v202_v26 }
 0x13d   :  { %v167_v20 = vpop.xlane.xlu1 %166  ;;  %v188_v38 = vpop.xlane.xlu0 %187 }
 0x13e   :  { %v269_v39 = vmul.f32 %v933_v30, %v246_v31  ;;  %717 = vrsqrt.f32 %v225_v32  ;;  %v203_v40 = vmul.f32 0.03125, %v167_v20  ;;  %v210_v41 = vmul.f32 0.03125, %v188_v38 }
 0x13f   :  { %v706_v42 = vpop.eup %705  ;;  %719 = vrsqrt.f32 %v218_v33 }
 0x140   :  { %v708_v43 = vpop.eup %707  ;;  %v292_v46 = vadd.f32 %v939_v34, %v269_v39  ;;  %v247_v36 = vmul.f32 %v706_v42, %v842_v44  ;;  %v219_v24 = vadd.f32 1e-06, %v203_v40  ;;  %v226_v48 = vadd.f32 1e-06, %v210_v41 }
 0x141   :  { %v254_v49 = vmul.f32 %v708_v43, %v836_v37  ;;  %v191_v50 = vpop.xlane.xlu1 %190  ;;  %v170_v51 = vpop.xlane.xlu0 %169 }
 0x142   :  { %v640_v52 = vpack.c.bf16 %v292_v46, %v292_v46  ;;  %v270_v28 = vmul.f32 %v933_v30, %v247_v36  ;;  %721 = vrsqrt.f32 %v219_v24  ;;  %v211_v29 = vmul.f32 0.03125, %v191_v50 }
 0x143   :  { %v710_v53 = vpop.eup %709  ;;  %v277_v56 = vmul.f32 %v933_v30, %v254_v49  ;;  %723 = vrsqrt.f32 %v226_v48  ;;  %v204_v57 = vmul.f32 0.03125, %v170_v51 }
 0x144   :  { %v712_v58 = vpop.eup %711  ;;  %373 = vst.msk [vmem:[#allocation2] sm:$0xf] %vm372_vm1, %v640_v52  ;;  %v293_v44 = vadd.f32 %v939_v34, %v270_v28  ;;  %v255_v59 = vmul.f32 %v710_v53, %v844_v45  ;;  %v227_v37 = vadd.f32 1e-06, %v211_v29 }
 0x145   :  { %v300_v60 = vadd.f32 %v939_v34, %v277_v56  ;;  %v248_v61 = vmul.f32 %v712_v58, %v852_v54  ;;  %v220_v62 = vadd.f32 1e-06, %v204_v57  ;;  %v173_v63 = vpop.xlane.xlu1 %172  ;;  %v194_v2 = vpop.xlane.xlu0 %193 }
 0x146   :  { %v641_v3 = vpack.c.bf16 %v293_v44, %v293_v44  ;;  %v278_v4 = vmul.f32 %v933_v30, %v255_v59  ;;  %725 = vrsqrt.f32 %v227_v37  ;;  %v205_v5 = vmul.f32 0.03125, %v173_v63 }
 0x147   :  { %v714_v6 = vpop.eup %713  ;;  %v648_v7 = vpack.c.bf16 %v300_v60, %v300_v60  ;;  %v271_v8 = vmul.f32 %v933_v30, %v248_v61  ;;  %727 = vrsqrt.f32 %v220_v62  ;;  %v212_v9 = vmul.f32 0.03125, %v194_v2 }
 0x148   :  { %v716_v45 = vpop.eup %715  ;;  %374 = vst.msk [vmem:[#allocation2 + $0x4] sm:$0xf] %vm372_vm1, %v641_v3  ;;  %v301_v12 = vadd.f32 %v939_v34, %v278_v4  ;;  %v249_v54 = vmul.f32 %v714_v6, %v854_v55  ;;  %v221_v13 = vadd.f32 1e-06, %v205_v5 }
 0x149   :  { %381 = vst.msk [vmem:[#allocation2 + $0x20] sm:$0xf] %vm372_vm1, %v648_v7  ;;  %v294_v14 = vadd.f32 %v939_v34, %v271_v8  ;;  %v256_v15 = vmul.f32 %v716_v45, %v863_v0  ;;  %v228_v18 = vadd.f32 1e-06, %v212_v9  ;;  %v197_v19 = vpop.xlane.xlu1 %196 }
 0x14a   :  { %v649_v22 = vpack.c.bf16 %v301_v12, %v301_v12  ;;  %v272_v16 = vmul.f32 %v933_v30, %v249_v54  ;;  %729 = vrsqrt.f32 %v221_v13  ;;  %v213_v26 = vmul.f32 0.03125, %v197_v19 }
 0x14b   :  { %v718_v27 = vpop.eup %717  ;;  %v642_v31 = vpack.c.bf16 %v294_v14, %v294_v14  ;;  %v279_v32 = vmul.f32 %v933_v30, %v256_v15  ;;  %731 = vrsqrt.f32 %v228_v18 }
 0x14c   :  { %v720_v55 = vpop.eup %719  ;;  %382 = vst.msk [vmem:[#allocation2 + $0x24] sm:$0xf] %vm372_vm1, %v649_v22  ;;  %v295_v33 = vadd.f32 %v939_v34, %v272_v16  ;;  %v257_v20 = vmul.f32 %v718_v27, %v866_v1  ;;  %v229_v0 = vadd.f32 1e-06, %v213_v26 }
 0x14d   :  { %375 = vst.msk [vmem:[#allocation2 + $0x8] sm:$0xf] %vm372_vm1, %v642_v31  ;;  %v302_v38 = vadd.f32 %v939_v34, %v279_v32  ;;  %v250_v39 = vmul.f32 %v720_v55, %v875_v10 }
 0x14e   :  { %v643_v40 = vpack.c.bf16 %v295_v33, %v295_v33  ;;  %v280_v41 = vmul.f32 %v933_v30, %v257_v20  ;;  %733 = vrsqrt.f32 %v229_v0 }
 0x14f   :  { %v722_v42 = vpop.eup %721  ;;  %v650_v43 = vpack.c.bf16 %v302_v38, %v302_v38  ;;  %v273_v46 = vmul.f32 %v933_v30, %v250_v39  ;;  %v694_v36 = vld [vmem:[#allocation2] sm:$0xff]  }
 0x150   :  { %v724_v24 = vpop.eup %723  ;;  %376 = vst.msk [vmem:[#allocation2 + $0xc] sm:$0xf] %vm372_vm1, %v643_v40  ;;  %v303_v1 = vadd.f32 %v939_v34, %v280_v41  ;;  %v251_v48 = vmul.f32 %v722_v42, %v878_v11  ;;  %670 = vmatprep.mubr.msk.bf16.mxu0 %vm52_vm0, %v694_v36 }
 0x151   :  { %383 = vst.msk [vmem:[#allocation2 + $0x28] sm:$0xf] %vm372_vm1, %v650_v43  ;;  %v296_v10 = vadd.f32 %v939_v34, %v273_v46  ;;  %v258_v49 = vmul.f32 %v724_v24, %v887_v23 }
 0x152   :  { %v651_v50 = vpack.c.bf16 %v303_v1, %v303_v1  ;;  %v274_v51 = vmul.f32 %v933_v30, %v251_v48 }
 0x153   :  { %v726_v52 = vpop.eup %725  ;;  %v644_v28 = vpack.c.bf16 %v296_v10, %v296_v10  ;;  %v281_v29 = vmul.f32 %v933_v30, %v258_v49  ;;  %v696_v53 = vld [vmem:[#allocation2 + $0x20] sm:$0xff]  }
 0x154   :  { %v728_v56 = vpop.eup %727  ;;  %384 = vst.msk [vmem:[#allocation2 + $0x2c] sm:$0xf] %vm372_vm1, %v651_v50  ;;  %v297_v11 = vadd.f32 %v939_v34, %v274_v51  ;;  %v259_v57 = vmul.f32 %v726_v52, %v890_v17  ;;  %678 = vmatprep.mubr.msk.bf16.mxu1 %vm52_vm0, %v696_v53 }
 0x155   :  { %377 = vst.msk [vmem:[#allocation2 + $0x10] sm:$0xf] %vm372_vm1, %v644_v28  ;;  %v304_v23 = vadd.f32 %v939_v34, %v281_v29  ;;  %v252_v58 = vmul.f32 %v728_v56, %v899_v35 }
 0x156   :  { %v645_v44 = vpack.c.bf16 %v297_v11, %v297_v11  ;;  %v282_v59 = vmul.f32 %v933_v30, %v259_v57 }
 0x157   :  { %v730_v37 = vpop.eup %729  ;;  %v652_v60 = vpack.c.bf16 %v304_v23, %v304_v23  ;;  %v275_v61 = vmul.f32 %v933_v30, %v252_v58  ;;  %v697_v62 = vld [vmem:[#allocation2 + $0x8] sm:$0xff]  }
 0x158   :  { %v732_v63 = vpop.eup %731  ;;  %378 = vst.msk [vmem:[#allocation2 + $0x14] sm:$0xf] %vm372_vm1, %v645_v44  ;;  %v305_v17 = vadd.f32 %v939_v34, %v282_v59  ;;  %v253_v2 = vmul.f32 %v730_v37, %v902_v21  ;;  %671 = vmatmul.mubr.msk.bf16.vlgmr.msra.gmra.mxu0 %vm52_vm0, %v697_v62 }
 0x159   :  { %385 = vst.msk [vmem:[#allocation2 + $0x30] sm:$0xf] %vm372_vm1, %v652_v60  ;;  %v298_v35 = vadd.f32 %v939_v34, %v275_v61  ;;  %v260_v3 = vmul.f32 %v732_v63, %v911_v47 }
 0x15a   :  { %v653_v4 = vpack.c.bf16 %v305_v17, %v305_v17  ;;  %v276_v5 = vmul.f32 %v933_v30, %v253_v2 }
 0x15b   :  { %v734_v6 = vpop.eup %733  ;;  %v646_v7 = vpack.c.bf16 %v298_v35, %v298_v35  ;;  %v283_v8 = vmul.f32 %v933_v30, %v260_v3  ;;  %v698_v9 = vld [vmem:[#allocation2 + $0x28] sm:$0xff]  }
 0x15c   :  { %386 = vst.msk [vmem:[#allocation2 + $0x34] sm:$0xf] %vm372_vm1, %v653_v4  ;;  %v299_v21 = vadd.f32 %v939_v34, %v276_v5  ;;  %v261_v45 = vmul.f32 %v734_v6, %v914_v25  ;;  %679 = vmatmul.mubr.msk.bf16.vlgmr.msra.gmra.mxu1 %vm52_vm0, %v698_v9 }
 0x15d   :  { %379 = vst.msk [vmem:[#allocation2 + $0x18] sm:$0xf] %vm372_vm1, %v646_v7  ;;  %v306_v47 = vadd.f32 %v939_v34, %v283_v8 }
 0x15e   :  { %v647_v12 = vpack.c.bf16 %v299_v21, %v299_v21  ;;  %v284_v54 = vmul.f32 %v933_v30, %v261_v45 }
 0x15f   :  { %v654_v13 = vpack.c.bf16 %v306_v47, %v306_v47  ;;  %v699_v14 = vld [vmem:[#allocation2 + $0x10] sm:$0xff]  }
 0x160   :  { %380 = vst.msk [vmem:[#allocation2 + $0x1c] sm:$0xf] %vm372_vm1, %v647_v12  ;;  %v307_v15 = vadd.f32 %v939_v34, %v284_v54  ;;  %674 = vmatprep.mubr.msk.bf16.mxu0 %vm52_vm0, %v699_v14 }
 0x161   :  { %387 = vst.msk [vmem:[#allocation2 + $0x38] sm:$0xf] %vm372_vm1, %v654_v13 }
 0x162   :  { %v655_v25 = vpack.c.bf16 %v307_v15, %v307_v15 }
 0x163   :  { %v700_v18 = vld [vmem:[#allocation2 + $0x30] sm:$0xff]  }
 0x164   :  { %388 = vst.msk [vmem:[#allocation2 + $0x3c] sm:$0xf] %vm372_vm1, %v655_v25  ;;  %682 = vmatprep.mubr.msk.bf16.mxu1 %vm52_vm0, %v700_v18 }
 0x167   :  { %v701_v19 = vld [vmem:[#allocation2 + $0x18] sm:$0xff]  }
 0x168   :  { %675 = vmatmul.mubr.msk.bf16.gmra.mxu0 %vm52_vm0, %v701_v19 }
 0x16b   :  { %v702_v30 = vld [vmem:[#allocation2 + $0x38] sm:$0xff]  }
 0x16c   :  { %683 = vmatmul.mubr.msk.bf16.gmra.mxu1 %vm52_vm0, %v702_v30 }
 0x218   :  { %v672_v22 = vpop.f32.mrf.mxu0 }
 0x219   :  { %585 = vst [vmem:[%s1064_s4 + $0x10] sm:$0xff] %v672_v22 }
 0x21a   :  { %v520_v34 = vpop.f32.mrf.mxu0 }
 0x21b   :  { %583 = vst [vmem:[%s1064_s4] sm:$0xff] %v520_v34 }
 0x21c   :  { %v673_v16 = vpop.f32.mrf.mxu0  ;;  %v680_v26 = vpop.f32.mrf.mxu1 }
 0x21d   :  { %586 = vst [vmem:[%s1064_s4 + $0x18] sm:$0xff] %v673_v16  ;;  %593 = vst [vmem:[%s1064_s4 + $0x50] sm:$0xff] %v680_v26 }
 0x21e   :  { %v523_v27 = vpop.f32.mrf.mxu0  ;;  %v552_v31 = vpop.f32.mrf.mxu1 }
 0x21f   :  { %584 = vst [vmem:[%s1064_s4 + $0x8] sm:$0xff] %v523_v27  ;;  %591 = vst [vmem:[%s1064_s4 + $0x40] sm:$0xff] %v552_v31 }
 0x220   :  { %v681_v32 = vpop.f32.mrf.mxu1 }
 0x221   :  { %594 = vst [vmem:[%s1064_s4 + $0x58] sm:$0xff] %v681_v32 }
 0x222   :  { %v555_v55 = vpop.f32.mrf.mxu1 }
 0x223   :  { %592 = vst [vmem:[%s1064_s4 + $0x48] sm:$0xff] %v555_v55 }
 0x228   :  { %v676_v33 = vpop.f32.mrf.mxu0 }
 0x229   :  { %589 = vst [vmem:[%s1064_s4 + $0x30] sm:$0xff] %v676_v33 }
 0x22a   :  { %v536_v20 = vpop.f32.mrf.mxu0 }
 0x22b   :  { %587 = vst [vmem:[%s1064_s4 + $0x20] sm:$0xff] %v536_v20 }
 0x22c   :  { %v677_v0 = vpop.f32.mrf.mxu0  ;;  %v684_v38 = vpop.f32.mrf.mxu1 }
 0x22d   :  { %590 = vst [vmem:[%s1064_s4 + $0x38] sm:$0xff] %v677_v0  ;;  %597 = vst [vmem:[%s1064_s4 + $0x70] sm:$0xff] %v684_v38 }
 0x22e   :  { %v539_v39 = vpop.f32.mrf.mxu0  ;;  %v568_v40 = vpop.f32.mrf.mxu1 }
 0x22f   :  { %588 = vst [vmem:[%s1064_s4 + $0x28] sm:$0xff] %v539_v39  ;;  %595 = vst [vmem:[%s1064_s4 + $0x60] sm:$0xff] %v568_v40 }
 0x230   :  { %v685_v41 = vpop.f32.mrf.mxu1 }
 0x231   :  { %598 = vst [vmem:[%s1064_s4 + $0x78] sm:$0xff] %v685_v41 }
 0x232   :  { %v571_v42 = vpop.f32.mrf.mxu1 }
 0x233   :  { %596 = vst [vmem:[%s1064_s4 + $0x68] sm:$0xff] %v571_v42 }
 0x234   :  { %603 = vsyncpa [#allocation4], 1 }

// kernel: vss_stage_forward.20
= control target key start
LH: loop header
LB: loop body
LE: loop exit
PB: predicated region body
PF: predicated region fallthrough
CT: control target
= control target key end

     0   :  { %s1003_s15 = smov 0   ;;  %s1005_s16 = smov 0   ;;  %s1188_s0 = inlined_call_operand.vmem [shape: f32[128,64], index: 0, kind: input, shape index: {}]   ;;  %s1189_s1 = inlined_call_operand.vmem [shape: bf16[2,64,34], index: 1, kind: input, shape index: {}]   ;;  %s1190_s2 = inlined_call_operand.vmem [shape: bf16[2,34,64], index: 2, kind: input, shape index: {}]   ;;  %s1191_s3 = inlined_call_operand.vmem [shape: f32[2,128,32], index: 3, kind: output, shape index: {0}]   ;;  %s1192_s4 = inlined_call_operand.vmem [shape: f32[2,128,64], index: 4, kind: output, shape index: {1}]  }
   0x1   :  { %s1007_s17 = smov 0  }
   0x2 LB: > { %s24_s18 = sadd.s32 1, %s972_s16  ;;  %p816_p0 = scmp.ge.s32.totalorder %s976_s17, 1  ;;  %s976_s17 = sphi %s1007_s17, %s15_s17   ;;  %s972_s16 = sphi %s1005_s16, %s1194_s16   ;;  %s968_s15 = sphi %s1003_s15, %s1193_s15  }
   0x3   : > { %p25_p1 = scmp.ge.s32.totalorder %s24_s18, 2  ;;  %p202_p2 = scmp.lt.s32.totalorder %s976_s17, 3 }
   0x5   : > { %s1196_s18 = smov (%p25_p1, %s24_s18), 0  ;;  %p203_p3 = pnand %p816_p0, %p202_p2 }
   0x6   : > { %p257_p4 = scmp.lt.s32.totalorder (!%p203_p3), %s968_s15, 1 }
   0x7   : > { %206 = sbr.rel (%p203_p3) target bundleno = 458 (0x1ca), region = 32 }
   0xc   : > { %v288_v0 = vld [vmem:[%s1188_s0] sm:$0xff]  ;;  %v289_v1 = vld [vmem:[%s1188_s0 + $0x8] sm:$0xff]  ;;  %vm344_vm0 = vcmask 523264   ;;  %s1198_s15 = smov (!%p257_p4, %s968_s15), 1  ;;  %vm536_vm1 = vcmask 1040384   ;;  %v290_v9 = vld [vmem:[%s1188_s0 + $0x10] sm:$0xff] }
   0xd   : > { %v304_v2 = vpack.c.bf16 %v289_v1, %v288_v0  ;;  %s849_s23 = sshll.u32 %s1198_s15, 5  ;;  %s922_s27 = smul.u32 20, %s1198_s15  ;;  %v291_v10 = vld [vmem:[%s1188_s0 + $0x18] sm:$0xff]  ;;  %v292_v11 = vld [vmem:[%s1188_s0 + $0x20] sm:$0xff]  ;;  %v293_v12 = vld [vmem:[%s1188_s0 + $0x28] sm:$0xff]  ;;  %vm466_vm2 = vcmask 261120  }
   0xe   : > { %s261_s26 = scalar_lea.vmem %s1189_s1, %s849_s23  ;;  %v305_v13 = vpack.c.bf16 %v291_v10, %v290_v9  ;;  %v306_v14 = vpack.c.bf16 %v293_v12, %v292_v11  ;;  %v294_v15 = vld [vmem:[%s1188_s0 + $0x30] sm:$0xff]  ;;  %v295_v16 = vld [vmem:[%s1188_s0 + $0x38] sm:$0xff]  ;;  %v296_v17 = vld [vmem:[%s1188_s0 + $0x40] sm:$0xff]  ;;  %s850_s12 = sshll.u32 %s1198_s15, 7  ;;  %vm511_vm3 = vcmask 277504  }
   0xf   : > { %883 = vmatprep.mubr.msk.bf16.mxu0 %vm344_vm0, %v304_v2  ;;  %v947_v3 = vld [vmem:[%s261_s26 + $0x18] sm:$0xff]   ;;  %v948_v4 = vld [vmem:[%s261_s26 + $0x10] sm:$0xff]   ;;  %s1038_s30 = scalar_lea.vmem %s1190_s2, %s922_s27  ;;  %v949_v5 = vld [vmem:[%s261_s26 + $0x8] sm:$0xff]   ;;  %v307_v19 = vpack.c.bf16 %v295_v16, %v294_v15  ;;  %s1098_s19 = scalar_lea.vmem %s1191_s3, %s850_s12 }
  0x10   : > { %875 = vmatprep.subr.bf16.mxu0 %v947_v3  ;;  %v951_v6 = vld [vmem:[%s1038_s30 + $0x10] ss:$0 sps:$4 sm:$0x11]   ;;  %v950_v8 = vld [vmem:[%s261_s26] sm:$0xff]   ;;  %v297_v18 = vld [vmem:[%s1188_s0 + $0x48] sm:$0xff]  ;;  %s1145_s21 = scalar_lea.vmem %s1192_s4, %s850_s12 }
  0x11   : > { %876 = vmatpush3.bf16.msra.mxu0 %v947_v3  ;;  %921 = vmatprep.subr.msk.bf16.mxu1 %vm536_vm1, %v951_v6  ;;  %v538_v7 = vsel %vm536_vm1, %v951_v6, 0  ;;  %v308_v20 = vpack.c.bf16 %v297_v18, %v296_v17  ;;  %v298_v21 = vld [vmem:[%s1188_s0 + $0x50] sm:$0xff]  ;;  %v299_v22 = vld [vmem:[%s1188_s0 + $0x58] sm:$0xff]  ;;  %v300_v23 = vld [vmem:[%s1188_s0 + $0x60] sm:$0xff] }
  0x12   : > { %877 = vmatprep.subr.bf16.mxu0 %v948_v4  ;;  %900 = vmatpush3.bf16.msra.mxu1 %v538_v7  ;;  %v301_v24 = vld [vmem:[%s1188_s0 + $0x68] sm:$0xff]  ;;  %v309_v25 = vpack.c.bf16 %v299_v22, %v298_v21  ;;  %v302_v27 = vld [vmem:[%s1188_s0 + $0x70] sm:$0xff]  ;;  %v303_v28 = vld [vmem:[%s1188_s0 + $0x78] sm:$0xff] }
  0x13   : > { %v310_v26 = vpack.c.bf16 %v301_v24, %v300_v23  ;;  %v311_v29 = vpack.c.bf16 %v303_v28, %v302_v27  ;;  %v952_v30 = vld [vmem:[%s1038_s30 + $0x8] sm:$0xff]   ;;  %v953_v31 = vld [vmem:[%s1038_s30] sm:$0xff]  }
  0x14   : > { %901 = vmatprep.subr.bf16.mxu1 %v952_v30 }
  0x15   : > { %878 = vmatpush3.bf16.msra.mxu0 %v948_v4 }
  0x16   : > { %879 = vmatprep.subr.bf16.mxu0 %v949_v5  ;;  %902 = vmatpush3.bf16.msra.mxu1 %v952_v30 }
  0x17   : > { %903 = vmatprep.subr.bf16.mxu1 %v953_v31 }
  0x19   : > { %880 = vmatpush3.bf16.msra.mxu0 %v949_v5 }
  0x1a   : > { %881 = vmatprep.subr.bf16.mxu0 %v950_v8  ;;  %904 = vmatpush3.bf16.msra.mxu1 %v953_v31 }
  0x1d   : > { %882 = vmatpush3.bf16.msra.mxu0 %v950_v8 }
  0x20   : > { %884 = vmatmul.mubr.msk.bf16.vlgmr.msra.gmra.mxu0 %vm344_vm0, %v305_v13 }
  0x21   : > { %887 = vmatprep.mubr.msk.bf16.mxu0 %vm344_vm0, %v306_v14 }
  0x28   : > { %888 = vmatmul.mubr.msk.bf16.gmra.mxu0 %vm344_vm0, %v307_v19 }
  0x29   : > { %891 = vmatprep.mubr.msk.bf16.mxu0 %vm344_vm0, %v308_v20 }
  0x30   : > { %892 = vmatmul.mubr.msk.bf16.gmra.mxu0 %vm344_vm0, %v309_v25 }
  0x31   : > { %895 = vmatprep.mubr.msk.bf16.mxu0 %vm344_vm0, %v310_v26 }
  0x38   : > { %896 = vmatmul.mubr.msk.bf16.gmra.mxu0 %vm344_vm0, %v311_v29 }
  0xe0   : > { %v885_v32 = vpop.f32.mrf.mxu0 }
  0xe1   : > { %469 = vst.msk [vmem:[%s1098_s19 + $0x10] sm:$0xff] %vm466_vm2, %v885_v32 }
  0xe2   : > { %v403_v33 = vpop.f32.mrf.mxu0 }
  0xe3   : > { %467 = vst.msk [vmem:[%s1098_s19] sm:$0xff] %vm466_vm2, %v403_v33 }
  0xe4   : > { %v886_v34 = vpop.f32.mrf.mxu0 }
  0xe5   : > { %470 = vst.msk [vmem:[%s1098_s19 + $0x18] sm:$0xff] %vm466_vm2, %v886_v34  ;;  %v484_v37 = vpack.c.bf16 %v886_v34, %v885_v32 }
  0xe6   : > { %v406_v35 = vpop.f32.mrf.mxu0 }
  0xe7   : > { %468 = vst.msk [vmem:[%s1098_s19 + $0x8] sm:$0xff] %vm466_vm2, %v406_v35  ;;  %v483_v36 = vpack.c.bf16 %v406_v35, %v403_v33 }
  0xe8   : > { %v889_v38 = vpop.f32.mrf.mxu0 }
  0xe9   : > { %473 = vst.msk [vmem:[%s1098_s19 + $0x30] sm:$0xff] %vm466_vm2, %v889_v38  ;;  %905 = vmatprep.mubr.msk.bf16.mxu1 %vm511_vm3, %v483_v36 }
  0xea   : > { %v419_v39 = vpop.f32.mrf.mxu0  ;;  %906 = vmatmul.mubr.msk.bf16.vlgmr.msra.gmra.mxu1 %vm511_vm3, %v484_v37 }
  0xeb   : > { %471 = vst.msk [vmem:[%s1098_s19 + $0x20] sm:$0xff] %vm466_vm2, %v419_v39 }
  0xec   : > { %v890_v40 = vpop.f32.mrf.mxu0 }
  0xed   : > { %474 = vst.msk [vmem:[%s1098_s19 + $0x38] sm:$0xff] %vm466_vm2, %v890_v40  ;;  %v486_v43 = vpack.c.bf16 %v890_v40, %v889_v38 }
  0xee   : > { %v422_v41 = vpop.f32.mrf.mxu0 }
  0xef   : > { %472 = vst.msk [vmem:[%s1098_s19 + $0x28] sm:$0xff] %vm466_vm2, %v422_v41  ;;  %v485_v42 = vpack.c.bf16 %v422_v41, %v419_v39 }
  0xf0   : > { %v893_v44 = vpop.f32.mrf.mxu0 }
  0xf1   : > { %477 = vst.msk [vmem:[%s1098_s19 + $0x50] sm:$0xff] %vm466_vm2, %v893_v44  ;;  %909 = vmatprep.mubr.msk.bf16.mxu1 %vm511_vm3, %v485_v42 }
  0xf2   : > { %v435_v45 = vpop.f32.mrf.mxu0  ;;  %910 = vmatmul.mubr.msk.bf16.gmra.mxu1 %vm511_vm3, %v486_v43 }
  0xf3   : > { %475 = vst.msk [vmem:[%s1098_s19 + $0x40] sm:$0xff] %vm466_vm2, %v435_v45 }
  0xf4   : > { %v894_v46 = vpop.f32.mrf.mxu0 }
  0xf5   : > { %478 = vst.msk [vmem:[%s1098_s19 + $0x58] sm:$0xff] %vm466_vm2, %v894_v46  ;;  %v488_v49 = vpack.c.bf16 %v894_v46, %v893_v44 }
  0xf6   : > { %v438_v47 = vpop.f32.mrf.mxu0 }
  0xf7   : > { %476 = vst.msk [vmem:[%s1098_s19 + $0x48] sm:$0xff] %vm466_vm2, %v438_v47  ;;  %v487_v48 = vpack.c.bf16 %v438_v47, %v435_v45 }
  0xf8   : > { %v897_v50 = vpop.f32.mrf.mxu0 }
  0xf9   : > { %481 = vst.msk [vmem:[%s1098_s19 + $0x70] sm:$0xff] %vm466_vm2, %v897_v50  ;;  %913 = vmatprep.mubr.msk.bf16.mxu1 %vm511_vm3, %v487_v48 }
  0xfa   : > { %v451_v51 = vpop.f32.mrf.mxu0  ;;  %914 = vmatmul.mubr.msk.bf16.gmra.mxu1 %vm511_vm3, %v488_v49 }
  0xfb   : > { %479 = vst.msk [vmem:[%s1098_s19 + $0x60] sm:$0xff] %vm466_vm2, %v451_v51 }
  0xfc   : > { %v898_v52 = vpop.f32.mrf.mxu0 }
  0xfd   : > { %482 = vst.msk [vmem:[%s1098_s19 + $0x78] sm:$0xff] %vm466_vm2, %v898_v52  ;;  %v490_v55 = vpack.c.bf16 %v898_v52, %v897_v50 }
  0xfe   : > { %v454_v53 = vpop.f32.mrf.mxu0 }
  0xff   : > { %480 = vst.msk [vmem:[%s1098_s19 + $0x68] sm:$0xff] %vm466_vm2, %v454_v53  ;;  %v489_v54 = vpack.c.bf16 %v454_v53, %v451_v51 }
 0x101   : > { %917 = vmatprep.mubr.msk.bf16.mxu1 %vm511_vm3, %v489_v54 }
 0x102   : > { %918 = vmatmul.mubr.msk.bf16.gmra.mxu1 %vm511_vm3, %v490_v55 }
 0x1aa   : > { %v907_v56 = vpop.f32.mrf.mxu1 }
 0x1ab   : > { %639 = vst.msk [vmem:[%s1145_s21 + $0x10] sm:$0xff] %vm344_vm0, %v907_v56 }
 0x1ac   : > { %v574_v57 = vpop.f32.mrf.mxu1 }
 0x1ad   : > { %637 = vst.msk [vmem:[%s1145_s21] sm:$0xff] %vm344_vm0, %v574_v57 }
 0x1ae   : > { %v908_v58 = vpop.f32.mrf.mxu1 }
 0x1af   : > { %640 = vst.msk [vmem:[%s1145_s21 + $0x18] sm:$0xff] %vm344_vm0, %v908_v58 }
 0x1b0   : > { %v577_v59 = vpop.f32.mrf.mxu1 }
 0x1b1   : > { %638 = vst.msk [vmem:[%s1145_s21 + $0x8] sm:$0xff] %vm344_vm0, %v577_v59 }
 0x1b2   : > { %v911_v60 = vpop.f32.mrf.mxu1 }
 0x1b3   : > { %643 = vst.msk [vmem:[%s1145_s21 + $0x30] sm:$0xff] %vm344_vm0, %v911_v60 }
 0x1b4   : > { %v590_v61 = vpop.f32.mrf.mxu1 }
 0x1b5   : > { %641 = vst.msk [vmem:[%s1145_s21 + $0x20] sm:$0xff] %vm344_vm0, %v590_v61 }
 0x1b6   : > { %v912_v62 = vpop.f32.mrf.mxu1 }
 0x1b7   : > { %644 = vst.msk [vmem:[%s1145_s21 + $0x38] sm:$0xff] %vm344_vm0, %v912_v62 }
 0x1b8   : > { %v593_v63 = vpop.f32.mrf.mxu1 }
 0x1b9   : > { %642 = vst.msk [vmem:[%s1145_s21 + $0x28] sm:$0xff] %vm344_vm0, %v593_v63 }
 0x1ba   : > { %v915_v0 = vpop.f32.mrf.mxu1 }
 0x1bb   : > { %647 = vst.msk [vmem:[%s1145_s21 + $0x50] sm:$0xff] %vm344_vm0, %v915_v0 }
 0x1bc   : > { %v606_v1 = vpop.f32.mrf.mxu1 }
 0x1bd   : > { %645 = vst.msk [vmem:[%s1145_s21 + $0x40] sm:$0xff] %vm344_vm0, %v606_v1 }
 0x1be   : > { %v916_v2 = vpop.f32.mrf.mxu1 }
 0x1bf   : > { %648 = vst.msk [vmem:[%s1145_s21 + $0x58] sm:$0xff] %vm344_vm0, %v916_v2 }
 0x1c0   : > { %v609_v3 = vpop.f32.mrf.mxu1 }
 0x1c1   : > { %646 = vst.msk [vmem:[%s1145_s21 + $0x48] sm:$0xff] %vm344_vm0, %v609_v3 }
 0x1c2   : > { %v919_v4 = vpop.f32.mrf.mxu1 }
 0x1c3   : > { %651 = vst.msk [vmem:[%s1145_s21 + $0x70] sm:$0xff] %vm344_vm0, %v919_v4 }
 0x1c4   : > { %v622_v5 = vpop.f32.mrf.mxu1 }
 0x1c5   : > { %649 = vst.msk [vmem:[%s1145_s21 + $0x60] sm:$0xff] %vm344_vm0, %v622_v5 }
 0x1c6   : > { %v920_v6 = vpop.f32.mrf.mxu1 }
 0x1c7   : > { %652 = vst.msk [vmem:[%s1145_s21 + $0x78] sm:$0xff] %vm344_vm0, %v920_v6 }
 0x1c8   : > { %v625_v7 = vpop.f32.mrf.mxu1 }
 0x1c9   : > { %650 = vst.msk [vmem:[%s1145_s21 + $0x68] sm:$0xff] %vm344_vm0, %v625_v7 }
 0x1ca PF: > { %s15_s17 = sadd.s32 1, %s976_s17   ;;  %s1193_s15 = smov %s972_s16 }
 0x1cb   : > { %p12_p5 = scmp.ge.s32.totalorder %s15_s17, 4   ;;  %s1194_s16 = smov %s1196_s18 }
 0x1cd   :  { %14 = sbr.rel (!%p12_p5) target bundleno = 2 (0x2), region = 80 }

// kernel: vss_stage_forward.22
= control target key start
LH: loop header
LB: loop body
LE: loop exit
PB: predicated region body
PF: predicated region fallthrough
CT: control target
= control target key end

     0   :  { %s1293_s21 = smov 0   ;;  %s1295_s22 = smov 0   ;;  %s1645_s0 = inlined_call_operand.vmem [shape: f32[2,64,64], index: 0, kind: input, shape index: {}]   ;;  %s1646_s1 = inlined_call_operand.vmem [shape: f32[2,2,64,64], index: 1, kind: input, shape index: {}]   ;;  %s1647_s2 = inlined_call_operand.vmem [shape: f32[2,2,64,32], index: 2, kind: input, shape index: {}]   ;;  %s1648_s3 = inlined_call_operand.vmem [shape: f32[2,16,64], index: 3, kind: input, shape index: {}]   ;;  %s1649_s4 = inlined_call_operand.vmem [shape: f32[2,1,64], index: 4, kind: input, shape index: {}]   ;;  %s1650_s5 = inlined_call_operand.vmem [shape: f32[2,1,64], index: 5, kind: input, shape index: {}]   ;;  %s1651_s6 = inlined_call_operand.vmem [shape: f32[2,64,64], index: 6, kind: output, shape index: {}]  }
   0x1   :  { %s1297_s23 = smov 0  }
   0x2 LB: > { %s28_s24 = sadd.s32 1, %s1230_s22  ;;  %p1057_p0 = scmp.ge.s32.totalorder %s1234_s23, 1  ;;  %s1234_s23 = sphi %s1297_s23, %s16_s23   ;;  %s1230_s22 = sphi %s1295_s22, %s1656_s22   ;;  %s1226_s21 = sphi %s1293_s21, %s1655_s21  }
   0x3   : > { %p30_p1 = scmp.ge.s32.totalorder %s28_s24, 2  ;;  %p267_p2 = scmp.lt.s32.totalorder %s1234_s23, 3 }
   0x5   : > { %s1658_s24 = smov (%p30_p1, %s28_s24), 0  ;;  %p268_p3 = pnand %p1057_p0, %p267_p2 }
   0x6   : > { %p324_p4 = scmp.lt.s32.totalorder (!%p268_p3), %s1226_s21, 1  ;;  %s1355_s25 = smov (!%p268_p3), 0  }
   0x7   : > { %271 = sbr.rel (%p268_p3) target bundleno = 413 (0x19d), region = 44 }
   0xc   : > { %vm367_vm0 = vcmask 523264   ;;  %v1314_v0 = vld [vmem:[%s1648_s3] sm:$0xff]  ;;  %v1319_v1 = vld [vmem:[%s1648_s3 + $0x8] sm:$0xff]  ;;  %v1248_v2 = vmov 0.0   ;;  %s1660_s21 = smov (!%p324_p4, %s1226_s21), 1 }
   0xd   : > { %368 = vst.msk [vmem:[#allocation2] sm:$0xff] %vm367_vm0, %v1248_v2  ;;  %369 = vst.msk [vmem:[#allocation2 + $0x8] sm:$0xff] %vm367_vm0, %v1248_v2  ;;  %v1326_v3 = vld [vmem:[%s1649_s4] ss:$0 sm:$0xff]  ;;  %s1333_s9 = sshll.u32 %s1660_s21, 6 }
   0xe   : > { %v1331_v4 = vld [vmem:[%s1650_s5] ss:$0 sm:$0xff]  ;;  %s331_s12 = scalar_lea.vmem %s1645_s0, %s1333_s9  ;;  %s341_s15 = scalar_lea.vmem %s1646_s1, %s1333_s9 }
   0xf   : > { %s351_s18 = scalar_lea.vmem %s1647_s2, %s1333_s9  ;;  %s361_s21 = scalar_lea.vmem %s1651_s6, %s1333_s9 }
  0x14   : > { %v374_v5 = vld [vmem:[#allocation2] sm:$0xff]   ;;  %v375_v6 = vld [vmem:[#allocation2 + $0x8] sm:$0xff]  }
  0x15 LB: >> { %v1249_v7 = vmov 1   ;;  %s1368_s26 = sshll.u32 %s1246_s25, 3  ;;  %v1250_v9 = vmov 0   ;;  %v1251_v12 = vmov 2   ;;  %v1252_v14 = vmov 3   ;;  %s381_s25 = sadd.s32 1, %s1246_s25   ;;  %s1246_s25 = sphi %s1355_s25, %s381_s25   ;;  %v1242_v5 = vphi %v374_v5, %v1654_v5   ;;  %v1238_v6 = vphi %v375_v6, %v1653_v6  }
  0x16   : >> { %1135 = vset.pattern.permute.xlu1 %v1249_v7  ;;  %s389_s29 = scalar_lea.vmem %s351_s18, %s1368_s26  ;;  %v1253_v16 = vmov 4   ;;  %v1254_v17 = vmov 5   ;;  %s387_s8 = scalar_lea.vmem %s341_s15, %s1368_s26  ;;  %v1255_v18 = vmov 6   ;;  %v1256_v20 = vmov 7  }
  0x17   : >> { %v390_v8 = vld [vmem:[%s389_s29] sm:$0xff]  ;;  %v1257_v30 = vmov 1966171168   ;;  %v418_v32 = vlaneseq  ;;  %s385_s13 = scalar_lea.vmem %s331_s12, %s1368_s26  ;;  %vm884_vm3 = vcmask 1040384   ;;  %vm886_vm4 = vcmask 1041408   ;;  %s906_s17 = scalar_lea.vmem %s361_s21, %s1368_s26 }
  0x18   : >> { %551 = vxpose.xlu0.b32.start.end [1/1] (short) (narrow) %v390_v8, 32  ;;  %v388_v19 = vld [vmem:[%s387_s8] sm:$0xff]  ;;  %v416_v31 = vunpack.c.l.s4 %v1257_v30  ;;  %vm888_vm5 = vcmask 1042432   ;;  %vm890_vm6 = vcmask 1043456   ;;  %vm892_vm7 = vcmask 1044480   ;;  %p378_p5 = scmp.ge.s32.totalorder %s381_s25, 8  }
  0x19   : >> { %v397_v21 = vadd.f32 %v1326_v3, %v388_v19  ;;  %v1411_v36 = vshrl.u32 %v418_v32, 7  ;;  %v1457_v61 = vld [vmem:[%s385_s13] sm:$0xff]  ;;  %vm894_vm8 = vcmask 1045504   ;;  %vm896_vm9 = vcmask 1046528  }
  0x1a   : >> { %v417_v35 = vunpack.c.0.s8 %v416_v31 }
  0x1b   : >> { %v399_v22 = vmin.f32 %v397_v21, 20.0  ;;  %vm398_vm2 = vcmp.gt.f32.partialorder %v397_v21, 20.0  ;;  %v1420_v41 = vsub.s32 0, %v1411_v36 }
  0x1c   : >> { %v420_v38 = vsub.s32 %v417_v35, %v1411_v36 }
  0x1d   : >> { %v400_v23 = vmul.f32 1.442695, %v399_v22 }
  0x1f   : >> { %1164 = vpow2.f32 %v400_v23 }
  0x2c   : >> { %v1165_v24 = vpop.eup %1164 }
  0x2d   : >> { %v402_v25 = vadd.f32 1.0, %v1165_v24  ;;  %v405_v26 = vmul.f32 -0.5, %v1165_v24  ;;  %v408_v29 = vand.u32 2147483647, %v1165_v24 }
  0x2f   : >> { %1166 = vlog2.f32 %v402_v25  ;;  %v406_v27 = vadd.f32 1.0, %v405_v26  ;;  %vm409_vm1 = vcmp.lt.f32.partialorder %v408_v29, 0.0004427343 }
  0x31   : >> { %v407_v34 = vmul.f32 %v1165_v24, %v406_v27 }
  0x3c   : >> { %v1167_v28 = vpop.eup %1166 }
  0x3d   : >> { %v404_v33 = vmul.f32 0.6931472, %v1167_v28 }
  0x3f   : >> { %v410_v37 = vsel %vm409_vm1, %v407_v34, %v404_v33 }
  0x40   : >> { %v411_v39 = vsel %vm398_vm2, %v397_v21, %v410_v37 }
  0x41   : >> { %1134 = vset.pattern.permute.xlu0 %v1250_v9  ;;  %v421_v40 = vrot.slane %v411_v39, %v420_v38  ;;  %v414_v47 = vcombine.high %v411_v39, %v411_v39 }
  0x43   : >> { %v437_v42 = vrot.slane %v421_v40, %v420_v38  ;;  %v429_v43 = vcombine.high %v421_v40, %v421_v40  ;;  %v428_v51 = vrot.slane %v414_v47, %v420_v38 }
  0x45   : >> { %v1424_v44 = vrot.slane %v437_v42, %v1420_v41  ;;  %v451_v45 = vrot.slane %v429_v43, %v420_v38  ;;  %v459_v48 = vcombine.high %v437_v42, %v437_v42  ;;  %v444_v55 = vrot.slane %v428_v51, %v420_v38 }
  0x46   : >> { %v430_v56 = vcombine.high %v428_v51, %v428_v51 }
  0x47   : >> { %v503_v46 = vmul.f32 %v1424_v44, %v1314_v0  ;;  %v1432_v49 = vrot.slane %v451_v45, %v1420_v41  ;;  %v461_v52 = vcombine.high %v451_v45, %v451_v45  ;;  %v1436_v53 = vrot.slane %v459_v48, %v1420_v41 }
  0x48   : >> { %v1455_v60 = vrot.slane %v444_v55, %v1420_v41  ;;  %v458_v62 = vrot.slane %v430_v56, %v420_v38  ;;  %v460_v8 = vcombine.high %v444_v55, %v444_v55  ;;  %v785_v56 = vsub.s32 5, %v1411_v36 }
  0x49   : >> { %v519_v50 = vmul.f32 1.442695, %v503_v46  ;;  %v505_v54 = vmul.f32 %v1432_v49, %v1314_v0  ;;  %v507_v58 = vmul.f32 %v1436_v53, %v1314_v0  ;;  %v1445_v59 = vrot.slane %v461_v52, %v1420_v41 }
  0x4a   : >> { %v1484_v19 = vrot.slane %v460_v8, %v1420_v41  ;;  %v462_v21 = vcombine.high %v458_v62, %v458_v62 }
  0x4b   : >> { %1168 = vpow2.f32 %v519_v50  ;;  %v523_v57 = vmul.f32 1.442695, %v505_v54  ;;  %v527_v63 = vmul.f32 1.442695, %v507_v58  ;;  %v509_v2 = vmul.f32 %v1445_v59, %v1314_v0 }
  0x4c   : >> { %v515_v27 = vmul.f32 %v1484_v19, %v1314_v0  ;;  %v1496_v30 = vrot.slane %v462_v21, %v1420_v41 }
  0x4d   : >> { %1170 = vpow2.f32 %v523_v57 }
  0x4e   : >> { %1172 = vpow2.f32 %v527_v63  ;;  %v543_v34 = vmul.f32 1.442695, %v515_v27  ;;  %v517_v38 = vmul.f32 %v1496_v30, %v1314_v0 }
  0x50   : >> { %v547_v47 = vmul.f32 1.442695, %v517_v38 }
  0x94   : >> { %v567_v10 = vpop.trf.xlu0 }
  0x95   : >> { %628 = vperm.xlu1 %1135, %v567_v10   ;;  %587 = vperm.xlu0 %1134, %v567_v10  }
  0x98   : >> { %v568_v11 = vpop.trf.xlu0 }
  0x99   : >> { %1136 = vset.pattern.permute.xlu1 %v1251_v12  ;;  %1150 = vset.pattern.permute.xlu0 %v1249_v7 }
  0x9a   : >> { %665 = vperm.xlu1 %1136, %v567_v10  }
  0x9c   : >> { %v1378_v13 = vpop.trf.xlu0 }
  0x9d   : >> { %644 = vperm.xlu0 %1150, %v1378_v13  }
  0x9e   : >> { %1137 = vset.pattern.permute.xlu1 %v1252_v14 }
  0x9f   : >> { %702 = vperm.xlu1 %1137, %v567_v10  }
  0xa0   : >> { %v1382_v15 = vpop.trf.xlu0 }
  0xa1   : >> { %1156 = vset.pattern.permute.xlu0 %v1251_v12 }
  0xa2   : >> { %685 = vperm.xlu0 %1156, %v1382_v15  }
  0xa3   : >> { %1138 = vset.pattern.permute.xlu1 %v1253_v16 }
  0xa4   : >> { %739 = vperm.xlu1 %1138, %v567_v10  }
  0xa6   : >> { %1159 = vset.pattern.permute.xlu0 %v1253_v16 }
  0xa7   : >> { %759 = vperm.xlu0 %1159, %v1382_v15  }
  0xa8   : >> { %1139 = vset.pattern.permute.xlu1 %v1254_v17 }
  0xa9   : >> { %776 = vperm.xlu1 %1139, %v567_v10  }
  0xab   : >> { %1160 = vset.pattern.permute.xlu0 %v1255_v18 }
  0xac   : >> { %829 = vperm.xlu0 %1160, %v1378_v13  }
  0xad   : >> { %1140 = vset.pattern.permute.xlu1 %v1255_v18 }
  0xae   : >> { %813 = vperm.xlu1 %1140, %v567_v10  }
  0xb0   : >> { %1161 = vset.pattern.permute.xlu0 %v1256_v20 }
  0xb1   : >> { %850 = vperm.xlu0 %1161, %v567_v10   ;;  %v511_v10 = vmul.f32 %v1455_v60, %v1314_v0 }
  0xb2   : >> { %1141 = vset.pattern.permute.xlu1 %v1250_v9 }
  0xb3   : >> { %592 = vperm.xlu1 %1141, %v568_v11  }
  0xb5   : >> { %870 = vperm.xlu0 %1161, %v1382_v15  }
  0xb7   : >> { %1142 = vset.pattern.permute.xlu1 %v1249_v7 }
  0xb8   : >> { %632 = vperm.xlu1 %1142, %v568_v11  }
  0xbc   : >> { %1143 = vset.pattern.permute.xlu1 %v1251_v12 }
  0xbd   : >> { %669 = vperm.xlu1 %1143, %v568_v11  }
  0xc1   : >> { %1144 = vset.pattern.permute.xlu1 %v1252_v14 }
  0xc2   : >> { %706 = vperm.xlu1 %1144, %v568_v11  }
  0xc6   : >> { %1145 = vset.pattern.permute.xlu1 %v1253_v16 }
  0xc7   : >> { %743 = vperm.xlu1 %1145, %v568_v11  }
  0xcb   : >> { %1146 = vset.pattern.permute.xlu1 %v1254_v17 }
  0xcc   : >> { %780 = vperm.xlu1 %1146, %v568_v11  }
  0xd0   : >> { %1147 = vset.pattern.permute.xlu1 %v1255_v18 }
  0xd1   : >> { %817 = vperm.xlu1 %1147, %v568_v11  }
  0xd5   : >> { %1148 = vset.pattern.permute.xlu1 %v1256_v20 }
  0xd6   : >> { %854 = vperm.xlu1 %1148, %v568_v11   ;;  %v531_v11 = vmul.f32 1.442695, %v509_v2 }
  0xd8   : >> { %1174 = vpow2.f32 %v531_v11 }
  0xda   : >> { %1149 = vset.pattern.permute.xlu1 %v1250_v9 }
  0xdb   : >> { %605 = vperm.xlu1 %1149, %v1378_v13  }
  0xdf   : >> { %1151 = vset.pattern.permute.xlu1 %v1251_v12  ;;  %v1470_v12 = vrot.slane %v458_v62, %v1420_v41 }
  0xe0   : >> { %681 = vperm.xlu1 %1151, %v1378_v13  }
  0xe4   : >> { %1152 = vset.pattern.permute.xlu1 %v1252_v14 }
  0xe5   : >> { %718 = vperm.xlu1 %1152, %v1378_v13  }
  0xe9   : >> { %1153 = vset.pattern.permute.xlu1 %v1253_v16  ;;  %v535_v16 = vmul.f32 1.442695, %v511_v10  ;;  %v822_v10 = vsub.s32 6, %v1411_v36 }
  0xea   : >> { %755 = vperm.xlu1 %1153, %v1378_v13  }
  0xeb   : >> { %1176 = vpow2.f32 %v535_v16  ;;  %v504_v16 = vmul.f32 %v1424_v44, %v1319_v1 }
  0xee   : >> { %1154 = vset.pattern.permute.xlu1 %v1250_v9  ;;  %v637_v9 = vsub.s32 1, %v1411_v36 }
  0xef   : >> { %610 = vperm.xlu1 %1154, %v1382_v15  }
  0xf3   : >> { %1155 = vset.pattern.permute.xlu1 %v1249_v7  ;;  %v1464_v7 = vmul.f32 %v411_v39, %v1457_v61 }
  0xf4   : >> { %648 = vperm.xlu1 %1155, %v1382_v15  }
  0xf5   : >> { %v1529_v2 = vrot.slane %v1464_v7, %v785_v56 }
  0xf8   : >> { %1157 = vset.pattern.permute.xlu1 %v1252_v14  ;;  %v1169_v14 = vpop.eup %1168 }
  0xf9   : >> { %722 = vperm.xlu1 %1157, %v1382_v15   ;;  %v1171_v28 = vpop.eup %1170 }
  0xfa   : >> { %v1173_v35 = vpop.eup %1172 }
  0xfb   : >> { %v1175_v45 = vpop.eup %1174 }
  0xfc   : >> { %v1177_v52 = vpop.eup %1176 }
  0xfd   : >> { %1158 = vset.pattern.permute.xlu1 %v1254_v17  ;;  %v1479_v17 = vrot.slane %v1464_v7, %v1420_v41  ;;  %v748_v41 = vsub.s32 4, %v1411_v36 }
  0xfe   : >> { %792 = vperm.xlu1 %1158, %v1378_v13  }
  0xff   : >> { %v1518_v51 = vrot.slane %v1464_v7, %v748_v41 }
 0x102   : >> { %796 = vperm.xlu1 %1158, %v1382_v15  }
 0x106   : >> { %1162 = vset.pattern.permute.xlu1 %v1255_v18  ;;  %v513_v18 = vmul.f32 %v1470_v12, %v1314_v0 }
 0x107   : >> { %833 = vperm.xlu1 %1162, %v1382_v15   ;;  %v1475_v15 = vrot.slane %v1464_v7, %v637_v9 }
 0x108   : >> { %v539_v26 = vmul.f32 1.442695, %v513_v18 }
 0x10a   : >> { %1178 = vpow2.f32 %v539_v26 }
 0x10b   : >> { %1163 = vset.pattern.permute.xlu1 %v1256_v20  ;;  %v674_v20 = vsub.s32 2, %v1411_v36  ;;  %1180 = vpow2.f32 %v543_v34 }
 0x10c   : >> { %866 = vperm.xlu1 %1163, %v1378_v13   ;;  %v583_v13 = vmul.f32 %v1242_v5, %v1169_v14  ;;  %v711_v5 = vsub.s32 3, %v1411_v36  ;;  %1182 = vpow2.f32 %v547_v47 }
 0x10d   : >> { %v1493_v29 = vrot.slane %v1464_v7, %v674_v20  ;;  %v859_v20 = vsub.s32 7, %v1411_v36 }
 0x10e   : >> { %v1508_v40 = vrot.slane %v1464_v7, %v711_v5 }
 0x10f   : >> { %v1550_v44 = vrot.slane %v1464_v7, %v859_v20 }
 0x110   : >> { %v629_v22 = vpop.permute.xlu1 %628  ;;  %v588_v23 = vpop.permute.xlu0 %587 }
 0x111   : >> { %v639_v24 = vmul.f32 %v1475_v15, %v629_v22  ;;  %v599_v25 = vmul.f32 %v1479_v17, %v588_v23  ;;  %v1542_v22 = vrot.slane %v1464_v7, %v822_v10 }
 0x113   : >> { %v1498_v31 = vadd.f32 %v599_v25, %v583_v13  ;;  %v521_v25 = vmul.f32 1.442695, %v504_v16 }
 0x115   : >> { %v625_v32 = vmul.f32 %v1171_v28, %v1498_v31  ;;  %v666_v33 = vpop.permute.xlu1 %665  ;;  %1184 = vpow2.f32 %v521_v25 }
 0x116   : >> { %v676_v37 = vmul.f32 %v1493_v29, %v666_v33  ;;  %v506_v33 = vmul.f32 %v1432_v49, %v1319_v1 }
 0x117   : >> { %v1505_v39 = vadd.f32 %v639_v24, %v625_v32  ;;  %v1179_v8 = vpop.eup %1178 }
 0x118   : >> { %v1512_v43 = vpop.permute.xlu0 %644  ;;  %v1181_v13 = vpop.eup %1180  ;;  %v525_v38 = vmul.f32 1.442695, %v506_v33 }
 0x119   : >> { %v662_v42 = vmul.f32 %v1173_v35, %v1505_v39  ;;  %v1183_v5 = vpop.eup %1182 }
 0x11a   : >> { %v703_v46 = vpop.permute.xlu1 %702  ;;  %1186 = vpow2.f32 %v525_v38  ;;  %v516_v38 = vmul.f32 %v1484_v19, %v1319_v1 }
 0x11b   : >> { %v1514_v48 = vadd.f32 %v676_v37, %v662_v42  ;;  %v713_v50 = vmul.f32 %v1508_v40, %v703_v46  ;;  %v508_v42 = vmul.f32 %v1436_v53, %v1319_v1  ;;  %v512_v53 = vmul.f32 %v1455_v60, %v1319_v1 }
 0x11c   : >> { %v514_v60 = vmul.f32 %v1470_v12, %v1319_v1 }
 0x11d   : >> { %v699_v54 = vmul.f32 %v1175_v45, %v1514_v48  ;;  %v1521_v55 = vpop.permute.xlu0 %685  ;;  %v529_v46 = vmul.f32 1.442695, %v508_v42  ;;  %v537_v16 = vmul.f32 1.442695, %v512_v53 }
 0x11f   : >> { %v1524_v57 = vadd.f32 %v713_v50, %v699_v54  ;;  %v740_v58 = vpop.permute.xlu1 %739  ;;  %1188 = vpow2.f32 %v529_v46  ;;  %v545_v46 = vmul.f32 1.442695, %v516_v38 }
 0x120   : >> { %v750_v62 = vmul.f32 %v1518_v51, %v740_v58 }
 0x121   : >> { %v736_v63 = vmul.f32 %v1177_v52, %v1524_v57  ;;  %v510_v52 = vmul.f32 %v1445_v59, %v1319_v1 }
 0x122   : >> { %v1531_v9 = vpop.permute.xlu0 %759  ;;  %v1185_v47 = vpop.eup %1184 }
 0x123   : >> { %v1534_v11 = vadd.f32 %v750_v62, %v736_v63  ;;  %v584_v50 = vmul.f32 %v1238_v6, %v1185_v47  ;;  %v533_v58 = vmul.f32 1.442695, %v510_v52  ;;  %v518_v47 = vmul.f32 %v1496_v30, %v1319_v1 }
 0x124   : >> { %v777_v14 = vpop.permute.xlu1 %776 }
 0x125   : >> { %v773_v18 = vmul.f32 %v1179_v8, %v1534_v11  ;;  %v787_v21 = vmul.f32 %v1529_v2, %v777_v14  ;;  %1190 = vpow2.f32 %v533_v58 }
 0x126   : >> { %1192 = vpow2.f32 %v537_v16 }
 0x127   : >> { %v1544_v23 = vadd.f32 %v787_v21, %v773_v18  ;;  %v1546_v24 = vpop.permute.xlu0 %829  ;;  %v1187_v62 = vpop.eup %1186 }
 0x129   : >> { %v814_v26 = vpop.permute.xlu1 %813  ;;  %v810_v27 = vmul.f32 %v1181_v13, %v1544_v23 }
 0x12a   : >> { %v824_v28 = vmul.f32 %v1542_v22, %v814_v26 }
 0x12c   : >> { %v1553_v32 = vadd.f32 %v824_v28, %v810_v27  ;;  %v851_v36 = vpop.permute.xlu0 %850 }
 0x12d   : >> { %v861_v34 = vmul.f32 %v1550_v44, %v851_v36  ;;  %v541_v36 = vmul.f32 1.442695, %v514_v60 }
 0x12e   : >> { %v593_v35 = vpop.permute.xlu1 %592  ;;  %v847_v37 = vmul.f32 %v1183_v5, %v1553_v32 }
 0x12f   : >> { %v600_v49 = vmul.f32 %v1479_v17, %v593_v35  ;;  %v1189_v17 = vpop.eup %1188  ;;  %1194 = vpow2.f32 %v541_v36 }
 0x130   : >> { %v1559_v5 = vadd.f32 %v861_v34, %v847_v37   ;;  %1196 = vpow2.f32 %v545_v46 }
 0x131   : >> { %v602_v56 = vadd.f32 %v600_v49, %v584_v50  ;;  %v549_v49 = vmul.f32 1.442695, %v518_v47 }
 0x132   : >> { %v1652_v41 = vmov %v1559_v5  ;;  %v1191_v13 = vpop.eup %1190 }
 0x133   : >> { %v633_v7 = vpop.permute.xlu1 %632  ;;  %v626_v8 = vmul.f32 %v1187_v62, %v602_v56  ;;  %v1193_v5 = vpop.eup %1192  ;;  %1198 = vpow2.f32 %v549_v49  ;;  %909 = vst.msk [vmem:[#allocation2] sm:$0xff] (%p378_p5), %vm367_vm0, %v1652_v41 }
 0x134   : >> { %v640_v10 = vmul.f32 %v1475_v15, %v633_v7 }
 0x136   : >> { %v642_v6 = vadd.f32 %v640_v10, %v626_v8 }
 0x138   : >> { %v670_v45 = vpop.permute.xlu1 %669  ;;  %v663_v18 = vmul.f32 %v1189_v17, %v642_v6 }
 0x139   : >> { %v677_v21 = vmul.f32 %v1493_v29, %v670_v45 }
 0x13b   : >> { %v679_v20 = vadd.f32 %v677_v21, %v663_v18 }
 0x13c   : >> { %v1195_v62 = vpop.eup %1194 }
 0x13d   : >> { %v707_v54 = vpop.permute.xlu1 %706  ;;  %v700_v26 = vmul.f32 %v1191_v13, %v679_v20  ;;  %v689_v33 = vmul.f32 %v1521_v55, %v679_v20  ;;  %v1197_v60 = vpop.eup %1196 }
 0x13e   : >> { %v714_v15 = vmul.f32 %v1508_v40, %v707_v54 }
 0x13f   : >> { %v691_v12 = vsel %vm367_vm0, %v689_v33, 0.0 }
 0x140   : >> { %v716_v28 = vadd.f32 %v714_v15, %v700_v26 }
 0x142   : >> { %v744_v63 = vpop.permute.xlu1 %743  ;;  %v737_v34 = vmul.f32 %v1193_v5, %v716_v28 }
 0x143   : >> { %v751_v35 = vmul.f32 %v1518_v51, %v744_v63 }
 0x145   : >> { %v753_v42 = vadd.f32 %v751_v35, %v737_v34 }
 0x147   : >> { %v781_v14 = vpop.permute.xlu1 %780  ;;  %v763_v55 = vmul.f32 %v1531_v9, %v753_v42  ;;  %v774_v10 = vmul.f32 %v1195_v62, %v753_v42 }
 0x148   : >> { %v788_v53 = vmul.f32 %v1529_v2, %v781_v14 }
 0x149   : >> { %v765_v19 = vsel %vm367_vm0, %v763_v55, 0.0 }
 0x14a   : >> { %v790_v13 = vadd.f32 %v788_v53, %v774_v10 }
 0x14c   : >> { %v1571_v59 = vpop.permute.xlu1 %817 }
 0x151   : >> { %v1573_v25 = vpop.permute.xlu1 %854 }
 0x152   : >> { %v862_v49 = vmul.f32 %v1550_v44, %v1573_v25 }
 0x156   : >> { %v606_v27 = vpop.permute.xlu1 %605 }
 0x157   : >> { %v613_v52 = vmul.f32 %v606_v27, %v1498_v31 }
 0x159   : >> { %v616_v9 = vsel %vm367_vm0, %v613_v52, 0.0 }
 0x15b   : >> { %v682_v29 = vpop.permute.xlu1 %681 }
 0x15c   : >> { %v688_v37 = vmul.f32 %v682_v29, %v1514_v48  ;;  %v811_v29 = vmul.f32 %v1197_v60, %v790_v13 }
 0x15e   : >> { %v690_v40 = vsel %vm367_vm0, %v688_v37, 0.0 }
 0x15f   : >> { %v692_v7 = vadd.f32 %v691_v12, %v690_v40 }
 0x160   : >> { %v719_v45 = vpop.permute.xlu1 %718 }
 0x161   : >> { %v693_v8 = vrot.slane %v692_v7, 4  ;;  %v725_v27 = vmul.f32 %v719_v45, %v1524_v57  ;;  %v1199_v45 = vpop.eup %1198 }
 0x163   : >> { %v694_v18 = vadd.f32 %v693_v8, %v692_v7  ;;  %v727_v34 = vsel %vm367_vm0, %v725_v27, 0.0 }
 0x165   : >> { %v756_v51 = vpop.permute.xlu1 %755 }
 0x166   : >> { %v762_v48 = vmul.f32 %v756_v51, %v1534_v11  ;;  %v651_v11 = vmul.f32 %v1512_v43, %v1505_v39  ;;  %v695_v39 = vrot.slane %v694_v18, 2 }
 0x168   : >> { %v764_v50 = vsel %vm367_vm0, %v762_v48, 0.0  ;;  %v696_v40 = vadd.f32 %v695_v39, %v694_v18 }
 0x169   : >> { %v766_v54 = vadd.f32 %v765_v19, %v764_v50 }
 0x16a   : >> { %v611_v58 = vpop.permute.xlu1 %610  ;;  %v697_v51 = vrot.slane %v696_v40, 1 }
 0x16b   : >> { %v614_v63 = vmul.f32 %v611_v58, %v602_v56  ;;  %v767_v20 = vrot.slane %v766_v54, 4  ;;  %v653_v56 = vsel %vm367_vm0, %v651_v11, 0.0 }
 0x16c   : >> { %v698_v8 = vadd.f32 %v697_v51, %v696_v40  ;;  %v904_v51 = vmul.f32 %v1331_v4, %v1457_v61 }
 0x16d   : >> { %v617_v30 = vsel %vm367_vm0, %v614_v63, 0.0  ;;  %v768_v2 = vadd.f32 %v767_v20, %v766_v54 }
 0x16e   : >> { %v618_v16 = vadd.f32 %v617_v30, %v616_v9 }
 0x16f   : >> { %v649_v17 = vpop.permute.xlu1 %648  ;;  %v769_v57 = vrot.slane %v768_v2, 2 }
 0x170   : >> { %v619_v31 = vrot.slane %v618_v16, 4  ;;  %v652_v21 = vmul.f32 %v649_v17, %v642_v6  ;;  %v825_v6 = vmul.f32 %v1542_v22, %v1571_v59 }
 0x171   : >> { %v770_v59 = vadd.f32 %v769_v57, %v768_v2 }
 0x172   : >> { %v620_v26 = vadd.f32 %v619_v31, %v618_v16  ;;  %v654_v15 = vsel %vm367_vm0, %v652_v21, 0.0  ;;  %v827_v46 = vadd.f32 %v825_v6, %v811_v29  ;;  %v836_v16 = vmul.f32 %v1546_v24, %v1553_v32  ;;  %v871_v31 = vpop.permute.xlu0 %870 }
 0x173   : >> { %v655_v5 = vadd.f32 %v654_v15, %v653_v56 }
 0x174   : >> { %v621_v43 = vrot.slane %v620_v26, 2  ;;  %v723_v36 = vpop.permute.xlu1 %722  ;;  %v848_v52 = vmul.f32 %v1199_v45, %v827_v46  ;;  %v838_v15 = vsel %vm367_vm0, %v836_v16, 0.0 }
 0x175   : >> { %v656_v14 = vrot.slane %v655_v5, 4  ;;  %v726_v33 = vmul.f32 %v723_v36, %v716_v28 }
 0x176   : >> { %v622_v35 = vadd.f32 %v621_v43, %v620_v26  ;;  %v864_v17 = vadd.f32 %v862_v49, %v848_v52  }
 0x177   : >> { %v657_v37 = vadd.f32 %v656_v14, %v655_v5  ;;  %v728_v38 = vsel %vm367_vm0, %v726_v33, 0.0 }
 0x178   : >> { %v729_v12 = vadd.f32 %v728_v38, %v727_v34  ;;  %v623_v47 = vrot.slane %v622_v35, 1  ;;  %v874_v27 = vmul.f32 %v871_v31, %v864_v17  ;;  %910 = vst.msk [vmem:[#allocation2 + $0x8] sm:$0xff] (%p378_p5), %vm367_vm0, %v864_v17 }
 0x179   : >> { %v658_v7 = vrot.slane %v657_v37, 2  ;;  %v793_v42 = vpop.permute.xlu1 %792 }
 0x17a   : >> { %v730_v55 = vrot.slane %v729_v12, 4  ;;  %v799_v22 = vmul.f32 %v793_v42, %v1544_v23  ;;  %v624_v62 = vadd.f32 %v623_v47, %v622_v35  ;;  %v771_v23 = vrot.slane %v770_v59, 1 }
 0x17b   : >> { %v659_v28 = vadd.f32 %v658_v7, %v657_v37  ;;  %v876_v33 = vsel %vm367_vm0, %v874_v27, 0.0 }
 0x17c   : >> { %v731_v48 = vadd.f32 %v730_v55, %v729_v12  ;;  %v801_v30 = vsel %vm367_vm0, %v799_v22, 0.0 }
 0x17d   : >> { %v660_v50 = vrot.slane %v659_v28, 1  ;;  %v797_v19 = vpop.permute.xlu1 %796 }
 0x17e   : >> { %v732_v54 = vrot.slane %v731_v48, 2  ;;  %v800_v58 = vmul.f32 %v797_v19, %v790_v13  ;;  %v772_v13 = vadd.f32 %v771_v23, %v770_v59 }
 0x17f   : >> { %v661_v63 = vadd.f32 %v660_v50, %v659_v28 }
 0x180   : >> { %v733_v9 = vadd.f32 %v732_v54, %v731_v48  ;;  %v802_v11 = vsel %vm367_vm0, %v800_v58, 0.0 }
 0x181   : >> { %v885_v10 = vsel %vm884_vm3, %v624_v62, %v661_v63  ;;  %v803_v53 = vadd.f32 %v802_v11, %v801_v30 }
 0x182   : >> { %v734_v44 = vrot.slane %v733_v9, 1  ;;  %v887_v25 = vsel %vm886_vm4, %v885_v10, %v698_v8  ;;  %v834_v18 = vpop.permute.xlu1 %833 }
 0x183   : >> { %v804_v21 = vrot.slane %v803_v53, 4  ;;  %v837_v20 = vmul.f32 %v834_v18, %v827_v46 }
 0x184   : >> { %v735_v56 = vadd.f32 %v734_v44, %v733_v9 }
 0x185   : >> { %v805_v26 = vadd.f32 %v804_v21, %v803_v53  ;;  %v839_v60 = vsel %vm367_vm0, %v837_v20, 0.0 }
 0x186   : >> { %v889_v5 = vsel %vm888_vm5, %v887_v25, %v735_v56  ;;  %v840_v39 = vadd.f32 %v839_v60, %v838_v15 }
 0x187   : >> { %v806_v24 = vrot.slane %v805_v26, 2  ;;  %v891_v32 = vsel %vm890_vm6, %v889_v5, %v772_v13  ;;  %v867_v43 = vpop.permute.xlu1 %866  ;;  %v1654_v5 = vmov %v1652_v41 }
 0x188   : >> { %v841_v36 = vrot.slane %v840_v39, 4  ;;  %v873_v2 = vmul.f32 %v867_v43, %v1652_v41 }
 0x189   : >> { %v807_v14 = vadd.f32 %v806_v24, %v805_v26 }
 0x18a   : >> { %v842_v29 = vadd.f32 %v841_v36, %v840_v39  ;;  %v875_v6 = vsel %vm367_vm0, %v873_v2, 0.0 }
 0x18b   : >> { %v808_v34 = vrot.slane %v807_v14, 1  ;;  %v877_v35 = vadd.f32 %v876_v33, %v875_v6  ;;  %v1653_v6 = vmov %v864_v17 }
 0x18c   : >> { %v843_v37 = vrot.slane %v842_v29, 2 }
 0x18d   : >> { %v809_v38 = vadd.f32 %v808_v34, %v807_v14  ;;  %v878_v40 = vrot.slane %v877_v35, 4 }
 0x18e   : >> { %v844_v12 = vadd.f32 %v843_v37, %v842_v29 }
 0x18f   : >> { %v893_v57 = vsel %vm892_vm7, %v891_v32, %v809_v38  ;;  %v879_v7 = vadd.f32 %v878_v40, %v877_v35 }
 0x190   : >> { %v845_v42 = vrot.slane %v844_v12, 1 }
 0x191   : >> { %v880_v45 = vrot.slane %v879_v7, 2 }
 0x192   : >> { %v846_v46 = vadd.f32 %v845_v42, %v844_v12 }
 0x193   : >> { %v881_v55 = vadd.f32 %v880_v45, %v879_v7 }
 0x194   : >> { %v895_v47 = vsel %vm894_vm8, %v893_v57, %v846_v46 }
 0x195   : >> { %v882_v28 = vrot.slane %v881_v55, 1 }
 0x197   : >> { %v883_v48 = vadd.f32 %v882_v28, %v881_v55 }
 0x198   : > { %380 = sbr.rel (!%p378_p5) target bundleno = 21 (0x15), region = 95 }
 0x199   : >> { %v897_v22 = vsel %vm896_vm9, %v895_v47, %v883_v48 }
 0x19a   : >> { %v905_v59 = vadd.f32 %v904_v51, %v897_v22 }
 0x19c   : >> { %907 = vst.msk [vmem:[%s906_s17] sm:$0xff] %vm367_vm0, %v905_v59 }
 0x19d PF: > { %s16_s23 = sadd.s32 1, %s1234_s23   ;;  %s1655_s21 = smov %s1230_s22 }
 0x19e   : > { %p13_p6 = scmp.ge.s32.totalorder %s16_s23, 4   ;;  %s1656_s22 = smov %s1658_s24 }
 0x1a0   :  { %15 = sbr.rel (!%p13_p6) target bundleno = 2 (0x2), region = 106 }

// kernel: vss_stage_forward.23
= control target key start
LH: loop header
LB: loop body
LE: loop exit
PB: predicated region body
PF: predicated region fallthrough
CT: control target
= control target key end

     0   :  { %s1487_s24 = smov 0   ;;  %s1489_s25 = smov 0   ;;  %s1802_s0 = inlined_call_operand.vmem [shape: f32[2,64,64], index: 0, kind: input, shape index: {}]   ;;  %s1803_s1 = inlined_call_operand.vmem [shape: f32[2,2,64,64], index: 1, kind: input, shape index: {}]   ;;  %s1804_s2 = inlined_call_operand.vmem [shape: f32[2,2,64,32], index: 2, kind: input, shape index: {}]   ;;  %s1805_s3 = inlined_call_operand.vmem [shape: f32[2,16,64], index: 3, kind: input, shape index: {}]   ;;  %s1806_s4 = inlined_call_operand.vmem [shape: f32[2,1,64], index: 4, kind: input, shape index: {}]   ;;  %s1807_s5 = inlined_call_operand.vmem [shape: f32[2,1,64], index: 5, kind: input, shape index: {}]   ;;  %s1808_s6 = inlined_call_operand.vmem [shape: f32[2,64,64], index: 6, kind: input, shape index: {}, may-alias: {6,7}]   ;;  %s1809_s7 = inlined_call_operand.vmem [shape: f32[2,64,64], index: 7, kind: output, shape index: {}, may-alias: {6,7}]  }
   0x1   :  { %s1491_s26 = smov 0  }
   0x2 LB: > { %s29_s27 = sadd.s32 1, %s1419_s25  ;;  %p1233_p0 = scmp.ge.s32.totalorder %s1423_s26, 1  ;;  %s1423_s26 = sphi %s1491_s26, %s17_s26   ;;  %s1419_s25 = sphi %s1489_s25, %s1815_s25   ;;  %s1415_s24 = sphi %s1487_s24, %s1814_s24  }
   0x3   : > { %p31_p1 = scmp.ge.s32.totalorder %s29_s27, 2  ;;  %p332_p2 = scmp.lt.s32.totalorder %s1423_s26, 3 }
   0x5   : > { %s1817_s27 = smov (%p31_p1, %s29_s27), 0  ;;  %p333_p3 = pnand %p1233_p0, %p332_p2 }
   0x6   : > { %p411_p4 = scmp.lt.s32.totalorder (!%p333_p3), %s1415_s24, 1  ;;  %s1553_s9 = smov (!%p333_p3), 0  }
   0x7   : > { %336 = sbr.rel (%p333_p3) target bundleno = 417 (0x1a1), region = 48 }
   0xc   : > { %vm478_vm0 = vcmask 523264   ;;  %v1508_v0 = vld [vmem:[%s1805_s3 + $0x10] sm:$0xff]  ;;  %v1513_v1 = vld [vmem:[%s1805_s3 + $0x18] sm:$0xff]  ;;  %v1437_v2 = vmov 0.0   ;;  %v1520_v3 = vld [vmem:[%s1806_s4 + $0x1] ss:$0 sm:$0xff] }
   0xd   : > { %479 = vst.msk [vmem:[#allocation2] sm:$0xff] %vm478_vm0, %v1437_v2  ;;  %480 = vst.msk [vmem:[#allocation2 + $0x8] sm:$0xff] %vm478_vm0, %v1437_v2  ;;  %v1525_v4 = vld [vmem:[%s1807_s5 + $0x1] ss:$0 sm:$0xff]  ;;  %s1819_s24 = smov (!%p411_p4, %s1415_s24), 1 }
   0xe   : > { %s1527_s13 = sshll.u32 %s1819_s24, 6 }
   0xf   : > { %s418_s16 = scalar_lea.vmem %s1802_s0, %s1527_s13  ;;  %s1106_s19 = scalar_lea.vmem %s1803_s1, %s1527_s13 }
  0x10   : > { %s1111_s22 = scalar_lea.vmem %s1804_s2, %s1527_s13  ;;  %s459_s28 = scalar_lea.vmem %s1808_s6, %s1527_s13 }
  0x11   : > { %s471_s8 = scalar_lea.vmem %s1809_s7, %s1527_s13 }
  0x14   : > { %v485_v5 = vld [vmem:[#allocation2] sm:$0xff]   ;;  %v486_v6 = vld [vmem:[#allocation2 + $0x8] sm:$0xff]  }
  0x15 LB: >> { %v1438_v7 = vmov 6   ;;  %s495_s10 = ssub.s32 7, %s1435_s9  ;;  %v1439_v9 = vmov 7   ;;  %v1440_v12 = vmov 5   ;;  %v1441_v13 = vmov 0   ;;  %s492_s9 = sadd.s32 1, %s1435_s9   ;;  %s1435_s9 = sphi %s1553_s9, %s492_s9   ;;  %v1431_v5 = vphi %v485_v5, %v1813_v5   ;;  %v1427_v6 = vphi %v486_v6, %v1812_v6  }
  0x16   : >> { %1322 = vset.pattern.permute.xlu1 %v1438_v7  ;;  %s1566_s11 = sshll.u32 %s495_s10, 3  ;;  %v1442_v15 = vmov 4   ;;  %v1443_v16 = vmov 2   ;;  %v1444_v17 = vmov 3   ;;  %v1445_v19 = vmov 1   ;;  %p489_p5 = scmp.ge.s32.totalorder %s492_s9, 8  }
  0x17   : >> { %s1127_s15 = scalar_lea.vmem %s1111_s22, %s1566_s11  ;;  %s1124_s20 = scalar_lea.vmem %s1106_s19, %s1566_s11  ;;  %v1446_v32 = vmov 1966171168   ;;  %v530_v34 = vlaneseq  ;;  %vm996_vm3 = vcmask 1040384   ;;  %vm998_vm4 = vcmask 1041408  }
  0x18   : >> { %v1252_v8 = vld [vmem:[%s1127_s15 + $0x80] sm:$0xff]  ;;  %v528_v33 = vunpack.c.l.s4 %v1446_v32  ;;  %s497_s24 = scalar_lea.vmem %s418_s16, %s1566_s11  ;;  %vm1000_vm5 = vcmask 1042432   ;;  %vm1002_vm6 = vcmask 1043456   ;;  %vm1004_vm7 = vcmask 1044480   ;;  %s1018_s10 = scalar_lea.vmem %s459_s28, %s1566_s11 }
  0x19   : >> { %663 = vxpose.xlu0.b32.start.end [1/1] (short) (narrow) %v1252_v8, 32  ;;  %v1250_v20 = vld [vmem:[%s1124_s20 + $0x80] sm:$0xff]  ;;  %v1612_v37 = vshrl.u32 %v530_v34, 7  ;;  %vm1006_vm8 = vcmask 1045504   ;;  %vm1008_vm9 = vcmask 1046528   ;;  %s1021_s15 = scalar_lea.vmem %s471_s8, %s1566_s11 }
  0x1a   : >> { %v509_v21 = vadd.f32 %v1520_v3, %v1250_v20  ;;  %v529_v36 = vunpack.c.0.s8 %v528_v33  ;;  %v1655_v2 = vld [vmem:[%s497_s24] sm:$0xff] }
  0x1b   : >> { %v1630_v45 = vsub.s32 0, %v1612_v37 }
  0x1c   : >> { %v511_v22 = vmin.f32 %v509_v21, 20.0  ;;  %vm510_vm2 = vcmp.gt.f32.partialorder %v509_v21, 20.0  ;;  %v1617_v39 = vsub.s32 %v529_v36, %v1612_v37 }
  0x1e   : >> { %v512_v23 = vmul.f32 1.442695, %v511_v22 }
  0x20   : >> { %1353 = vpow2.f32 %v512_v23 }
  0x2d   : >> { %v1354_v24 = vpop.eup %1353 }
  0x2e   : >> { %v514_v25 = vadd.f32 1.0, %v1354_v24  ;;  %v517_v26 = vmul.f32 -0.5, %v1354_v24  ;;  %v520_v29 = vand.u32 2147483647, %v1354_v24 }
  0x30   : >> { %1355 = vlog2.f32 %v514_v25  ;;  %v518_v27 = vadd.f32 1.0, %v517_v26  ;;  %vm521_vm1 = vcmp.lt.f32.partialorder %v520_v29, 0.0004427343  ;;  %v749_v29 = vsub.s32 6, %v1612_v37 }
  0x32   : >> { %v519_v31 = vmul.f32 %v1354_v24, %v518_v27 }
  0x3d   : >> { %v1356_v28 = vpop.eup %1355 }
  0x3e   : >> { %v516_v30 = vmul.f32 0.6931472, %v1356_v28 }
  0x40   : >> { %v522_v35 = vsel %vm521_vm1, %v519_v31, %v516_v30 }
  0x41   : >> { %v523_v38 = vsel %vm510_vm2, %v509_v21, %v522_v35 }
  0x42   : >> { %1321 = vset.pattern.permute.xlu0 %v1439_v9  ;;  %v526_v40 = vcombine.high %v523_v38, %v523_v38  ;;  %v533_v62 = vrot.slane %v523_v38, %v1617_v39 }
  0x44   : >> { %v540_v41 = vrot.slane %v526_v40, %v1617_v39  ;;  %v549_v32 = vrot.slane %v533_v62, %v1617_v39 }
  0x46   : >> { %v542_v42 = vcombine.high %v540_v41, %v540_v41  ;;  %v556_v47 = vrot.slane %v540_v41, %v1617_v39 }
  0x48   : >> { %v570_v43 = vrot.slane %v542_v42, %v1617_v39  ;;  %v572_v50 = vcombine.high %v556_v47, %v556_v47 }
  0x4a   : >> { %v574_v46 = vcombine.high %v570_v43, %v570_v43  ;;  %v602_v54 = vrot.slane %v572_v50, %v1630_v45  ;;  %v598_v60 = vrot.slane %v570_v43, %v1630_v45 }
  0x4c   : >> { %v606_v48 = vrot.slane %v574_v46, %v1630_v45  ;;  %v627_v58 = vmul.f32 %v1508_v0, %v602_v54  ;;  %v628_v59 = vmul.f32 %v1513_v1, %v602_v54  ;;  %v625_v8 = vmul.f32 %v1508_v0, %v598_v60 }
  0x4d   : >> { %v571_v46 = vcombine.high %v549_v32, %v549_v32 }
  0x4e   : >> { %v629_v51 = vmul.f32 %v1508_v0, %v606_v48  ;;  %v630_v53 = vmul.f32 %v1513_v1, %v606_v48  ;;  %v655_v63 = vmul.f32 1.442695, %v627_v58 }
  0x50   : >> { %v659_v55 = vmul.f32 1.442695, %v629_v51  ;;  %v661_v56 = vmul.f32 1.442695, %v630_v53  ;;  %v786_v51 = vsub.s32 5, %v1612_v37 }
  0x52   : >> { %1357 = vpow2.f32 %v659_v55 }
  0x53   : >> { %1359 = vpow2.f32 %v661_v56  ;;  %v586_v56 = vrot.slane %v571_v46, %v1630_v45 }
  0x54   : >> { %1361 = vpow2.f32 %v655_v63 }
  0x95   : >> { %v679_v10 = vpop.trf.xlu0 }
  0x96   : >> { %740 = vperm.xlu1 %1322, %v679_v10   ;;  %699 = vperm.xlu0 %1321, %v679_v10  }
  0x99   : >> { %v680_v11 = vpop.trf.xlu0 }
  0x9a   : >> { %1323 = vset.pattern.permute.xlu1 %v1440_v12  ;;  %1336 = vset.pattern.permute.xlu0 %v1441_v13 }
  0x9b   : >> { %777 = vperm.xlu1 %1323, %v679_v10   ;;  %966 = vperm.xlu0 %1336, %v680_v11  }
  0x9d   : >> { %v1577_v14 = vpop.trf.xlu0 }
  0x9f   : >> { %1324 = vset.pattern.permute.xlu1 %v1442_v15  ;;  %978 = vperm.xlu0 %1336, %v1577_v14  }
  0xa0   : >> { %814 = vperm.xlu1 %1324, %v679_v10  }
  0xa1   : >> { %v1582_v18 = vpop.trf.xlu0 }
  0xa3   : >> { %1339 = vset.pattern.permute.xlu0 %v1443_v16 }
  0xa4   : >> { %1325 = vset.pattern.permute.xlu1 %v1444_v17  ;;  %904 = vperm.xlu0 %1339, %v1577_v14  }
  0xa5   : >> { %851 = vperm.xlu1 %1325, %v679_v10  }
  0xa8   : >> { %1345 = vset.pattern.permute.xlu0 %v1444_v17 }
  0xa9   : >> { %1326 = vset.pattern.permute.xlu1 %v1443_v16  ;;  %871 = vperm.xlu0 %1345, %v1582_v18  }
  0xaa   : >> { %888 = vperm.xlu1 %1326, %v679_v10  }
  0xad   : >> { %1347 = vset.pattern.permute.xlu0 %v1440_v12 }
  0xae   : >> { %1327 = vset.pattern.permute.xlu1 %v1445_v19  ;;  %793 = vperm.xlu0 %1347, %v1577_v14  }
  0xaf   : >> { %925 = vperm.xlu1 %1327, %v679_v10  }
  0xb2   : >> { %1350 = vset.pattern.permute.xlu0 %v1438_v7 }
  0xb3   : >> { %1328 = vset.pattern.permute.xlu1 %v1441_v13  ;;  %760 = vperm.xlu0 %1350, %v1582_v18  }
  0xb4   : >> { %962 = vperm.xlu1 %1328, %v679_v10   ;;  %v541_v10 = vcombine.high %v533_v62, %v533_v62 }
  0xb7   : >> { %1352 = vset.pattern.permute.xlu0 %v1441_v13 }
  0xb8   : >> { %1329 = vset.pattern.permute.xlu1 %v1439_v9 }
  0xb9   : >> { %704 = vperm.xlu1 %1329, %v680_v11  }
  0xbd   : >> { %1330 = vset.pattern.permute.xlu1 %v1438_v7 }
  0xbe   : >> { %744 = vperm.xlu1 %1330, %v680_v11  }
  0xc2   : >> { %1331 = vset.pattern.permute.xlu1 %v1440_v12 }
  0xc3   : >> { %781 = vperm.xlu1 %1331, %v680_v11  }
  0xc7   : >> { %1332 = vset.pattern.permute.xlu1 %v1442_v15 }
  0xc8   : >> { %818 = vperm.xlu1 %1332, %v680_v11  }
  0xcc   : >> { %1333 = vset.pattern.permute.xlu1 %v1444_v17 }
  0xcd   : >> { %855 = vperm.xlu1 %1333, %v680_v11  }
  0xd1   : >> { %1334 = vset.pattern.permute.xlu1 %v1443_v16 }
  0xd2   : >> { %892 = vperm.xlu1 %1334, %v680_v11  }
  0xd6   : >> { %1335 = vset.pattern.permute.xlu1 %v1445_v19 }
  0xd7   : >> { %929 = vperm.xlu1 %1335, %v680_v11   ;;  %v709_v11 = vsub.s32 7, %v1612_v37 }
  0xdb   : >> { %1337 = vset.pattern.permute.xlu1 %v1439_v9 }
  0xdc   : >> { %717 = vperm.xlu1 %1337, %v1577_v14  }
  0xe0   : >> { %1338 = vset.pattern.permute.xlu1 %v1445_v19 }
  0xe1   : >> { %941 = vperm.xlu1 %1338, %v1577_v14  }
  0xe5   : >> { %1340 = vset.pattern.permute.xlu1 %v1444_v17  ;;  %v594_v17 = vrot.slane %v556_v47, %v1630_v45 }
  0xe6   : >> { %867 = vperm.xlu1 %1340, %v1577_v14  }
  0xe7   : >> { %v623_v25 = vmul.f32 %v1508_v0, %v594_v17  ;;  %v624_v28 = vmul.f32 %v1513_v1, %v594_v17 }
  0xe9   : >> { %v647_v34 = vmul.f32 1.442695, %v623_v25 }
  0xea   : >> { %1341 = vset.pattern.permute.xlu1 %v1442_v15 }
  0xeb   : >> { %830 = vperm.xlu1 %1341, %v1577_v14  }
  0xef   : >> { %1342 = vset.pattern.permute.xlu1 %v1445_v19 }
  0xf0   : >> { %945 = vperm.xlu1 %1342, %v1582_v18  }
  0xf4   : >> { %1343 = vset.pattern.permute.xlu1 %v1441_v13  ;;  %v626_v13 = vmul.f32 %v1513_v1, %v598_v60 }
  0xf5   : >> { %982 = vperm.xlu1 %1343, %v1582_v18  }
  0xf6   : >> { %v653_v21 = vmul.f32 1.442695, %v626_v13  ;;  %v620_v13 = vmul.f32 %v1513_v1, %v586_v56 }
  0xf9   : >> { %1344 = vset.pattern.permute.xlu1 %v1443_v16 }
  0xfa   : >> { %908 = vperm.xlu1 %1344, %v1582_v18  }
  0xfe   : >> { %1346 = vset.pattern.permute.xlu1 %v1442_v15  ;;  %v563_v15 = vrot.slane %v541_v10, %v1617_v39 }
  0xff   : >> { %834 = vperm.xlu1 %1346, %v1582_v18  }
 0x100   : >> { %v573_v26 = vcombine.high %v563_v15, %v563_v15  ;;  %v582_v17 = vrot.slane %v563_v15, %v1630_v45 }
 0x103   : >> { %1348 = vset.pattern.permute.xlu1 %v1440_v12 }
 0x104   : >> { %797 = vperm.xlu1 %1348, %v1582_v18  }
 0x108   : >> { %1349 = vset.pattern.permute.xlu1 %v1438_v7  ;;  %v657_v7 = vmul.f32 1.442695, %v628_v59 }
 0x109   : >> { %756 = vperm.xlu1 %1349, %v1577_v14   ;;  %v651_v14 = vmul.f32 1.442695, %v625_v8 }
 0x10a   : >> { %1363 = vpow2.f32 %v657_v7 }
 0x10b   : >> { %1365 = vpow2.f32 %v651_v14 }
 0x10c   : >> { %1367 = vpow2.f32 %v653_v21 }
 0x10d   : >> { %1351 = vset.pattern.permute.xlu1 %v1439_v9  ;;  %v1659_v9 = vmul.f32 %v523_v38, %v1655_v2  ;;  %v649_v38 = vmul.f32 1.442695, %v624_v28  ;;  %1369 = vpow2.f32 %v647_v34 }
 0x10e   : >> { %722 = vperm.xlu1 %1351, %v1582_v18   ;;  %v1358_v18 = vpop.eup %1357 }
 0x10f   : >> { %v710_v16 = vrot.slane %v1659_v9, %v709_v11  ;;  %v1360_v22 = vpop.eup %1359  ;;  %v695_v23 = vmul.f32 %v1431_v5, %v1358_v18  ;;  %v590_v5 = vrot.slane %v573_v26, %v1630_v45  ;;  %1371 = vpow2.f32 %v649_v38 }
 0x110   : >> { %v696_v27 = vmul.f32 %v1427_v6, %v1360_v22  ;;  %v1362_v35 = vpop.eup %1361  ;;  %v750_v6 = vrot.slane %v1659_v9, %v749_v29  ;;  %v787_v63 = vrot.slane %v1659_v9, %v786_v51 }
 0x111   : >> { %v1627_v44 = vpop.permute.xlu1 %740  ;;  %v700_v19 = vpop.permute.xlu0 %699  ;;  %v621_v43 = vmul.f32 %v1508_v0, %v590_v5  ;;  %v622_v48 = vmul.f32 %v1513_v1, %v590_v5 }
 0x112   : >> { %v711_v24 = vmul.f32 %v710_v16, %v700_v19  ;;  %v751_v50 = vmul.f32 %v750_v6, %v1627_v44  ;;  %v619_v44 = vmul.f32 %v1508_v0, %v586_v56 }
 0x113   : >> { %v643_v55 = vmul.f32 1.442695, %v621_v43  ;;  %v645_v60 = vmul.f32 1.442695, %v622_v48 }
 0x114   : >> { %v1676_v33 = vadd.f32 %v711_v24, %v695_v23  ;;  %v639_v19 = vmul.f32 1.442695, %v619_v44  ;;  %v641_v23 = vmul.f32 1.442695, %v620_v13 }
 0x115   : >> { %1373 = vpow2.f32 %v643_v55 }
 0x116   : >> { %v1634_v49 = vpop.permute.xlu1 %777  ;;  %v737_v42 = vmul.f32 %v1362_v35, %v1676_v33  ;;  %1375 = vpow2.f32 %v645_v60 }
 0x117   : >> { %v1364_v40 = vpop.eup %1363  ;;  %v788_v14 = vmul.f32 %v787_v63, %v1634_v49  ;;  %v860_v49 = vsub.s32 3, %v1612_v37  ;;  %1377 = vpow2.f32 %v639_v19 }
 0x118   : >> { %v1366_v53 = vpop.eup %1365  ;;  %v1688_v54 = vadd.f32 %v751_v50, %v737_v42  ;;  %1379 = vpow2.f32 %v641_v23 }
 0x119   : >> { %v1368_v62 = vpop.eup %1367  ;;  %v861_v38 = vrot.slane %v1659_v9, %v860_v49 }
 0x11a   : >> { %v774_v7 = vmul.f32 %v1366_v53, %v1688_v54  ;;  %v1370_v21 = vpop.eup %1369 }
 0x11b   : >> { %v1637_v52 = vpop.permute.xlu1 %814 }
 0x11c   : >> { %v1701_v18 = vadd.f32 %v788_v14, %v774_v7  ;;  %v1372_v24 = vpop.eup %1371 }
 0x11e   : >> { %v811_v28 = vmul.f32 %v1370_v21, %v1701_v18 }
 0x120   : >> { %v1641_v57 = vpop.permute.xlu1 %851 }
 0x125   : >> { %v1652_v61 = vpop.permute.xlu1 %888 }
 0x12a   : >> { %v1662_v12 = vpop.permute.xlu1 %925 }
 0x12f   : >> { %v1668_v20 = vpop.permute.xlu1 %962 }
 0x134   : >> { %v705_v30 = vpop.permute.xlu1 %704 }
 0x135   : >> { %v712_v31 = vmul.f32 %v710_v16, %v705_v30  ;;  %v823_v16 = vsub.s32 4, %v1612_v37  ;;  %v618_v30 = vmul.f32 %v1513_v1, %v582_v17 }
 0x137   : >> { %v1679_v36 = vadd.f32 %v712_v31, %v696_v27  ;;  %v824_v25 = vrot.slane %v1659_v9, %v823_v16  ;;  %v617_v27 = vmul.f32 %v1508_v0, %v582_v17  ;;  %v637_v42 = vmul.f32 1.442695, %v618_v30 }
 0x139   : >> { %v745_v41 = vpop.permute.xlu1 %744  ;;  %v738_v47 = vmul.f32 %v1364_v40, %v1679_v36  ;;  %v825_v31 = vmul.f32 %v824_v25, %v1637_v52  ;;  %v635_v34 = vmul.f32 1.442695, %v617_v27  ;;  %v578_v40 = vrot.slane %v549_v32, %v1630_v45 }
 0x13a   : >> { %v752_v39 = vmul.f32 %v750_v6, %v745_v41  ;;  %v1374_v6 = vpop.eup %1373  ;;  %v897_v52 = vsub.s32 2, %v1612_v37 }
 0x13b   : >> { %v1712_v35 = vadd.f32 %v825_v31, %v811_v28  ;;  %v1376_v43 = vpop.eup %1375  ;;  %1381 = vpow2.f32 %v635_v34  ;;  %v616_v32 = vmul.f32 %v1513_v1, %v578_v40 }
 0x13c   : >> { %v1691_v59 = vadd.f32 %v752_v39, %v738_v47  ;;  %v862_v39 = vmul.f32 %v861_v38, %v1641_v57  ;;  %v615_v47 = vmul.f32 %v1508_v0, %v578_v40  ;;  %1383 = vpow2.f32 %v637_v42 }
 0x13d   : >> { %v848_v46 = vmul.f32 %v1374_v6, %v1712_v35  ;;  %v898_v55 = vrot.slane %v1659_v9, %v897_v52  ;;  %v633_v57 = vmul.f32 1.442695, %v616_v32 }
 0x13e   : >> { %v782_v58 = vpop.permute.xlu1 %781  ;;  %v775_v8 = vmul.f32 %v1368_v62, %v1691_v59  ;;  %v631_v56 = vmul.f32 1.442695, %v615_v47 }
 0x13f   : >> { %v789_v10 = vmul.f32 %v787_v63, %v782_v58  ;;  %v864_v53 = vadd.f32 %v862_v39, %v848_v46  ;;  %v1378_v58 = vpop.eup %1377  ;;  %v899_v44 = vmul.f32 %v898_v55, %v1652_v61 }
 0x140   : >> { %v1380_v63 = vpop.eup %1379  ;;  %1385 = vpow2.f32 %v631_v56 }
 0x141   : >> { %v1703_v22 = vadd.f32 %v789_v10, %v775_v8  ;;  %v885_v7 = vmul.f32 %v1378_v58, %v864_v53  ;;  %v934_v8 = vsub.s32 1, %v1612_v37  ;;  %1387 = vpow2.f32 %v633_v57 }
 0x142   : >> { %v972_v37 = vrot.slane %v1659_v9, %v1630_v45 }
 0x143   : >> { %v819_v11 = vpop.permute.xlu1 %818  ;;  %v812_v15 = vmul.f32 %v1372_v24, %v1703_v22  ;;  %v901_v16 = vadd.f32 %v899_v44, %v885_v7  ;;  %v935_v17 = vrot.slane %v1659_v9, %v934_v8 }
 0x144   : >> { %v826_v29 = vmul.f32 %v824_v25, %v819_v11 }
 0x145   : >> { %v936_v25 = vmul.f32 %v935_v17, %v1662_v12 }
 0x146   : >> { %v1716_v41 = vadd.f32 %v826_v29, %v812_v15 }
 0x148   : >> { %v856_v26 = vpop.permute.xlu1 %855  ;;  %v849_v50 = vmul.f32 %v1376_v43, %v1716_v41  ;;  %v1382_v14 = vpop.eup %1381 }
 0x149   : >> { %v863_v51 = vmul.f32 %v861_v38, %v856_v26  ;;  %v1384_v21 = vpop.eup %1383  ;;  %v922_v24 = vmul.f32 %v1382_v14, %v901_v16  ;;  %v967_v26 = vpop.permute.xlu0 %966 }
 0x14a   : >> { %v974_v6 = vmul.f32 %v972_v37, %v967_v26 }
 0x14b   : >> { %v865_v60 = vadd.f32 %v863_v51, %v849_v50  ;;  %v938_v28 = vadd.f32 %v936_v25, %v922_v24 }
 0x14d   : >> { %v893_v5 = vpop.permute.xlu1 %892  ;;  %v886_v10 = vmul.f32 %v1380_v63, %v865_v60  ;;  %v1386_v15 = vpop.eup %1385 }
 0x14e   : >> { %v900_v11 = vmul.f32 %v898_v55, %v893_v5  ;;  %v1388_v30 = vpop.eup %1387  ;;  %v979_v31 = vpop.permute.xlu0 %978  ;;  %v959_v34 = vmul.f32 %v1386_v15, %v938_v28  ;;  %v973_v5 = vmul.f32 %v972_v37, %v1668_v20 }
 0x150   : >> { %v902_v19 = vadd.f32 %v900_v11, %v886_v10  ;;  %v1734_v5 = vadd.f32 %v973_v5, %v959_v34  }
 0x152   : >> { %v930_v48 = vpop.permute.xlu1 %929  ;;  %v923_v61 = vmul.f32 %v1384_v21, %v902_v19  ;;  %v1810_v12 = vmov %v1734_v5  ;;  %v905_v42 = vpop.permute.xlu0 %904 }
 0x153   : >> { %v937_v27 = vmul.f32 %v935_v17, %v930_v48  ;;  %v985_v39 = vmul.f32 %v979_v31, %v1810_v12  ;;  %v911_v48 = vmul.f32 %v905_v42, %v901_v16  ;;  %1024 = vst.msk [vmem:[#allocation2] sm:$0xff] (%p489_p5), %vm478_vm0, %v1810_v12 }
 0x155   : >> { %v939_v29 = vadd.f32 %v937_v27, %v923_v61  ;;  %v987_v55 = vsel %vm478_vm0, %v985_v39, 0.0  ;;  %v913_v7 = vsel %vm478_vm0, %v911_v48, 0.0 }
 0x156   : >> { %v872_v50 = vpop.permute.xlu0 %871 }
 0x157   : >> { %v1725_v62 = vpop.permute.xlu1 %717  ;;  %v960_v40 = vmul.f32 %v1388_v30, %v939_v29  ;;  %v875_v63 = vmul.f32 %v872_v50, %v865_v60 }
 0x158   : >> { %v725_v39 = vmul.f32 %v1725_v62, %v1676_v33 }
 0x159   : >> { %v1736_v6 = vadd.f32 %v974_v6, %v960_v40  }
 0x15a   : >> { %v794_v14 = vpop.permute.xlu0 %793 }
 0x15b   : >> { %v1811_v43 = vmov %v1736_v6 }
 0x15c   : >> { %v942_v13 = vpop.permute.xlu1 %941  ;;  %1025 = vst.msk [vmem:[#allocation2 + $0x8] sm:$0xff] (%p489_p5), %vm478_vm0, %v1811_v43 }
 0x15d   : >> { %v948_v52 = vmul.f32 %v942_v13, %v938_v28 }
 0x15e   : >> { %v761_v27 = vpop.permute.xlu0 %760 }
 0x15f   : >> { %v950_v57 = vsel %vm478_vm0, %v948_v52, 0.0  ;;  %v764_v31 = vmul.f32 %v761_v27, %v1691_v59 }
 0x161   : >> { %v868_v23 = vpop.permute.xlu1 %867 }
 0x162   : >> { %v874_v51 = vmul.f32 %v868_v23, %v864_v53 }
 0x164   : >> { %v876_v13 = vsel %vm478_vm0, %v874_v51, 0.0 }
 0x166   : >> { %v831_v49 = vpop.permute.xlu1 %830 }
 0x167   : >> { %v837_v8 = vmul.f32 %v831_v49, %v1712_v35  ;;  %v800_v35 = vmul.f32 %v794_v14, %v1701_v18 }
 0x169   : >> { %v839_v60 = vsel %vm478_vm0, %v837_v8, 0.0  ;;  %v802_v30 = vsel %vm478_vm0, %v800_v35, 0.0 }
 0x16b   : >> { %v946_v38 = vpop.permute.xlu1 %945 }
 0x16c   : >> { %v949_v9 = vmul.f32 %v946_v38, %v939_v29 }
 0x16e   : >> { %v951_v32 = vsel %vm478_vm0, %v949_v9, 0.0 }
 0x16f   : >> { %v952_v10 = vadd.f32 %v951_v32, %v950_v57 }
 0x170   : >> { %v983_v46 = vpop.permute.xlu1 %982 }
 0x171   : >> { %v986_v45 = vmul.f32 %v983_v46, %v1811_v43  ;;  %v953_v24 = vrot.slane %v952_v10, 4 }
 0x173   : >> { %v988_v47 = vsel %vm478_vm0, %v986_v45, 0.0  ;;  %v954_v29 = vadd.f32 %v953_v24, %v952_v10 }
 0x174   : >> { %v989_v58 = vadd.f32 %v988_v47, %v987_v55 }
 0x175   : >> { %v909_v20 = vpop.permute.xlu1 %908  ;;  %v955_v46 = vrot.slane %v954_v29, 2 }
 0x176   : >> { %v912_v56 = vmul.f32 %v909_v20, %v902_v19  ;;  %v990_v16 = vrot.slane %v989_v58, 4  ;;  %v877_v19 = vsel %vm478_vm0, %v875_v63, 0.0 }
 0x177   : >> { %v878_v23 = vadd.f32 %v877_v19, %v876_v13  ;;  %v956_v32 = vadd.f32 %v955_v46, %v954_v29 }
 0x178   : >> { %v914_v44 = vsel %vm478_vm0, %v912_v56, 0.0  ;;  %v991_v61 = vadd.f32 %v990_v16, %v989_v58 }
 0x179   : >> { %v915_v11 = vadd.f32 %v914_v44, %v913_v7  ;;  %v957_v10 = vrot.slane %v956_v32, 1 }
 0x17a   : >> { %v835_v53 = vpop.permute.xlu1 %834  ;;  %v992_v5 = vrot.slane %v991_v61, 2 }
 0x17b   : >> { %v838_v17 = vmul.f32 %v835_v53, %v1716_v41  ;;  %v916_v21 = vrot.slane %v915_v11, 4  ;;  %v879_v41 = vrot.slane %v878_v23, 4 }
 0x17c   : >> { %v993_v52 = vadd.f32 %v992_v5, %v991_v61 }
 0x17d   : >> { %v840_v25 = vsel %vm478_vm0, %v838_v17, 0.0  ;;  %v917_v28 = vadd.f32 %v916_v21, %v915_v11  ;;  %v880_v42 = vadd.f32 %v879_v41, %v878_v23  ;;  %v958_v23 = vadd.f32 %v957_v10, %v956_v32 }
 0x17e   : >> { %v841_v26 = vadd.f32 %v840_v25, %v839_v60  ;;  %v994_v63 = vrot.slane %v993_v52, 1 }
 0x17f   : >> { %v798_v37 = vpop.permute.xlu1 %797  ;;  %v918_v40 = vrot.slane %v917_v28, 2  ;;  %v881_v51 = vrot.slane %v880_v42, 2 }
 0x180   : >> { %v842_v49 = vrot.slane %v841_v26, 4  ;;  %v801_v15 = vmul.f32 %v798_v37, %v1703_v22  ;;  %v766_v22 = vsel %vm478_vm0, %v764_v31, 0.0  ;;  %v995_v14 = vadd.f32 %v994_v63, %v993_v52 }
 0x181   : >> { %v919_v48 = vadd.f32 %v918_v40, %v917_v28  ;;  %v882_v8 = vadd.f32 %v881_v51, %v880_v42  ;;  %v1019_v40 = vld [vmem:[%s1018_s10] sm:$0xff] }
 0x182   : >> { %v803_v34 = vsel %vm478_vm0, %v801_v15, 0.0  ;;  %v843_v18 = vadd.f32 %v842_v49, %v841_v26  ;;  %v997_v35 = vsel %vm996_vm3, %v995_v14, %v958_v23 }
 0x183   : >> { %v804_v38 = vadd.f32 %v803_v34, %v802_v30  ;;  %v920_v7 = vrot.slane %v919_v48, 1  ;;  %v883_v21 = vrot.slane %v882_v8, 1  ;;  %v1016_v30 = vmul.f32 %v1525_v4, %v1655_v2 }
 0x184   : >> { %v757_v6 = vpop.permute.xlu1 %756  ;;  %v844_v50 = vrot.slane %v843_v18, 2 }
 0x185   : >> { %v805_v45 = vrot.slane %v804_v38, 4  ;;  %v763_v9 = vmul.f32 %v757_v6, %v1688_v54  ;;  %v728_v54 = vsel %vm478_vm0, %v725_v39, 0.0  ;;  %v921_v17 = vadd.f32 %v920_v7, %v919_v48 }
 0x186   : >> { %v845_v44 = vadd.f32 %v844_v50, %v843_v18  ;;  %v884_v37 = vadd.f32 %v883_v21, %v882_v8 }
 0x187   : >> { %v806_v47 = vadd.f32 %v805_v45, %v804_v38  ;;  %v765_v59 = vsel %vm478_vm0, %v763_v9, 0.0  ;;  %v999_v27 = vsel %vm998_vm4, %v997_v35, %v921_v17 }
 0x188   : >> { %v767_v20 = vadd.f32 %v766_v22, %v765_v59  ;;  %v846_v19 = vrot.slane %v845_v44, 1  ;;  %v1001_v41 = vsel %vm1000_vm5, %v999_v27, %v884_v37 }
 0x189   : >> { %v807_v55 = vrot.slane %v806_v47, 2  ;;  %v723_v56 = vpop.permute.xlu1 %722 }
 0x18a   : >> { %v768_v58 = vrot.slane %v767_v20, 4  ;;  %v726_v57 = vmul.f32 %v723_v56, %v1679_v36  ;;  %v847_v61 = vadd.f32 %v846_v19, %v845_v44 }
 0x18b   : >> { %v808_v11 = vadd.f32 %v807_v55, %v806_v47 }
 0x18c   : >> { %v769_v33 = vadd.f32 %v768_v58, %v767_v20  ;;  %v729_v62 = vsel %vm478_vm0, %v726_v57, 0.0  ;;  %v1003_v31 = vsel %vm1002_vm6, %v1001_v41, %v847_v61 }
 0x18d   : >> { %v730_v13 = vadd.f32 %v729_v62, %v728_v54  ;;  %v809_v60 = vrot.slane %v808_v11, 1 }
 0x18e   : >> { %v770_v53 = vrot.slane %v769_v33, 2 }
 0x18f   : >> { %v731_v16 = vrot.slane %v730_v13, 4  ;;  %v810_v28 = vadd.f32 %v809_v60, %v808_v11 }
 0x190   : >> { %v771_v36 = vadd.f32 %v770_v53, %v769_v33 }
 0x191   : >> { %v732_v24 = vadd.f32 %v731_v16, %v730_v13  ;;  %v1005_v34 = vsel %vm1004_vm7, %v1003_v31, %v810_v28 }
 0x192   : >> { %v772_v25 = vrot.slane %v771_v36, 1 }
 0x193   : >> { %v733_v26 = vrot.slane %v732_v24, 2 }
 0x194   : >> { %v773_v15 = vadd.f32 %v772_v25, %v771_v36 }
 0x195   : >> { %v734_v49 = vadd.f32 %v733_v26, %v732_v24 }
 0x196   : >> { %v1007_v38 = vsel %vm1006_vm8, %v1005_v34, %v773_v15 }
 0x197   : >> { %v735_v29 = vrot.slane %v734_v49, 1 }
 0x199   : >> { %v736_v5 = vadd.f32 %v735_v29, %v734_v49 }
 0x19b   : >> { %v1009_v18 = vsel %vm1008_vm9, %v1007_v38, %v736_v5  ;;  %v1813_v5 = vmov %v1810_v12 }
 0x19c   : >> { %v1017_v6 = vadd.f32 %v1016_v30, %v1009_v18  ;;  %491 = sbr.rel (!%p489_p5) target bundleno = 21 (0x15), region = 112 }
 0x19e   : >> { %v1020_v42 = vadd.f32 %v1019_v40, %v1017_v6  ;;  %v1812_v6 = vmov %v1811_v43 }
 0x1a0   : >> { %1022 = vst.msk [vmem:[%s1021_s15] sm:$0xff] %vm478_vm0, %v1020_v42 }
 0x1a1 PF: > { %s17_s26 = sadd.s32 1, %s1423_s26   ;;  %s1814_s24 = smov %s1419_s25 }
 0x1a2   : > { %p14_p6 = scmp.ge.s32.totalorder %s17_s26, 4   ;;  %s1815_s25 = smov %s1817_s27 }
 0x1a4   :  { %16 = sbr.rel (!%p14_p6) target bundleno = 2 (0x2), region = 123 }

// kernel: vss_stage_forward.27
= control target key start
LH: loop header
LB: loop body
LE: loop exit
PB: predicated region body
PF: predicated region fallthrough
CT: control target
= control target key end

     0   :  { %vm38_vm0 = vcmask 261120   ;;  %vm358_vm1 = vcmask 257024   ;;  %s1062_s0 = inlined_call_operand.vmem [shape: f32[128,32], index: 0, kind: input, shape index: {}]   ;;  %s1063_s3 = inlined_call_operand.vmem [shape: bf16[32,128], index: 3, kind: input, shape index: {}]   ;;  %s1064_s1 = inlined_call_operand.vmem [shape: f32[1,32], index: 1, kind: input, shape index: {}]   ;;  %s1065_s2 = inlined_call_operand.vmem [shape: f32[1,32], index: 2, kind: input, shape index: {}]   ;;  %s1066_s4 = inlined_call_operand.vmem [shape: f32[128,128], index: 4, kind: output, shape index: {}]  }
   0x1   :  { %v22_v0 = vld [vmem:[%s1062_s0] sm:$0xff]  ;;  %v23_v2 = vld [vmem:[%s1062_s0 + $0x8] sm:$0xff]  ;;  %v24_v8 = vld [vmem:[%s1062_s0 + $0x10] sm:$0xff] }
   0x2   :  { %v30_v1 = vld [vmem:[%s1062_s0 + $0x40] sm:$0xff]  ;;  %v39_v3 = vsel %vm38_vm0, %v22_v0, 0.0  ;;  %v31_v5 = vld [vmem:[%s1062_s0 + $0x48] sm:$0xff]  ;;  %v42_v6 = vsel %vm38_vm0, %v23_v2, 0.0  ;;  %v25_v9 = vld [vmem:[%s1062_s0 + $0x18] sm:$0xff]  ;;  %v45_v10 = vsel %vm38_vm0, %v24_v8, 0.0 }
   0x3   :  { %v63_v4 = vsel %vm38_vm0, %v30_v1, 0.0  ;;  %40 = vadd.xlane.f32.xlu0 %v39_v3  ;;  %v66_v7 = vsel %vm38_vm0, %v31_v5, 0.0  ;;  %v48_v11 = vsel %vm38_vm0, %v25_v9, 0.0  ;;  %v769_v12 = vld [vmem:[%s1062_s0 + $0x50] sm:$0xff]  ;;  %v774_v13 = vld [vmem:[%s1062_s0 + $0x58] sm:$0xff]  ;;  %v783_v16 = vld [vmem:[%s1062_s0 + $0x20] sm:$0xff] }
   0x4   :  { %64 = vadd.xlane.f32.xlu1 %v63_v4  ;;  %v69_v14 = vsel %vm38_vm0, %v769_v12, 0.0  ;;  %v72_v15 = vsel %vm38_vm0, %v774_v13, 0.0  ;;  %v788_v17 = vld [vmem:[%s1062_s0 + $0x28] sm:$0xff]  ;;  %v51_v18 = vsel %vm38_vm0, %v783_v16, 0.0  ;;  %v797_v20 = vld [vmem:[%s1062_s0 + $0x60] sm:$0xff]  ;;  %v811_v24 = vld [vmem:[%s1062_s0 + $0x30] sm:$0xff] }
   0x5   :  { %v54_v19 = vsel %vm38_vm0, %v788_v17, 0.0  ;;  %v802_v21 = vld [vmem:[%s1062_s0 + $0x68] sm:$0xff]  ;;  %v75_v22 = vsel %vm38_vm0, %v797_v20, 0.0  ;;  %v816_v25 = vld [vmem:[%s1062_s0 + $0x38] sm:$0xff]  ;;  %v57_v26 = vsel %vm38_vm0, %v811_v24, 0.0  ;;  %v825_v28 = vld [vmem:[%s1062_s0 + $0x70] sm:$0xff] }
   0x6   :  { %v78_v23 = vsel %vm38_vm0, %v802_v21, 0.0  ;;  %v60_v27 = vsel %vm38_vm0, %v816_v25, 0.0  ;;  %v830_v29 = vld [vmem:[%s1062_s0 + $0x78] sm:$0xff]  ;;  %v81_v30 = vsel %vm38_vm0, %v825_v28, 0.0 }
   0x7   :  { %43 = vadd.xlane.f32.xlu0 %v42_v6  ;;  %v84_v31 = vsel %vm38_vm0, %v830_v29, 0.0 }
   0x8   :  { %67 = vadd.xlane.f32.xlu1 %v66_v7 }
   0xb   :  { %46 = vadd.xlane.f32.xlu0 %v45_v10 }
   0xc   :  { %49 = vadd.xlane.f32.xlu1 %v48_v11 }
   0xf   :  { %70 = vadd.xlane.f32.xlu0 %v69_v14 }
  0x10   :  { %73 = vadd.xlane.f32.xlu1 %v72_v15 }
  0x13   :  { %52 = vadd.xlane.f32.xlu0 %v51_v18 }
  0x14   :  { %55 = vadd.xlane.f32.xlu1 %v54_v19 }
  0x17   :  { %76 = vadd.xlane.f32.xlu0 %v75_v22 }
  0x18   :  { %79 = vadd.xlane.f32.xlu1 %v78_v23 }
  0x1b   :  { %58 = vadd.xlane.f32.xlu0 %v57_v26 }
  0x1c   :  { %61 = vadd.xlane.f32.xlu1 %v60_v27 }
  0x1f   :  { %82 = vadd.xlane.f32.xlu0 %v81_v30 }
  0x20   :  { %85 = vadd.xlane.f32.xlu1 %v84_v31 }
  0x8c   :  { %v41_v32 = vpop.xlane.xlu0 %40 }
  0x8d   :  { %v65_v33 = vpop.xlane.xlu1 %64  ;;  %v88_v34 = vmul.f32 0.03125, %v41_v32 }
  0x8e   :  { %v96_v35 = vmul.f32 0.03125, %v65_v33 }
  0x8f   :  { %v836_v36 = vsub.f32 %v22_v0, %v88_v34 }
  0x90   :  { %v838_v37 = vsub.f32 %v30_v1, %v96_v35  ;;  %v44_v38 = vpop.xlane.xlu0 %43 }
  0x91   :  { %v68_v39 = vpop.xlane.xlu1 %67  ;;  %v89_v40 = vmul.f32 0.03125, %v44_v38  ;;  %v120_v42 = vmul.f32 %v836_v36, %v836_v36 }
  0x92   :  { %v97_v41 = vmul.f32 0.03125, %v68_v39  ;;  %v128_v43 = vmul.f32 %v838_v37, %v838_v37 }
  0x93   :  { %v844_v44 = vsub.f32 %v23_v2, %v89_v40  ;;  %v136_v46 = vsel %vm38_vm0, %v120_v42, 0.0 }
  0x94   :  { %v846_v45 = vsub.f32 %v31_v5, %v97_v41  ;;  %137 = vadd.xlane.f32.xlu0 %v136_v46  ;;  %v47_v47 = vpop.xlane.xlu0 %46  ;;  %v160_v49 = vsel %vm38_vm0, %v128_v43, 0.0 }
  0x95   :  { %v50_v48 = vpop.xlane.xlu1 %49  ;;  %v90_v50 = vmul.f32 0.03125, %v47_v47  ;;  %v121_v52 = vmul.f32 %v844_v44, %v844_v44 }
  0x96   :  { %v91_v51 = vmul.f32 0.03125, %v50_v48  ;;  %v129_v53 = vmul.f32 %v846_v45, %v846_v45 }
  0x97   :  { %v854_v54 = vsub.f32 %v24_v8, %v90_v50  ;;  %v139_v56 = vsel %vm38_vm0, %v121_v52, 0.0 }
  0x98   :  { %v856_v55 = vsub.f32 %v25_v9, %v91_v51  ;;  %161 = vadd.xlane.f32.xlu0 %v160_v49  ;;  %140 = vadd.xlane.f32.xlu1 %v139_v56  ;;  %v71_v57 = vpop.xlane.xlu0 %70  ;;  %v163_v59 = vsel %vm38_vm0, %v129_v53, 0.0  ;;  %v677_v53 = vld [vmem:[%s1063_s3] sm:$0xff]  }
  0x99   :  { %v74_v58 = vpop.xlane.xlu1 %73  ;;  %v98_v60 = vmul.f32 0.03125, %v71_v57  ;;  %v122_v62 = vmul.f32 %v854_v54, %v854_v54 }
  0x9a   :  { %v99_v61 = vmul.f32 0.03125, %v74_v58  ;;  %v123_v63 = vmul.f32 %v856_v55, %v856_v55 }
  0x9b   :  { %v865_v0 = vsub.f32 %v769_v12, %v98_v60  ;;  %v142_v2 = vsel %vm38_vm0, %v122_v62, 0.0 }
  0x9c   :  { %v868_v1 = vsub.f32 %v774_v13, %v99_v61  ;;  %164 = vadd.xlane.f32.xlu1 %v163_v59  ;;  %143 = vadd.xlane.f32.xlu0 %v142_v2  ;;  %v53_v3 = vpop.xlane.xlu0 %52  ;;  %v145_v5 = vsel %vm38_vm0, %v123_v63, 0.0 }
  0x9d   :  { %v56_v4 = vpop.xlane.xlu1 %55  ;;  %v92_v6 = vmul.f32 0.03125, %v53_v3  ;;  %v130_v8 = vmul.f32 %v865_v0, %v865_v0 }
  0x9e   :  { %v93_v7 = vmul.f32 0.03125, %v56_v4  ;;  %v131_v9 = vmul.f32 %v868_v1, %v868_v1 }
  0x9f   :  { %v877_v10 = vsub.f32 %v783_v16, %v92_v6  ;;  %v166_v12 = vsel %vm38_vm0, %v130_v8, 0.0 }
  0xa0   :  { %v880_v11 = vsub.f32 %v788_v17, %v93_v7  ;;  %146 = vadd.xlane.f32.xlu1 %v145_v5  ;;  %167 = vadd.xlane.f32.xlu0 %v166_v12  ;;  %v77_v13 = vpop.xlane.xlu0 %76  ;;  %v169_v15 = vsel %vm38_vm0, %v131_v9, 0.0 }
  0xa1   :  { %v80_v14 = vpop.xlane.xlu1 %79  ;;  %v100_v18 = vmul.f32 0.03125, %v77_v13  ;;  %v124_v22 = vmul.f32 %v877_v10, %v877_v10 }
  0xa2   :  { %v101_v19 = vmul.f32 0.03125, %v80_v14  ;;  %v125_v16 = vmul.f32 %v880_v11, %v880_v11 }
  0xa3   :  { %v889_v23 = vsub.f32 %v797_v20, %v100_v18  ;;  %v148_v26 = vsel %vm38_vm0, %v124_v22, 0.0 }
  0xa4   :  { %v892_v17 = vsub.f32 %v802_v21, %v101_v19  ;;  %170 = vadd.xlane.f32.xlu1 %v169_v15  ;;  %149 = vadd.xlane.f32.xlu0 %v148_v26  ;;  %v59_v27 = vpop.xlane.xlu0 %58  ;;  %v151_v31 = vsel %vm38_vm0, %v125_v16, 0.0 }
  0xa5   :  { %v62_v30 = vpop.xlane.xlu1 %61  ;;  %v94_v32 = vmul.f32 0.03125, %v59_v27  ;;  %v132_v34 = vmul.f32 %v889_v23, %v889_v23 }
  0xa6   :  { %v95_v33 = vmul.f32 0.03125, %v62_v30  ;;  %v133_v20 = vmul.f32 %v892_v17, %v892_v17  ;;  %v935_v30 = vld [vmem:[%s1064_s1] ss:$0 sm:$0xff] }
  0xa7   :  { %v901_v35 = vsub.f32 %v811_v24, %v94_v32  ;;  %v172_v38 = vsel %vm38_vm0, %v132_v34, 0.0  ;;  %v941_v34 = vld [vmem:[%s1065_s2] ss:$0 sm:$0xff] }
  0xa8   :  { %v904_v21 = vsub.f32 %v816_v25, %v95_v33  ;;  %152 = vadd.xlane.f32.xlu1 %v151_v31  ;;  %173 = vadd.xlane.f32.xlu0 %v172_v38  ;;  %v83_v39 = vpop.xlane.xlu0 %82  ;;  %v175_v41 = vsel %vm38_vm0, %v133_v20, 0.0 }
  0xa9   :  { %v86_v40 = vpop.xlane.xlu1 %85  ;;  %v102_v42 = vmul.f32 0.03125, %v83_v39  ;;  %v126_v46 = vmul.f32 %v901_v35, %v901_v35 }
  0xaa   :  { %v103_v43 = vmul.f32 0.03125, %v86_v40  ;;  %v127_v24 = vmul.f32 %v904_v21, %v904_v21 }
  0xab   :  { %v913_v47 = vsub.f32 %v825_v28, %v102_v42  ;;  %v154_v48 = vsel %vm38_vm0, %v126_v46, 0.0 }
  0xac   :  { %v916_v25 = vsub.f32 %v830_v29, %v103_v43  ;;  %176 = vadd.xlane.f32.xlu1 %v175_v41  ;;  %155 = vadd.xlane.f32.xlu0 %v154_v48  ;;  %v157_v49 = vsel %vm38_vm0, %v127_v24, 0.0  ;;  %v675_v29 = vld [vmem:[%s1063_s3 + $0x8] sm:$0xff]  }
  0xad   :  { %v134_v50 = vmul.f32 %v913_v47, %v913_v47  ;;  %651 = vmatprep.subr.bf16.mxu0 %v675_v29  ;;  %671 = vmatprep.subr.bf16.mxu1 %v675_v29 }
  0xae   :  { %v135_v51 = vmul.f32 %v916_v25, %v916_v25  ;;  %652 = vmatpush3.bf16.msra.mxu0 %v675_v29  ;;  %673 = vmatpush3.bf16.msra.mxu1 %v675_v29 }
  0xaf   :  { %v178_v52 = vsel %vm38_vm0, %v134_v50, 0.0  ;;  %653 = vmatprep.subr.bf16.mxu0 %v677_v53  ;;  %672 = vmatprep.subr.bf16.mxu1 %v677_v53 }
  0xb0   :  { %158 = vadd.xlane.f32.xlu1 %v157_v49  ;;  %179 = vadd.xlane.f32.xlu0 %v178_v52  ;;  %v181_v28 = vsel %vm38_vm0, %v135_v51, 0.0 }
  0xb2   :  { %654 = vmatpush3.bf16.msra.mxu0 %v677_v53  ;;  %674 = vmatpush3.bf16.msra.mxu1 %v677_v53 }
  0xb4   :  { %182 = vadd.xlane.f32.xlu1 %v181_v28 }
 0x11d   :  { %v138_v56 = vpop.xlane.xlu0 %137 }
 0x11e   :  { %v184_v57 = vmul.f32 0.03125, %v138_v56 }
 0x120   :  { %v200_v58 = vadd.f32 1e-06, %v184_v57 }
 0x121   :  { %v141_v59 = vpop.xlane.xlu1 %140  ;;  %v162_v60 = vpop.xlane.xlu0 %161 }
 0x122   :  { %685 = vrsqrt.f32 %v200_v58  ;;  %v185_v61 = vmul.f32 0.03125, %v141_v59  ;;  %v192_v62 = vmul.f32 0.03125, %v162_v60 }
 0x124   :  { %v201_v63 = vadd.f32 1e-06, %v185_v61  ;;  %v208_v2 = vadd.f32 1e-06, %v192_v62 }
 0x125   :  { %v165_v3 = vpop.xlane.xlu1 %164  ;;  %v144_v4 = vpop.xlane.xlu0 %143 }
 0x126   :  { %687 = vrsqrt.f32 %v201_v63  ;;  %v193_v5 = vmul.f32 0.03125, %v165_v3  ;;  %v186_v6 = vmul.f32 0.03125, %v144_v4 }
 0x127   :  { %689 = vrsqrt.f32 %v208_v2 }
 0x128   :  { %v209_v7 = vadd.f32 1e-06, %v193_v5  ;;  %v202_v8 = vadd.f32 1e-06, %v186_v6 }
 0x129   :  { %v147_v9 = vpop.xlane.xlu1 %146  ;;  %v168_v12 = vpop.xlane.xlu0 %167 }
 0x12a   :  { %691 = vrsqrt.f32 %v209_v7  ;;  %v187_v13 = vmul.f32 0.03125, %v147_v9  ;;  %v194_v14 = vmul.f32 0.03125, %v168_v12 }
 0x12b   :  { %693 = vrsqrt.f32 %v202_v8 }
 0x12c   :  { %v203_v15 = vadd.f32 1e-06, %v187_v13  ;;  %v210_v18 = vadd.f32 1e-06, %v194_v14 }
 0x12d   :  { %v171_v19 = vpop.xlane.xlu1 %170  ;;  %v150_v22 = vpop.xlane.xlu0 %149 }
 0x12e   :  { %695 = vrsqrt.f32 %v203_v15  ;;  %v195_v16 = vmul.f32 0.03125, %v171_v19  ;;  %v188_v26 = vmul.f32 0.03125, %v150_v22 }
 0x12f   :  { %v686_v27 = vpop.eup %685  ;;  %697 = vrsqrt.f32 %v210_v18 }
 0x130   :  { %v232_v31 = vmul.f32 %v686_v27, %v836_v36  ;;  %v211_v32 = vadd.f32 1e-06, %v195_v16  ;;  %v204_v33 = vadd.f32 1e-06, %v188_v26 }
 0x131   :  { %v153_v20 = vpop.xlane.xlu1 %152  ;;  %v174_v38 = vpop.xlane.xlu0 %173 }
 0x132   :  { %v255_v39 = vmul.f32 %v935_v30, %v232_v31  ;;  %699 = vrsqrt.f32 %v211_v32  ;;  %v189_v40 = vmul.f32 0.03125, %v153_v20  ;;  %v196_v41 = vmul.f32 0.03125, %v174_v38 }
 0x133   :  { %v688_v42 = vpop.eup %687  ;;  %701 = vrsqrt.f32 %v204_v33 }
 0x134   :  { %v690_v43 = vpop.eup %689  ;;  %v278_v46 = vadd.f32 %v941_v34, %v255_v39  ;;  %v233_v36 = vmul.f32 %v688_v42, %v844_v44  ;;  %v205_v24 = vadd.f32 1e-06, %v189_v40  ;;  %v212_v48 = vadd.f32 1e-06, %v196_v41 }
 0x135   :  { %v240_v49 = vmul.f32 %v690_v43, %v838_v37  ;;  %v177_v50 = vpop.xlane.xlu1 %176  ;;  %v156_v51 = vpop.xlane.xlu0 %155 }
 0x136   :  { %v625_v52 = vpack.c.bf16 %v278_v46, %v278_v46  ;;  %v256_v28 = vmul.f32 %v935_v30, %v233_v36  ;;  %703 = vrsqrt.f32 %v205_v24  ;;  %v197_v29 = vmul.f32 0.03125, %v177_v50 }
 0x137   :  { %v692_v53 = vpop.eup %691  ;;  %v263_v56 = vmul.f32 %v935_v30, %v240_v49  ;;  %705 = vrsqrt.f32 %v212_v48  ;;  %v190_v57 = vmul.f32 0.03125, %v156_v51 }
 0x138   :  { %v694_v58 = vpop.eup %693  ;;  %359 = vst.msk [vmem:[#allocation2] sm:$0xf] %vm358_vm1, %v625_v52  ;;  %v279_v44 = vadd.f32 %v941_v34, %v256_v28  ;;  %v241_v59 = vmul.f32 %v692_v53, %v846_v45  ;;  %v213_v37 = vadd.f32 1e-06, %v197_v29 }
 0x139   :  { %v286_v60 = vadd.f32 %v941_v34, %v263_v56  ;;  %v234_v61 = vmul.f32 %v694_v58, %v854_v54  ;;  %v206_v62 = vadd.f32 1e-06, %v190_v57  ;;  %v159_v63 = vpop.xlane.xlu1 %158  ;;  %v180_v2 = vpop.xlane.xlu0 %179 }
 0x13a   :  { %v626_v3 = vpack.c.bf16 %v279_v44, %v279_v44  ;;  %v264_v4 = vmul.f32 %v935_v30, %v241_v59  ;;  %707 = vrsqrt.f32 %v213_v37  ;;  %v191_v5 = vmul.f32 0.03125, %v159_v63 }
 0x13b   :  { %v696_v6 = vpop.eup %695  ;;  %v633_v7 = vpack.c.bf16 %v286_v60, %v286_v60  ;;  %v257_v8 = vmul.f32 %v935_v30, %v234_v61  ;;  %709 = vrsqrt.f32 %v206_v62  ;;  %v198_v9 = vmul.f32 0.03125, %v180_v2 }
 0x13c   :  { %v698_v45 = vpop.eup %697  ;;  %360 = vst.msk [vmem:[#allocation2 + $0x4] sm:$0xf] %vm358_vm1, %v626_v3  ;;  %v287_v12 = vadd.f32 %v941_v34, %v264_v4  ;;  %v235_v54 = vmul.f32 %v696_v6, %v856_v55  ;;  %v207_v13 = vadd.f32 1e-06, %v191_v5 }
 0x13d   :  { %367 = vst.msk [vmem:[#allocation2 + $0x20] sm:$0xf] %vm358_vm1, %v633_v7  ;;  %v280_v14 = vadd.f32 %v941_v34, %v257_v8  ;;  %v242_v15 = vmul.f32 %v698_v45, %v865_v0  ;;  %v214_v18 = vadd.f32 1e-06, %v198_v9  ;;  %v183_v19 = vpop.xlane.xlu1 %182 }
 0x13e   :  { %v634_v22 = vpack.c.bf16 %v287_v12, %v287_v12  ;;  %v258_v16 = vmul.f32 %v935_v30, %v235_v54  ;;  %711 = vrsqrt.f32 %v207_v13  ;;  %v199_v26 = vmul.f32 0.03125, %v183_v19 }
 0x13f   :  { %v700_v27 = vpop.eup %699  ;;  %v627_v31 = vpack.c.bf16 %v280_v14, %v280_v14  ;;  %v265_v32 = vmul.f32 %v935_v30, %v242_v15  ;;  %713 = vrsqrt.f32 %v214_v18 }
 0x140   :  { %v702_v55 = vpop.eup %701  ;;  %368 = vst.msk [vmem:[#allocation2 + $0x24] sm:$0xf] %vm358_vm1, %v634_v22  ;;  %v281_v33 = vadd.f32 %v941_v34, %v258_v16  ;;  %v243_v20 = vmul.f32 %v700_v27, %v868_v1  ;;  %v215_v0 = vadd.f32 1e-06, %v199_v26 }
 0x141   :  { %361 = vst.msk [vmem:[#allocation2 + $0x8] sm:$0xf] %vm358_vm1, %v627_v31  ;;  %v288_v38 = vadd.f32 %v941_v34, %v265_v32  ;;  %v236_v39 = vmul.f32 %v702_v55, %v877_v10 }
 0x142   :  { %v628_v40 = vpack.c.bf16 %v281_v33, %v281_v33  ;;  %v266_v41 = vmul.f32 %v935_v30, %v243_v20  ;;  %715 = vrsqrt.f32 %v215_v0 }
 0x143   :  { %v704_v42 = vpop.eup %703  ;;  %v635_v43 = vpack.c.bf16 %v288_v38, %v288_v38  ;;  %v259_v46 = vmul.f32 %v935_v30, %v236_v39  ;;  %v676_v36 = vld [vmem:[#allocation2] sm:$0xff]  }
 0x144   :  { %v706_v24 = vpop.eup %705  ;;  %362 = vst.msk [vmem:[#allocation2 + $0xc] sm:$0xf] %vm358_vm1, %v628_v40  ;;  %v289_v1 = vadd.f32 %v941_v34, %v266_v41  ;;  %v237_v48 = vmul.f32 %v704_v42, %v880_v11  ;;  %655 = vmatprep.mubr.msk.bf16.mxu0 %vm38_vm0, %v676_v36 }
 0x145   :  { %369 = vst.msk [vmem:[#allocation2 + $0x28] sm:$0xf] %vm358_vm1, %v635_v43  ;;  %v282_v10 = vadd.f32 %v941_v34, %v259_v46  ;;  %v244_v49 = vmul.f32 %v706_v24, %v889_v23 }
 0x146   :  { %v636_v50 = vpack.c.bf16 %v289_v1, %v289_v1  ;;  %v260_v51 = vmul.f32 %v935_v30, %v237_v48 }
 0x147   :  { %v708_v52 = vpop.eup %707  ;;  %v629_v28 = vpack.c.bf16 %v282_v10, %v282_v10  ;;  %v267_v29 = vmul.f32 %v935_v30, %v244_v49  ;;  %v678_v53 = vld [vmem:[#allocation2 + $0x20] sm:$0xff]  }
 0x148   :  { %v710_v56 = vpop.eup %709  ;;  %370 = vst.msk [vmem:[#allocation2 + $0x2c] sm:$0xf] %vm358_vm1, %v636_v50  ;;  %v283_v11 = vadd.f32 %v941_v34, %v260_v51  ;;  %v245_v57 = vmul.f32 %v708_v52, %v892_v17  ;;  %663 = vmatprep.mubr.msk.bf16.mxu1 %vm38_vm0, %v678_v53 }
 0x149   :  { %363 = vst.msk [vmem:[#allocation2 + $0x10] sm:$0xf] %vm358_vm1, %v629_v28  ;;  %v290_v23 = vadd.f32 %v941_v34, %v267_v29  ;;  %v238_v58 = vmul.f32 %v710_v56, %v901_v35 }
 0x14a   :  { %v630_v44 = vpack.c.bf16 %v283_v11, %v283_v11  ;;  %v268_v59 = vmul.f32 %v935_v30, %v245_v57 }
 0x14b   :  { %v712_v37 = vpop.eup %711  ;;  %v637_v60 = vpack.c.bf16 %v290_v23, %v290_v23  ;;  %v261_v61 = vmul.f32 %v935_v30, %v238_v58  ;;  %v679_v62 = vld [vmem:[#allocation2 + $0x8] sm:$0xff]  }
 0x14c   :  { %v714_v63 = vpop.eup %713  ;;  %364 = vst.msk [vmem:[#allocation2 + $0x14] sm:$0xf] %vm358_vm1, %v630_v44  ;;  %v291_v17 = vadd.f32 %v941_v34, %v268_v59  ;;  %v239_v2 = vmul.f32 %v712_v37, %v904_v21  ;;  %656 = vmatmul.mubr.msk.bf16.vlgmr.msra.gmra.mxu0 %vm38_vm0, %v679_v62 }
 0x14d   :  { %371 = vst.msk [vmem:[#allocation2 + $0x30] sm:$0xf] %vm358_vm1, %v637_v60  ;;  %v284_v35 = vadd.f32 %v941_v34, %v261_v61  ;;  %v246_v3 = vmul.f32 %v714_v63, %v913_v47 }
 0x14e   :  { %v638_v4 = vpack.c.bf16 %v291_v17, %v291_v17  ;;  %v262_v5 = vmul.f32 %v935_v30, %v239_v2 }
 0x14f   :  { %v716_v6 = vpop.eup %715  ;;  %v631_v7 = vpack.c.bf16 %v284_v35, %v284_v35  ;;  %v269_v8 = vmul.f32 %v935_v30, %v246_v3  ;;  %v680_v9 = vld [vmem:[#allocation2 + $0x28] sm:$0xff]  }
 0x150   :  { %372 = vst.msk [vmem:[#allocation2 + $0x34] sm:$0xf] %vm358_vm1, %v638_v4  ;;  %v285_v21 = vadd.f32 %v941_v34, %v262_v5  ;;  %v247_v45 = vmul.f32 %v716_v6, %v916_v25  ;;  %664 = vmatmul.mubr.msk.bf16.vlgmr.msra.gmra.mxu1 %vm38_vm0, %v680_v9 }
 0x151   :  { %365 = vst.msk [vmem:[#allocation2 + $0x18] sm:$0xf] %vm358_vm1, %v631_v7  ;;  %v292_v47 = vadd.f32 %v941_v34, %v269_v8 }
 0x152   :  { %v632_v12 = vpack.c.bf16 %v285_v21, %v285_v21  ;;  %v270_v54 = vmul.f32 %v935_v30, %v247_v45 }
 0x153   :  { %v639_v13 = vpack.c.bf16 %v292_v47, %v292_v47  ;;  %v681_v14 = vld [vmem:[#allocation2 + $0x10] sm:$0xff]  }
 0x154   :  { %366 = vst.msk [vmem:[#allocation2 + $0x1c] sm:$0xf] %vm358_vm1, %v632_v12  ;;  %v293_v15 = vadd.f32 %v941_v34, %v270_v54  ;;  %659 = vmatprep.mubr.msk.bf16.mxu0 %vm38_vm0, %v681_v14 }
 0x155   :  { %373 = vst.msk [vmem:[#allocation2 + $0x38] sm:$0xf] %vm358_vm1, %v639_v13 }
 0x156   :  { %v640_v25 = vpack.c.bf16 %v293_v15, %v293_v15 }
 0x157   :  { %v682_v18 = vld [vmem:[#allocation2 + $0x30] sm:$0xff]  }
 0x158   :  { %374 = vst.msk [vmem:[#allocation2 + $0x3c] sm:$0xf] %vm358_vm1, %v640_v25  ;;  %667 = vmatprep.mubr.msk.bf16.mxu1 %vm38_vm0, %v682_v18 }
 0x15b   :  { %v683_v19 = vld [vmem:[#allocation2 + $0x18] sm:$0xff]  }
 0x15c   :  { %660 = vmatmul.mubr.msk.bf16.gmra.mxu0 %vm38_vm0, %v683_v19 }
 0x15f   :  { %v684_v30 = vld [vmem:[#allocation2 + $0x38] sm:$0xff]  }
 0x160   :  { %668 = vmatmul.mubr.msk.bf16.gmra.mxu1 %vm38_vm0, %v684_v30 }
 0x20c   :  { %v657_v22 = vpop.f32.mrf.mxu0 }
 0x20d   :  { %571 = vst [vmem:[%s1066_s4 + $0x10] sm:$0xff] %v657_v22 }
 0x20e   :  { %v506_v34 = vpop.f32.mrf.mxu0 }
 0x20f   :  { %569 = vst [vmem:[%s1066_s4] sm:$0xff] %v506_v34 }
 0x210   :  { %v658_v16 = vpop.f32.mrf.mxu0  ;;  %v665_v26 = vpop.f32.mrf.mxu1 }
 0x211   :  { %572 = vst [vmem:[%s1066_s4 + $0x18] sm:$0xff] %v658_v16  ;;  %579 = vst [vmem:[%s1066_s4 + $0x50] sm:$0xff] %v665_v26 }
 0x212   :  { %v509_v27 = vpop.f32.mrf.mxu0  ;;  %v538_v31 = vpop.f32.mrf.mxu1 }
 0x213   :  { %570 = vst [vmem:[%s1066_s4 + $0x8] sm:$0xff] %v509_v27  ;;  %577 = vst [vmem:[%s1066_s4 + $0x40] sm:$0xff] %v538_v31 }
 0x214   :  { %v666_v32 = vpop.f32.mrf.mxu1 }
 0x215   :  { %580 = vst [vmem:[%s1066_s4 + $0x58] sm:$0xff] %v666_v32 }
 0x216   :  { %v541_v55 = vpop.f32.mrf.mxu1 }
 0x217   :  { %578 = vst [vmem:[%s1066_s4 + $0x48] sm:$0xff] %v541_v55 }
 0x21c   :  { %v661_v33 = vpop.f32.mrf.mxu0 }
 0x21d   :  { %575 = vst [vmem:[%s1066_s4 + $0x30] sm:$0xff] %v661_v33 }
 0x21e   :  { %v522_v20 = vpop.f32.mrf.mxu0 }
 0x21f   :  { %573 = vst [vmem:[%s1066_s4 + $0x20] sm:$0xff] %v522_v20 }
 0x220   :  { %v662_v0 = vpop.f32.mrf.mxu0  ;;  %v669_v38 = vpop.f32.mrf.mxu1 }
 0x221   :  { %576 = vst [vmem:[%s1066_s4 + $0x38] sm:$0xff] %v662_v0  ;;  %583 = vst [vmem:[%s1066_s4 + $0x70] sm:$0xff] %v669_v38 }
 0x222   :  { %v525_v39 = vpop.f32.mrf.mxu0  ;;  %v554_v40 = vpop.f32.mrf.mxu1 }
 0x223   :  { %574 = vst [vmem:[%s1066_s4 + $0x28] sm:$0xff] %v525_v39  ;;  %581 = vst [vmem:[%s1066_s4 + $0x60] sm:$0xff] %v554_v40 }
 0x224   :  { %v670_v41 = vpop.f32.mrf.mxu1 }
 0x225   :  { %584 = vst [vmem:[%s1066_s4 + $0x78] sm:$0xff] %v670_v41 }
 0x226   :  { %v557_v42 = vpop.f32.mrf.mxu1 }
 0x227   :  { %582 = vst [vmem:[%s1066_s4 + $0x68] sm:$0xff] %v557_v42 }

// kernel: vss_stage_forward.26
= control target key start
LH: loop header
LB: loop body
LE: loop exit
PB: predicated region body
PF: predicated region fallthrough
CT: control target
= control target key end

     0   :  { %vm79_vm0 = vcmask 523264   ;;  %vm543_vm1 = vcmask 519168   ;;  %vm802_vm2 = vcmask 261120   ;;  %s1670_s0 = inlined_call_operand.vmem [shape: f32[128,64], index: 0, kind: input, shape index: {}]   ;;  %s1671_s1 = inlined_call_operand.vmem [shape: f32[128,64], index: 1, kind: input, shape index: {}]   ;;  %s1672_s5 = inlined_call_operand.vmem [shape: bf16[64,32], index: 5, kind: input, shape index: {}]   ;;  %s1673_s2 = inlined_call_operand.vmem [shape: f32[128,64], index: 2, kind: input, shape index: {}]   ;;  %s1674_s3 = inlined_call_operand.vmem [shape: f32[1,64], index: 3, kind: input, shape index: {}]   ;;  %s1675_s4 = inlined_call_operand.vmem [shape: f32[1,64], index: 4, kind: input, shape index: {}]   ;;  %s1676_s6 = inlined_call_operand.vmem [shape: f32[128,32], index: 6, kind: input, shape index: {}]   ;;  %s1677_s7 = inlined_call_operand.vmem [shape: f32[128,32], index: 7, kind: output, shape index: {}]  }
   0x1   :  { %v31_v0 = vld [vmem:[%s1670_s0] sm:$0xff]  ;;  %v32_v5 = vld [vmem:[%s1670_s0 + $0x8] sm:$0xff]  ;;  %v33_v11 = vld [vmem:[%s1670_s0 + $0x10] sm:$0xff] }
   0x2   :  { %v47_v1 = vld [vmem:[%s1671_s1] sm:$0xff]  ;;  %v48_v6 = vld [vmem:[%s1671_s1 + $0x8] sm:$0xff]  ;;  %v49_v14 = vld [vmem:[%s1671_s1 + $0x10] sm:$0xff] }
   0x3   :  { %v39_v2 = vld [vmem:[%s1670_s0 + $0x40] sm:$0xff]  ;;  %v1078_v3 = vadd.f32 %v47_v1, %v31_v0  ;;  %v1091_v8 = vadd.f32 %v48_v6, %v32_v5  ;;  %v40_v9 = vld [vmem:[%s1670_s0 + $0x48] sm:$0xff]  ;;  %v34_v15 = vld [vmem:[%s1670_s0 + $0x18] sm:$0xff]  ;;  %v1119_v19 = vadd.f32 %v49_v14, %v33_v11 }
   0x4   :  { %v55_v4 = vld [vmem:[%s1671_s1 + $0x40] sm:$0xff]  ;;  %v56_v10 = vld [vmem:[%s1671_s1 + $0x48] sm:$0xff]  ;;  %v50_v16 = vld [vmem:[%s1671_s1 + $0x18] sm:$0xff] }
   0x5   :  { %v1089_v7 = vadd.f32 %v55_v4, %v39_v2  ;;  %v80_v12 = vsel %vm79_vm0, %v1078_v3, 0.0  ;;  %v1104_v13 = vadd.f32 %v56_v10, %v40_v9  ;;  %v83_v18 = vsel %vm79_vm0, %v1091_v8, 0.0  ;;  %v41_v22 = vld [vmem:[%s1670_s0 + $0x50] sm:$0xff]  ;;  %v42_v24 = vld [vmem:[%s1670_s0 + $0x58] sm:$0xff]  ;;  %v35_v30 = vld [vmem:[%s1670_s0 + $0x20] sm:$0xff] }
   0x6   :  { %81 = vadd.xlane.f32.xlu0 %v80_v12  ;;  %v1123_v21 = vadd.f32 %v50_v16, %v34_v15  ;;  %v57_v23 = vld [vmem:[%s1671_s1 + $0x50] sm:$0xff]  ;;  %v58_v25 = vld [vmem:[%s1671_s1 + $0x58] sm:$0xff]  ;;  %v86_v26 = vsel %vm79_vm0, %v1119_v19, 0.0  ;;  %v51_v31 = vld [vmem:[%s1671_s1 + $0x20] sm:$0xff] }
   0x7   :  { %v104_v17 = vsel %vm79_vm0, %v1089_v7, 0.0  ;;  %v107_v20 = vsel %vm79_vm0, %v1104_v13, 0.0  ;;  %v1139_v27 = vadd.f32 %v57_v23, %v41_v22  ;;  %v1143_v29 = vadd.f32 %v58_v25, %v42_v24  ;;  %v36_v32 = vld [vmem:[%s1670_s0 + $0x28] sm:$0xff]  ;;  %v43_v38 = vld [vmem:[%s1670_s0 + $0x60] sm:$0xff]  ;;  %v37_v46 = vld [vmem:[%s1670_s0 + $0x30] sm:$0xff] }
   0x8   :  { %105 = vadd.xlane.f32.xlu1 %v104_v17  ;;  %v89_v28 = vsel %vm79_vm0, %v1123_v21, 0.0  ;;  %v52_v33 = vld [vmem:[%s1671_s1 + $0x28] sm:$0xff]  ;;  %v1159_v35 = vadd.f32 %v51_v31, %v35_v30  ;;  %v59_v39 = vld [vmem:[%s1671_s1 + $0x60] sm:$0xff]  ;;  %v53_v47 = vld [vmem:[%s1671_s1 + $0x30] sm:$0xff] }
   0x9   :  { %v110_v34 = vsel %vm79_vm0, %v1139_v27, 0.0  ;;  %v113_v36 = vsel %vm79_vm0, %v1143_v29, 0.0  ;;  %v1163_v37 = vadd.f32 %v52_v33, %v36_v32  ;;  %v44_v40 = vld [vmem:[%s1670_s0 + $0x68] sm:$0xff]  ;;  %v1179_v43 = vadd.f32 %v59_v39, %v43_v38  ;;  %v38_v48 = vld [vmem:[%s1670_s0 + $0x38] sm:$0xff]  ;;  %v45_v54 = vld [vmem:[%s1670_s0 + $0x70] sm:$0xff] }
   0xa   :  { %84 = vadd.xlane.f32.xlu0 %v83_v18  ;;  %v60_v41 = vld [vmem:[%s1671_s1 + $0x68] sm:$0xff]  ;;  %v92_v42 = vsel %vm79_vm0, %v1159_v35, 0.0  ;;  %v54_v49 = vld [vmem:[%s1671_s1 + $0x38] sm:$0xff]  ;;  %v1199_v51 = vadd.f32 %v53_v47, %v37_v46  ;;  %v61_v55 = vld [vmem:[%s1671_s1 + $0x70] sm:$0xff] }
   0xb   :  { %v95_v44 = vsel %vm79_vm0, %v1163_v37, 0.0  ;;  %v1183_v45 = vadd.f32 %v60_v41, %v44_v40  ;;  %v116_v50 = vsel %vm79_vm0, %v1179_v43, 0.0  ;;  %v1203_v53 = vadd.f32 %v54_v49, %v38_v48  ;;  %v46_v56 = vld [vmem:[%s1670_s0 + $0x78] sm:$0xff] }
   0xc   :  { %108 = vadd.xlane.f32.xlu1 %v107_v20  ;;  %v62_v57 = vld [vmem:[%s1671_s1 + $0x78] sm:$0xff]  ;;  %v98_v58 = vsel %vm79_vm0, %v1199_v51, 0.0  ;;  %v1219_v59 = vadd.f32 %v61_v55, %v45_v54 }
   0xd   :  { %v119_v52 = vsel %vm79_vm0, %v1183_v45, 0.0  ;;  %v101_v60 = vsel %vm79_vm0, %v1203_v53, 0.0  ;;  %v1223_v61 = vadd.f32 %v62_v57, %v46_v56 }
   0xe   :  { %87 = vadd.xlane.f32.xlu0 %v86_v26  ;;  %v122_v62 = vsel %vm79_vm0, %v1219_v59, 0.0 }
   0xf   :  { %v125_v63 = vsel %vm79_vm0, %v1223_v61, 0.0 }
  0x10   :  { %90 = vadd.xlane.f32.xlu1 %v89_v28 }
  0x12   :  { %111 = vadd.xlane.f32.xlu0 %v110_v34 }
  0x14   :  { %114 = vadd.xlane.f32.xlu1 %v113_v36 }
  0x16   :  { %93 = vadd.xlane.f32.xlu0 %v92_v42 }
  0x18   :  { %96 = vadd.xlane.f32.xlu1 %v95_v44 }
  0x1a   :  { %117 = vadd.xlane.f32.xlu0 %v116_v50 }
  0x1c   :  { %120 = vadd.xlane.f32.xlu1 %v119_v52 }
  0x1e   :  { %99 = vadd.xlane.f32.xlu0 %v98_v58 }
  0x20   :  { %102 = vadd.xlane.f32.xlu1 %v101_v60 }
  0x22   :  { %123 = vadd.xlane.f32.xlu0 %v122_v62 }
  0x24   :  { %126 = vadd.xlane.f32.xlu1 %v125_v63 }
  0x8f   :  { %v82_v0 = vpop.xlane.xlu0 %81 }
  0x90   :  { %v129_v1 = vmul.f32 0.015625, %v82_v0 }
  0x91   :  { %v106_v2 = vpop.xlane.xlu1 %105 }
  0x92   :  { %v137_v4 = vmul.f32 0.015625, %v106_v2  ;;  %v1230_v5 = vsub.f32 %v1078_v3, %v129_v1 }
  0x93   :  { %v85_v9 = vpop.xlane.xlu0 %84 }
  0x94   :  { %v1233_v6 = vsub.f32 %v1089_v7, %v137_v4  ;;  %v130_v10 = vmul.f32 0.015625, %v85_v9  ;;  %v161_v12 = vmul.f32 %v1230_v5, %v1230_v5 }
  0x95   :  { %v109_v11 = vpop.xlane.xlu1 %108 }
  0x96   :  { %v138_v14 = vmul.f32 0.015625, %v109_v11  ;;  %v169_v15 = vmul.f32 %v1233_v6, %v1233_v6  ;;  %v1240_v16 = vsub.f32 %v1091_v8, %v130_v10  ;;  %v177_v17 = vsel %vm79_vm0, %v161_v12, 0.0 }
  0x97   :  { %178 = vadd.xlane.f32.xlu0 %v177_v17  ;;  %v88_v7 = vpop.xlane.xlu0 %87 }
  0x98   :  { %v1244_v3 = vsub.f32 %v1104_v13, %v138_v14  ;;  %v131_v18 = vmul.f32 0.015625, %v88_v7  ;;  %v201_v22 = vsel %vm79_vm0, %v169_v15, 0.0  ;;  %v162_v23 = vmul.f32 %v1240_v16, %v1240_v16 }
  0x99   :  { %v91_v20 = vpop.xlane.xlu1 %90 }
  0x9a   :  { %v132_v24 = vmul.f32 0.015625, %v91_v20  ;;  %v170_v25 = vmul.f32 %v1244_v3, %v1244_v3  ;;  %v1252_v8 = vsub.f32 %v1119_v19, %v131_v18  ;;  %v180_v26 = vsel %vm79_vm0, %v162_v23, 0.0 }
  0x9b   :  { %202 = vadd.xlane.f32.xlu0 %v201_v22  ;;  %181 = vadd.xlane.f32.xlu1 %v180_v26  ;;  %v112_v28 = vpop.xlane.xlu0 %111  ;;  %v923_v26 = vld [vmem:[%s1672_s5 + $0x8] sm:$0xff]  }
  0x9c   :  { %v1256_v13 = vsub.f32 %v1123_v21, %v132_v24  ;;  %v139_v30 = vmul.f32 0.015625, %v112_v28  ;;  %v204_v32 = vsel %vm79_vm0, %v170_v25, 0.0  ;;  %v163_v33 = vmul.f32 %v1252_v8, %v1252_v8  ;;  %v922_v25 = vld [vmem:[%s1672_s5 + $0x10] sm:$0xff]   ;;  %v925_v28 = vld [vmem:[%s1672_s5] sm:$0xff]  }
  0x9d   :  { %v115_v31 = vpop.xlane.xlu1 %114 }
  0x9e   :  { %v140_v34 = vmul.f32 0.015625, %v115_v31  ;;  %v164_v19 = vmul.f32 %v1256_v13, %v1256_v13  ;;  %v1264_v36 = vsub.f32 %v1139_v27, %v139_v30  ;;  %v183_v21 = vsel %vm79_vm0, %v163_v33, 0.0  ;;  %v1340_v30 = vld [vmem:[%s1673_s2] sm:$0xff] }
  0x9f   :  { %205 = vadd.xlane.f32.xlu1 %v204_v32  ;;  %184 = vadd.xlane.f32.xlu0 %v183_v21  ;;  %v94_v39 = vpop.xlane.xlu0 %93  ;;  %v351_v31 = vsub.f32 0.0, %v1340_v30  ;;  %v1346_v32 = vld [vmem:[%s1673_s2 + $0x8] sm:$0xff]  ;;  %v1351_v33 = vld [vmem:[%s1673_s2 + $0x40] sm:$0xff] }
  0xa0   :  { %v1268_v38 = vsub.f32 %v1143_v29, %v140_v34  ;;  %v133_v40 = vmul.f32 0.015625, %v94_v39  ;;  %v186_v42 = vsel %vm79_vm0, %v164_v19, 0.0  ;;  %v171_v44 = vmul.f32 %v1264_v36, %v1264_v36  ;;  %v1358_v39 = vld [vmem:[%s1673_s2 + $0x48] sm:$0xff] }
  0xa1   :  { %v97_v41 = vpop.xlane.xlu1 %96  ;;  %v352_v34 = vsub.f32 0.0, %v1346_v32  ;;  %v367_v19 = vmul.f32 1.442695, %v351_v31  ;;  %v359_v21 = vsub.f32 0.0, %v1351_v33 }
  0xa2   :  { %v134_v46 = vmul.f32 0.015625, %v97_v41  ;;  %v172_v27 = vmul.f32 %v1268_v38, %v1268_v38  ;;  %v1276_v47 = vsub.f32 %v1159_v35, %v133_v40  ;;  %v207_v29 = vsel %vm79_vm0, %v171_v44, 0.0  ;;  %v1363_v40 = vld [vmem:[%s1673_s2 + $0x10] sm:$0xff]  ;;  %v1368_v41 = vld [vmem:[%s1673_s2 + $0x18] sm:$0xff] }
  0xa3   :  { %187 = vadd.xlane.f32.xlu1 %v186_v42  ;;  %208 = vadd.xlane.f32.xlu0 %v207_v29  ;;  %v118_v49 = vpop.xlane.xlu0 %117  ;;  %v369_v42 = vmul.f32 1.442695, %v352_v34  ;;  %v360_v44 = vsub.f32 0.0, %v1358_v39  ;;  %933 = vpow2.f32 %v367_v19  ;;  %v354_v29 = vsub.f32 0.0, %v1368_v41 }
  0xa4   :  { %v1280_v48 = vsub.f32 %v1163_v37, %v134_v46  ;;  %v141_v50 = vmul.f32 0.015625, %v118_v49  ;;  %v210_v54 = vsel %vm79_vm0, %v172_v27, 0.0  ;;  %v165_v55 = vmul.f32 %v1276_v47, %v1276_v47  ;;  %v1376_v49 = vld [vmem:[%s1673_s2 + $0x50] sm:$0xff] }
  0xa5   :  { %v121_v52 = vpop.xlane.xlu1 %120  ;;  %v383_v46 = vmul.f32 1.442695, %v359_v21  ;;  %v353_v27 = vsub.f32 0.0, %v1363_v40  ;;  %935 = vpow2.f32 %v369_v42 }
  0xa6   :  { %v142_v56 = vmul.f32 0.015625, %v121_v52  ;;  %v166_v35 = vmul.f32 %v1280_v48, %v1280_v48  ;;  %v1288_v57 = vsub.f32 %v1179_v43, %v141_v50  ;;  %v189_v37 = vsel %vm79_vm0, %v165_v55, 0.0  ;;  %v1381_v50 = vld [vmem:[%s1673_s2 + $0x58] sm:$0xff] }
  0xa7   :  { %211 = vadd.xlane.f32.xlu1 %v210_v54  ;;  %190 = vadd.xlane.f32.xlu0 %v189_v37  ;;  %v100_v60 = vpop.xlane.xlu0 %99  ;;  %v385_v52 = vmul.f32 1.442695, %v360_v44  ;;  %v1386_v54 = vld [vmem:[%s1673_s2 + $0x20] sm:$0xff]  ;;  %937 = vpow2.f32 %v383_v46  ;;  %v371_v55 = vmul.f32 1.442695, %v353_v27  ;;  %v362_v37 = vsub.f32 0.0, %v1381_v50 }
  0xa8   :  { %v1292_v58 = vsub.f32 %v1183_v45, %v142_v56  ;;  %v135_v62 = vmul.f32 0.015625, %v100_v60  ;;  %v192_v0 = vsel %vm79_vm0, %v166_v35, 0.0  ;;  %v173_v1 = vmul.f32 %v1288_v57, %v1288_v57 }
  0xa9   :  { %v103_v63 = vpop.xlane.xlu1 %102  ;;  %v361_v56 = vsub.f32 0.0, %v1376_v49  ;;  %v373_v35 = vmul.f32 1.442695, %v354_v29  ;;  %v355_v60 = vsub.f32 0.0, %v1386_v54  ;;  %939 = vpow2.f32 %v385_v52 }
  0xaa   :  { %v136_v2 = vmul.f32 0.015625, %v103_v63  ;;  %v174_v43 = vmul.f32 %v1292_v58, %v1292_v58  ;;  %v1300_v4 = vsub.f32 %v1199_v51, %v135_v62  ;;  %v213_v45 = vsel %vm79_vm0, %v173_v1, 0.0  ;;  %v1394_v62 = vld [vmem:[%s1673_s2 + $0x28] sm:$0xff] }
  0xab   :  { %193 = vadd.xlane.f32.xlu1 %v192_v0  ;;  %214 = vadd.xlane.f32.xlu0 %v213_v45  ;;  %v124_v10 = vpop.xlane.xlu0 %123  ;;  %941 = vpow2.f32 %v371_v55  ;;  %v387_v63 = vmul.f32 1.442695, %v361_v56  ;;  %v389_v0 = vmul.f32 1.442695, %v362_v37  ;;  %v375_v1 = vmul.f32 1.442695, %v355_v60 }
  0xac   :  { %v1304_v9 = vsub.f32 %v1203_v53, %v136_v2  ;;  %v143_v11 = vmul.f32 0.015625, %v124_v10  ;;  %v216_v14 = vsel %vm79_vm0, %v174_v43, 0.0  ;;  %v167_v15 = vmul.f32 %v1300_v4, %v1300_v4  ;;  %v1400_v43 = vld [vmem:[%s1673_s2 + $0x60] sm:$0xff]  ;;  %v1405_v45 = vld [vmem:[%s1673_s2 + $0x68] sm:$0xff] }
  0xad   :  { %v127_v12 = vpop.xlane.xlu1 %126  ;;  %943 = vpow2.f32 %v373_v35  ;;  %v356_v2 = vsub.f32 0.0, %v1394_v62  ;;  %v1430_v35 = vld [vmem:[%s1673_s2 + $0x78] sm:$0xff] }
  0xae   :  { %v144_v17 = vmul.f32 0.015625, %v127_v12  ;;  %v168_v51 = vmul.f32 %v1304_v9, %v1304_v9  ;;  %v1312_v7 = vsub.f32 %v1219_v59, %v143_v11  ;;  %v195_v53 = vsel %vm79_vm0, %v167_v15, 0.0  ;;  %v1412_v15 = vld [vmem:[%s1673_s2 + $0x30] sm:$0xff] }
  0xaf   :  { %217 = vadd.xlane.f32.xlu1 %v216_v14  ;;  %196 = vadd.xlane.f32.xlu0 %v195_v53  ;;  %945 = vpow2.f32 %v387_v63  ;;  %v363_v11 = vsub.f32 0.0, %v1400_v43  ;;  %v377_v12 = vmul.f32 1.442695, %v356_v2  ;;  %v364_v14 = vsub.f32 0.0, %v1405_v45 }
  0xb0   :  { %v1316_v18 = vsub.f32 %v1223_v61, %v144_v17  ;;  %v198_v20 = vsel %vm79_vm0, %v168_v51, 0.0  ;;  %v175_v22 = vmul.f32 %v1312_v7, %v1312_v7  ;;  %v921_v61 = vld [vmem:[%s1672_s5 + $0x18] sm:$0xff]   ;;  %v934_v10 = vpop.eup %933  ;;  %947 = vpow2.f32 %v389_v0 }
  0xb1   :  { %889 = vmatprep.subr.bf16.mxu0 %v921_v61  ;;  %913 = vmatprep.subr.bf16.mxu1 %v921_v61  ;;  %949 = vpow2.f32 %v375_v1  ;;  %v1417_v17 = vld [vmem:[%s1673_s2 + $0x38] sm:$0xff]  ;;  %v399_v53 = vadd.f32 1.0, %v934_v10  ;;  %v366_v2 = vsub.f32 0.0, %v1430_v35 }
  0xb2   :  { %v176_v23 = vmul.f32 %v1316_v18, %v1316_v18  ;;  %v219_v24 = vsel %vm79_vm0, %v175_v22, 0.0  ;;  %890 = vmatpush3.bf16.msra.mxu0 %v921_v61  ;;  %917 = vmatpush3.bf16.msra.mxu1 %v921_v61  ;;  %v936_v51 = vpop.eup %935  ;;  %v391_v22 = vmul.f32 1.442695, %v363_v11  ;;  %951 = vpow2.f32 %v377_v12 }
  0xb3   :  { %199 = vadd.xlane.f32.xlu1 %v198_v20  ;;  %220 = vadd.xlane.f32.xlu0 %v219_v24  ;;  %v393_v24 = vmul.f32 1.442695, %v364_v14  ;;  %v400_v61 = vadd.f32 1.0, %v936_v51  ;;  %953 = vrcp.f32 %v399_v53 }
  0xb4   :  { %v222_v59 = vsel %vm79_vm0, %v176_v23, 0.0  ;;  %891 = vmatprep.subr.bf16.mxu0 %v922_v25  ;;  %914 = vmatprep.subr.bf16.mxu1 %v922_v25  ;;  %v938_v20 = vpop.eup %937  ;;  %v357_v23 = vsub.f32 0.0, %v1412_v15  ;;  %955 = vpow2.f32 %v391_v22 }
  0xb5   :  { %957 = vpow2.f32 %v393_v24  ;;  %v397_v24 = vmul.f32 1.442695, %v366_v2 }
  0xb6   :  { %892 = vmatpush3.bf16.msra.mxu0 %v922_v25  ;;  %918 = vmatpush3.bf16.msra.mxu1 %v922_v25  ;;  %v1424_v25 = vld [vmem:[%s1673_s2 + $0x70] sm:$0xff]  ;;  %v379_v34 = vmul.f32 1.442695, %v357_v23  ;;  %959 = vrcp.f32 %v400_v61 }
  0xb7   :  { %223 = vadd.xlane.f32.xlu1 %v222_v59  ;;  %893 = vmatprep.subr.bf16.mxu0 %v923_v26  ;;  %v358_v59 = vsub.f32 0.0, %v1417_v17  ;;  %v365_v42 = vsub.f32 0.0, %v1424_v25 }
  0xb8   :  { %915 = vmatprep.subr.bf16.mxu1 %v923_v26 }
  0xb9   :  { %v381_v21 = vmul.f32 1.442695, %v358_v59  ;;  %v395_v56 = vmul.f32 1.442695, %v365_v42 }
  0xba   :  { %894 = vmatpush3.bf16.msra.mxu0 %v923_v26  ;;  %919 = vmatpush3.bf16.msra.mxu1 %v923_v26  ;;  %v940_v26 = vpop.eup %939 }
  0xbb   :  { %895 = vmatprep.subr.bf16.mxu0 %v925_v28  ;;  %916 = vmatprep.subr.bf16.mxu1 %v925_v28  ;;  %v942_v31 = vpop.eup %941  ;;  %v408_v44 = vadd.f32 1.0, %v940_v26 }
  0xbc   :  { %v944_v19 = vpop.eup %943  ;;  %v401_v46 = vadd.f32 1.0, %v942_v31 }
  0xbd   :  { %v946_v27 = vpop.eup %945  ;;  %v402_v29 = vadd.f32 1.0, %v944_v19 }
  0xbe   :  { %896 = vmatpush3.bf16.msra.mxu0 %v925_v28  ;;  %920 = vmatpush3.bf16.msra.mxu1 %v925_v28  ;;  %v407_v28 = vadd.f32 1.0, %v938_v20  ;;  %v948_v52 = vpop.eup %947  ;;  %v409_v63 = vadd.f32 1.0, %v946_v27 }
  0xbf   :  { %v950_v37 = vpop.eup %949  ;;  %v410_v1 = vadd.f32 1.0, %v948_v52 }
  0xc0   :  { %961 = vrcp.f32 %v407_v28  ;;  %v403_v12 = vadd.f32 1.0, %v950_v37  ;;  %v952_v14 = vpop.eup %951 }
  0xc1   :  { %963 = vpow2.f32 %v379_v34  ;;  %v954_v20 = vpop.eup %953  ;;  %v404_v28 = vadd.f32 1.0, %v952_v14 }
  0xc2   :  { %965 = vpow2.f32 %v381_v21  ;;  %v956_v59 = vpop.eup %955 }
  0xc3   :  { %967 = vrcp.f32 %v408_v44  ;;  %v958_v31 = vpop.eup %957  ;;  %v411_v27 = vadd.f32 1.0, %v956_v59 }
  0xc4   :  { %969 = vrcp.f32 %v401_v46  ;;  %v960_v21 = vpop.eup %959 }
  0xc5   :  { %971 = vrcp.f32 %v402_v29 }
  0xc6   :  { %973 = vpow2.f32 %v395_v56  ;;  %v412_v56 = vadd.f32 1.0, %v958_v31 }
  0xcd   :  { %v962_v42 = vpop.eup %961 }
  0xce   :  { %v964_v29 = vpop.eup %963 }
  0xcf   :  { %v966_v37 = vpop.eup %965 }
 0x120   :  { %v179_v55 = vpop.xlane.xlu0 %178 }
 0x121   :  { %v225_v60 = vmul.f32 0.015625, %v179_v55 }
 0x123   :  { %v241_v0 = vadd.f32 1e-05, %v225_v60 }
 0x124   :  { %v182_v10 = vpop.xlane.xlu1 %181  ;;  %v203_v11 = vpop.xlane.xlu0 %202 }
 0x125   :  { %975 = vrsqrt.f32 %v241_v0  ;;  %v226_v51 = vmul.f32 0.015625, %v182_v10  ;;  %v233_v53 = vmul.f32 0.015625, %v203_v11  ;;  %v968_v0 = vpop.eup %967  ;;  %v405_v11 = vadd.f32 1.0, %v964_v29 }
 0x126   :  { %977 = vrcp.f32 %v409_v63 }
 0x127   :  { %v242_v22 = vadd.f32 1e-05, %v226_v51  ;;  %v249_v23 = vadd.f32 1e-05, %v233_v53  ;;  %979 = vrcp.f32 %v410_v1  ;;  %v970_v1 = vpop.eup %969  ;;  %v406_v53 = vadd.f32 1.0, %v966_v37 }
 0x128   :  { %v206_v61 = vpop.xlane.xlu1 %205  ;;  %v185_v26 = vpop.xlane.xlu0 %184  ;;  %981 = vrcp.f32 %v403_v12 }
 0x129   :  { %983 = vrsqrt.f32 %v242_v22  ;;  %v234_v34 = vmul.f32 0.015625, %v206_v61  ;;  %v227_v19 = vmul.f32 0.015625, %v185_v26  ;;  %v972_v12 = vpop.eup %971  ;;  %v1436_v61 = vld [vmem:[%s1674_s3] ss:$0 sm:$0xff] }
 0x12a   :  { %985 = vrsqrt.f32 %v249_v23  ;;  %v974_v22 = vpop.eup %973 }
 0x12b   :  { %v250_v44 = vadd.f32 1e-05, %v234_v34  ;;  %v243_v46 = vadd.f32 1e-05, %v227_v19  ;;  %987 = vpow2.f32 %v397_v24 }
 0x12c   :  { %v188_v52 = vpop.xlane.xlu1 %187  ;;  %v209_v55 = vpop.xlane.xlu0 %208  ;;  %989 = vrcp.f32 %v404_v28 }
 0x12d   :  { %991 = vrsqrt.f32 %v250_v44  ;;  %v228_v60 = vmul.f32 0.015625, %v188_v52  ;;  %v235_v63 = vmul.f32 0.015625, %v209_v55  ;;  %v1446_v44 = vld [vmem:[%s1675_s4] ss:$0 sm:$0xff]  ;;  %v413_v52 = vadd.f32 1.0, %v974_v22 }
 0x12e   :  { %993 = vrsqrt.f32 %v243_v46  ;;  %v447_v46 = vmul.f32 %v954_v20, %v1340_v30  ;;  %v456_v22 = vmul.f32 %v968_v0, %v1358_v39 }
 0x12f   :  { %v244_v2 = vadd.f32 1e-05, %v228_v60  ;;  %v251_v10 = vadd.f32 1e-05, %v235_v63  ;;  %995 = vrcp.f32 %v411_v27  ;;  %v448_v63 = vmul.f32 %v960_v21, %v1346_v32 }
 0x130   :  { %v212_v14 = vpop.xlane.xlu1 %211  ;;  %v191_v51 = vpop.xlane.xlu0 %190  ;;  %997 = vrcp.f32 %v412_v56 }
 0x131   :  { %999 = vrsqrt.f32 %v244_v2  ;;  %v236_v23 = vmul.f32 0.015625, %v212_v14  ;;  %v229_v24 = vmul.f32 0.015625, %v191_v51  ;;  %v455_v2 = vmul.f32 %v962_v42, %v1351_v33 }
 0x132   :  { %v976_v59 = vpop.eup %975  ;;  %1001 = vrsqrt.f32 %v251_v10 }
 0x133   :  { %v1438_v26 = vpop.eup %977  ;;  %v273_v28 = vmul.f32 %v976_v59, %v1230_v5  ;;  %v252_v31 = vadd.f32 1e-05, %v236_v23  ;;  %v245_v34 = vadd.f32 1e-05, %v229_v24  ;;  %1003 = vrcp.f32 %v405_v11 }
 0x134   :  { %v1441_v19 = vpop.eup %979  ;;  %v194_v27 = vpop.xlane.xlu1 %193  ;;  %1005 = vrcp.f32 %v406_v53  ;;  %v449_v23 = vmul.f32 %v970_v1, %v1363_v40 }
 0x135   :  { %v215_v29 = vpop.xlane.xlu0 %214  ;;  %v1449_v55 = vpop.eup %981  ;;  %v296_v5 = vmul.f32 %v1436_v61, %v273_v28  ;;  %1007 = vrsqrt.f32 %v252_v31  ;;  %v230_v56 = vmul.f32 0.015625, %v194_v27  ;;  %v450_v31 = vmul.f32 %v972_v12, %v1368_v41 }
 0x136   :  { %v237_v37 = vmul.f32 0.015625, %v215_v29  ;;  %v984_v60 = vpop.eup %983  ;;  %1009 = vrsqrt.f32 %v245_v34 }
 0x137   :  { %v986_v10 = vpop.eup %985  ;;  %v319_v30 = vadd.f32 %v1446_v44, %v296_v5  ;;  %v274_v20 = vmul.f32 %v984_v60, %v1240_v16  ;;  %v246_v11 = vadd.f32 1e-05, %v230_v56  ;;  %1011 = vrcp.f32 %v413_v52 }
 0x138   :  { %v253_v14 = vadd.f32 1e-05, %v237_v37  ;;  %v988_v51 = vpop.eup %987  ;;  %v281_v53 = vmul.f32 %v986_v10, %v1233_v6  ;;  %v218_v24 = vpop.xlane.xlu1 %217 }
 0x139   :  { %v197_v59 = vpop.xlane.xlu0 %196  ;;  %v1459_v32 = vpop.eup %989  ;;  %v463_v33 = vmul.f32 %v447_v46, %v319_v30  ;;  %v297_v21 = vmul.f32 %v1436_v61, %v274_v20  ;;  %1013 = vrsqrt.f32 %v246_v11  ;;  %v238_v42 = vmul.f32 0.015625, %v218_v24 }
 0x13a   :  { %v992_v16 = vpop.eup %991  ;;  %v304_v28 = vmul.f32 %v1436_v61, %v281_v53  ;;  %1015 = vrsqrt.f32 %v253_v14  ;;  %v231_v6 = vmul.f32 0.015625, %v197_v59  ;;  %v414_v37 = vadd.f32 1.0, %v988_v51 }
 0x13b   :  { %v994_v39 = vpop.eup %993  ;;  %v861_v0 = vpack.c.bf16 %v463_v33, %v463_v33  ;;  %v320_v40 = vadd.f32 %v1446_v44, %v297_v21  ;;  %v282_v1 = vmul.f32 %v992_v16, %v1244_v3  ;;  %v254_v34 = vadd.f32 1e-05, %v238_v42 }
 0x13c   :  { %v1466_v27 = vpop.eup %995  ;;  %v327_v46 = vadd.f32 %v1446_v44, %v304_v28  ;;  %v275_v29 = vmul.f32 %v994_v39, %v1252_v8  ;;  %v247_v52 = vadd.f32 1e-05, %v231_v6  ;;  %v200_v5 = vpop.xlane.xlu1 %199 }
 0x13d   :  { %v221_v56 = vpop.xlane.xlu0 %220  ;;  %v1470_v41 = vpop.eup %997  ;;  %544 = vst.msk [vmem:[#allocation2] sm:$0xf] %vm543_vm1, %v861_v0  ;;  %v464_v12 = vmul.f32 %v448_v63, %v320_v40  ;;  %v305_v60 = vmul.f32 %v1436_v61, %v282_v1  ;;  %1017 = vrsqrt.f32 %v254_v34  ;;  %v232_v3 = vmul.f32 0.015625, %v200_v5 }
 0x13e   :  { %v1000_v10 = vpop.eup %999  ;;  %v471_v30 = vmul.f32 %v455_v2, %v327_v46  ;;  %v298_v20 = vmul.f32 %v1436_v61, %v275_v29  ;;  %1019 = vrsqrt.f32 %v247_v52  ;;  %v239_v11 = vmul.f32 0.015625, %v221_v56 }
 0x13f   :  { %v1002_v8 = vpop.eup %1001  ;;  %v862_v14 = vpack.c.bf16 %v464_v12, %v464_v12  ;;  %v328_v53 = vadd.f32 %v1446_v44, %v305_v60  ;;  %v276_v51 = vmul.f32 %v1000_v10, %v1256_v13  ;;  %v248_v24 = vadd.f32 1e-05, %v232_v3 }
 0x140   :  { %v1477_v59 = vpop.eup %1003  ;;  %v869_v63 = vpack.c.bf16 %v471_v30, %v471_v30  ;;  %v321_v33 = vadd.f32 %v1446_v44, %v298_v20  ;;  %v283_v21 = vmul.f32 %v1002_v8, %v1264_v36  ;;  %v255_v42 = vadd.f32 1e-05, %v239_v11  ;;  %v224_v2 = vpop.xlane.xlu1 %223 }
 0x141   :  { %v1481_v16 = vpop.eup %1005  ;;  %545 = vst.msk [vmem:[#allocation2 + $0x4] sm:$0xf] %vm543_vm1, %v862_v14  ;;  %v472_v28 = vmul.f32 %v456_v22, %v328_v53  ;;  %v299_v6 = vmul.f32 %v1436_v61, %v276_v51  ;;  %1021 = vrsqrt.f32 %v248_v24  ;;  %v240_v39 = vmul.f32 0.015625, %v224_v2 }
 0x142   :  { %v1008_v13 = vpop.eup %1007  ;;  %552 = vst.msk [vmem:[#allocation2 + $0x20] sm:$0xf] %vm543_vm1, %v869_v63  ;;  %v465_v0 = vmul.f32 %v449_v23, %v321_v33  ;;  %v457_v40 = vmul.f32 %v1438_v26, %v1376_v49  ;;  %v306_v36 = vmul.f32 %v1436_v61, %v283_v21  ;;  %1023 = vrsqrt.f32 %v255_v42 }
 0x143   :  { %v1010_v1 = vpop.eup %1009  ;;  %v870_v34 = vpack.c.bf16 %v472_v28, %v472_v28  ;;  %v322_v46 = vadd.f32 %v1446_v44, %v299_v6  ;;  %v284_v22 = vmul.f32 %v1008_v13, %v1268_v38  ;;  %v256_v29 = vadd.f32 1e-05, %v240_v39 }
 0x144   :  { %v863_v52 = vpack.c.bf16 %v465_v0, %v465_v0  ;;  %v329_v5 = vadd.f32 %v1446_v44, %v306_v36  ;;  %v277_v56 = vmul.f32 %v1010_v1, %v1276_v47  ;;  %1025 = vrcp.f32 %v414_v37  ;;  %v1493_v23 = vpop.eup %1011 }
 0x145   :  { %553 = vst.msk [vmem:[#allocation2 + $0x24] sm:$0xf] %vm543_vm1, %v870_v34  ;;  %v466_v49 = vmul.f32 %v450_v31, %v322_v46  ;;  %v458_v26 = vmul.f32 %v1441_v19, %v1381_v50  ;;  %v307_v12 = vmul.f32 %v1436_v61, %v284_v22  ;;  %1027 = vrsqrt.f32 %v256_v29 }
 0x146   :  { %v1014_v60 = vpop.eup %1013  ;;  %546 = vst.msk [vmem:[#allocation2 + $0x8] sm:$0xf] %vm543_vm1, %v863_v52  ;;  %v473_v38 = vmul.f32 %v457_v40, %v329_v5  ;;  %v451_v3 = vmul.f32 %v1449_v55, %v1386_v54  ;;  %v300_v47 = vmul.f32 %v1436_v61, %v277_v56  ;;  %v452_v54 = vmul.f32 %v1459_v32, %v1394_v62 }
 0x147   :  { %v1016_v37 = vpop.eup %1015  ;;  %v864_v10 = vpack.c.bf16 %v466_v49, %v466_v49  ;;  %v330_v30 = vadd.f32 %v1446_v44, %v307_v12  ;;  %v278_v31 = vmul.f32 %v1014_v60, %v1280_v48  ;;  %v459_v48 = vmul.f32 %v1466_v27, %v1400_v43 }
 0x148   :  { %v871_v20 = vpack.c.bf16 %v473_v38, %v473_v38  ;;  %v323_v50 = vadd.f32 %v1446_v44, %v300_v47  ;;  %v285_v19 = vmul.f32 %v1016_v37, %v1288_v57  ;;  %v924_v11 = vld [vmem:[#allocation2] sm:$0xff]   ;;  %v460_v43 = vmul.f32 %v1470_v41, %v1405_v45 }
 0x149   :  { %547 = vst.msk [vmem:[#allocation2 + $0xc] sm:$0xf] %vm543_vm1, %v864_v10  ;;  %v474_v8 = vmul.f32 %v458_v26, %v330_v30  ;;  %v301_v55 = vmul.f32 %v1436_v61, %v278_v31  ;;  %897 = vmatprep.mubr.msk.bf16.mxu0 %vm79_vm0, %v924_v11  ;;  %v560_v31 = vld [vmem:[%s1676_s6] sm:$0xff]  ;;  %v570_v11 = vld [vmem:[%s1676_s6 + $0x50] sm:$0xff] }
 0x14a   :  { %v1018_v14 = vpop.eup %1017  ;;  %554 = vst.msk [vmem:[#allocation2 + $0x28] sm:$0xf] %vm543_vm1, %v871_v20  ;;  %v467_v53 = vmul.f32 %v451_v3, %v323_v50  ;;  %v308_v51 = vmul.f32 %v1436_v61, %v285_v19  ;;  %v563_v19 = vld [vmem:[%s1676_s6 + $0x18] sm:$0xff] }
 0x14b   :  { %v1020_v57 = vpop.eup %1019  ;;  %v872_v24 = vpack.c.bf16 %v474_v8, %v474_v8  ;;  %v324_v63 = vadd.f32 %v1446_v44, %v301_v55  ;;  %v286_v33 = vmul.f32 %v1018_v14, %v1292_v58  ;;  %v453_v58 = vmul.f32 %v1477_v59, %v1412_v15  ;;  %v561_v14 = vld [vmem:[%s1676_s6 + $0x8] sm:$0xff] }
 0x14c   :  { %v865_v62 = vpack.c.bf16 %v467_v53, %v467_v53  ;;  %v331_v32 = vadd.f32 %v1446_v44, %v308_v51  ;;  %v279_v21 = vmul.f32 %v1020_v57, %v1300_v4  ;;  %v926_v42 = vld [vmem:[#allocation2 + $0x20] sm:$0xff]   ;;  %v454_v59 = vmul.f32 %v1481_v16, %v1417_v17 }
 0x14d   :  { %555 = vst.msk [vmem:[#allocation2 + $0x2c] sm:$0xf] %vm543_vm1, %v872_v24  ;;  %v468_v2 = vmul.f32 %v452_v54, %v324_v63  ;;  %v309_v27 = vmul.f32 %v1436_v61, %v286_v33  ;;  %905 = vmatprep.mubr.msk.bf16.mxu1 %vm79_vm0, %v926_v42  ;;  %v568_v53 = vld [vmem:[%s1676_s6 + $0x40] sm:$0xff]  ;;  %v571_v63 = vld [vmem:[%s1676_s6 + $0x58] sm:$0xff] }
 0x14e   :  { %v1022_v28 = vpop.eup %1021  ;;  %548 = vst.msk [vmem:[#allocation2 + $0x10] sm:$0xf] %vm543_vm1, %v865_v62  ;;  %v475_v6 = vmul.f32 %v459_v48, %v331_v32  ;;  %v302_v39 = vmul.f32 %v1436_v61, %v279_v21  ;;  %v569_v21 = vld [vmem:[%s1676_s6 + $0x48] sm:$0xff] }
 0x14f   :  { %v1024_v4 = vpop.eup %1023  ;;  %v866_v13 = vpack.c.bf16 %v468_v2, %v468_v2  ;;  %v332_v0 = vadd.f32 %v1446_v44, %v309_v27  ;;  %v280_v40 = vmul.f32 %v1022_v28, %v1304_v9  ;;  %v461_v9 = vmul.f32 %v1493_v23, %v1424_v25  ;;  %v566_v27 = vld [vmem:[%s1676_s6 + $0x30] sm:$0xff] }
 0x150   :  { %v873_v45 = vpack.c.bf16 %v475_v6, %v475_v6  ;;  %v325_v41 = vadd.f32 %v1446_v44, %v302_v39  ;;  %v287_v36 = vmul.f32 %v1024_v4, %v1312_v7  ;;  %v927_v1 = vld [vmem:[#allocation2 + $0x8] sm:$0xff]   ;;  %v564_v6 = vld [vmem:[%s1676_s6 + $0x20] sm:$0xff]  ;;  %v567_v4 = vld [vmem:[%s1676_s6 + $0x38] sm:$0xff] }
 0x151   :  { %v1026_v34 = vpop.eup %1025  ;;  %549 = vst.msk [vmem:[#allocation2 + $0x14] sm:$0xf] %vm543_vm1, %v866_v13  ;;  %v476_v15 = vmul.f32 %v460_v43, %v332_v0  ;;  %v303_v46 = vmul.f32 %v1436_v61, %v280_v40  ;;  %898 = vmatmul.mubr.msk.bf16.vlgmr.msra.gmra.mxu0 %vm79_vm0, %v927_v1  ;;  %v574_v13 = vld [vmem:[%s1676_s6 + $0x70] sm:$0xff] }
 0x152   :  { %v1028_v22 = vpop.eup %1027  ;;  %556 = vst.msk [vmem:[#allocation2 + $0x30] sm:$0xf] %vm543_vm1, %v873_v45  ;;  %v469_v29 = vmul.f32 %v453_v58, %v325_v41  ;;  %v310_v52 = vmul.f32 %v1436_v61, %v287_v36  ;;  %v462_v12 = vmul.f32 %v1026_v34, %v1430_v35  ;;  %v565_v41 = vld [vmem:[%s1676_s6 + $0x28] sm:$0xff]  ;;  %v572_v36 = vld [vmem:[%s1676_s6 + $0x60] sm:$0xff] }
 0x153   :  { %v874_v7 = vpack.c.bf16 %v476_v15, %v476_v15  ;;  %v326_v5 = vadd.f32 %v1446_v44, %v303_v46  ;;  %v288_v56 = vmul.f32 %v1028_v22, %v1316_v18  ;;  %v575_v46 = vld [vmem:[%s1676_s6 + $0x78] sm:$0xff] }
 0x154   :  { %v867_v49 = vpack.c.bf16 %v469_v29, %v469_v29  ;;  %v333_v17 = vadd.f32 %v1446_v44, %v310_v52  ;;  %v928_v16 = vld [vmem:[#allocation2 + $0x28] sm:$0xff]  }
 0x155   :  { %557 = vst.msk [vmem:[#allocation2 + $0x34] sm:$0xf] %vm543_vm1, %v874_v7  ;;  %v470_v26 = vmul.f32 %v454_v59, %v326_v5  ;;  %v311_v25 = vmul.f32 %v1436_v61, %v288_v56  ;;  %906 = vmatmul.mubr.msk.bf16.vlgmr.msra.gmra.mxu1 %vm79_vm0, %v928_v16  ;;  %v573_v52 = vld [vmem:[%s1676_s6 + $0x68] sm:$0xff] }
 0x156   :  { %550 = vst.msk [vmem:[#allocation2 + $0x18] sm:$0xf] %vm543_vm1, %v867_v49  ;;  %v477_v23 = vmul.f32 %v461_v9, %v333_v17 }
 0x157   :  { %v868_v60 = vpack.c.bf16 %v470_v26, %v470_v26  ;;  %v334_v38 = vadd.f32 %v1446_v44, %v311_v25  ;;  %v562_v44 = vld [vmem:[%s1676_s6 + $0x10] sm:$0xff] }
 0x158   :  { %v875_v18 = vpack.c.bf16 %v477_v23, %v477_v23  ;;  %v929_v3 = vld [vmem:[#allocation2 + $0x10] sm:$0xff]  }
 0x159   :  { %551 = vst.msk [vmem:[#allocation2 + $0x1c] sm:$0xf] %vm543_vm1, %v868_v60  ;;  %v478_v47 = vmul.f32 %v462_v12, %v334_v38  ;;  %901 = vmatprep.mubr.msk.bf16.mxu0 %vm79_vm0, %v929_v3 }
 0x15a   :  { %558 = vst.msk [vmem:[#allocation2 + $0x38] sm:$0xf] %vm543_vm1, %v875_v18 }
 0x15b   :  { %v876_v35 = vpack.c.bf16 %v478_v47, %v478_v47 }
 0x15c   :  { %v930_v37 = vld [vmem:[#allocation2 + $0x30] sm:$0xff]  }
 0x15d   :  { %559 = vst.msk [vmem:[#allocation2 + $0x3c] sm:$0xf] %vm543_vm1, %v876_v35  ;;  %909 = vmatprep.mubr.msk.bf16.mxu1 %vm79_vm0, %v930_v37 }
 0x160   :  { %v931_v61 = vld [vmem:[#allocation2 + $0x18] sm:$0xff]  }
 0x161   :  { %902 = vmatmul.mubr.msk.bf16.gmra.mxu0 %vm79_vm0, %v931_v61 }
 0x164   :  { %v932_v10 = vld [vmem:[#allocation2 + $0x38] sm:$0xff]  }
 0x165   :  { %910 = vmatmul.mubr.msk.bf16.gmra.mxu1 %vm79_vm0, %v932_v10 }
 0x211   :  { %v899_v30 = vpop.f32.mrf.mxu0 }
 0x212   :  { %v788_v20 = vadd.f32 %v899_v30, %v562_v44 }
 0x213   :  { %v723_v50 = vpop.f32.mrf.mxu0 }
 0x214   :  { %805 = vst.msk [vmem:[%s1677_s7 + $0x10] sm:$0xff] %vm802_vm2, %v788_v20  ;;  %v786_v8 = vadd.f32 %v723_v50, %v560_v31 }
 0x215   :  { %v900_v54 = vpop.f32.mrf.mxu0  ;;  %v907_v55 = vpop.f32.mrf.mxu1 }
 0x216   :  { %803 = vst.msk [vmem:[%s1677_s7] sm:$0xff] %vm802_vm2, %v786_v8  ;;  %v789_v48 = vadd.f32 %v900_v54, %v563_v19  ;;  %v796_v51 = vadd.f32 %v907_v55, %v570_v11 }
 0x217   :  { %v726_v57 = vpop.f32.mrf.mxu0  ;;  %v755_v24 = vpop.f32.mrf.mxu1 }
 0x218   :  { %806 = vst.msk [vmem:[%s1677_s7 + $0x18] sm:$0xff] %vm802_vm2, %v789_v48  ;;  %813 = vst.msk [vmem:[%s1677_s7 + $0x50] sm:$0xff] %vm802_vm2, %v796_v51  ;;  %v787_v33 = vadd.f32 %v726_v57, %v561_v14  ;;  %v794_v62 = vadd.f32 %v755_v24, %v568_v53 }
 0x219   :  { %v908_v32 = vpop.f32.mrf.mxu1 }
 0x21a   :  { %804 = vst.msk [vmem:[%s1677_s7 + $0x8] sm:$0xff] %vm802_vm2, %v787_v33  ;;  %811 = vst.msk [vmem:[%s1677_s7 + $0x40] sm:$0xff] %vm802_vm2, %v794_v62  ;;  %v797_v42 = vadd.f32 %v908_v32, %v571_v63 }
 0x21b   :  { %v758_v2 = vpop.f32.mrf.mxu1 }
 0x21c   :  { %814 = vst.msk [vmem:[%s1677_s7 + $0x58] sm:$0xff] %vm802_vm2, %v797_v42  ;;  %v795_v43 = vadd.f32 %v758_v2, %v569_v21 }
 0x21e   :  { %812 = vst.msk [vmem:[%s1677_s7 + $0x48] sm:$0xff] %vm802_vm2, %v795_v43 }
 0x221   :  { %v903_v28 = vpop.f32.mrf.mxu0 }
 0x222   :  { %v792_v58 = vadd.f32 %v903_v28, %v566_v27 }
 0x223   :  { %v739_v39 = vpop.f32.mrf.mxu0 }
 0x224   :  { %809 = vst.msk [vmem:[%s1677_s7 + $0x30] sm:$0xff] %vm802_vm2, %v792_v58  ;;  %v790_v0 = vadd.f32 %v739_v39, %v564_v6 }
 0x225   :  { %v904_v40 = vpop.f32.mrf.mxu0  ;;  %v911_v45 = vpop.f32.mrf.mxu1 }
 0x226   :  { %807 = vst.msk [vmem:[%s1677_s7 + $0x20] sm:$0xff] %vm802_vm2, %v790_v0  ;;  %v793_v1 = vadd.f32 %v904_v40, %v567_v4  ;;  %v800_v34 = vadd.f32 %v911_v45, %v574_v13 }
 0x227   :  { %v742_v15 = vpop.f32.mrf.mxu0  ;;  %v771_v59 = vpop.f32.mrf.mxu1 }
 0x228   :  { %810 = vst.msk [vmem:[%s1677_s7 + $0x38] sm:$0xff] %vm802_vm2, %v793_v1  ;;  %817 = vst.msk [vmem:[%s1677_s7 + $0x70] sm:$0xff] %vm802_vm2, %v800_v34  ;;  %v791_v22 = vadd.f32 %v742_v15, %v565_v41  ;;  %v798_v29 = vadd.f32 %v771_v59, %v572_v36 }
 0x229   :  { %v912_v9 = vpop.f32.mrf.mxu1 }
 0x22a   :  { %808 = vst.msk [vmem:[%s1677_s7 + $0x28] sm:$0xff] %vm802_vm2, %v791_v22  ;;  %815 = vst.msk [vmem:[%s1677_s7 + $0x60] sm:$0xff] %vm802_vm2, %v798_v29  ;;  %v801_v7 = vadd.f32 %v912_v9, %v575_v46 }
 0x22b   :  { %v774_v5 = vpop.f32.mrf.mxu1 }
 0x22c   :  { %818 = vst.msk [vmem:[%s1677_s7 + $0x78] sm:$0xff] %vm802_vm2, %v801_v7  ;;  %v799_v56 = vadd.f32 %v774_v5, %v573_v52 }
 0x22e   :  { %816 = vst.msk [vmem:[%s1677_s7 + $0x68] sm:$0xff] %vm802_vm2, %v799_v56 }

// kernel: vss_stage_forward.35
= control target key start
LH: loop header
LB: loop body
LE: loop exit
PB: predicated region body
PF: predicated region fallthrough
CT: control target
= control target key end

     0   :  { %vm80_vm0 = vcmask 523264   ;;  %s1666_s0 = inlined_call_operand.vmem [shape: f32[128,64], index: 0, kind: input, shape index: {}]   ;;  %s1667_s1 = inlined_call_operand.vmem [shape: f32[128,64], index: 1, kind: input, shape index: {}]   ;;  %s1668_s2 = inlined_call_operand.vmem [shape: f32[128,64], index: 2, kind: input, shape index: {}]   ;;  %s1669_s3 = inlined_call_operand.vmem [shape: f32[1,64], index: 3, kind: input, shape index: {}]   ;;  %s1670_s4 = inlined_call_operand.vmem [shape: f32[1,64], index: 4, kind: input, shape index: {}]   ;;  %s1671_s5 = inlined_call_operand.vmem [shape: bf16[64,32], index: 5, kind: input, shape index: {}]   ;;  %s1672_s6 = inlined_call_operand.vmem [shape: f32[128,32], index: 6, kind: input, shape index: {}]   ;;  %s1673_s7 = inlined_call_operand.hbm [shape: f32[128,32], index: 7, kind: output, shape index: {}]  }
   0x1   :  { %v32_v0 = vld [vmem:[%s1666_s0] sm:$0xff]  ;;  %v33_v5 = vld [vmem:[%s1666_s0 + $0x8] sm:$0xff]  ;;  %v34_v11 = vld [vmem:[%s1666_s0 + $0x10] sm:$0xff] }
   0x2   :  { %v48_v1 = vld [vmem:[%s1667_s1] sm:$0xff]  ;;  %v49_v6 = vld [vmem:[%s1667_s1 + $0x8] sm:$0xff]  ;;  %v50_v14 = vld [vmem:[%s1667_s1 + $0x10] sm:$0xff] }
   0x3   :  { %v40_v2 = vld [vmem:[%s1666_s0 + $0x40] sm:$0xff]  ;;  %v1119_v3 = vadd.f32 %v48_v1, %v32_v0  ;;  %v1132_v8 = vadd.f32 %v49_v6, %v33_v5  ;;  %v41_v9 = vld [vmem:[%s1666_s0 + $0x48] sm:$0xff]  ;;  %v35_v15 = vld [vmem:[%s1666_s0 + $0x18] sm:$0xff]  ;;  %v1160_v19 = vadd.f32 %v50_v14, %v34_v11 }
   0x4   :  { %v56_v4 = vld [vmem:[%s1667_s1 + $0x40] sm:$0xff]  ;;  %v57_v10 = vld [vmem:[%s1667_s1 + $0x48] sm:$0xff]  ;;  %v51_v16 = vld [vmem:[%s1667_s1 + $0x18] sm:$0xff] }
   0x5   :  { %v1130_v7 = vadd.f32 %v56_v4, %v40_v2  ;;  %v81_v12 = vsel %vm80_vm0, %v1119_v3, 0.0  ;;  %v1145_v13 = vadd.f32 %v57_v10, %v41_v9  ;;  %v84_v18 = vsel %vm80_vm0, %v1132_v8, 0.0  ;;  %v42_v22 = vld [vmem:[%s1666_s0 + $0x50] sm:$0xff]  ;;  %v43_v24 = vld [vmem:[%s1666_s0 + $0x58] sm:$0xff]  ;;  %v36_v28 = vld [vmem:[%s1666_s0 + $0x20] sm:$0xff] }
   0x6   :  { %82 = vadd.xlane.f32.xlu0 %v81_v12  ;;  %v1164_v21 = vadd.f32 %v51_v16, %v35_v15  ;;  %v58_v23 = vld [vmem:[%s1667_s1 + $0x50] sm:$0xff]  ;;  %v59_v25 = vld [vmem:[%s1667_s1 + $0x58] sm:$0xff]  ;;  %v87_v26 = vsel %vm80_vm0, %v1160_v19, 0.0  ;;  %v52_v31 = vld [vmem:[%s1667_s1 + $0x20] sm:$0xff] }
   0x7   :  { %v105_v17 = vsel %vm80_vm0, %v1130_v7, 0.0  ;;  %v108_v20 = vsel %vm80_vm0, %v1145_v13, 0.0  ;;  %v1180_v27 = vadd.f32 %v58_v23, %v42_v22  ;;  %v1187_v30 = vadd.f32 %v59_v25, %v43_v24  ;;  %v37_v32 = vld [vmem:[%s1666_s0 + $0x28] sm:$0xff]  ;;  %v44_v36 = vld [vmem:[%s1666_s0 + $0x60] sm:$0xff] }
   0x8   :  { %106 = vadd.xlane.f32.xlu1 %v105_v17  ;;  %v90_v29 = vsel %vm80_vm0, %v1164_v21, 0.0  ;;  %v53_v33 = vld [vmem:[%s1667_s1 + $0x28] sm:$0xff]  ;;  %v1200_v35 = vadd.f32 %v52_v31, %v36_v28  ;;  %v60_v39 = vld [vmem:[%s1667_s1 + $0x60] sm:$0xff] }
   0x9   :  { %v111_v34 = vsel %vm80_vm0, %v1180_v27, 0.0  ;;  %v114_v37 = vsel %vm80_vm0, %v1187_v30, 0.0  ;;  %v1207_v38 = vadd.f32 %v53_v33, %v37_v32 }
   0xa   :  { %85 = vadd.xlane.f32.xlu0 %v84_v18 }
   0xc   :  { %109 = vadd.xlane.f32.xlu1 %v108_v20 }
   0xe   :  { %88 = vadd.xlane.f32.xlu0 %v87_v26 }
  0x10   :  { %91 = vadd.xlane.f32.xlu1 %v90_v29 }
  0x11   :  { %12 = vsyncpa [#allocation4], 0  ;;  %v45_v40 = vld [vmem:[%s1666_s0 + $0x68] sm:$0xff]  ;;  %v93_v42 = vsel %vm80_vm0, %v1200_v35, 0.0  ;;  %v1220_v43 = vadd.f32 %v60_v39, %v44_v36  ;;  %v96_v44 = vsel %vm80_vm0, %v1207_v38, 0.0  ;;  %v38_v46 = vld [vmem:[%s1666_s0 + $0x30] sm:$0xff] }
  0x12   :  { %v61_v41 = vld [vmem:[%s1667_s1 + $0x68] sm:$0xff]  ;;  %112 = vadd.xlane.f32.xlu0 %v111_v34  ;;  %v54_v47 = vld [vmem:[%s1667_s1 + $0x30] sm:$0xff]  ;;  %v39_v48 = vld [vmem:[%s1666_s0 + $0x38] sm:$0xff]  ;;  %vm544_vm1 = vcmask 519168   ;;  %vm803_vm2 = vcmask 261120   ;;  %s1067_s11 = smov [#allocation3]  }
  0x13   :  { %v1224_v45 = vadd.f32 %v61_v41, %v45_v40  ;;  %v55_v49 = vld [vmem:[%s1667_s1 + $0x38] sm:$0xff]  ;;  %v117_v50 = vsel %vm80_vm0, %v1220_v43, 0.0  ;;  %v1240_v51 = vadd.f32 %v54_v47, %v38_v46  ;;  %v46_v54 = vld [vmem:[%s1666_s0 + $0x70] sm:$0xff]  ;;  %s825_s12 = sshll.u32 %s1067_s11, 4  ;;  %s826_s12 = int_to_ptr.vmem [resolvable:$true] %s825_s12 }
  0x14   :  { %115 = vadd.xlane.f32.xlu1 %v114_v37  ;;  %v1244_v53 = vadd.f32 %v55_v49, %v39_v48  ;;  %v62_v55 = vld [vmem:[%s1667_s1 + $0x70] sm:$0xff]  ;;  %v47_v56 = vld [vmem:[%s1666_s0 + $0x78] sm:$0xff]  ;;  %s1045_s13 = scalar_lea.vmem %s826_s12, 2048  ;;  %p1050_p1 = scmp.lt.s32.totalorder %s826_s12, %s826_s12 }
  0x15   :  { %v120_v52 = vsel %vm80_vm0, %v1224_v45, 0.0  ;;  %v63_v57 = vld [vmem:[%s1667_s1 + $0x78] sm:$0xff]  ;;  %v99_v58 = vsel %vm80_vm0, %v1240_v51, 0.0  ;;  %v1260_v59 = vadd.f32 %v62_v55, %v46_v54  ;;  %p1046_p0 = scmp.ne.s32.totalorder %s826_s12, %s1045_s13  ;;  %p1051_p2 = scmp.lt.s32.totalorder %s1045_s13, %s1045_s13 }
  0x16   :  { %94 = vadd.xlane.f32.xlu0 %v93_v42  ;;  %v102_v60 = vsel %vm80_vm0, %v1244_v53, 0.0  ;;  %v1264_v61 = vadd.f32 %v63_v57, %v47_v56 }
  0x17   :  { %v123_v62 = vsel %vm80_vm0, %v1260_v59, 0.0  ;;  %p1052_p3 = por %p1051_p2, %p1050_p1 }
  0x18   :  { %97 = vadd.xlane.f32.xlu1 %v96_v44  ;;  %v126_v63 = vsel %vm80_vm0, %v1264_v61, 0.0 }
  0x19   :  { %p1053_p4 = pnand %p1052_p3, %p1046_p0 }
  0x1a   :  { %118 = vadd.xlane.f32.xlu0 %v117_v50 }
  0x1c   :  { %121 = vadd.xlane.f32.xlu1 %v120_v52 }
  0x1e   :  { %100 = vadd.xlane.f32.xlu0 %v99_v58 }
  0x20   :  { %103 = vadd.xlane.f32.xlu1 %v102_v60 }
  0x22   :  { %124 = vadd.xlane.f32.xlu0 %v123_v62 }
  0x24   :  { %127 = vadd.xlane.f32.xlu1 %v126_v63 }
  0x8f   :  { %v83_v0 = vpop.xlane.xlu0 %82 }
  0x90   :  { %v130_v1 = vmul.f32 0.015625, %v83_v0 }
  0x91   :  { %v107_v2 = vpop.xlane.xlu1 %106 }
  0x92   :  { %v138_v4 = vmul.f32 0.015625, %v107_v2  ;;  %v1271_v5 = vsub.f32 %v1119_v3, %v130_v1 }
  0x93   :  { %v86_v9 = vpop.xlane.xlu0 %85 }
  0x94   :  { %v1274_v6 = vsub.f32 %v1130_v7, %v138_v4  ;;  %v131_v10 = vmul.f32 0.015625, %v86_v9  ;;  %v162_v12 = vmul.f32 %v1271_v5, %v1271_v5 }
  0x95   :  { %v110_v11 = vpop.xlane.xlu1 %109 }
  0x96   :  { %v139_v14 = vmul.f32 0.015625, %v110_v11  ;;  %v170_v15 = vmul.f32 %v1274_v6, %v1274_v6  ;;  %v1281_v16 = vsub.f32 %v1132_v8, %v131_v10  ;;  %v178_v17 = vsel %vm80_vm0, %v162_v12, 0.0 }
  0x97   :  { %179 = vadd.xlane.f32.xlu0 %v178_v17  ;;  %v89_v7 = vpop.xlane.xlu0 %88 }
  0x98   :  { %v1285_v3 = vsub.f32 %v1145_v13, %v139_v14  ;;  %v132_v18 = vmul.f32 0.015625, %v89_v7  ;;  %v202_v22 = vsel %vm80_vm0, %v170_v15, 0.0  ;;  %v163_v23 = vmul.f32 %v1281_v16, %v1281_v16 }
  0x99   :  { %v92_v20 = vpop.xlane.xlu1 %91 }
  0x9a   :  { %v133_v24 = vmul.f32 0.015625, %v92_v20  ;;  %v171_v25 = vmul.f32 %v1285_v3, %v1285_v3  ;;  %v1293_v8 = vsub.f32 %v1160_v19, %v132_v18  ;;  %v181_v26 = vsel %vm80_vm0, %v163_v23, 0.0 }
  0x9b   :  { %203 = vadd.xlane.f32.xlu0 %v202_v22  ;;  %182 = vadd.xlane.f32.xlu1 %v181_v26  ;;  %v113_v28 = vpop.xlane.xlu0 %112  ;;  %v939_v26 = vld [vmem:[%s1671_s5 + $0x8] sm:$0xff]  }
  0x9c   :  { %v1297_v13 = vsub.f32 %v1164_v21, %v133_v24  ;;  %v140_v29 = vmul.f32 0.015625, %v113_v28  ;;  %v205_v32 = vsel %vm80_vm0, %v171_v25, 0.0  ;;  %v164_v33 = vmul.f32 %v1293_v8, %v1293_v8  ;;  %v938_v25 = vld [vmem:[%s1671_s5 + $0x10] sm:$0xff]   ;;  %v941_v28 = vld [vmem:[%s1671_s5] sm:$0xff]  }
  0x9d   :  { %v116_v31 = vpop.xlane.xlu1 %115 }
  0x9e   :  { %v141_v34 = vmul.f32 0.015625, %v116_v31  ;;  %v165_v19 = vmul.f32 %v1297_v13, %v1297_v13  ;;  %v1305_v36 = vsub.f32 %v1180_v27, %v140_v29  ;;  %v184_v21 = vsel %vm80_vm0, %v164_v33, 0.0  ;;  %v1381_v29 = vld [vmem:[%s1668_s2] sm:$0xff] }
  0x9f   :  { %206 = vadd.xlane.f32.xlu1 %v205_v32  ;;  %185 = vadd.xlane.f32.xlu0 %v184_v21  ;;  %v95_v39 = vpop.xlane.xlu0 %94  ;;  %v352_v31 = vsub.f32 0.0, %v1381_v29  ;;  %v1387_v32 = vld [vmem:[%s1668_s2 + $0x8] sm:$0xff]  ;;  %v1392_v33 = vld [vmem:[%s1668_s2 + $0x40] sm:$0xff] }
  0xa0   :  { %v1309_v37 = vsub.f32 %v1187_v30, %v141_v34  ;;  %v134_v40 = vmul.f32 0.015625, %v95_v39  ;;  %v187_v42 = vsel %vm80_vm0, %v165_v19, 0.0  ;;  %v172_v44 = vmul.f32 %v1305_v36, %v1305_v36  ;;  %v1399_v39 = vld [vmem:[%s1668_s2 + $0x48] sm:$0xff] }
  0xa1   :  { %v98_v41 = vpop.xlane.xlu1 %97  ;;  %v353_v34 = vsub.f32 0.0, %v1387_v32  ;;  %v368_v19 = vmul.f32 1.442695, %v352_v31  ;;  %v360_v21 = vsub.f32 0.0, %v1392_v33 }
  0xa2   :  { %v135_v46 = vmul.f32 0.015625, %v98_v41  ;;  %v173_v27 = vmul.f32 %v1309_v37, %v1309_v37  ;;  %v1317_v47 = vsub.f32 %v1200_v35, %v134_v40  ;;  %v208_v30 = vsel %vm80_vm0, %v172_v44, 0.0  ;;  %v1404_v40 = vld [vmem:[%s1668_s2 + $0x10] sm:$0xff]  ;;  %v1409_v41 = vld [vmem:[%s1668_s2 + $0x18] sm:$0xff] }
  0xa3   :  { %188 = vadd.xlane.f32.xlu1 %v187_v42  ;;  %209 = vadd.xlane.f32.xlu0 %v208_v30  ;;  %v119_v49 = vpop.xlane.xlu0 %118  ;;  %v370_v42 = vmul.f32 1.442695, %v353_v34  ;;  %v361_v44 = vsub.f32 0.0, %v1399_v39  ;;  %949 = vpow2.f32 %v368_v19  ;;  %v355_v30 = vsub.f32 0.0, %v1409_v41 }
  0xa4   :  { %v1321_v48 = vsub.f32 %v1207_v38, %v135_v46  ;;  %v142_v50 = vmul.f32 0.015625, %v119_v49  ;;  %v211_v54 = vsel %vm80_vm0, %v173_v27, 0.0  ;;  %v166_v55 = vmul.f32 %v1317_v47, %v1317_v47  ;;  %v1417_v49 = vld [vmem:[%s1668_s2 + $0x50] sm:$0xff] }
  0xa5   :  { %v122_v52 = vpop.xlane.xlu1 %121  ;;  %v384_v46 = vmul.f32 1.442695, %v360_v21  ;;  %v354_v27 = vsub.f32 0.0, %v1404_v40  ;;  %951 = vpow2.f32 %v370_v42 }
  0xa6   :  { %v143_v56 = vmul.f32 0.015625, %v122_v52  ;;  %v167_v35 = vmul.f32 %v1321_v48, %v1321_v48  ;;  %v1329_v57 = vsub.f32 %v1220_v43, %v142_v50  ;;  %v190_v38 = vsel %vm80_vm0, %v166_v55, 0.0  ;;  %v1422_v50 = vld [vmem:[%s1668_s2 + $0x58] sm:$0xff] }
  0xa7   :  { %212 = vadd.xlane.f32.xlu1 %v211_v54  ;;  %191 = vadd.xlane.f32.xlu0 %v190_v38  ;;  %v101_v60 = vpop.xlane.xlu0 %100  ;;  %v386_v52 = vmul.f32 1.442695, %v361_v44  ;;  %v1427_v54 = vld [vmem:[%s1668_s2 + $0x20] sm:$0xff]  ;;  %953 = vpow2.f32 %v384_v46  ;;  %v372_v55 = vmul.f32 1.442695, %v354_v27  ;;  %v363_v38 = vsub.f32 0.0, %v1422_v50 }
  0xa8   :  { %v1333_v58 = vsub.f32 %v1224_v45, %v143_v56  ;;  %v136_v62 = vmul.f32 0.015625, %v101_v60  ;;  %v193_v0 = vsel %vm80_vm0, %v167_v35, 0.0  ;;  %v174_v1 = vmul.f32 %v1329_v57, %v1329_v57 }
  0xa9   :  { %v104_v63 = vpop.xlane.xlu1 %103  ;;  %v362_v56 = vsub.f32 0.0, %v1417_v49  ;;  %v374_v35 = vmul.f32 1.442695, %v355_v30  ;;  %v356_v60 = vsub.f32 0.0, %v1427_v54  ;;  %955 = vpow2.f32 %v386_v52 }
  0xaa   :  { %v137_v2 = vmul.f32 0.015625, %v104_v63  ;;  %v175_v43 = vmul.f32 %v1333_v58, %v1333_v58  ;;  %v1341_v4 = vsub.f32 %v1240_v51, %v136_v62  ;;  %v214_v45 = vsel %vm80_vm0, %v174_v1, 0.0  ;;  %v1435_v62 = vld [vmem:[%s1668_s2 + $0x28] sm:$0xff] }
  0xab   :  { %194 = vadd.xlane.f32.xlu1 %v193_v0  ;;  %215 = vadd.xlane.f32.xlu0 %v214_v45  ;;  %v125_v10 = vpop.xlane.xlu0 %124  ;;  %957 = vpow2.f32 %v372_v55  ;;  %v388_v63 = vmul.f32 1.442695, %v362_v56  ;;  %v390_v0 = vmul.f32 1.442695, %v363_v38  ;;  %v376_v1 = vmul.f32 1.442695, %v356_v60 }
  0xac   :  { %v1345_v9 = vsub.f32 %v1244_v53, %v137_v2  ;;  %v144_v11 = vmul.f32 0.015625, %v125_v10  ;;  %v217_v14 = vsel %vm80_vm0, %v175_v43, 0.0  ;;  %v168_v15 = vmul.f32 %v1341_v4, %v1341_v4  ;;  %v1441_v43 = vld [vmem:[%s1668_s2 + $0x60] sm:$0xff]  ;;  %v1446_v45 = vld [vmem:[%s1668_s2 + $0x68] sm:$0xff] }
  0xad   :  { %v128_v12 = vpop.xlane.xlu1 %127  ;;  %959 = vpow2.f32 %v374_v35  ;;  %v357_v2 = vsub.f32 0.0, %v1435_v62  ;;  %v1471_v35 = vld [vmem:[%s1668_s2 + $0x78] sm:$0xff] }
  0xae   :  { %v145_v17 = vmul.f32 0.015625, %v128_v12  ;;  %v169_v51 = vmul.f32 %v1345_v9, %v1345_v9  ;;  %v1353_v7 = vsub.f32 %v1260_v59, %v144_v11  ;;  %v196_v53 = vsel %vm80_vm0, %v168_v15, 0.0  ;;  %v1453_v15 = vld [vmem:[%s1668_s2 + $0x30] sm:$0xff] }
  0xaf   :  { %218 = vadd.xlane.f32.xlu1 %v217_v14  ;;  %197 = vadd.xlane.f32.xlu0 %v196_v53  ;;  %961 = vpow2.f32 %v388_v63  ;;  %v364_v11 = vsub.f32 0.0, %v1441_v43  ;;  %v378_v12 = vmul.f32 1.442695, %v357_v2  ;;  %v365_v14 = vsub.f32 0.0, %v1446_v45 }
  0xb0   :  { %v1357_v18 = vsub.f32 %v1264_v61, %v145_v17  ;;  %v199_v20 = vsel %vm80_vm0, %v169_v51, 0.0  ;;  %v176_v22 = vmul.f32 %v1353_v7, %v1353_v7  ;;  %v937_v61 = vld [vmem:[%s1671_s5 + $0x18] sm:$0xff]   ;;  %v950_v10 = vpop.eup %949  ;;  %963 = vpow2.f32 %v390_v0 }
  0xb1   :  { %902 = vmatprep.subr.bf16.mxu0 %v937_v61  ;;  %926 = vmatprep.subr.bf16.mxu1 %v937_v61  ;;  %965 = vpow2.f32 %v376_v1  ;;  %v1458_v17 = vld [vmem:[%s1668_s2 + $0x38] sm:$0xff]  ;;  %v400_v53 = vadd.f32 1.0, %v950_v10  ;;  %v367_v2 = vsub.f32 0.0, %v1471_v35 }
  0xb2   :  { %v177_v23 = vmul.f32 %v1357_v18, %v1357_v18  ;;  %v220_v24 = vsel %vm80_vm0, %v176_v22, 0.0  ;;  %903 = vmatpush3.bf16.msra.mxu0 %v937_v61  ;;  %930 = vmatpush3.bf16.msra.mxu1 %v937_v61  ;;  %v952_v51 = vpop.eup %951  ;;  %v392_v22 = vmul.f32 1.442695, %v364_v11  ;;  %967 = vpow2.f32 %v378_v12 }
  0xb3   :  { %200 = vadd.xlane.f32.xlu1 %v199_v20  ;;  %221 = vadd.xlane.f32.xlu0 %v220_v24  ;;  %v394_v24 = vmul.f32 1.442695, %v365_v14  ;;  %v401_v61 = vadd.f32 1.0, %v952_v51  ;;  %969 = vrcp.f32 %v400_v53 }
  0xb4   :  { %v223_v59 = vsel %vm80_vm0, %v177_v23, 0.0  ;;  %904 = vmatprep.subr.bf16.mxu0 %v938_v25  ;;  %927 = vmatprep.subr.bf16.mxu1 %v938_v25  ;;  %v954_v20 = vpop.eup %953  ;;  %v358_v23 = vsub.f32 0.0, %v1453_v15  ;;  %971 = vpow2.f32 %v392_v22 }
  0xb5   :  { %973 = vpow2.f32 %v394_v24  ;;  %v398_v24 = vmul.f32 1.442695, %v367_v2 }
  0xb6   :  { %905 = vmatpush3.bf16.msra.mxu0 %v938_v25  ;;  %931 = vmatpush3.bf16.msra.mxu1 %v938_v25  ;;  %v1465_v25 = vld [vmem:[%s1668_s2 + $0x70] sm:$0xff]  ;;  %v380_v34 = vmul.f32 1.442695, %v358_v23  ;;  %975 = vrcp.f32 %v401_v61 }
  0xb7   :  { %224 = vadd.xlane.f32.xlu1 %v223_v59  ;;  %906 = vmatprep.subr.bf16.mxu0 %v939_v26  ;;  %v359_v59 = vsub.f32 0.0, %v1458_v17  ;;  %v366_v42 = vsub.f32 0.0, %v1465_v25 }
  0xb8   :  { %928 = vmatprep.subr.bf16.mxu1 %v939_v26 }
  0xb9   :  { %v382_v21 = vmul.f32 1.442695, %v359_v59  ;;  %v396_v56 = vmul.f32 1.442695, %v366_v42 }
  0xba   :  { %907 = vmatpush3.bf16.msra.mxu0 %v939_v26  ;;  %932 = vmatpush3.bf16.msra.mxu1 %v939_v26  ;;  %v956_v26 = vpop.eup %955 }
  0xbb   :  { %908 = vmatprep.subr.bf16.mxu0 %v941_v28  ;;  %929 = vmatprep.subr.bf16.mxu1 %v941_v28  ;;  %v958_v31 = vpop.eup %957  ;;  %v409_v44 = vadd.f32 1.0, %v956_v26 }
  0xbc   :  { %v960_v19 = vpop.eup %959  ;;  %v402_v46 = vadd.f32 1.0, %v958_v31 }
  0xbd   :  { %v962_v27 = vpop.eup %961  ;;  %v403_v30 = vadd.f32 1.0, %v960_v19 }
  0xbe   :  { %909 = vmatpush3.bf16.msra.mxu0 %v941_v28  ;;  %933 = vmatpush3.bf16.msra.mxu1 %v941_v28  ;;  %v408_v28 = vadd.f32 1.0, %v954_v20  ;;  %v964_v52 = vpop.eup %963  ;;  %v410_v63 = vadd.f32 1.0, %v962_v27 }
  0xbf   :  { %v966_v38 = vpop.eup %965  ;;  %v411_v1 = vadd.f32 1.0, %v964_v52 }
  0xc0   :  { %977 = vrcp.f32 %v408_v28  ;;  %v404_v12 = vadd.f32 1.0, %v966_v38  ;;  %v968_v14 = vpop.eup %967 }
  0xc1   :  { %979 = vpow2.f32 %v380_v34  ;;  %v970_v20 = vpop.eup %969  ;;  %v405_v28 = vadd.f32 1.0, %v968_v14 }
  0xc2   :  { %981 = vpow2.f32 %v382_v21  ;;  %v972_v59 = vpop.eup %971 }
  0xc3   :  { %983 = vrcp.f32 %v409_v44  ;;  %v974_v31 = vpop.eup %973  ;;  %v412_v27 = vadd.f32 1.0, %v972_v59 }
  0xc4   :  { %985 = vrcp.f32 %v402_v46  ;;  %v976_v21 = vpop.eup %975 }
  0xc5   :  { %987 = vrcp.f32 %v403_v30 }
  0xc6   :  { %989 = vpow2.f32 %v396_v56  ;;  %v413_v56 = vadd.f32 1.0, %v974_v31 }
  0xcd   :  { %v978_v42 = vpop.eup %977 }
  0xce   :  { %v980_v30 = vpop.eup %979 }
  0xcf   :  { %v982_v38 = vpop.eup %981 }
 0x120   :  { %v180_v55 = vpop.xlane.xlu0 %179 }
 0x121   :  { %v226_v60 = vmul.f32 0.015625, %v180_v55 }
 0x123   :  { %v242_v0 = vadd.f32 1e-05, %v226_v60 }
 0x124   :  { %v183_v10 = vpop.xlane.xlu1 %182  ;;  %v204_v11 = vpop.xlane.xlu0 %203 }
 0x125   :  { %991 = vrsqrt.f32 %v242_v0  ;;  %v227_v51 = vmul.f32 0.015625, %v183_v10  ;;  %v234_v53 = vmul.f32 0.015625, %v204_v11  ;;  %v984_v0 = vpop.eup %983  ;;  %v406_v11 = vadd.f32 1.0, %v980_v30 }
 0x126   :  { %993 = vrcp.f32 %v410_v63 }
 0x127   :  { %v243_v22 = vadd.f32 1e-05, %v227_v51  ;;  %v250_v23 = vadd.f32 1e-05, %v234_v53  ;;  %995 = vrcp.f32 %v411_v1  ;;  %v986_v1 = vpop.eup %985  ;;  %v407_v53 = vadd.f32 1.0, %v982_v38 }
 0x128   :  { %v207_v61 = vpop.xlane.xlu1 %206  ;;  %v186_v26 = vpop.xlane.xlu0 %185  ;;  %997 = vrcp.f32 %v404_v12 }
 0x129   :  { %999 = vrsqrt.f32 %v243_v22  ;;  %v235_v34 = vmul.f32 0.015625, %v207_v61  ;;  %v228_v19 = vmul.f32 0.015625, %v186_v26  ;;  %v988_v12 = vpop.eup %987  ;;  %v1477_v61 = vld [vmem:[%s1669_s3] ss:$0 sm:$0xff] }
 0x12a   :  { %1001 = vrsqrt.f32 %v250_v23  ;;  %v990_v22 = vpop.eup %989 }
 0x12b   :  { %v251_v44 = vadd.f32 1e-05, %v235_v34  ;;  %v244_v46 = vadd.f32 1e-05, %v228_v19  ;;  %1003 = vpow2.f32 %v398_v24 }
 0x12c   :  { %v189_v52 = vpop.xlane.xlu1 %188  ;;  %v210_v55 = vpop.xlane.xlu0 %209  ;;  %1005 = vrcp.f32 %v405_v28 }
 0x12d   :  { %1007 = vrsqrt.f32 %v251_v44  ;;  %v229_v60 = vmul.f32 0.015625, %v189_v52  ;;  %v236_v63 = vmul.f32 0.015625, %v210_v55  ;;  %v1487_v44 = vld [vmem:[%s1670_s4] ss:$0 sm:$0xff]  ;;  %v414_v52 = vadd.f32 1.0, %v990_v22 }
 0x12e   :  { %1009 = vrsqrt.f32 %v244_v46  ;;  %v448_v46 = vmul.f32 %v970_v20, %v1381_v29  ;;  %v457_v22 = vmul.f32 %v984_v0, %v1399_v39 }
 0x12f   :  { %v245_v2 = vadd.f32 1e-05, %v229_v60  ;;  %v252_v10 = vadd.f32 1e-05, %v236_v63  ;;  %1011 = vrcp.f32 %v412_v27  ;;  %v449_v63 = vmul.f32 %v976_v21, %v1387_v32 }
 0x130   :  { %v213_v14 = vpop.xlane.xlu1 %212  ;;  %v192_v51 = vpop.xlane.xlu0 %191  ;;  %1013 = vrcp.f32 %v413_v56 }
 0x131   :  { %1015 = vrsqrt.f32 %v245_v2  ;;  %v237_v23 = vmul.f32 0.015625, %v213_v14  ;;  %v230_v24 = vmul.f32 0.015625, %v192_v51  ;;  %v456_v2 = vmul.f32 %v978_v42, %v1392_v33 }
 0x132   :  { %v992_v59 = vpop.eup %991  ;;  %1017 = vrsqrt.f32 %v252_v10 }
 0x133   :  { %v1479_v26 = vpop.eup %993  ;;  %v274_v28 = vmul.f32 %v992_v59, %v1271_v5  ;;  %v253_v31 = vadd.f32 1e-05, %v237_v23  ;;  %v246_v34 = vadd.f32 1e-05, %v230_v24  ;;  %1019 = vrcp.f32 %v406_v11 }
 0x134   :  { %v1482_v19 = vpop.eup %995  ;;  %v195_v27 = vpop.xlane.xlu1 %194  ;;  %1021 = vrcp.f32 %v407_v53  ;;  %v450_v23 = vmul.f32 %v986_v1, %v1404_v40 }
 0x135   :  { %v216_v30 = vpop.xlane.xlu0 %215  ;;  %v1490_v55 = vpop.eup %997  ;;  %v297_v5 = vmul.f32 %v1477_v61, %v274_v28  ;;  %1023 = vrsqrt.f32 %v253_v31  ;;  %v231_v56 = vmul.f32 0.015625, %v195_v27  ;;  %v451_v31 = vmul.f32 %v988_v12, %v1409_v41 }
 0x136   :  { %v238_v38 = vmul.f32 0.015625, %v216_v30  ;;  %v1000_v60 = vpop.eup %999  ;;  %1025 = vrsqrt.f32 %v246_v34 }
 0x137   :  { %v1002_v10 = vpop.eup %1001  ;;  %v320_v29 = vadd.f32 %v1487_v44, %v297_v5  ;;  %v275_v20 = vmul.f32 %v1000_v60, %v1281_v16  ;;  %v247_v11 = vadd.f32 1e-05, %v231_v56  ;;  %1027 = vrcp.f32 %v414_v52 }
 0x138   :  { %v254_v14 = vadd.f32 1e-05, %v238_v38  ;;  %v1004_v51 = vpop.eup %1003  ;;  %v282_v53 = vmul.f32 %v1002_v10, %v1274_v6  ;;  %v219_v24 = vpop.xlane.xlu1 %218 }
 0x139   :  { %v198_v59 = vpop.xlane.xlu0 %197  ;;  %v1500_v32 = vpop.eup %1005  ;;  %v464_v33 = vmul.f32 %v448_v46, %v320_v29  ;;  %v298_v21 = vmul.f32 %v1477_v61, %v275_v20  ;;  %1029 = vrsqrt.f32 %v247_v11  ;;  %v239_v42 = vmul.f32 0.015625, %v219_v24 }
 0x13a   :  { %v1008_v16 = vpop.eup %1007  ;;  %v305_v28 = vmul.f32 %v1477_v61, %v282_v53  ;;  %1031 = vrsqrt.f32 %v254_v14  ;;  %v232_v6 = vmul.f32 0.015625, %v198_v59  ;;  %v415_v38 = vadd.f32 1.0, %v1004_v51 }
 0x13b   :  { %v1010_v39 = vpop.eup %1009  ;;  %v874_v0 = vpack.c.bf16 %v464_v33, %v464_v33  ;;  %v321_v40 = vadd.f32 %v1487_v44, %v298_v21  ;;  %v283_v1 = vmul.f32 %v1008_v16, %v1285_v3  ;;  %v255_v34 = vadd.f32 1e-05, %v239_v42 }
 0x13c   :  { %v1507_v27 = vpop.eup %1011  ;;  %v328_v46 = vadd.f32 %v1487_v44, %v305_v28  ;;  %v276_v30 = vmul.f32 %v1010_v39, %v1293_v8  ;;  %v248_v52 = vadd.f32 1e-05, %v232_v6  ;;  %v201_v5 = vpop.xlane.xlu1 %200 }
 0x13d   :  { %v222_v56 = vpop.xlane.xlu0 %221  ;;  %v1511_v41 = vpop.eup %1013  ;;  %545 = vst.msk [vmem:[#allocation2] sm:$0xf] %vm544_vm1, %v874_v0  ;;  %v465_v12 = vmul.f32 %v449_v63, %v321_v40  ;;  %v306_v60 = vmul.f32 %v1477_v61, %v283_v1  ;;  %1033 = vrsqrt.f32 %v255_v34  ;;  %v233_v3 = vmul.f32 0.015625, %v201_v5 }
 0x13e   :  { %v1016_v10 = vpop.eup %1015  ;;  %v472_v29 = vmul.f32 %v456_v2, %v328_v46  ;;  %v299_v20 = vmul.f32 %v1477_v61, %v276_v30  ;;  %1035 = vrsqrt.f32 %v248_v52  ;;  %v240_v11 = vmul.f32 0.015625, %v222_v56 }
 0x13f   :  { %v1018_v8 = vpop.eup %1017  ;;  %v875_v14 = vpack.c.bf16 %v465_v12, %v465_v12  ;;  %v329_v53 = vadd.f32 %v1487_v44, %v306_v60  ;;  %v277_v51 = vmul.f32 %v1016_v10, %v1297_v13  ;;  %v249_v24 = vadd.f32 1e-05, %v233_v3 }
 0x140   :  { %v1518_v59 = vpop.eup %1019  ;;  %v882_v63 = vpack.c.bf16 %v472_v29, %v472_v29  ;;  %v322_v33 = vadd.f32 %v1487_v44, %v299_v20  ;;  %v284_v21 = vmul.f32 %v1018_v8, %v1305_v36  ;;  %v256_v42 = vadd.f32 1e-05, %v240_v11  ;;  %v225_v2 = vpop.xlane.xlu1 %224 }
 0x141   :  { %v1522_v16 = vpop.eup %1021  ;;  %546 = vst.msk [vmem:[#allocation2 + $0x4] sm:$0xf] %vm544_vm1, %v875_v14  ;;  %v473_v28 = vmul.f32 %v457_v22, %v329_v53  ;;  %v300_v6 = vmul.f32 %v1477_v61, %v277_v51  ;;  %1037 = vrsqrt.f32 %v249_v24  ;;  %v241_v39 = vmul.f32 0.015625, %v225_v2 }
 0x142   :  { %v1024_v13 = vpop.eup %1023  ;;  %553 = vst.msk [vmem:[#allocation2 + $0x20] sm:$0xf] %vm544_vm1, %v882_v63  ;;  %v466_v0 = vmul.f32 %v450_v23, %v322_v33  ;;  %v458_v40 = vmul.f32 %v1479_v26, %v1417_v49  ;;  %v307_v36 = vmul.f32 %v1477_v61, %v284_v21  ;;  %1039 = vrsqrt.f32 %v256_v42 }
 0x143   :  { %v1026_v1 = vpop.eup %1025  ;;  %v883_v34 = vpack.c.bf16 %v473_v28, %v473_v28  ;;  %v323_v46 = vadd.f32 %v1487_v44, %v300_v6  ;;  %v285_v22 = vmul.f32 %v1024_v13, %v1309_v37  ;;  %v257_v30 = vadd.f32 1e-05, %v241_v39 }
 0x144   :  { %v876_v52 = vpack.c.bf16 %v466_v0, %v466_v0  ;;  %v330_v5 = vadd.f32 %v1487_v44, %v307_v36  ;;  %v278_v56 = vmul.f32 %v1026_v1, %v1317_v47  ;;  %1041 = vrcp.f32 %v415_v38  ;;  %v1534_v23 = vpop.eup %1027 }
 0x145   :  { %554 = vst.msk [vmem:[#allocation2 + $0x24] sm:$0xf] %vm544_vm1, %v883_v34  ;;  %v467_v49 = vmul.f32 %v451_v31, %v323_v46  ;;  %v459_v26 = vmul.f32 %v1482_v19, %v1422_v50  ;;  %v308_v12 = vmul.f32 %v1477_v61, %v285_v22  ;;  %1043 = vrsqrt.f32 %v257_v30 }
 0x146   :  { %v1030_v60 = vpop.eup %1029  ;;  %547 = vst.msk [vmem:[#allocation2 + $0x8] sm:$0xf] %vm544_vm1, %v876_v52  ;;  %v474_v37 = vmul.f32 %v458_v40, %v330_v5  ;;  %v452_v3 = vmul.f32 %v1490_v55, %v1427_v54  ;;  %v301_v47 = vmul.f32 %v1477_v61, %v278_v56  ;;  %v453_v54 = vmul.f32 %v1500_v32, %v1435_v62 }
 0x147   :  { %v1032_v38 = vpop.eup %1031  ;;  %v877_v10 = vpack.c.bf16 %v467_v49, %v467_v49  ;;  %v331_v29 = vadd.f32 %v1487_v44, %v308_v12  ;;  %v279_v31 = vmul.f32 %v1030_v60, %v1321_v48  ;;  %v460_v48 = vmul.f32 %v1507_v27, %v1441_v43 }
 0x148   :  { %v884_v20 = vpack.c.bf16 %v474_v37, %v474_v37  ;;  %v324_v50 = vadd.f32 %v1487_v44, %v301_v47  ;;  %v286_v19 = vmul.f32 %v1032_v38, %v1329_v57  ;;  %v940_v11 = vld [vmem:[#allocation2] sm:$0xff]   ;;  %v461_v43 = vmul.f32 %v1511_v41, %v1446_v45 }
 0x149   :  { %548 = vst.msk [vmem:[#allocation2 + $0xc] sm:$0xf] %vm544_vm1, %v877_v10  ;;  %v475_v8 = vmul.f32 %v459_v26, %v331_v29  ;;  %v302_v55 = vmul.f32 %v1477_v61, %v279_v31  ;;  %910 = vmatprep.mubr.msk.bf16.mxu0 %vm80_vm0, %v940_v11  ;;  %v561_v31 = vld [vmem:[%s1672_s6] sm:$0xff]  ;;  %v571_v11 = vld [vmem:[%s1672_s6 + $0x50] sm:$0xff] }
 0x14a   :  { %v1034_v14 = vpop.eup %1033  ;;  %555 = vst.msk [vmem:[#allocation2 + $0x28] sm:$0xf] %vm544_vm1, %v884_v20  ;;  %v468_v53 = vmul.f32 %v452_v3, %v324_v50  ;;  %v309_v51 = vmul.f32 %v1477_v61, %v286_v19  ;;  %v564_v19 = vld [vmem:[%s1672_s6 + $0x18] sm:$0xff] }
 0x14b   :  { %v1036_v57 = vpop.eup %1035  ;;  %v885_v24 = vpack.c.bf16 %v475_v8, %v475_v8  ;;  %v325_v63 = vadd.f32 %v1487_v44, %v302_v55  ;;  %v287_v33 = vmul.f32 %v1034_v14, %v1333_v58  ;;  %v454_v58 = vmul.f32 %v1518_v59, %v1453_v15  ;;  %v562_v14 = vld [vmem:[%s1672_s6 + $0x8] sm:$0xff] }
 0x14c   :  { %v878_v62 = vpack.c.bf16 %v468_v53, %v468_v53  ;;  %v332_v32 = vadd.f32 %v1487_v44, %v309_v51  ;;  %v280_v21 = vmul.f32 %v1036_v57, %v1341_v4  ;;  %v942_v42 = vld [vmem:[#allocation2 + $0x20] sm:$0xff]   ;;  %v455_v59 = vmul.f32 %v1522_v16, %v1458_v17 }
 0x14d   :  { %556 = vst.msk [vmem:[#allocation2 + $0x2c] sm:$0xf] %vm544_vm1, %v885_v24  ;;  %v469_v2 = vmul.f32 %v453_v54, %v325_v63  ;;  %v310_v27 = vmul.f32 %v1477_v61, %v287_v33  ;;  %918 = vmatprep.mubr.msk.bf16.mxu1 %vm80_vm0, %v942_v42  ;;  %v569_v53 = vld [vmem:[%s1672_s6 + $0x40] sm:$0xff]  ;;  %v572_v63 = vld [vmem:[%s1672_s6 + $0x58] sm:$0xff] }
 0x14e   :  { %v1038_v28 = vpop.eup %1037  ;;  %549 = vst.msk [vmem:[#allocation2 + $0x10] sm:$0xf] %vm544_vm1, %v878_v62  ;;  %v476_v6 = vmul.f32 %v460_v48, %v332_v32  ;;  %v303_v39 = vmul.f32 %v1477_v61, %v280_v21  ;;  %v570_v21 = vld [vmem:[%s1672_s6 + $0x48] sm:$0xff] }
 0x14f   :  { %v1040_v4 = vpop.eup %1039  ;;  %v879_v13 = vpack.c.bf16 %v469_v2, %v469_v2  ;;  %v333_v0 = vadd.f32 %v1487_v44, %v310_v27  ;;  %v281_v40 = vmul.f32 %v1038_v28, %v1345_v9  ;;  %v462_v9 = vmul.f32 %v1534_v23, %v1465_v25  ;;  %v567_v27 = vld [vmem:[%s1672_s6 + $0x30] sm:$0xff] }
 0x150   :  { %v886_v45 = vpack.c.bf16 %v476_v6, %v476_v6  ;;  %v326_v41 = vadd.f32 %v1487_v44, %v303_v39  ;;  %v288_v36 = vmul.f32 %v1040_v4, %v1353_v7  ;;  %v943_v1 = vld [vmem:[#allocation2 + $0x8] sm:$0xff]   ;;  %v565_v6 = vld [vmem:[%s1672_s6 + $0x20] sm:$0xff]  ;;  %v568_v4 = vld [vmem:[%s1672_s6 + $0x38] sm:$0xff] }
 0x151   :  { %v1042_v34 = vpop.eup %1041  ;;  %550 = vst.msk [vmem:[#allocation2 + $0x14] sm:$0xf] %vm544_vm1, %v879_v13  ;;  %v477_v15 = vmul.f32 %v461_v43, %v333_v0  ;;  %v304_v46 = vmul.f32 %v1477_v61, %v281_v40  ;;  %911 = vmatmul.mubr.msk.bf16.vlgmr.msra.gmra.mxu0 %vm80_vm0, %v943_v1  ;;  %v575_v13 = vld [vmem:[%s1672_s6 + $0x70] sm:$0xff] }
 0x152   :  { %v1044_v22 = vpop.eup %1043  ;;  %557 = vst.msk [vmem:[#allocation2 + $0x30] sm:$0xf] %vm544_vm1, %v886_v45  ;;  %v470_v30 = vmul.f32 %v454_v58, %v326_v41  ;;  %v311_v52 = vmul.f32 %v1477_v61, %v288_v36  ;;  %v463_v12 = vmul.f32 %v1042_v34, %v1471_v35  ;;  %v566_v41 = vld [vmem:[%s1672_s6 + $0x28] sm:$0xff]  ;;  %v573_v36 = vld [vmem:[%s1672_s6 + $0x60] sm:$0xff] }
 0x153   :  { %v887_v7 = vpack.c.bf16 %v477_v15, %v477_v15  ;;  %v327_v5 = vadd.f32 %v1487_v44, %v304_v46  ;;  %v289_v56 = vmul.f32 %v1044_v22, %v1357_v18  ;;  %v576_v46 = vld [vmem:[%s1672_s6 + $0x78] sm:$0xff] }
 0x154   :  { %v880_v49 = vpack.c.bf16 %v470_v30, %v470_v30  ;;  %v334_v17 = vadd.f32 %v1487_v44, %v311_v52  ;;  %v944_v16 = vld [vmem:[#allocation2 + $0x28] sm:$0xff]  }
 0x155   :  { %558 = vst.msk [vmem:[#allocation2 + $0x34] sm:$0xf] %vm544_vm1, %v887_v7  ;;  %v471_v26 = vmul.f32 %v455_v59, %v327_v5  ;;  %v312_v25 = vmul.f32 %v1477_v61, %v289_v56  ;;  %919 = vmatmul.mubr.msk.bf16.vlgmr.msra.gmra.mxu1 %vm80_vm0, %v944_v16  ;;  %v574_v52 = vld [vmem:[%s1672_s6 + $0x68] sm:$0xff] }
 0x156   :  { %551 = vst.msk [vmem:[#allocation2 + $0x18] sm:$0xf] %vm544_vm1, %v880_v49  ;;  %v478_v23 = vmul.f32 %v462_v9, %v334_v17 }
 0x157   :  { %v881_v60 = vpack.c.bf16 %v471_v26, %v471_v26  ;;  %v335_v37 = vadd.f32 %v1487_v44, %v312_v25  ;;  %v563_v44 = vld [vmem:[%s1672_s6 + $0x10] sm:$0xff] }
 0x158   :  { %v888_v18 = vpack.c.bf16 %v478_v23, %v478_v23  ;;  %v945_v3 = vld [vmem:[#allocation2 + $0x10] sm:$0xff]  }
 0x159   :  { %552 = vst.msk [vmem:[#allocation2 + $0x1c] sm:$0xf] %vm544_vm1, %v881_v60  ;;  %v479_v47 = vmul.f32 %v463_v12, %v335_v37  ;;  %914 = vmatprep.mubr.msk.bf16.mxu0 %vm80_vm0, %v945_v3 }
 0x15a   :  { %559 = vst.msk [vmem:[#allocation2 + $0x38] sm:$0xf] %vm544_vm1, %v888_v18 }
 0x15b   :  { %v889_v35 = vpack.c.bf16 %v479_v47, %v479_v47 }
 0x15c   :  { %v946_v38 = vld [vmem:[#allocation2 + $0x30] sm:$0xff]  }
 0x15d   :  { %560 = vst.msk [vmem:[#allocation2 + $0x3c] sm:$0xf] %vm544_vm1, %v889_v35  ;;  %922 = vmatprep.mubr.msk.bf16.mxu1 %vm80_vm0, %v946_v38 }
 0x160   :  { %v947_v61 = vld [vmem:[#allocation2 + $0x18] sm:$0xff]  }
 0x161   :  { %915 = vmatmul.mubr.msk.bf16.gmra.mxu0 %vm80_vm0, %v947_v61 }
 0x164   :  { %v948_v10 = vld [vmem:[#allocation2 + $0x38] sm:$0xff]  }
 0x165   :  { %923 = vmatmul.mubr.msk.bf16.gmra.mxu1 %vm80_vm0, %v948_v10 }
 0x211   :  { %v912_v29 = vpop.f32.mrf.mxu0 }
 0x212   :  { %v789_v20 = vadd.f32 %v912_v29, %v563_v44 }
 0x213   :  { %v724_v50 = vpop.f32.mrf.mxu0 }
 0x214   :  { %806 = vst.msk [vmem:[#allocation3 + $0x10] sm:$0xff] %vm803_vm2, %v789_v20  ;;  %v787_v8 = vadd.f32 %v724_v50, %v561_v31 }
 0x215   :  { %v913_v54 = vpop.f32.mrf.mxu0  ;;  %v920_v55 = vpop.f32.mrf.mxu1 }
 0x216   :  { %804 = vst.msk [vmem:[#allocation3] sm:$0xff] %vm803_vm2, %v787_v8  ;;  %v790_v48 = vadd.f32 %v913_v54, %v564_v19  ;;  %v797_v51 = vadd.f32 %v920_v55, %v571_v11 }
 0x217   :  { %v727_v57 = vpop.f32.mrf.mxu0  ;;  %v756_v24 = vpop.f32.mrf.mxu1 }
 0x218   :  { %807 = vst.msk [vmem:[#allocation3 + $0x18] sm:$0xff] %vm803_vm2, %v790_v48  ;;  %814 = vst.msk [vmem:[#allocation3 + $0x50] sm:$0xff] %vm803_vm2, %v797_v51  ;;  %v788_v33 = vadd.f32 %v727_v57, %v562_v14  ;;  %v795_v62 = vadd.f32 %v756_v24, %v569_v53 }
 0x219   :  { %v921_v32 = vpop.f32.mrf.mxu1 }
 0x21a   :  { %805 = vst.msk [vmem:[#allocation3 + $0x8] sm:$0xff] %vm803_vm2, %v788_v33  ;;  %812 = vst.msk [vmem:[#allocation3 + $0x40] sm:$0xff] %vm803_vm2, %v795_v62  ;;  %v798_v42 = vadd.f32 %v921_v32, %v572_v63 }
 0x21b   :  { %v759_v2 = vpop.f32.mrf.mxu1 }
 0x21c   :  { %815 = vst.msk [vmem:[#allocation3 + $0x58] sm:$0xff] %vm803_vm2, %v798_v42  ;;  %v796_v43 = vadd.f32 %v759_v2, %v570_v21 }
 0x21e   :  { %813 = vst.msk [vmem:[#allocation3 + $0x48] sm:$0xff] %vm803_vm2, %v796_v43 }
 0x221   :  { %v916_v28 = vpop.f32.mrf.mxu0 }
 0x222   :  { %v793_v58 = vadd.f32 %v916_v28, %v567_v27 }
 0x223   :  { %v740_v39 = vpop.f32.mrf.mxu0 }
 0x224   :  { %810 = vst.msk [vmem:[#allocation3 + $0x30] sm:$0xff] %vm803_vm2, %v793_v58  ;;  %v791_v0 = vadd.f32 %v740_v39, %v565_v6 }
 0x225   :  { %v917_v40 = vpop.f32.mrf.mxu0  ;;  %v924_v45 = vpop.f32.mrf.mxu1 }
 0x226   :  { %808 = vst.msk [vmem:[#allocation3 + $0x20] sm:$0xff] %vm803_vm2, %v791_v0  ;;  %v794_v1 = vadd.f32 %v917_v40, %v568_v4  ;;  %v801_v34 = vadd.f32 %v924_v45, %v575_v13 }
 0x227   :  { %v743_v15 = vpop.f32.mrf.mxu0  ;;  %v772_v59 = vpop.f32.mrf.mxu1 }
 0x228   :  { %811 = vst.msk [vmem:[#allocation3 + $0x38] sm:$0xff] %vm803_vm2, %v794_v1  ;;  %818 = vst.msk [vmem:[#allocation3 + $0x70] sm:$0xff] %vm803_vm2, %v801_v34  ;;  %v792_v22 = vadd.f32 %v743_v15, %v566_v41  ;;  %v799_v30 = vadd.f32 %v772_v59, %v573_v36 }
 0x229   :  { %v925_v9 = vpop.f32.mrf.mxu1 }
 0x22a   :  { %809 = vst.msk [vmem:[#allocation3 + $0x28] sm:$0xff] %vm803_vm2, %v792_v22  ;;  %816 = vst.msk [vmem:[#allocation3 + $0x60] sm:$0xff] %vm803_vm2, %v799_v30  ;;  %v802_v7 = vadd.f32 %v925_v9, %v576_v46 }
 0x22b   :  { %v775_v5 = vpop.f32.mrf.mxu1 }
 0x22c   :  { %819 = vst.msk [vmem:[#allocation3 + $0x78] sm:$0xff] %vm803_vm2, %v802_v7  ;;  %v800_v56 = vadd.f32 %v775_v5, %v574_v52 }
 0x22e   :  { %817 = vst.msk [vmem:[#allocation3 + $0x68] sm:$0xff] %vm803_vm2, %v800_v56 }
 0x22f   :  { %1056 = shalt.err (!%p1053_p4)
}
 0x230   :  { %s1068_s6 = smov 128   ;;  %s1069_s14 = smov 8  }
 0x231   :  { %831 = dma.vmem_to_hbm [thread:$0]  %s826_s12, 2048, %s1673_s7, [#allocation4], %s1068_s6, %s1068_s6, %s1069_s14  }
 0x232   :  { %1065 = dma.done.wait [#allocation4], 2048  }
 0x233   :  { %1066 = vsyncadd [#allocation4], 4294965248 }
 0x234   :  { %835 = vsyncpa [#allocation4], 1 }

</bundles_post_ra>
